<compile_context>
chip_gen: v6e
topology: v6e:2x2x1
jax: 0.10.0
libtpu: 0.0.40
codegen_flags: <defaults>
</compile_context>

<pallas_src>
import functools
import math

import numpy as np
import jax
import jax.numpy as jnp
from jax.experimental import pallas as pl
from jax.experimental.pallas import tpu as pltpu

# ----------------------------- config (matches L1SpecLoss defaults) ---------
SAMPLE_RATE = 22050
HOP_LENGTH = 256
WIN_LENGTH = 24
N_FFT = 1024
N_STFT = N_FFT // 2 + 1          # 513
N_MELS = 80
MEL_FMIN = 0.0
MEL_FMAX = 8000.0
EPSILON = float(np.finfo(np.float32).eps)

K_PAD = 128                      # padded frame length (only 24 live samples)
N_MELS_PAD = 128                 # lane-dense mel output (cols 80..127 zero)


# ----------------------------- glue: mel filterbank (slaney/slaney) ---------
def _hz_to_mel_slaney(freq):
    freq = np.asarray(freq, dtype=np.float64)
    f_sp = 200.0 / 3
    mels = freq / f_sp
    min_log_hz = 1000.0
    min_log_mel = min_log_hz / f_sp
    logstep = math.log(6.4) / 27.0
    safe = np.maximum(freq, 1e-10)
    return np.where(freq >= min_log_hz,
                    min_log_mel + np.log(safe / min_log_hz) / logstep,
                    mels)


def _mel_to_hz_slaney(mels):
    mels = np.asarray(mels, dtype=np.float64)
    f_sp = 200.0 / 3
    freqs = mels * f_sp
    min_log_hz = 1000.0
    min_log_mel = min_log_hz / f_sp
    logstep = math.log(6.4) / 27.0
    return np.where(mels >= min_log_mel,
                    min_log_hz * np.exp(logstep * (mels - min_log_mel)),
                    freqs)


def make_mel_filterbank():
    """(N_STFT, N_MELS) slaney-scaled, slaney-normalized triangular filters."""
    all_freqs = np.linspace(0.0, SAMPLE_RATE / 2, N_STFT)
    m_min = _hz_to_mel_slaney(MEL_FMIN)
    m_max = _hz_to_mel_slaney(MEL_FMAX)
    m_pts = np.linspace(m_min, m_max, N_MELS + 2)
    f_pts = _mel_to_hz_slaney(m_pts)
    f_diff = f_pts[1:] - f_pts[:-1]                        # (N_MELS+1,)
    slopes = f_pts[None, :] - all_freqs[:, None]           # (N_STFT, N_MELS+2)
    down = -slopes[:, :-2] / f_diff[:-1]
    up = slopes[:, 2:] / f_diff[1:]
    fb = np.maximum(0.0, np.minimum(down, up))             # (N_STFT, N_MELS)
    enorm = 2.0 / (f_pts[2:N_MELS + 2] - f_pts[:N_MELS])   # slaney norm
    fb = fb * enorm[None, :]
    return fb.astype(np.float32)


_FB_FULL = make_mel_filterbank()                           # (513, 80)


def _active_freq_pad(fb):
    """Number of STFT bins with any nonzero mel weight, rounded up to 128."""
    nz = np.nonzero(np.any(fb > 0.0, axis=1))[0]
    n_keep = int(nz[-1]) + 1 if nz.size else 1
    return ((n_keep + 127) // 128) * 128


N_FREQ_PAD = _active_freq_pad(_FB_FULL)                    # 384 for defaults


def make_dft_bases():
    """(K_PAD, N_FREQ_PAD) cos and sin DFT bases.

    Only rows 0..23 are nonzero: they correspond to frame offsets
    left..left+23 (the centered window support inside the n_fft frame).
    Sign of the sin basis is irrelevant (magnitude only)."""
    left = (N_FFT - WIN_LENGTH) // 2
    n = (left + np.arange(WIN_LENGTH))[:, None].astype(np.float64)
    k = np.arange(N_FREQ_PAD)[None, :].astype(np.float64)
    ang = 2.0 * np.pi * n * k / N_FFT
    cos_b = np.zeros((K_PAD, N_FREQ_PAD), dtype=np.float32)
    sin_b = np.zeros((K_PAD, N_FREQ_PAD), dtype=np.float32)
    cos_b[:WIN_LENGTH, :] = np.cos(ang)
    sin_b[:WIN_LENGTH, :] = np.sin(ang)
    return cos_b, sin_b


def make_window():
    """Periodic Hann window of length WIN_LENGTH (torch.hann_window default)."""
    n = np.arange(WIN_LENGTH)
    return (0.5 - 0.5 * np.cos(2.0 * np.pi * n / WIN_LENGTH)).astype(np.float32)


def frame_audio(audio, window):
    """(B, T) -> windowed 24-sample bf16 frames (B * n_frames, WIN_LENGTH).

    Matches torch.stft(center=True, pad_mode='reflect') with the win_length=24
    window centered inside the n_fft=1024 frame: only the 24 samples under the
    window support are extracted."""
    B, T = audio.shape
    pad = N_FFT // 2
    padded = jnp.pad(audio, ((0, 0), (pad, pad)), mode="reflect")
    n_frames = 1 + T // HOP_LENGTH
    left = (N_FFT - WIN_LENGTH) // 2
    idx = (jnp.arange(n_frames)[:, None] * HOP_LENGTH + left
           + jnp.arange(WIN_LENGTH)[None, :])               # (n_frames, 24)
    frames = padded[:, idx] * window[None, None, :]          # (B, n_frames, 24) f32
    frames = frames.astype(jnp.bfloat16)                     # halve pad/DMA bytes
    return frames.reshape(B * n_frames, WIN_LENGTH), n_frames


def _choose_tile_m(M, base=256, max_tile=1024):
    """Biggest tile <= max_tile; short inputs still split into >=2 grid steps
    so v7x's two TensorCores both get work (no-op on single-TC v5e/v6e)."""
    n_chunks = -(-M // base)
    per_core = -(-n_chunks // 2)
    return int(min(max_tile, base * per_core))


# ----------------------------- Pallas kernel ---------------------------------
def l1_spec_kernel(fh_ref, fy_ref, cos_ref, sin_ref, mel_ref, out_ref, *, tile_m):
    """Per frame-tile: STFT-as-matmul (separate cos/sin -> no slicing),
    magnitude (power=1), mel projection, log compression, |diff|, and an
    (8, 128) sublane-group partial sum."""
    cos_b = cos_ref[...]          # (K_PAD, N_FREQ_PAD) bf16, VMEM-resident
    sin_b = sin_ref[...]          # (K_PAD, N_FREQ_PAD) bf16
    mel_fb = mel_ref[...]         # (N_FREQ_PAD, N_MELS_PAD) bf16

    def log_mel(frames):
        # bf16 operands, f32 MXU accumulation.
        re = jnp.dot(frames, cos_b, preferred_element_type=jnp.float32)
        im = jnp.dot(frames, sin_b, preferred_element_type=jnp.float32)
        mag = jnp.sqrt(re * re + im * im)                    # power = 1.0 (f32)
        mel = jnp.dot(mag.astype(jnp.bfloat16), mel_fb,
                      preferred_element_type=jnp.float32)
        return jnp.log(jnp.maximum(mel, EPSILON))            # dyn. range compression

    diff = jnp.abs(log_mel(fy_ref[...]) - log_mel(fh_ref[...]))   # (tile_m, 128) f32
    # Sublane-group partial sums: cheap vreg adds, lane-dense (8,128) output;
    # the tiny final reduce + mean happens in the wrapper.
    out_ref[...] = jnp.sum(diff.reshape(tile_m // 8, 8, N_MELS_PAD), axis=0)


def l1_spec_loss(y_hat, y):
    """Mean L1 loss between log-mel spectrograms of y_hat and y. Inputs: (B, T)."""
    window = jnp.asarray(make_window())
    cos_np, sin_np = make_dft_bases()
    cos_b = jnp.asarray(cos_np).astype(jnp.bfloat16)
    sin_b = jnp.asarray(sin_np).astype(jnp.bfloat16)
    mel_fb_np = np.zeros((N_FREQ_PAD, N_MELS_PAD), dtype=np.float32)
    mel_fb_np[:, :N_MELS] = _FB_FULL[:N_FREQ_PAD, :]
    mel_fb = jnp.asarray(mel_fb_np).astype(jnp.bfloat16)

    frames_hat, n_frames = frame_audio(y_hat, window)
    frames_y, _ = frame_audio(y, window)
    B = y.shape[0]
    M = B * n_frames
    tile_m = _choose_tile_m(M)
    num_tiles = pl.cdiv(M, tile_m)
    m_pad = num_tiles * tile_m

    def pad_frames(f):
        # Zero-padded rows/cols contribute exactly 0 to the L1 sum (both
        # signals get log(eps) in those positions).
        return jnp.pad(f, ((0, m_pad - M), (0, K_PAD - WIN_LENGTH)))

    frames_hat = pad_frames(frames_hat)
    frames_y = pad_frames(frames_y)

    # Advisory cost estimate so XLA schedules the framing / final reduce well.
    flops = (2 * (2 * m_pad * K_PAD * N_FREQ_PAD) * 2          # cos + sin matmuls
             + 2 * (2 * m_pad * N_FREQ_PAD * N_MELS_PAD))      # mel matmuls
    transcendentals = 2 * m_pad * (N_FREQ_PAD + N_MELS_PAD)    # sqrt + log
    bytes_accessed = (2 * m_pad * K_PAD * 2                     # bf16 frames
                      + (2 * K_PAD * N_FREQ_PAD + N_FREQ_PAD * N_MELS_PAD) * 2
                      + num_tiles * 8 * N_MELS_PAD * 4)
    cost = pl.CostEstimate(flops=int(flops),
                           transcendentals=int(transcendentals),
                           bytes_accessed=int(bytes_accessed))

    partials = pl.pallas_call(
        functools.partial(l1_spec_kernel, tile_m=tile_m),
        out_shape=jax.ShapeDtypeStruct((num_tiles * 8, N_MELS_PAD), jnp.float32),
        grid_spec=pltpu.PrefetchScalarGridSpec(
            num_scalar_prefetch=0,
            grid=(num_tiles,),
            in_specs=[
                pl.BlockSpec((tile_m, K_PAD), lambda i: (i, 0)),           # frames y_hat
                pl.BlockSpec((tile_m, K_PAD), lambda i: (i, 0)),           # frames y
                pl.BlockSpec((K_PAD, N_FREQ_PAD), lambda i: (0, 0)),       # cos basis
                pl.BlockSpec((K_PAD, N_FREQ_PAD), lambda i: (0, 0)),       # sin basis
                pl.BlockSpec((N_FREQ_PAD, N_MELS_PAD), lambda i: (0, 0)),  # mel fb
            ],
            out_specs=pl.BlockSpec((8, N_MELS_PAD), lambda i: (i, 0)),     # partials
        ),
        compiler_params=pltpu.CompilerParams(
            dimension_semantics=("parallel",),
            vmem_limit_bytes=48 * 1024 * 1024),
        cost_estimate=cost,
    )(frames_hat, frames_y, cos_b, sin_b, mel_fb)

    count = B * N_MELS * n_frames          # torch.mean over (B, 80, n_frames)
    return jnp.sum(partials) / count


# ----------------------------- demo ------------------------------------------
if __name__ == "__main__":
    key = jax.random.PRNGKey(0)
    k1, k2 = jax.random.split(key)
    B, T = 2, 2048                         # small synthetic raw-audio batch
    y_hat = jax.random.normal(k1, (B, T), dtype=jnp.float32) * 0.1
    y = jax.random.normal(k2, (B, T), dtype=jnp.float32) * 0.1

    loss = l1_spec_loss(y_hat, y)
    jax.block_until_ready(loss)
    assert loss.shape == () and jnp.isfinite(loss)
    print("KERNEL_OK")
</pallas_src>

<mosaic_0001>
module attributes {stable_mosaic.version = 11 : i64} {
  func.func @l1_spec_kernel(%arg0: i32, %arg1: memref<256x128xbf16, #tpu.memory_space<vmem>>, %arg2: memref<256x128xbf16, #tpu.memory_space<vmem>>, %arg3: memref<128x384xbf16, #tpu.memory_space<vmem>>, %arg4: memref<128x384xbf16, #tpu.memory_space<vmem>>, %arg5: memref<384x128xbf16, #tpu.memory_space<vmem>>, %arg6: memref<8x128xf32, #tpu.memory_space<vmem>>) attributes {dimension_semantics = [#tpu.dimension_semantics<parallel>], iteration_bounds = array<i64: 1>, scalar_prefetch = 0 : i64, scratch_operands = 0 : i64, tpu.core_type = #tpu.core_type<tc>, window_params = [{transform_indices = @transform_0, window_bounds = array<i64: 256, 128>}, {transform_indices = @transform_1, window_bounds = array<i64: 256, 128>}, {pipeline_mode = #tpu.pipeline_mode<synchronous>, transform_indices = @transform_2, window_bounds = array<i64: 128, 384>}, {pipeline_mode = #tpu.pipeline_mode<synchronous>, transform_indices = @transform_3, window_bounds = array<i64: 128, 384>}, {pipeline_mode = #tpu.pipeline_mode<synchronous>, transform_indices = @transform_4, window_bounds = array<i64: 384, 128>}, {transform_indices = @transform_5, window_bounds = array<i64: 8, 128>}]} {
    %c0 = arith.constant 0 : index
    %c0_0 = arith.constant 0 : index
    %0 = vector.load %arg3[%c0, %c0_0] : memref<128x384xbf16, #tpu.memory_space<vmem>>, vector<128x384xbf16>
    %c0_1 = arith.constant 0 : index
    %c0_2 = arith.constant 0 : index
    %1 = vector.load %arg4[%c0_1, %c0_2] : memref<128x384xbf16, #tpu.memory_space<vmem>>, vector<128x384xbf16>
    %c0_3 = arith.constant 0 : index
    %c0_4 = arith.constant 0 : index
    %2 = vector.load %arg5[%c0_3, %c0_4] : memref<384x128xbf16, #tpu.memory_space<vmem>>, vector<384x128xbf16>
    %c0_5 = arith.constant 0 : index
    %c0_6 = arith.constant 0 : index
    %3 = vector.load %arg2[%c0_5, %c0_6] : memref<256x128xbf16, #tpu.memory_space<vmem>>, vector<256x128xbf16>
    %cst = arith.constant dense<0.000000e+00> : vector<256x384xf32>
    %4 = tpu.matmul %3, %0, %cst {dimension_numbers = #tpu.dot_dimension_numbers<[1], [0], [0], [1], [0, 0, 1, 1], [], []>} : vector<256x128xbf16>, vector<128x384xbf16>, vector<256x384xf32> -> vector<256x384xf32>
    %cst_7 = arith.constant dense<0.000000e+00> : vector<256x384xf32>
    %5 = tpu.matmul %3, %1, %cst_7 {dimension_numbers = #tpu.dot_dimension_numbers<[1], [0], [0], [1], [0, 0, 1, 1], [], []>} : vector<256x128xbf16>, vector<128x384xbf16>, vector<256x384xf32> -> vector<256x384xf32>
    %6 = arith.mulf %4, %4 : vector<256x384xf32>
    %7 = arith.mulf %5, %5 : vector<256x384xf32>
    %8 = arith.addf %6, %7 : vector<256x384xf32>
    %9 = math.sqrt %8 : vector<256x384xf32>
    %10 = arith.truncf %9 : vector<256x384xf32> to vector<256x384xbf16>
    %cst_8 = arith.constant dense<0.000000e+00> : vector<256x128xf32>
    %11 = tpu.matmul %10, %2, %cst_8 {dimension_numbers = #tpu.dot_dimension_numbers<[1], [0], [0], [1], [0, 0, 1, 1], [], []>} : vector<256x384xbf16>, vector<384x128xbf16>, vector<256x128xf32> -> vector<256x128xf32>
    %cst_9 = arith.constant 1.1920929E-7 : f32
    %12 = vector.broadcast %cst_9 : f32 to vector<256x128xf32>
    %13 = arith.maximumf %11, %12 : vector<256x128xf32>
    %14 = math.log %13 : vector<256x128xf32>
    %c0_10 = arith.constant 0 : index
    %c0_11 = arith.constant 0 : index
    %15 = vector.load %arg1[%c0_10, %c0_11] : memref<256x128xbf16, #tpu.memory_space<vmem>>, vector<256x128xbf16>
    %cst_12 = arith.constant dense<0.000000e+00> : vector<256x384xf32>
    %16 = tpu.matmul %15, %0, %cst_12 {dimension_numbers = #tpu.dot_dimension_numbers<[1], [0], [0], [1], [0, 0, 1, 1], [], []>} : vector<256x128xbf16>, vector<128x384xbf16>, vector<256x384xf32> -> vector<256x384xf32>
    %cst_13 = arith.constant dense<0.000000e+00> : vector<256x384xf32>
    %17 = tpu.matmul %15, %1, %cst_13 {dimension_numbers = #tpu.dot_dimension_numbers<[1], [0], [0], [1], [0, 0, 1, 1], [], []>} : vector<256x128xbf16>, vector<128x384xbf16>, vector<256x384xf32> -> vector<256x384xf32>
    %18 = arith.mulf %16, %16 : vector<256x384xf32>
    %19 = arith.mulf %17, %17 : vector<256x384xf32>
    %20 = arith.addf %18, %19 : vector<256x384xf32>
    %21 = math.sqrt %20 : vector<256x384xf32>
    %22 = arith.truncf %21 : vector<256x384xf32> to vector<256x384xbf16>
    %cst_14 = arith.constant dense<0.000000e+00> : vector<256x128xf32>
    %23 = tpu.matmul %22, %2, %cst_14 {dimension_numbers = #tpu.dot_dimension_numbers<[1], [0], [0], [1], [0, 0, 1, 1], [], []>} : vector<256x384xbf16>, vector<384x128xbf16>, vector<256x128xf32> -> vector<256x128xf32>
    %cst_15 = arith.constant 1.1920929E-7 : f32
    %24 = vector.broadcast %cst_15 : f32 to vector<256x128xf32>
    %25 = arith.maximumf %23, %24 : vector<256x128xf32>
    %26 = math.log %25 : vector<256x128xf32>
    %27 = arith.subf %14, %26 : vector<256x128xf32>
    %28 = math.absf %27 : vector<256x128xf32>
    %29 = vector.shape_cast %28 : vector<256x128xf32> to vector<32x8x128xf32>
    %cst_16 = arith.constant dense<0.000000e+00> : vector<8x128xf32>
    %30 = vector.multi_reduction <add>, %29, %cst_16 [0] : vector<32x8x128xf32> to vector<8x128xf32>
    %c0_17 = arith.constant 0 : index
    %c0_18 = arith.constant 0 : index
    %31 = vector.load %arg6[%c0_17, %c0_18] : memref<8x128xf32, #tpu.memory_space<vmem>>, vector<8x128xf32>
    tpu.vector_store %arg6[%c0_17, %c0_18], %30 {strides = array<i32>} : memref<8x128xf32, #tpu.memory_space<vmem>>, vector<8x128xf32>,
    return
  }
  func.func @transform_0(%arg0: i32) -> (i32, i32) {
    %c0_i32 = arith.constant 0 : i32
    %c0_i32_0 = arith.constant 0 : i32
    return %arg0, %c0_i32 : i32, i32
  }
  func.func @transform_1(%arg0: i32) -> (i32, i32) {
    %c0_i32 = arith.constant 0 : i32
    %c0_i32_0 = arith.constant 0 : i32
    return %arg0, %c0_i32 : i32, i32
  }
  func.func @transform_2(%arg0: i32) -> (i32, i32) {
    %c0_i32 = arith.constant 0 : i32
    %c0_i32_0 = arith.constant 0 : i32
    %c0_i32_1 = arith.constant 0 : i32
    return %c0_i32, %c0_i32_0 : i32, i32
  }
  func.func @transform_3(%arg0: i32) -> (i32, i32) {
    %c0_i32 = arith.constant 0 : i32
    %c0_i32_0 = arith.constant 0 : i32
    %c0_i32_1 = arith.constant 0 : i32
    return %c0_i32, %c0_i32_0 : i32, i32
  }
  func.func @transform_4(%arg0: i32) -> (i32, i32) {
    %c0_i32 = arith.constant 0 : i32
    %c0_i32_0 = arith.constant 0 : i32
    %c0_i32_1 = arith.constant 0 : i32
    return %c0_i32, %c0_i32_0 : i32, i32
  }
  func.func @transform_5(%arg0: i32) -> (i32, i32) {
    %c0_i32 = arith.constant 0 : i32
    %c0_i32_0 = arith.constant 0 : i32
    return %arg0, %c0_i32 : i32, i32
  }
}

</mosaic_0001>

<bundles_post_ra>
// kernel: tpu_custom_call.1
= control target key start
LH: loop header
LB: loop body
LE: loop exit
PB: predicated region body
PF: predicated region fallthrough
CT: control target
= control target key end

     0   :  { %10 = vsyncpa [#allocation3], 0  ;;  %s10717_s0 = inlined_call_operand.hbm [shape: bf16[256,128], index: 0, kind: input, shape index: {}]   ;;  %s10718_s1 = inlined_call_operand.hbm [shape: bf16[256,128], index: 1, kind: input, shape index: {}]   ;;  %s10719_s2 = inlined_call_operand.hbm [shape: bf16[128,384], index: 2, kind: input, shape index: {}]   ;;  %s10720_s3 = inlined_call_operand.hbm [shape: bf16[128,384], index: 3, kind: input, shape index: {}]   ;;  %s10721_s4 = inlined_call_operand.hbm [shape: bf16[384,128], index: 4, kind: input, shape index: {}]   ;;  %s10722_s5 = inlined_call_operand.hbm [shape: f32[8,128], index: 5, kind: output, shape index: {}]  }
   0x1   :  { %11 = vsyncpa [#allocation6], 0 }
   0x2   :  { %12 = vsyncpa [#allocation9], 0 }
   0x3   :  { %13 = vsyncpa [#allocation4], 0  ;;  %s6841_s18 = smov [#allocation5]  }
   0x4   :  { %s31_s19 = sshll.u32 %s6841_s18, 4  ;;  %s32_s19 = int_to_ptr.vmem [resolvable:$true] %s31_s19 }
   0x5   :  { %s6721_s20 = scalar_lea.vmem %s32_s19, 2048  ;;  %p6726_p1 = scmp.lt.s32.totalorder %s32_s19, %s32_s19 }
   0x6   :  { %p6722_p0 = scmp.ne.s32.totalorder %s32_s19, %s6721_s20  ;;  %p6727_p2 = scmp.lt.s32.totalorder %s6721_s20, %s6721_s20 }
   0x8   :  { %p6728_p3 = por %p6727_p2, %p6726_p1 }
   0xa   :  { %p6729_p4 = pnand %p6728_p3, %p6722_p0 }
   0xc   :  { %6732 = shalt.err (!%p6729_p4)
}
   0xd   :  { %s6842_s21 = smov 64   ;;  %s6843_s22 = smov 4  }
   0xe   :  { %37 = dma.hbm_to_vmem [thread:$0]  %s10718_s1, 2048, %s32_s19, [#allocation6], %s6842_s21, %s6842_s21, %s6843_s22  }
   0xf   :  { %s6844_s25 = smov [#allocation8]   ;;  %s6845_s27 = smov [#allocation2]  }
  0x10   :  { %s55_s26 = sshll.u32 %s6844_s25, 4  ;;  %s19_s28 = sshll.u32 %s6845_s27, 4  ;;  %s56_s26 = int_to_ptr.vmem [resolvable:$true] %s55_s26  ;;  %s20_s28 = int_to_ptr.vmem [resolvable:$true] %s19_s28 }
  0x11   :  { %s6741_s29 = scalar_lea.vmem %s56_s26, 3072  ;;  %p6746_p6 = scmp.lt.s32.totalorder %s56_s26, %s56_s26 }
  0x12   :  { %p6742_p5 = scmp.ne.s32.totalorder %s56_s26, %s6741_s29  ;;  %p6747_p7 = scmp.lt.s32.totalorder %s6741_s29, %s6741_s29 }
  0x14   :  { %p6748_p8 = por %p6747_p7, %p6746_p6 }
  0x16   :  { %p6749_p9 = pnand %p6748_p8, %p6742_p5 }
  0x18   :  { %6752 = shalt.err (!%p6749_p9)
}
  0x19   :  { %s6846_s30 = smov 192   ;;  %s6847_s6 = smov 12  }
  0x1a   :  { %61 = dma.hbm_to_vmem [thread:$0]  %s10720_s3, 3072, %s56_s26, [#allocation9], %s6846_s30, %s6846_s30, %s6847_s6  }
  0x1b   :  { %s6761_s1 = scalar_lea.vmem %s20_s28, 2048  ;;  %p6766_p11 = scmp.lt.s32.totalorder %s20_s28, %s20_s28 }
  0x1c   :  { %p6762_p10 = scmp.ne.s32.totalorder %s20_s28, %s6761_s1  ;;  %p6767_p12 = scmp.lt.s32.totalorder %s6761_s1, %s6761_s1 }
  0x1e   :  { %p6768_p13 = por %p6767_p12, %p6766_p11 }
  0x20   :  { %p6769_p0 = pnand %p6768_p13, %p6762_p10 }
  0x22   :  { %6772 = shalt.err (!%p6769_p0)
}
  0x23   :  { %25 = dma.hbm_to_vmem [thread:$0]  %s10717_s0, 2048, %s20_s28, [#allocation3], %s6842_s21, %s6842_s21, %s6843_s22  }
  0x24   :  { %s6848_s11 = smov [#allocation7]   ;;  %s6849_s13 = smov [#allocation10]  }
  0x25   :  { %s43_s12 = sshll.u32 %s6848_s11, 4  ;;  %s67_s3 = sshll.u32 %s6849_s13, 4  ;;  %s44_s12 = int_to_ptr.vmem [resolvable:$true] %s43_s12  ;;  %s68_s3 = int_to_ptr.vmem [resolvable:$true] %s67_s3 }
  0x26   :  { %s6781_s14 = scalar_lea.vmem %s44_s12, 3072  ;;  %p6786_p2 = scmp.lt.s32.totalorder %s44_s12, %s44_s12 }
  0x27   :  { %p6782_p1 = scmp.ne.s32.totalorder %s44_s12, %s6781_s14  ;;  %p6787_p3 = scmp.lt.s32.totalorder %s6781_s14, %s6781_s14 }
  0x29   :  { %p6788_p4 = por %p6787_p3, %p6786_p2 }
  0x2b   :  { %p6789_p5 = pnand %p6788_p4, %p6782_p1 }
  0x2d   :  { %6792 = shalt.err (!%p6789_p5)
}
  0x2e   :  { %49 = dma.hbm_to_vmem [thread:$0]  %s10719_s2, 3072, %s44_s12, [#allocation6], %s6846_s30, %s6846_s30, %s6847_s6  }
  0x2f   :  { %s6801_s17 = scalar_lea.vmem %s68_s3, 3072  ;;  %p6806_p7 = scmp.lt.s32.totalorder %s68_s3, %s68_s3 }
  0x30   :  { %p6802_p6 = scmp.ne.s32.totalorder %s68_s3, %s6801_s17  ;;  %p6807_p8 = scmp.lt.s32.totalorder %s6801_s17, %s6801_s17 }
  0x32   :  { %p6808_p9 = por %p6807_p8, %p6806_p7 }
  0x34   :  { %p6809_p10 = pnand %p6808_p9, %p6802_p6 }
  0x36   :  { %6812 = shalt.err (!%p6809_p10)
}
  0x37   :  { %73 = dma.hbm_to_vmem [thread:$0]  %s10721_s4, 3072, %s68_s3, [#allocation9], %s6842_s21, %s6842_s21, %s6843_s22  }
  0x38   :  { %6833 = dma.done.wait [#allocation3], 2048  }
  0x39   :  { %6834 = vsyncadd [#allocation3], 4294965248 }
  0x3a   :  { %6835 = dma.done.wait [#allocation6], 5120  }
  0x3b   :  { %6836 = vsyncadd [#allocation6], 4294962176 }
  0x3c   :  { %6837 = dma.done.wait [#allocation9], 6144  }
  0x3d   :  { %6838 = vsyncadd [#allocation9], 4294961152  ;;  %v10723_v0 = vmov 0   ;;  %v6907_v1 = vld [vmem:[#allocation7 + $0xac] ss:$12 sps:$4 sm:$0xff]   ;;  %v6914_v19 = vld [vmem:[#allocation5] sm:$0xff]  }
  0x3e   :  { %490 = vmatprep.mubr.bf16.mxu0 %v10723_v0  ;;  %v6909_v2 = vld [vmem:[#allocation7 + $0xb0] ss:$12 sps:$4 sm:$0xff]   ;;  %458 = vmatprep.subr.bf16.mxu0 %v6907_v1  ;;  %v6013_v3 = vld [vmem:[#allocation7 + $0xa8] ss:$12 sps:$4 sm:$0xff]   ;;  %v6016_v5 = vld [vmem:[#allocation7 + $0x98] ss:$12 sps:$4 sm:$0xff]  }
  0x3f   :  { %5711 = vmatprep.subr.bf16.mxu1 %v6909_v2  ;;  %v6014_v4 = vld [vmem:[#allocation7 + $0x94] ss:$12 sps:$4 sm:$0xff]   ;;  %459 = vmatpush1.bf16.msra.mxu0 %v6013_v3  ;;  %v6017_v6 = vld [vmem:[#allocation7 + $0x90] ss:$12 sps:$4 sm:$0xff]   ;;  %v6021_v9 = vld [vmem:[#allocation7 + $0x78] ss:$12 sps:$4 sm:$0xff]  }
  0x40   :  { %5712 = vmatpush3.bf16.msra.mxu1 %v6909_v2  ;;  %460 = vmatprep.subr.bf16.mxu0 %v6014_v4  ;;  %v6018_v7 = vld [vmem:[#allocation7 + $0x7c] ss:$12 sps:$4 sm:$0xff]   ;;  %v6020_v8 = vld [vmem:[#allocation7 + $0x80] ss:$12 sps:$4 sm:$0xff]   ;;  %v6022_v10 = vld [vmem:[#allocation7 + $0x64] ss:$12 sps:$4 sm:$0xff]  }
  0x41   :  { %5713 = vmatprep.subr.bf16.mxu1 %v6016_v5  ;;  %v6024_v11 = vld [vmem:[#allocation7 + $0x68] ss:$12 sps:$4 sm:$0xff]   ;;  %v6025_v12 = vld [vmem:[#allocation7 + $0x60] ss:$12 sps:$4 sm:$0xff]   ;;  %v6028_v14 = vld [vmem:[#allocation7 + $0x50] ss:$12 sps:$4 sm:$0xff]   ;;  %5727 = vmatprep.mubr.bf16.mxu1 %v6914_v19 }
  0x42   :  { %v6026_v13 = vld [vmem:[#allocation7 + $0x4c] ss:$12 sps:$4 sm:$0xff]   ;;  %v6029_v15 = vld [vmem:[#allocation7 + $0x48] ss:$12 sps:$4 sm:$0xff]   ;;  %v6033_v18 = vld [vmem:[#allocation7 + $0x30] ss:$12 sps:$4 sm:$0xff]  }
  0x43   :  { %461 = vmatpush1.bf16.msra.mxu0 %v6017_v6  ;;  %v6030_v16 = vld [vmem:[#allocation7 + $0x34] ss:$12 sps:$4 sm:$0xff]   ;;  %v6032_v17 = vld [vmem:[#allocation7 + $0x38] ss:$12 sps:$4 sm:$0xff]   ;;  %v6034_v20 = vld [vmem:[#allocation7 + $0x1c] ss:$12 sps:$4 sm:$0xff]  }
  0x44   :  { %5714 = vmatpush3.bf16.msra.mxu1 %v6016_v5  ;;  %462 = vmatprep.subr.bf16.mxu0 %v6018_v7  ;;  %v6036_v21 = vld [vmem:[#allocation7 + $0x20] ss:$12 sps:$4 sm:$0xff]   ;;  %v6037_v22 = vld [vmem:[#allocation7 + $0x18] ss:$12 sps:$4 sm:$0xff]   ;;  %v6040_v24 = vld [vmem:[#allocation7 + $0x8] ss:$12 sps:$4 sm:$0xff]  }
  0x45   :  { %5715 = vmatprep.subr.bf16.mxu1 %v6020_v8  ;;  %v6038_v23 = vld [vmem:[#allocation7 + $0x4] ss:$12 sps:$4 sm:$0xff]   ;;  %v6041_v25 = vld [vmem:[#allocation7] ss:$12 sps:$4 sm:$0xff]   ;;  %v6045_v29 = vld [vmem:[#allocation8 + $0xa8] ss:$12 sps:$4 sm:$0xff]  }
  0x46   :  { %v6044_v26 = vld [vmem:[#allocation8 + $0xb0] ss:$12 sps:$4 sm:$0xff]   ;;  %v6047_v27 = vld [vmem:[#allocation8 + $0xac] ss:$12 sps:$4 sm:$0xff]   ;;  %v6052_v31 = vld [vmem:[#allocation8 + $0x94] ss:$12 sps:$4 sm:$0xff]  }
  0x47   :  { %463 = vmatpush1.bf16.msra.mxu0 %v6021_v9  ;;  %v6917_v28 = vld [vmem:[#allocation5 + $0x8] sm:$0xff]   ;;  %v6919_v30 = vld [vmem:[#allocation5 + $0x10] sm:$0xff]   ;;  %v6055_v32 = vld [vmem:[#allocation8 + $0x98] ss:$12 sps:$4 sm:$0xff]   ;;  %s6851_s2 = smov [#allocation11]  }
  0x48   :  { %5716 = vmatpush3.bf16.msra.mxu1 %v6020_v8  ;;  %464 = vmatprep.subr.bf16.mxu0 %v6022_v10  ;;  %v6050_v33 = vld [vmem:[#allocation8 + $0x90] ss:$12 sps:$4 sm:$0xff]   ;;  %v6066_v35 = vld [vmem:[#allocation8 + $0x80] ss:$12 sps:$4 sm:$0xff]   ;;  %v6056_v38 = vld [vmem:[#allocation8 + $0x78] ss:$12 sps:$4 sm:$0xff]  }
  0x49   :  { %5717 = vmatprep.subr.bf16.mxu1 %v6024_v11  ;;  %v6058_v34 = vld [vmem:[#allocation8 + $0x7c] ss:$12 sps:$4 sm:$0xff]   ;;  %v6927_v37 = vld [vmem:[#allocation5 + $0x20] sm:$0xff]   ;;  %v6069_v43 = vld [vmem:[#allocation8 + $0x4c] ss:$12 sps:$4 sm:$0xff]   ;;  %s5228_s4 = sshll.u32 %s6851_s2, 4  ;;  %s5229_s4 = int_to_ptr.vmem [resolvable:$true] %s5228_s4 }
  0x4a   :  { %v6925_v36 = vld [vmem:[#allocation5 + $0x18] sm:$0xff]   ;;  %v6063_v39 = vld [vmem:[#allocation8 + $0x64] ss:$12 sps:$4 sm:$0xff]   ;;  %v6077_v40 = vld [vmem:[#allocation8 + $0x68] ss:$12 sps:$4 sm:$0xff]   ;;  %s6813_s19 = scalar_lea.vmem %s5229_s4, 128  ;;  %p6818_p12 = scmp.lt.s32.totalorder %s5229_s4, %s5229_s4 }
  0x4b   :  { %465 = vmatpush1.bf16.msra.mxu0 %v6025_v12  ;;  %v6933_v41 = vld [vmem:[#allocation5 + $0x28] sm:$0xff]   ;;  %v6935_v44 = vld [vmem:[#allocation5 + $0x30] sm:$0xff]   ;;  %v6087_v48 = vld [vmem:[#allocation8 + $0x38] ss:$12 sps:$4 sm:$0xff]   ;;  %p6814_p11 = scmp.ne.s32.totalorder %s5229_s4, %s6813_s19  ;;  %p6819_p13 = scmp.lt.s32.totalorder %s6813_s19, %s6813_s19 }
  0x4c   :  { %5718 = vmatpush3.bf16.msra.mxu1 %v6024_v11  ;;  %466 = vmatprep.subr.bf16.mxu0 %v6026_v13  ;;  %v6061_v42 = vld [vmem:[#allocation8 + $0x60] ss:$12 sps:$4 sm:$0xff]   ;;  %v6067_v45 = vld [vmem:[#allocation8 + $0x48] ss:$12 sps:$4 sm:$0xff]   ;;  %v6086_v47 = vld [vmem:[#allocation8 + $0x50] ss:$12 sps:$4 sm:$0xff]  }
  0x4d   :  { %5719 = vmatprep.subr.bf16.mxu1 %v6028_v14  ;;  %v6074_v46 = vld [vmem:[#allocation8 + $0x34] ss:$12 sps:$4 sm:$0xff]   ;;  %v6072_v49 = vld [vmem:[#allocation8 + $0x30] ss:$12 sps:$4 sm:$0xff]   ;;  %v6078_v53 = vld [vmem:[#allocation8 + $0x18] ss:$12 sps:$4 sm:$0xff]   ;;  %p6820_p0 = por %p6819_p13, %p6818_p12 }
  0x4e   :  { %v6941_v50 = vld [vmem:[#allocation5 + $0x38] sm:$0xff]   ;;  %v6943_v52 = vld [vmem:[#allocation5 + $0x40] sm:$0xff]   ;;  %v6089_v56 = vld [vmem:[#allocation8 + $0x8] ss:$12 sps:$4 sm:$0xff]  }
  0x4f   :  { %467 = vmatpush1.bf16.msra.mxu0 %v6029_v15  ;;  %v6080_v51 = vld [vmem:[#allocation8 + $0x1c] ss:$12 sps:$4 sm:$0xff]   ;;  %v6088_v54 = vld [vmem:[#allocation8 + $0x20] ss:$12 sps:$4 sm:$0xff]   ;;  %v6085_v55 = vld [vmem:[#allocation8 + $0x4] ss:$12 sps:$4 sm:$0xff]   ;;  %p6821_p1 = pnand %p6820_p0, %p6814_p11 }
  0x50   :  { %5720 = vmatpush3.bf16.msra.mxu1 %v6028_v14  ;;  %468 = vmatprep.subr.bf16.mxu0 %v6030_v16  ;;  %v6083_v57 = vld [vmem:[#allocation8] ss:$12 sps:$4 sm:$0xff]   ;;  %v6951_v59 = vld [vmem:[#allocation5 + $0x50] sm:$0xff]   ;;  %v6957_v60 = vld [vmem:[#allocation5 + $0x58] sm:$0xff]  }
  0x51   :  { %5721 = vmatprep.subr.bf16.mxu1 %v6032_v17  ;;  %v6949_v58 = vld [vmem:[#allocation5 + $0x48] sm:$0xff]   ;;  %v6959_v61 = vld [vmem:[#allocation5 + $0x60] sm:$0xff]   ;;  %v6967_v63 = vld [vmem:[#allocation5 + $0x70] sm:$0xff]  }
  0x52   :  { %v6965_v62 = vld [vmem:[#allocation5 + $0x68] sm:$0xff]   ;;  %v6973_v3 = vld [vmem:[#allocation5 + $0x78] sm:$0xff]   ;;  %v6095_v6 = vld [vmem:[#allocation10 + $0xb0] sm:$0xff]  }
  0x53   :  { %469 = vmatpush1.bf16.msra.mxu0 %v6033_v18  ;;  %v6090_v4 = vld [vmem:[#allocation10 + $0xb8] sm:$0xff]   ;;  %v6093_v8 = vld [vmem:[#allocation10 + $0x70] sm:$0xff]   ;;  %v6096_v10 = vld [vmem:[#allocation10 + $0x68] sm:$0xff]  }
  0x54   :  { %5722 = vmatpush3.bf16.msra.mxu1 %v6032_v17  ;;  %470 = vmatprep.subr.bf16.mxu0 %v6034_v20  ;;  %v6091_v5 = vld [vmem:[#allocation10 + $0x78] sm:$0xff]   ;;  %v6094_v9 = vld [vmem:[#allocation10 + $0x30] sm:$0xff]   ;;  %v6100_v11 = vld [vmem:[#allocation10 + $0xa8] sm:$0xff]  }
  0x55   :  { %5723 = vmatprep.subr.bf16.mxu1 %v6036_v21  ;;  %v6092_v7 = vld [vmem:[#allocation10 + $0x38] sm:$0xff]   ;;  %v6097_v12 = vld [vmem:[#allocation10 + $0x28] sm:$0xff]   ;;  %v6098_v13 = vld [vmem:[#allocation10 + $0x60] sm:$0xff]  }
  0x56   :  { %v6099_v14 = vld [vmem:[#allocation10 + $0x20] sm:$0xff]   ;;  %v6101_v15 = vld [vmem:[#allocation10 + $0x58] sm:$0xff]   ;;  %v6103_v17 = vld [vmem:[#allocation10 + $0x50] sm:$0xff]  }
  0x57   :  { %471 = vmatpush1.bf16.msra.mxu0 %v6037_v22  ;;  %v6102_v16 = vld [vmem:[#allocation10 + $0x18] sm:$0xff]   ;;  %v6104_v18 = vld [vmem:[#allocation10 + $0x10] sm:$0xff]   ;;  %v6106_v20 = vld [vmem:[#allocation10 + $0x48] sm:$0xff]  }
  0x58   :  { %5724 = vmatpush3.bf16.msra.mxu1 %v6036_v21  ;;  %472 = vmatprep.subr.bf16.mxu0 %v6038_v23  ;;  %v6107_v21 = vld [vmem:[#allocation10 + $0x8] sm:$0xff]   ;;  %v6108_v22 = vld [vmem:[#allocation10 + $0x40] sm:$0xff]  }
  0x59   :  { %5725 = vmatprep.subr.bf16.mxu1 %v6040_v24  ;;  %v6109_v23 = vld [vmem:[#allocation10] sm:$0xff]  }
  0x5b   :  { %473 = vmatpush1.bf16.msra.mxu0 %v6041_v25 }
  0x5c   :  { %5726 = vmatpush3.bf16.msra.mxu1 %v6040_v24  ;;  %5759 = vmatprep.subr.bf16.mxu0 %v6044_v26  ;;  %v6110_v24 = vld [vmem:[#allocation10 + $0x98] sm:$0xff]  }
  0x5d   :  { %940 = vmatprep.subr.bf16.mxu1 %v6047_v27 }
  0x5e   :  { %491 = vmatmul.mubr.bf16.vlgmr.msra.gmra.mxu0 %v6914_v19 }
  0x5f   :  { %5728 = vmatmul.mubr.bf16.vlgmr.msra.gmra.mxu1 %v6917_v28  ;;  %5760 = vmatpush3.bf16.msra.mxu0 %v6044_v26 }
  0x60   :  { %941 = vmatpush1.bf16.msra.mxu1 %v6045_v29  ;;  %500 = vmatprep.mubr.bf16.mxu0 %v10723_v0 }
  0x61   :  { %5731 = vmatprep.mubr.bf16.mxu1 %v6919_v30  ;;  %942 = vmatprep.subr.bf16.mxu1 %v6052_v31 }
  0x62   :  { %5761 = vmatprep.subr.bf16.mxu0 %v6055_v32 }
  0x63   :  { %5762 = vmatpush3.bf16.msra.mxu0 %v6055_v32 }
  0x64   :  { %943 = vmatpush1.bf16.msra.mxu1 %v6050_v33  ;;  %5763 = vmatprep.subr.bf16.mxu0 %v6066_v35 }
  0x65   :  { %944 = vmatprep.subr.bf16.mxu1 %v6058_v34 }
  0x66   :  { %501 = vmatmul.mubr.bf16.gmra.mxu0 %v6917_v28 }
  0x67   :  { %5732 = vmatmul.mubr.bf16.gmra.mxu1 %v6925_v36  ;;  %510 = vmatprep.mubr.bf16.mxu0 %v10723_v0 }
  0x68   :  { %5735 = vmatprep.mubr.bf16.mxu1 %v6927_v37  ;;  %945 = vmatpush1.bf16.msra.mxu1 %v6056_v38 }
  0x69   :  { %5764 = vmatpush3.bf16.msra.mxu0 %v6066_v35  ;;  %946 = vmatprep.subr.bf16.mxu1 %v6063_v39 }
  0x6a   :  { %5765 = vmatprep.subr.bf16.mxu0 %v6077_v40 }
  0x6c   :  { %947 = vmatpush1.bf16.msra.mxu1 %v6061_v42 }
  0x6d   :  { %5766 = vmatpush3.bf16.msra.mxu0 %v6077_v40  ;;  %948 = vmatprep.subr.bf16.mxu1 %v6069_v43 }
  0x6e   :  { %511 = vmatmul.mubr.bf16.gmra.mxu0 %v6919_v30  ;;  %5767 = vmatprep.subr.bf16.mxu0 %v6086_v47 }
  0x6f   :  { %5736 = vmatmul.mubr.bf16.gmra.mxu1 %v6933_v41  ;;  %520 = vmatprep.mubr.bf16.mxu0 %v10723_v0 }
  0x70   :  { %5739 = vmatprep.mubr.bf16.mxu1 %v6935_v44  ;;  %949 = vmatpush1.bf16.msra.mxu1 %v6067_v45 }
  0x71   :  { %950 = vmatprep.subr.bf16.mxu1 %v6074_v46  ;;  %5768 = vmatpush3.bf16.msra.mxu0 %v6086_v47 }
  0x72   :  { %5769 = vmatprep.subr.bf16.mxu0 %v6087_v48 }
  0x74   :  { %951 = vmatpush1.bf16.msra.mxu1 %v6072_v49 }
  0x75   :  { %952 = vmatprep.subr.bf16.mxu1 %v6080_v51  ;;  %5770 = vmatpush3.bf16.msra.mxu0 %v6087_v48 }
  0x76   :  { %521 = vmatmul.mubr.bf16.gmra.mxu0 %v6925_v36  ;;  %5771 = vmatprep.subr.bf16.mxu0 %v6088_v54 }
  0x77   :  { %5740 = vmatmul.mubr.bf16.gmra.mxu1 %v6941_v50  ;;  %530 = vmatprep.mubr.bf16.mxu0 %v10723_v0 }
  0x78   :  { %5743 = vmatprep.mubr.bf16.mxu1 %v6943_v52  ;;  %953 = vmatpush1.bf16.msra.mxu1 %v6078_v53 }
  0x79   :  { %954 = vmatprep.subr.bf16.mxu1 %v6085_v55  ;;  %5772 = vmatpush3.bf16.msra.mxu0 %v6088_v54 }
  0x7a   :  { %5773 = vmatprep.subr.bf16.mxu0 %v6089_v56 }
  0x7c   :  { %955 = vmatpush1.bf16.msra.mxu1 %v6083_v57 }
  0x7d   :  { %5774 = vmatpush3.bf16.msra.mxu0 %v6089_v56  ;;  %5807 = vmatprep.subr.bf16.mxu1 %v6090_v4 }
  0x7e   :  { %531 = vmatmul.mubr.bf16.gmra.mxu0 %v6927_v37  ;;  %5391 = vmatprep.subr.bf16.mxu0 %v6091_v5 }
  0x7f   :  { %5744 = vmatmul.mubr.bf16.gmra.mxu1 %v6949_v58  ;;  %540 = vmatprep.mubr.bf16.mxu0 %v10723_v0 }
  0x80   :  { %5747 = vmatprep.mubr.bf16.mxu1 %v6951_v59 }
  0x86   :  { %541 = vmatmul.mubr.bf16.gmra.mxu0 %v6933_v41 }
  0x87   :  { %5748 = vmatmul.mubr.bf16.gmra.mxu1 %v6957_v60  ;;  %550 = vmatprep.mubr.bf16.mxu0 %v10723_v0 }
  0x88   :  { %5751 = vmatprep.mubr.bf16.mxu1 %v6959_v61 }
  0x8e   :  { %551 = vmatmul.mubr.bf16.gmra.mxu0 %v6935_v44 }
  0x8f   :  { %5752 = vmatmul.mubr.bf16.gmra.mxu1 %v6965_v62  ;;  %560 = vmatprep.mubr.bf16.mxu0 %v10723_v0 }
  0x90   :  { %5755 = vmatprep.mubr.bf16.mxu1 %v6967_v63 }
  0x96   :  { %561 = vmatmul.mubr.bf16.gmra.mxu0 %v6941_v50 }
  0x97   :  { %5756 = vmatmul.mubr.bf16.gmra.mxu1 %v6973_v3  ;;  %570 = vmatprep.mubr.bf16.mxu0 %v10723_v0 }
  0x98   :  { %972 = vmatprep.mubr.bf16.mxu1 %v10723_v0 }
  0x9e   :  { %571 = vmatmul.mubr.bf16.gmra.mxu0 %v6943_v52 }
  0x9f   :  { %973 = vmatmul.mubr.bf16.vlgmr.msra.gmra.mxu1 %v6914_v19  ;;  %580 = vmatprep.mubr.bf16.mxu0 %v10723_v0 }
  0xa0   :  { %982 = vmatprep.mubr.bf16.mxu1 %v10723_v0  ;;  %5808 = vmatpush3.bf16.msra.mxu1 %v6090_v4 }
  0xa1   :  { %5809 = vmatprep.subr.bf16.mxu1 %v6095_v6 }
  0xa4   :  { %5810 = vmatpush3.bf16.msra.mxu1 %v6095_v6 }
  0xa5   :  { %5811 = vmatprep.subr.bf16.mxu1 %v6100_v11 }
  0xa6   :  { %581 = vmatmul.mubr.bf16.gmra.mxu0 %v6949_v58 }
  0xa7   :  { %983 = vmatmul.mubr.bf16.gmra.mxu1 %v6917_v28  ;;  %590 = vmatprep.mubr.bf16.mxu0 %v10723_v0 }
  0xa8   :  { %992 = vmatprep.mubr.bf16.mxu1 %v10723_v0  ;;  %5812 = vmatpush3.bf16.msra.mxu1 %v6100_v11 }
  0xae   :  { %591 = vmatmul.mubr.bf16.gmra.mxu0 %v6951_v59 }
  0xaf   :  { %993 = vmatmul.mubr.bf16.gmra.mxu1 %v6919_v30  ;;  %600 = vmatprep.mubr.bf16.mxu0 %v10723_v0 }
  0xb0   :  { %1002 = vmatprep.mubr.bf16.mxu1 %v10723_v0 }
  0xb6   :  { %601 = vmatmul.mubr.bf16.gmra.mxu0 %v6957_v60 }
  0xb7   :  { %1003 = vmatmul.mubr.bf16.gmra.mxu1 %v6925_v36  ;;  %610 = vmatprep.mubr.bf16.mxu0 %v10723_v0 }
  0xb8   :  { %1012 = vmatprep.mubr.bf16.mxu1 %v10723_v0 }
  0xbe   :  { %611 = vmatmul.mubr.bf16.gmra.mxu0 %v6959_v61 }
  0xbf   :  { %1013 = vmatmul.mubr.bf16.gmra.mxu1 %v6927_v37  ;;  %620 = vmatprep.mubr.bf16.mxu0 %v10723_v0 }
  0xc0   :  { %1022 = vmatprep.mubr.bf16.mxu1 %v10723_v0 }
  0xc6   :  { %621 = vmatmul.mubr.bf16.gmra.mxu0 %v6965_v62 }
  0xc7   :  { %1023 = vmatmul.mubr.bf16.gmra.mxu1 %v6933_v41  ;;  %630 = vmatprep.mubr.bf16.mxu0 %v10723_v0 }
  0xc8   :  { %1032 = vmatprep.mubr.bf16.mxu1 %v10723_v0 }
  0xce   :  { %631 = vmatmul.mubr.bf16.gmra.mxu0 %v6967_v63 }
  0xcf   :  { %1033 = vmatmul.mubr.bf16.gmra.mxu1 %v6935_v44  ;;  %640 = vmatprep.mubr.bf16.mxu0 %v10723_v0 }
  0xd0   :  { %1042 = vmatprep.mubr.bf16.mxu1 %v10723_v0 }
  0xd6   :  { %641 = vmatmul.mubr.bf16.gmra.mxu0 %v6973_v3 }
  0xd7   :  { %1043 = vmatmul.mubr.bf16.gmra.mxu1 %v6941_v50  ;;  %5775 = vmatprep.mubr.bf16.mxu0 %v6914_v19  ;;  %v6105_v19 = vld [vmem:[#allocation10 + $0xa0] sm:$0xff]  }
  0xd8   :  { %1052 = vmatprep.mubr.bf16.mxu1 %v10723_v0  ;;  %5813 = vmatprep.subr.bf16.mxu1 %v6105_v19 }
  0xd9   :  { %5814 = vmatpush3.bf16.msra.mxu1 %v6105_v19 }
  0xda   :  { %5815 = vmatprep.subr.bf16.mxu1 %v6110_v24 }
  0xdd   :  { %5816 = vmatpush3.bf16.msra.mxu1 %v6110_v24 }
  0xde   :  { %5776 = vmatmul.mubr.bf16.vlgmr.msra.gmra.mxu0 %v6917_v28 }
  0xdf   :  { %1053 = vmatmul.mubr.bf16.gmra.mxu1 %v6943_v52  ;;  %5779 = vmatprep.mubr.bf16.mxu0 %v6919_v30 }
  0xe0   :  { %1062 = vmatprep.mubr.bf16.mxu1 %v10723_v0  ;;  %5392 = vmatpush3.bf16.msra.mxu0 %v6092_v7 }
  0xe1   :  { %5393 = vmatprep.subr.bf16.mxu0 %v6093_v8 }
  0xe4   :  { %5394 = vmatpush3.bf16.msra.mxu0 %v6094_v9 }
  0xe5   :  { %5395 = vmatprep.subr.bf16.mxu0 %v6096_v10 }
  0xe6   :  { %5780 = vmatmul.mubr.bf16.gmra.mxu0 %v6925_v36 }
  0xe7   :  { %1063 = vmatmul.mubr.bf16.gmra.mxu1 %v6949_v58  ;;  %5783 = vmatprep.mubr.bf16.mxu0 %v6927_v37  ;;  %v6112_v37 = vld [vmem:[#allocation10 + $0x88] sm:$0xff]  }
  0xe8   :  { %1072 = vmatprep.mubr.bf16.mxu1 %v10723_v0  ;;  %5396 = vmatpush3.bf16.msra.mxu0 %v6097_v12 }
  0xe9   :  { %5397 = vmatprep.subr.bf16.mxu0 %v6098_v13 }
  0xec   :  { %5398 = vmatpush3.bf16.msra.mxu0 %v6099_v14 }
  0xed   :  { %5399 = vmatprep.subr.bf16.mxu0 %v6101_v15 }
  0xee   :  { %5784 = vmatmul.mubr.bf16.gmra.mxu0 %v6933_v41 }
  0xef   :  { %1073 = vmatmul.mubr.bf16.gmra.mxu1 %v6951_v59  ;;  %5787 = vmatprep.mubr.bf16.mxu0 %v6935_v44 }
  0xf0   :  { %1082 = vmatprep.mubr.bf16.mxu1 %v10723_v0  ;;  %5400 = vmatpush3.bf16.msra.mxu0 %v6102_v16 }
  0xf1   :  { %5401 = vmatprep.subr.bf16.mxu0 %v6103_v17 }
  0xf4   :  { %5402 = vmatpush3.bf16.msra.mxu0 %v6104_v18 }
  0xf5   :  { %5403 = vmatprep.subr.bf16.mxu0 %v6106_v20 }
  0xf6   :  { %5788 = vmatmul.mubr.bf16.gmra.mxu0 %v6941_v50 }
  0xf7   :  { %1083 = vmatmul.mubr.bf16.gmra.mxu1 %v6957_v60  ;;  %5791 = vmatprep.mubr.bf16.mxu0 %v6943_v52 }
  0xf8   :  { %1092 = vmatprep.mubr.bf16.mxu1 %v10723_v0  ;;  %5404 = vmatpush3.bf16.msra.mxu0 %v6107_v21 }
  0xf9   :  { %5405 = vmatprep.subr.bf16.mxu0 %v6108_v22 }
  0xfc   :  { %5406 = vmatpush3.bf16.msra.mxu0 %v6109_v23 }
  0xfd   :  { %5855 = vmatprep.subr.bf16.mxu0 %v6909_v2  ;;  %v6111_v2 = vld [vmem:[#allocation10 + $0x90] sm:$0xff]  }
  0xfe   :  { %5792 = vmatmul.mubr.bf16.gmra.mxu0 %v6949_v58  ;;  %5817 = vmatprep.subr.bf16.mxu1 %v6111_v2 }
  0xff   :  { %1093 = vmatmul.mubr.bf16.gmra.mxu1 %v6959_v61  ;;  %5795 = vmatprep.mubr.bf16.mxu0 %v6951_v59 }
 0x100   :  { %1102 = vmatprep.mubr.bf16.mxu1 %v10723_v0  ;;  %5818 = vmatpush3.bf16.msra.mxu1 %v6111_v2 }
 0x101   :  { %5819 = vmatprep.subr.bf16.mxu1 %v6112_v37 }
 0x104   :  { %5820 = vmatpush3.bf16.msra.mxu1 %v6112_v37 }
 0x106   :  { %5796 = vmatmul.mubr.bf16.gmra.mxu0 %v6957_v60 }
 0x107   :  { %1103 = vmatmul.mubr.bf16.gmra.mxu1 %v6965_v62  ;;  %5799 = vmatprep.mubr.bf16.mxu0 %v6959_v61 }
 0x108   :  { %1112 = vmatprep.mubr.bf16.mxu1 %v10723_v0 }
 0x10e   :  { %5800 = vmatmul.mubr.bf16.gmra.mxu0 %v6965_v62 }
 0x10f   :  { %1113 = vmatmul.mubr.bf16.gmra.mxu1 %v6967_v63  ;;  %5803 = vmatprep.mubr.bf16.mxu0 %v6967_v63 }
 0x110   :  { %1122 = vmatprep.mubr.bf16.mxu1 %v10723_v0 }
 0x116   :  { %5804 = vmatmul.mubr.bf16.gmra.mxu0 %v6973_v3 }
 0x117   :  { %1123 = vmatmul.mubr.bf16.gmra.mxu1 %v6973_v3  ;;  %v6113_v3 = vld [vmem:[#allocation10 + $0x80] sm:$0xff]  }
 0x118   :  { %5821 = vmatprep.subr.bf16.mxu1 %v6113_v3 }
 0x119   :  { %5822 = vmatpush3.bf16.msra.mxu1 %v6113_v3 }
 0x11a   :  { %2992 = vmatprep.subr.bf16.mxu1 %v6907_v1 }
 0x11e   :  { %v7042_v25 = vpop.f32.mrf.mxu0 }
 0x11f   :  { %v7044_v26 = vpop.f32.mrf.mxu1  ;;  %v1294_v23 = vmul.f32 %v7042_v25, %v7042_v25 }
 0x120   :  { %v7046_v27 = vpop.f32.mrf.mxu0  ;;  %v7163_v24 = vmul.f32 %v7044_v26, %v7044_v26 }
 0x121   :  { %v7048_v28 = vpop.f32.mrf.mxu1  ;;  %v1295_v2 = vmul.f32 %v7046_v27, %v7046_v27 }
 0x122   :  { %v7050_v29 = vpop.f32.mrf.mxu0  ;;  %10789 = vst [vmem:[#allocation17_spill] sm:$0xff] %v7163_v24  ;;  %v7173_v0 = vmul.f32 %v7048_v28, %v7048_v28 }
 0x123   :  { %v7052_v30 = vpop.f32.mrf.mxu1 }
 0x124   :  { %v7054_v31 = vpop.f32.mrf.mxu0  ;;  %v7179_v25 = vmul.f32 %v7052_v30, %v7052_v30 }
 0x125   :  { %v7056_v32 = vpop.f32.mrf.mxu1  ;;  %v7183_v26 = vmul.f32 %v7054_v31, %v7054_v31 }
 0x126   :  { %v7058_v33 = vpop.f32.mrf.mxu0  ;;  %v7187_v27 = vmul.f32 %v7056_v32, %v7056_v32 }
 0x127   :  { %v7060_v34 = vpop.f32.mrf.mxu1  ;;  %v7191_v24 = vmul.f32 %v7058_v33, %v7058_v33 }
 0x128   :  { %v7062_v35 = vpop.f32.mrf.mxu0  ;;  %v7195_v28 = vmul.f32 %v7060_v34, %v7060_v34 }
 0x129   :  { %v7064_v36 = vpop.f32.mrf.mxu1 }
 0x12a   :  { %v7066_v38 = vpop.f32.mrf.mxu0  ;;  %10790 = vst [vmem:[#allocation18_spill] sm:$0xff] %v7195_v28  ;;  %v7207_v32 = vmul.f32 %v7064_v36, %v7064_v36 }
 0x12b   :  { %v7068_v39 = vpop.f32.mrf.mxu1  ;;  %v7211_v33 = vmul.f32 %v7066_v38, %v7066_v38 }
 0x12c   :  { %v7070_v40 = vpop.f32.mrf.mxu0  ;;  %v7215_v34 = vmul.f32 %v7068_v39, %v7068_v39 }
 0x12d   :  { %v7072_v41 = vpop.f32.mrf.mxu1 }
 0x12e   :  { %v7074_v42 = vpop.f32.mrf.mxu0  ;;  %10791 = vst [vmem:[#allocation19_spill] sm:$0xff] %v7215_v34  ;;  %v7223_v28 = vmul.f32 %v7072_v41, %v7072_v41 }
 0x12f   :  { %v7076_v43 = vpop.f32.mrf.mxu1  ;;  %v7227_v36 = vmul.f32 %v7074_v42, %v7074_v42 }
 0x130   :  { %v7078_v44 = vpop.f32.mrf.mxu0  ;;  %v7231_v38 = vmul.f32 %v7076_v43, %v7076_v43 }
 0x131   :  { %v7080_v45 = vpop.f32.mrf.mxu1  ;;  %v7235_v39 = vmul.f32 %v7078_v44, %v7078_v44 }
 0x132   :  { %v7082_v46 = vpop.f32.mrf.mxu0  ;;  %10792 = vst [vmem:[#allocation20_spill] sm:$0xff] %v7231_v38  ;;  %v7243_v41 = vmul.f32 %v7080_v45, %v7080_v45 }
 0x133   :  { %v7084_v47 = vpop.f32.mrf.mxu1  ;;  %v7247_v42 = vmul.f32 %v7082_v46, %v7082_v46 }
 0x134   :  { %v7086_v48 = vpop.f32.mrf.mxu0  ;;  %10794 = vst [vmem:[#allocation22_spill] sm:$0xff] %v7243_v41  ;;  %v7251_v43 = vmul.f32 %v7084_v47, %v7084_v47 }
 0x135   :  { %v7088_v49 = vpop.f32.mrf.mxu1  ;;  %v7255_v44 = vmul.f32 %v7086_v48, %v7086_v48 }
 0x136   :  { %v7090_v50 = vpop.f32.mrf.mxu0  ;;  %10795 = vst [vmem:[#allocation23_spill] sm:$0xff] %v7251_v43  ;;  %v7259_v38 = vmul.f32 %v7088_v49, %v7088_v49 }
 0x137   :  { %v7092_v51 = vpop.f32.mrf.mxu1  ;;  %v7263_v45 = vmul.f32 %v7090_v50, %v7090_v50 }
 0x138   :  { %v7094_v52 = vpop.f32.mrf.mxu0  ;;  %10796 = vst [vmem:[#allocation24_spill] sm:$0xff] %v7259_v38  ;;  %v7267_v46 = vmul.f32 %v7092_v51, %v7092_v51 }
 0x139   :  { %v7096_v53 = vpop.f32.mrf.mxu1  ;;  %v7271_v47 = vmul.f32 %v7094_v52, %v7094_v52 }
 0x13a   :  { %v7098_v54 = vpop.f32.mrf.mxu0  ;;  %10797 = vst [vmem:[#allocation25_spill] sm:$0xff] %v7267_v46  ;;  %v7277_v43 = vmul.f32 %v7096_v53, %v7096_v53 }
 0x13b   :  { %v7100_v55 = vpop.f32.mrf.mxu1  ;;  %v7281_v49 = vmul.f32 %v7098_v54, %v7098_v54 }
 0x13c   :  { %v7102_v56 = vpop.f32.mrf.mxu0  ;;  %10798 = vst [vmem:[#allocation26_spill] sm:$0xff] %v7277_v43  ;;  %v7285_v50 = vmul.f32 %v7100_v55, %v7100_v55 }
 0x13d   :  { %v7104_v57 = vpop.f32.mrf.mxu1  ;;  %v7289_v52 = vmul.f32 %v7102_v56, %v7102_v56 }
 0x13e   :  { %v7106_v58 = vpop.f32.mrf.mxu0  ;;  %10799 = vst [vmem:[#allocation27_spill] sm:$0xff] %v7285_v50  ;;  %v7293_v46 = vmul.f32 %v7104_v57, %v7104_v57 }
 0x13f   :  { %v7108_v59 = vpop.f32.mrf.mxu1  ;;  %v7297_v53 = vmul.f32 %v7106_v58, %v7106_v58 }
 0x140   :  { %v7110_v60 = vpop.f32.mrf.mxu0  ;;  %10800 = vst [vmem:[#allocation28_spill] sm:$0xff] %v7293_v46  ;;  %v7301_v54 = vmul.f32 %v7108_v59, %v7108_v59 }
 0x141   :  { %v7112_v61 = vpop.f32.mrf.mxu1 }
 0x142   :  { %v7114_v62 = vpop.f32.mrf.mxu0  ;;  %10801 = vst [vmem:[#allocation29_spill] sm:$0xff] %v7301_v54  ;;  %v7309_v56 = vmul.f32 %v7112_v61, %v7112_v61 }
 0x143   :  { %v7116_v63 = vpop.f32.mrf.mxu1  ;;  %v7315_v58 = vmul.f32 %v7114_v62, %v7114_v62 }
 0x144   :  { %v7118_v4 = vpop.f32.mrf.mxu0  ;;  %10802 = vst [vmem:[#allocation30_spill] sm:$0xff] %v7309_v56  ;;  %v7319_v59 = vmul.f32 %v7116_v63, %v7116_v63 }
 0x145   :  { %v7120_v5 = vpop.f32.mrf.mxu1  ;;  %v7323_v54 = vmul.f32 %v7118_v4, %v7118_v4 }
 0x146   :  { %v7122_v6 = vpop.f32.mrf.mxu0  ;;  %10803 = vst [vmem:[#allocation31_spill] sm:$0xff] %v7319_v59 }
 0x147   :  { %v7124_v7 = vpop.f32.mrf.mxu1 }
 0x148   :  { %v7127_v8 = vpop.f32.mrf.mxu0 }
 0x149   :  { %v7129_v9 = vpop.f32.mrf.mxu1  ;;  %v7342_v4 = vmul.f32 %v7127_v8, %v7127_v8 }
 0x14a   :  { %v7131_v10 = vpop.f32.mrf.mxu0 }
 0x14b   :  { %v7133_v11 = vpop.f32.mrf.mxu1 }
 0x14c   :  { %v7135_v12 = vpop.f32.mrf.mxu0 }
 0x14d   :  { %v7137_v13 = vpop.f32.mrf.mxu1 }
 0x14e   :  { %v7139_v14 = vpop.f32.mrf.mxu0 }
 0x14f   :  { %v7141_v15 = vpop.f32.mrf.mxu1 }
 0x150   :  { %v7143_v16 = vpop.f32.mrf.mxu0 }
 0x151   :  { %v7145_v17 = vpop.f32.mrf.mxu1 }
 0x152   :  { %v7147_v1 = vpop.f32.mrf.mxu0 }
 0x153   :  { %v7149_v18 = vpop.f32.mrf.mxu1 }
 0x154   :  { %v7151_v19 = vpop.f32.mrf.mxu0 }
 0x155   :  { %v7153_v20 = vpop.f32.mrf.mxu1 }
 0x156   :  { %v7155_v21 = vpop.f32.mrf.mxu0 }
 0x157   :  { %v7157_v22 = vpop.f32.mrf.mxu1 }
 0x158   :  { %10788 = vst [vmem:[#allocation16_spill] sm:$0xff] %v7157_v22  ;;  %v7167_v37 = vpop.f32.mrf.mxu0  ;;  %v1297_v22 = vmul.f32 %v7050_v29, %v7050_v29  ;;  %v7199_v29 = vmul.f32 %v7062_v35, %v7062_v35  ;;  %v7219_v35 = vmul.f32 %v7070_v40, %v7070_v40 }
 0x159   :  { %v7169_v3 = vpop.f32.mrf.mxu1 }
 0x15a   :  { %v7201_v30 = vpop.f32.mrf.mxu0 }
 0x15b   :  { %v7203_v31 = vpop.f32.mrf.mxu1 }
 0x15c   :  { %v7237_v34 = vpop.f32.mrf.mxu0 }
 0x15d   :  { %v7239_v40 = vpop.f32.mrf.mxu1 }
 0x15e   :  { %10793 = vst [vmem:[#allocation21_spill] sm:$0xff] %v7239_v40  ;;  %v7273_v40 = vpop.f32.mrf.mxu0 }
 0x15f   :  { %v974_v48 = vpop.f32.mrf.mxu1 }
 0x160   :  { %v1390_v51 = vmul.f32 %v974_v48, %v974_v48  ;;  %v574_v43 = vpop.f32.mrf.mxu0  ;;  %v7305_v48 = vmul.f32 %v7110_v60, %v7110_v60  ;;  %v7327_v60 = vmul.f32 %v7120_v5, %v7120_v5  ;;  %v7346_v5 = vmul.f32 %v7129_v9, %v7129_v9 }
 0x161   :  { %v976_v55 = vpop.f32.mrf.mxu1  ;;  %v7365_v9 = vmul.f32 %v7137_v13, %v7137_v13 }
 0x162   :  { %v7311_v57 = vadd.f32 %v1390_v51, %v1294_v23  ;;  %v1391_v46 = vmul.f32 %v976_v55, %v976_v55  ;;  %10804 = vst [vmem:[#allocation32_spill] sm:$0xff] %v7327_v60  ;;  %v576_v61 = vpop.f32.mrf.mxu0  ;;  %v7331_v51 = vmul.f32 %v7122_v6, %v7122_v6  ;;  %v7338_v55 = vmul.f32 %v7124_v7, %v7124_v7 }
 0x163   :  { %v978_v23 = vpop.f32.mrf.mxu1  ;;  %10806 = vst [vmem:[#allocation34_spill] sm:$0xff] %v7346_v5  ;;  %v7350_v6 = vmul.f32 %v7131_v10, %v7131_v10  ;;  %10808 = vst [vmem:[#allocation36_spill] sm:$0xff] %v7365_v9  ;;  %v7369_v10 = vmul.f32 %v7139_v14, %v7139_v14  ;;  %v7385_v14 = vmul.f32 %v7145_v17, %v7145_v17 }
 0x164   :  { %6130 = vrsqrt.f32 %v7311_v57  ;;  %v7334_v62 = vadd.f32 %v1391_v46, %v1295_v2  ;;  %v1393_v63 = vmul.f32 %v978_v23, %v978_v23  ;;  %10805 = vst [vmem:[#allocation33_spill] sm:$0xff] %v7338_v55  ;;  %v578_v60 = vpop.f32.mrf.mxu0  ;;  %v7354_v46 = vmul.f32 %v7133_v11, %v7133_v11 }
 0x165   :  { %v980_v2 = vpop.f32.mrf.mxu1  ;;  %v7361_v23 = vmul.f32 %v7135_v12, %v7135_v12  ;;  %v7373_v11 = vmul.f32 %v7141_v15, %v7141_v15  ;;  %10810 = vst [vmem:[#allocation38_spill] sm:$0xff] %v7385_v14  ;;  %v7389_v15 = vmul.f32 %v7147_v1, %v7147_v1  ;;  %v7445_v14 = vmul.f32 %v576_v61, %v576_v61 }
 0x166   :  { %10807 = vst [vmem:[#allocation35_spill] sm:$0xff] %v7354_v46  ;;  %6132 = vrsqrt.f32 %v7334_v62  ;;  %v7357_v7 = vadd.f32 %v1393_v63, %v1297_v22  ;;  %v1394_v8 = vmul.f32 %v980_v2, %v980_v2  ;;  %v582_v46 = vpop.f32.mrf.mxu0  ;;  %v7377_v63 = vmul.f32 %v7143_v16, %v7143_v16 }
 0x167   :  { %10809 = vst [vmem:[#allocation37_spill] sm:$0xff] %v7373_v11  ;;  %v984_v22 = vpop.f32.mrf.mxu1  ;;  %v7393_v2 = vmul.f32 %v7149_v18, %v7149_v18  ;;  %v7397_v16 = vmul.f32 %v7151_v19, %v7151_v19  ;;  %v7409_v18 = vmul.f32 %v7155_v21, %v7155_v21  ;;  %vm1591_vm0 = vcmp.eq.f32.partialorder %v7334_v62, inf }
 0x168   :  { %6134 = vrsqrt.f32 %v7357_v7  ;;  %v7381_v12 = vadd.f32 %v1394_v8, %v7183_v26  ;;  %v1396_v13 = vmul.f32 %v984_v22, %v984_v22  ;;  %v584_v11 = vpop.f32.mrf.mxu0  ;;  %v7401_v8 = vmul.f32 %v7153_v20, %v7153_v20  ;;  %v10813_v22 = vld [vmem:[#allocation16_spill] sm:$0xff] }
 0x169   :  { %10811 = vst [vmem:[#allocation39_spill] sm:$0xff] %v7393_v2  ;;  %v986_v26 = vpop.f32.mrf.mxu1  ;;  %v7413_v19 = vmul.f32 %v10813_v22, %v10813_v22  ;;  %v7417_v2 = vmul.f32 %v7167_v37, %v7167_v37  ;;  %v7421_v20 = vmul.f32 %v7169_v3, %v7169_v3  ;;  %v7433_v37 = vmul.f32 %v7203_v31, %v7203_v31 }
 0x16a   :  { %10812 = vst [vmem:[#allocation40_spill] sm:$0xff] %v7401_v8  ;;  %6136 = vrsqrt.f32 %v7381_v12  ;;  %v7405_v17 = vadd.f32 %v1396_v13, %v7191_v24  ;;  %v1397_v1 = vmul.f32 %v986_v26, %v986_v26  ;;  %v586_v8 = vpop.f32.mrf.mxu0  ;;  %v7425_v13 = vmul.f32 %v7201_v30, %v7201_v30 }
 0x16b   :  { %10814 = vst [vmem:[#allocation16_spill] sm:$0xff] %v7413_v19  ;;  %10815 = vst [vmem:[#allocation41_spill] sm:$0xff] %v7421_v20  ;;  %v988_v24 = vpop.f32.mrf.mxu1  ;;  %v7437_v3 = vmul.f32 %v7237_v34, %v7237_v34  ;;  %v7441_v22 = vmul.f32 %v7273_v40, %v7273_v40  ;;  %v7443_v30 = vmul.f32 %v574_v43, %v574_v43  ;;  %vm1584_vm1 = vcmp.eq.f32.partialorder %v7311_v57, inf }
 0x16c   :  { %6138 = vrsqrt.f32 %v7405_v17  ;;  %v7429_v21 = vadd.f32 %v1397_v1, %v7199_v29  ;;  %v1399_v26 = vmul.f32 %v988_v24, %v988_v24  ;;  %10816 = vst [vmem:[#allocation42_spill] sm:$0xff] %v7433_v37  ;;  %v588_v20 = vpop.f32.mrf.mxu0  ;;  %v7451_v1 = vmul.f32 %v578_v60, %v578_v60 }
 0x16d   :  { %v990_v19 = vpop.f32.mrf.mxu1  ;;  %vm1586_vm2 = vcmp.eq.f32.partialorder %v7311_v57, 0.0  ;;  %vm1605_vm3 = vcmp.eq.f32.partialorder %v7357_v7, inf  ;;  %vm1593_vm4 = vcmp.eq.f32.partialorder %v7334_v62, 0.0  ;;  %vm1612_vm5 = vcmp.eq.f32.partialorder %v7381_v12, inf }
 0x16e   :  { %6140 = vrsqrt.f32 %v7429_v21  ;;  %v7449_v29 = vadd.f32 %v1399_v26, %v7211_v33  ;;  %v1400_v31 = vmul.f32 %v990_v19, %v990_v19  ;;  %v592_v34 = vpop.f32.mrf.mxu0  ;;  %v7462_v19 = vmul.f32 %v582_v46, %v582_v46 }
 0x16f   :  { %v994_v24 = vpop.f32.mrf.mxu1  ;;  %v7464_v26 = vmul.f32 %v584_v11, %v584_v11  ;;  %vm1607_vm6 = vcmp.eq.f32.partialorder %v7357_v7, 0.0  ;;  %vm1614_vm7 = vcmp.eq.f32.partialorder %v7381_v12, 0.0  ;;  %vm1626_vm8 = vcmp.eq.f32.partialorder %v7405_v17, inf }
 0x170   :  { %6142 = vrsqrt.f32 %v7449_v29  ;;  %v7458_v43 = vadd.f32 %v1400_v31, %v7219_v35  ;;  %v1402_v61 = vmul.f32 %v994_v24, %v994_v24  ;;  %v594_v37 = vpop.f32.mrf.mxu0  ;;  %v7474_v24 = vmul.f32 %v586_v8, %v586_v8 }
 0x171   :  { %v6131_v60 = vpop.eup %6130  ;;  %v996_v9 = vpop.f32.mrf.mxu1  ;;  %v7488_v5 = vmul.f32 %v592_v34, %v592_v34  ;;  %vm1633_vm9 = vcmp.eq.f32.partialorder %v7429_v21, inf  ;;  %v7501_v8 = vmul.f32 %v594_v37, %v594_v37  ;;  %vm1628_vm10 = vcmp.eq.f32.partialorder %v7405_v17, 0.0 }
 0x172   :  { %6144 = vrsqrt.f32 %v7458_v43  ;;  %v7470_v35 = vadd.f32 %v1402_v61, %v7227_v36  ;;  %v1403_v31 = vmul.f32 %v996_v9, %v996_v9  ;;  %v596_v11 = vpop.f32.mrf.mxu0  ;;  %v1583_v55 = vmul.f32 %v6131_v60, %v7311_v57 }
 0x173   :  { %v6133_v46 = vpop.eup %6132  ;;  %v998_v33 = vpop.f32.mrf.mxu1  ;;  %v7480_v36 = vmul.f32 %v588_v20, %v588_v20  ;;  %v7503_v50 = vmul.f32 %v596_v11, %v596_v11  ;;  %vm1647_vm11 = vcmp.eq.f32.partialorder %v7449_v29, inf  ;;  %vm1635_vm12 = vcmp.eq.f32.partialorder %v7429_v21, 0.0 }
 0x174   :  { %v7483_v9 = vadd.f32 %v1403_v31, %v7235_v39  ;;  %v1405_v61 = vmul.f32 %v998_v33, %v998_v33  ;;  %6146 = vrsqrt.f32 %v7470_v35  ;;  %v598_v60 = vpop.f32.mrf.mxu0  ;;  %v1590_v20 = vmul.f32 %v6133_v46, %v7334_v62 }
 0x175   :  { %v6135_v59 = vpop.eup %6134  ;;  %v1000_v56 = vpop.f32.mrf.mxu1  ;;  %v1585_v31 = vsel %vm1584_vm1, %v7311_v57, %v1583_v55  ;;  %10817 = vst [vmem:[#allocation43_spill] sm:$0xff] %v7503_v50  ;;  %vm1654_vm13 = vcmp.eq.f32.partialorder %v7458_v43, inf  ;;  %vm1649_vm14 = vcmp.eq.f32.partialorder %v7449_v29, 0.0  ;;  %vm1656_vm15 = vcmp.eq.f32.partialorder %v7458_v43, 0.0 }
 0x176   :  { %6148 = vrsqrt.f32 %v7483_v9  ;;  %v7495_v39 = vadd.f32 %v1405_v61, %v7247_v42  ;;  %v1406_v33 = vmul.f32 %v1000_v56, %v1000_v56  ;;  %v602_v46 = vpop.f32.mrf.mxu0  ;;  %v1604_v40 = vmul.f32 %v6135_v59, %v7357_v7 }
 0x177   :  { %v6137_v34 = vpop.eup %6136  ;;  %v1004_v38 = vpop.f32.mrf.mxu1  ;;  %v7508_v42 = vmul.f32 %v598_v60, %v598_v60  ;;  %v1592_v37 = vsel %vm1591_vm0, %v7334_v62, %v1590_v20  ;;  %v10819_v60 = vand.u32 2147483648, %v7311_v57  ;;  %v7528_v20 = vmul.f32 %v602_v46, %v602_v46 }
 0x178   :  { %v7511_v56 = vadd.f32 %v1406_v33, %v7255_v44  ;;  %v1408_v55 = vmul.f32 %v1004_v38, %v1004_v38  ;;  %6150 = vrsqrt.f32 %v7495_v39  ;;  %v604_v59 = vpop.f32.mrf.mxu0  ;;  %v1611_v41 = vmul.f32 %v6137_v34, %v7381_v12 }
 0x179   :  { %10818 = vst [vmem:[#allocation44_spill] sm:$0xff] %v7508_v42  ;;  %v6139_v11 = vpop.eup %6138  ;;  %v1006_v61 = vpop.f32.mrf.mxu1  ;;  %v1588_v44 = vsel %vm1586_vm2, %v10819_v60, %v1585_v31  ;;  %v1606_v38 = vsel %vm1605_vm3, %v7357_v7, %v1604_v40  ;;  %v7535_v31 = vmul.f32 %v604_v59, %v604_v59  ;;  %v10821_v40 = vand.u32 2147483648, %v7334_v62 }
 0x17a   :  { %6152 = vrsqrt.f32 %v7511_v56  ;;  %v7531_v33 = vadd.f32 %v1408_v55, %v7263_v45  ;;  %v1409_v42 = vmul.f32 %v1006_v61, %v1006_v61  ;;  %v606_v34 = vpop.f32.mrf.mxu0  ;;  %v1613_v45 = vsel %vm1612_vm5, %v7381_v12, %v1611_v41 }
 0x17b   :  { %v6141_v57 = vpop.eup %6140  ;;  %10820 = vst [vmem:[#allocation45_spill] sm:$0xff] %v7535_v31  ;;  %v1008_v60 = vpop.f32.mrf.mxu1  ;;  %v1595_v50 = vsel %vm1593_vm4, %v10821_v40, %v1592_v37  ;;  %v1625_v46 = vmul.f32 %v6139_v11, %v7405_v17  ;;  %v10822_v59 = vand.u32 2147483648, %v7357_v7  ;;  %v10823_v11 = vand.u32 2147483648, %v7381_v12 }
 0x17c   :  { %v7546_v55 = vadd.f32 %v1409_v42, %v7271_v47  ;;  %v1411_v61 = vmul.f32 %v1008_v60, %v1008_v60  ;;  %6154 = vrsqrt.f32 %v7531_v33  ;;  %v608_v40 = vpop.f32.mrf.mxu0  ;;  %v1632_v42 = vmul.f32 %v6141_v57, %v7429_v21 }
 0x17d   :  { %v1609_v31 = vsel %vm1607_vm6, %v10822_v59, %v1606_v38  ;;  %v6143_v37 = vpop.eup %6142  ;;  %v1010_v41 = vpop.f32.mrf.mxu1  ;;  %v1616_v47 = vsel %vm1614_vm7, %v10823_v11, %v1613_v45  ;;  %v1627_v7 = vsel %vm1626_vm8, %v7405_v17, %v1625_v46  ;;  %v7564_v38 = vmul.f32 %v606_v34, %v606_v34 }
 0x17e   :  { %6156 = vrsqrt.f32 %v7546_v55  ;;  %v7567_v60 = vadd.f32 %v1411_v61, %v7281_v49  ;;  %v1412_v59 = vmul.f32 %v1010_v41, %v1010_v41  ;;  %vm1675_vm0 = vcmp.eq.f32.partialorder %v7483_v9, inf  ;;  %v612_v11 = vpop.f32.mrf.mxu0 }
 0x17f   :  { %10824 = vst [vmem:[#allocation46_spill] sm:$0xff] %v7564_v38  ;;  %vm1668_vm1 = vcmp.eq.f32.partialorder %v7470_v35, inf  ;;  %v6145_v12 = vpop.eup %6144  ;;  %v2255_v45 = vpack.c.bf16 %v1616_v47, %v1595_v50  ;;  %v1014_v57 = vpop.f32.mrf.mxu1  ;;  %v2254_v62 = vpack.c.bf16 %v1609_v31, %v1588_v44  ;;  %v1634_v46 = vsel %vm1633_vm9, %v7429_v21, %v1632_v42 }
 0x180   :  { %v1646_v34 = vmul.f32 %v6143_v37, %v7449_v29  ;;  %v7575_v38 = vmul.f32 %v608_v40, %v608_v40  ;;  %v7578_v49 = vadd.f32 %v1412_v59, %v7289_v52  ;;  %v1414_v61 = vmul.f32 %v1014_v57, %v1014_v57  ;;  %v614_v31 = vpop.f32.mrf.mxu0 }
 0x181   :  { %v10826_v41 = vand.u32 2147483648, %v7405_v17  ;;  %vm1677_vm2 = vcmp.eq.f32.partialorder %v7483_v9, 0.0  ;;  %6158 = vrsqrt.f32 %v7567_v60  ;;  %2478 = vmatprep.mubr.bf16.mxu0 %v2255_v45  ;;  %v7588_v44 = vmul.f32 %v612_v11, %v612_v11  ;;  %v1016_v37 = vpop.f32.mrf.mxu1  ;;  %v6147_v17 = vpop.eup %6146  ;;  %v6642_v11 = vld [vmem:[#allocation7 + $0xb0] ss:$12 sps:$4 sm:$0xff]  }
 0x182   :  { %10825 = vst [vmem:[#allocation47_spill] sm:$0xff] %v7575_v38  ;;  %v1653_v40 = vmul.f32 %v6145_v12, %v7458_v43  ;;  %v1648_v52 = vsel %vm1647_vm11, %v7449_v29, %v1646_v34  ;;  %vm1670_vm3 = vcmp.eq.f32.partialorder %v7470_v35, 0.0  ;;  %6160 = vrsqrt.f32 %v7578_v49  ;;  %2479 = vmatmul.mubr.bf16.vlgmr.msra.gmra.mxu0 %v2254_v62  ;;  %v616_v57 = vpop.f32.mrf.mxu0 }
 0x183   :  { %v7584_v50 = vsel %vm1628_vm10, %v10826_v41, %v1627_v7  ;;  %10827 = vst [vmem:[#allocation48_spill] sm:$0xff] %v7588_v44  ;;  %v7597_v47 = vadd.f32 %v1414_v61, %v7297_v53  ;;  %v1415_v42 = vmul.f32 %v1016_v37, %v1016_v37  ;;  %v10828_v7 = vand.u32 2147483648, %v7429_v21  ;;  %v6149_v12 = vpop.eup %6148  ;;  %5856 = vmatpush3.bf16.msra.mxu0 %v6642_v11  ;;  %v1018_v34 = vpop.f32.mrf.mxu1 }
 0x184   :  { %v7603_v45 = vmul.f32 %v614_v31, %v614_v31  ;;  %v1655_v41 = vsel %vm1654_vm13, %v7458_v43, %v1653_v40  ;;  %v10830_v53 = vand.u32 2147483648, %v7449_v29  ;;  %vm1696_vm4 = vcmp.eq.f32.partialorder %v7511_v56, inf  ;;  %v6643_v31 = vld [vmem:[#allocation7 + $0x98] ss:$12 sps:$4 sm:$0xff]   ;;  %v618_v40 = vpop.f32.mrf.mxu0 }
 0x185   :  { %v1637_v59 = vsel %vm1635_vm12, %v10828_v7, %v1634_v46  ;;  %6162 = vrsqrt.f32 %v7597_v47  ;;  %v7615_v21 = vadd.f32 %v1415_v42, %v7305_v48  ;;  %v1417_v46 = vmul.f32 %v1018_v34, %v1018_v34  ;;  %5857 = vmatprep.subr.bf16.mxu0 %v6643_v31  ;;  %v1020_v7 = vpop.f32.mrf.mxu1  ;;  %v6151_v42 = vpop.eup %6150 }
 0x186   :  { %10829 = vst [vmem:[#allocation49_spill] sm:$0xff] %v7603_v45  ;;  %v1651_v62 = vsel %vm1649_vm14, %v10830_v53, %v1648_v52  ;;  %vm1698_vm5 = vcmp.eq.f32.partialorder %v7511_v56, 0.0  ;;  %v1699_v61 = vand.u32 2147483648, %v7511_v56  ;;  %v7619_v37 = vmul.f32 %v616_v57, %v616_v57  ;;  %v622_v38 = vpop.f32.mrf.mxu0 }
 0x187   :  { %v10832_v29 = vand.u32 2147483648, %v7458_v43  ;;  %v1674_v11 = vmul.f32 %v6149_v12, %v7483_v9  ;;  %v1667_v48 = vmul.f32 %v6147_v17, %v7470_v35  ;;  %6164 = vrsqrt.f32 %v7615_v21  ;;  %v1024_v43 = vpop.f32.mrf.mxu1  ;;  %5858 = vmatpush3.bf16.msra.mxu0 %v6643_v31 }
 0x188   :  { %10831 = vst [vmem:[#allocation50_spill] sm:$0xff] %v7619_v37  ;;  %v7629_v34 = vadd.f32 %v1417_v46, %v7315_v58  ;;  %v1418_v53 = vmul.f32 %v1020_v7, %v1020_v7  ;;  %v2257_v57 = vpack.c.bf16 %v1651_v62, %v7584_v50  ;;  %v6153_v37 = vpop.eup %6152  ;;  %v7632_v45 = vmul.f32 %v618_v40, %v618_v40  ;;  %v624_v46 = vpop.f32.mrf.mxu0 }
 0x189   :  { %v1658_v52 = vsel %vm1656_vm15, %v10832_v29, %v1655_v41  ;;  %v1676_v12 = vsel %vm1675_vm0, %v7483_v9, %v1674_v11  ;;  %v1669_v17 = vsel %vm1668_vm1, %v7470_v35, %v1667_v48  ;;  %v1420_v50 = vmul.f32 %v1024_v43, %v1024_v43  ;;  %v1026_v40 = vpop.f32.mrf.mxu1 }
 0x18a   :  { %v2258_v44 = vpack.c.bf16 %v1658_v52, %v1637_v59  ;;  %6166 = vrsqrt.f32 %v7629_v34  ;;  %v7642_v58 = vadd.f32 %v1418_v53, %v7323_v54  ;;  %v1671_v41 = vand.u32 2147483648, %v7470_v35  ;;  %v6644_v59 = vld [vmem:[#allocation7 + $0x80] ss:$12 sps:$4 sm:$0xff]   ;;  %v7653_v52 = vpop.eup %6154 }
 0x18b   :  { %5859 = vmatprep.subr.bf16.mxu0 %v6644_v59  ;;  %v7645_v62 = vmul.f32 %v622_v38, %v622_v38  ;;  %v10833_v7 = vand.u32 2147483648, %v7483_v9  ;;  %v1695_v29 = vmul.f32 %v6153_v37, %v7511_v56  ;;  %v1688_v54 = vmul.f32 %v6151_v42, %v7495_v39  ;;  %v6157_v48 = vpop.eup %6156  ;;  %v626_v9 = vpop.f32.mrf.mxu0 }
 0x18c   :  { %2486 = vmatprep.mubr.bf16.mxu0 %v2258_v44  ;;  %6168 = vrsqrt.f32 %v7642_v58  ;;  %v7657_v11 = vadd.f32 %v1420_v50, %v7331_v51  ;;  %v1421_v38 = vmul.f32 %v1026_v40, %v1026_v40  ;;  %v1672_v44 = vsel %vm1670_vm3, %v1671_v41, %v1669_v17  ;;  %v1028_v43 = vpop.f32.mrf.mxu1  ;;  %5860 = vmatpush3.bf16.msra.mxu0 %v6644_v59 }
 0x18d   :  { %v1679_v31 = vsel %vm1677_vm2, %v10833_v7, %v1676_v12  ;;  %2487 = vmatmul.mubr.bf16.gmra.mxu0 %v2257_v57  ;;  %v7661_v53 = vmul.f32 %v624_v46, %v624_v46  ;;  %v1697_v37 = vsel %vm1696_vm4, %v7511_v56, %v1695_v29  ;;  %vm1689_vm6 = vcmp.eq.f32.partialorder %v7495_v39, inf  ;;  %v6645_v57 = vld [vmem:[#allocation7 + $0x68] ss:$12 sps:$4 sm:$0xff]   ;;  %v628_v17 = vpop.f32.mrf.mxu0 }
 0x18e   :  { %vm1691_vm7 = vcmp.eq.f32.partialorder %v7495_v39, 0.0  ;;  %6170 = vrsqrt.f32 %v7657_v11  ;;  %v7670_v51 = vadd.f32 %v1421_v38, %v7342_v4  ;;  %v1423_v35 = vmul.f32 %v1028_v43, %v1028_v43  ;;  %5861 = vmatprep.subr.bf16.mxu0 %v6645_v57  ;;  %v1030_v50 = vpop.f32.mrf.mxu1  ;;  %v7679_v40 = vpop.eup %6158 }
 0x18f   :  { %10834 = vst [vmem:[#allocation51_spill] sm:$0xff] %v7661_v53  ;;  %v1692_v42 = vand.u32 2147483648, %v7495_v39  ;;  %v7673_v12 = vmul.f32 %v626_v9, %v626_v9  ;;  %v1700_v41 = vsel %vm1698_vm5, %v1699_v61, %v1697_v37  ;;  %v1690_v46 = vsel %vm1689_vm6, %v7495_v39, %v1688_v54  ;;  %v6161_v29 = vpop.eup %6160  ;;  %v632_v56 = vpop.f32.mrf.mxu0  ;;  %v6646_v37 = vld [vmem:[#allocation7 + $0x50] ss:$12 sps:$4 sm:$0xff]  }
 0x190   :  { %v1716_v59 = vmul.f32 %v6157_v48, %v7546_v55  ;;  %6172 = vrsqrt.f32 %v7670_v51  ;;  %v7683_v4 = vadd.f32 %v1423_v35, %v7350_v6  ;;  %v1424_v7 = vmul.f32 %v1030_v50, %v1030_v50  ;;  %v1034_v61 = vpop.f32.mrf.mxu1  ;;  %5862 = vmatpush3.bf16.msra.mxu0 %v6645_v57 }
 0x191   :  { %10835 = vst [vmem:[#allocation52_spill] sm:$0xff] %v7673_v12  ;;  %vm1717_vm8 = vcmp.eq.f32.partialorder %v7546_v55, inf  ;;  %v7686_v38 = vmul.f32 %v628_v17, %v628_v17  ;;  %v2261_v9 = vpack.c.bf16 %v1700_v41, %v1679_v31  ;;  %v1693_v54 = vsel %vm1691_vm7, %v1692_v42, %v1690_v46  ;;  %5863 = vmatprep.subr.bf16.mxu0 %v6646_v37  ;;  %v634_v42 = vpop.f32.mrf.mxu0 }
 0x192   :  { %v1718_v48 = vsel %vm1717_vm8, %v7546_v55, %v1716_v59  ;;  %6174 = vrsqrt.f32 %v7683_v4  ;;  %v7693_v6 = vadd.f32 %v1424_v7, %v7361_v23  ;;  %v1426_v43 = vmul.f32 %v1034_v61, %v1034_v61  ;;  %v7696_v35 = vpop.eup %6162  ;;  %v1036_v17 = vpop.f32.mrf.mxu1 }
 0x193   :  { %10836 = vst [vmem:[#allocation53_spill] sm:$0xff] %v7686_v38  ;;  %vm1719_vm9 = vcmp.eq.f32.partialorder %v7546_v55, 0.0  ;;  %2494 = vmatprep.mubr.bf16.mxu0 %v2261_v9  ;;  %v7698_v31 = vmul.f32 %v632_v56, %v632_v56  ;;  %v2260_v39 = vpack.c.bf16 %v1693_v54, %v1672_v44  ;;  %v1720_v57 = vand.u32 2147483648, %v7546_v55  ;;  %v636_v7 = vpop.f32.mrf.mxu0 }
 0x194   :  { %v1737_v50 = vmul.f32 %v6161_v29, %v7578_v49  ;;  %6176 = vrsqrt.f32 %v7693_v6  ;;  %v7704_v23 = vadd.f32 %v1426_v43, %v7369_v10  ;;  %v1427_v41 = vmul.f32 %v1036_v17, %v1036_v17  ;;  %v6165_v46 = vpop.eup %6164  ;;  %v1038_v44 = vpop.f32.mrf.mxu1  ;;  %5864 = vmatpush3.bf16.msra.mxu0 %v6646_v37  ;;  %v6647_v17 = vld [vmem:[#allocation7 + $0x38] ss:$12 sps:$4 sm:$0xff]  }
 0x195   :  { %10837 = vst [vmem:[#allocation54_spill] sm:$0xff] %v7698_v31  ;;  %vm1738_vm10 = vcmp.eq.f32.partialorder %v7578_v49, inf  ;;  %2495 = vmatmul.mubr.bf16.gmra.mxu0 %v2260_v39  ;;  %v7707_v59 = vmul.f32 %v634_v42, %v634_v42  ;;  %v1721_v9 = vsel %vm1719_vm9, %v1720_v57, %v1718_v48  ;;  %v1741_v29 = vand.u32 2147483648, %v7578_v49  ;;  %v638_v39 = vpop.f32.mrf.mxu0  ;;  %5865 = vmatprep.subr.bf16.mxu0 %v6647_v17 }
 0x196   :  { %v1739_v56 = vsel %vm1738_vm10, %v7578_v49, %v1737_v50  ;;  %6178 = vrsqrt.f32 %v7704_v23  ;;  %v7715_v10 = vadd.f32 %v1427_v41, %v7377_v63  ;;  %v1429_v61 = vmul.f32 %v1038_v44, %v1038_v44  ;;  %v1040_v55 = vpop.f32.mrf.mxu1 }
 0x197   :  { %10838 = vst [vmem:[#allocation55_spill] sm:$0xff] %v7707_v59  ;;  %vm1740_vm11 = vcmp.eq.f32.partialorder %v7578_v49, 0.0  ;;  %v7718_v54 = vpop.eup %6166  ;;  %v7720_v43 = vmul.f32 %v636_v7, %v636_v7  ;;  %v1709_v42 = vmul.f32 %v7653_v52, %v7531_v33  ;;  %vm1710_vm12 = vcmp.eq.f32.partialorder %v7531_v33, inf  ;;  %v642_v50 = vpop.f32.mrf.mxu0 }
 0x198   :  { %v1742_v48 = vsel %vm1740_vm11, %v1741_v29, %v1739_v56  ;;  %6180 = vrsqrt.f32 %v7715_v10  ;;  %v7727_v63 = vadd.f32 %v1429_v61, %v7389_v15  ;;  %v1430_v49 = vmul.f32 %v1040_v55, %v1040_v55  ;;  %v1044_v41 = vpop.f32.mrf.mxu1  ;;  %5866 = vmatpush3.bf16.msra.mxu0 %v6647_v17 }
 0x199   :  { %10839 = vst [vmem:[#allocation56_spill] sm:$0xff] %v7720_v43  ;;  %vm1712_vm13 = vcmp.eq.f32.partialorder %v7531_v33, 0.0  ;;  %v6169_v37 = vpop.eup %6168  ;;  %v2264_v57 = vpack.c.bf16 %v1742_v48, %v1721_v9  ;;  %v1711_v7 = vsel %vm1710_vm12, %v7531_v33, %v1709_v42  ;;  %v1713_v52 = vand.u32 2147483648, %v7531_v33  ;;  %v644_v48 = vpop.f32.mrf.mxu0  ;;  %v6648_v42 = vld [vmem:[#allocation7 + $0x20] ss:$12 sps:$4 sm:$0xff]  }
 0x19a   :  { %v1730_v44 = vmul.f32 %v7679_v40, %v7567_v60  ;;  %6182 = vrsqrt.f32 %v7727_v63  ;;  %v7735_v56 = vmul.f32 %v638_v39, %v638_v39  ;;  %v7738_v15 = vadd.f32 %v1430_v49, %v7397_v16  ;;  %v1046_v39 = vpop.f32.mrf.mxu1  ;;  %5867 = vmatprep.subr.bf16.mxu0 %v6648_v42 }
 0x19b   :  { %v1432_v29 = vmul.f32 %v1044_v41, %v1044_v41  ;;  %v7740_v61 = vpop.eup %6170  ;;  %2502 = vmatprep.mubr.bf16.mxu0 %v2264_v57  ;;  %v7742_v9 = vmul.f32 %v642_v50, %v642_v50  ;;  %v1714_v55 = vsel %vm1712_vm13, %v1713_v52, %v1711_v7  ;;  %vm1731_vm14 = vcmp.eq.f32.partialorder %v7567_v60, inf  ;;  %v646_v41 = vpop.f32.mrf.mxu0 }
 0x19c   :  { %10840 = vst [vmem:[#allocation57_spill] sm:$0xff] %v7735_v56  ;;  %v1734_v40 = vand.u32 2147483648, %v7567_v60  ;;  %6184 = vrsqrt.f32 %v7738_v15  ;;  %v1732_v17 = vsel %vm1731_vm14, %v7567_v60, %v1730_v44  ;;  %vm1733_vm15 = vcmp.eq.f32.partialorder %v7567_v60, 0.0  ;;  %v1048_v7 = vpop.f32.mrf.mxu1  ;;  %5868 = vmatpush3.bf16.msra.mxu0 %v6648_v42 }
 0x19d   :  { %10841 = vst [vmem:[#allocation58_spill] sm:$0xff] %v7742_v9  ;;  %v7750_v16 = vadd.f32 %v1432_v29, %v7409_v18  ;;  %v7754_v49 = vpop.eup %6172  ;;  %v7756_v57 = vmul.f32 %v644_v48, %v644_v48  ;;  %v1433_v50 = vmul.f32 %v1046_v39, %v1046_v39  ;;  %v1758_v52 = vmul.f32 %v6165_v46, %v7615_v21  ;;  %v7768_v29 = vpop.f32.mrf.mxu0  ;;  %v6649_v39 = vld [vmem:[#allocation7 + $0x8] ss:$12 sps:$4 sm:$0xff]  }
 0x19e   :  { %v1735_v33 = vsel %vm1733_vm15, %v1734_v40, %v1732_v17  ;;  %v1435_v56 = vmul.f32 %v1048_v7, %v1048_v7  ;;  %vm1759_vm0 = vcmp.eq.f32.partialorder %v7615_v21, inf  ;;  %v7766_v44 = vmul.f32 %v646_v41, %v646_v41  ;;  %v1050_v40 = vpop.f32.mrf.mxu1  ;;  %5869 = vmatprep.subr.bf16.mxu0 %v6649_v39 }
 0x19f   :  { %10842 = vst [vmem:[#allocation59_spill] sm:$0xff] %v7756_v57  ;;  %6186 = vrsqrt.f32 %v7750_v16  ;;  %v2263_v9 = vpack.c.bf16 %v1735_v33, %v1714_v55  ;;  %v7761_v18 = vpop.eup %6174  ;;  %v7764_v60 = vadd.f32 %v1433_v50, %v7417_v2  ;;  %v1760_v48 = vsel %vm1759_vm0, %v7615_v21, %v1758_v52  ;;  %v5777_v41 = vpop.f32.mrf.mxu0 }
 0x1a0   :  { %10843 = vst [vmem:[#allocation60_spill] sm:$0xff] %v7766_v44  ;;  %v1762_v46 = vand.u32 2147483648, %v7615_v21  ;;  %v7773_v55 = vadd.f32 %v1435_v56, %v7425_v13  ;;  %v1436_v42 = vmul.f32 %v1050_v40, %v1050_v40  ;;  %vm1761_vm1 = vcmp.eq.f32.partialorder %v7615_v21, 0.0  ;;  %v1054_v50 = vpop.f32.mrf.mxu1  ;;  %5870 = vmatpush3.bf16.msra.mxu0 %v6649_v39 }
 0x1a1   :  { %2503 = vmatmul.mubr.bf16.gmra.mxu0 %v2263_v9  ;;  %v1779_v2 = vmul.f32 %v6169_v37, %v7642_v58  ;;  %v7777_v17 = vpop.eup %6176  ;;  %6188 = vrsqrt.f32 %v7764_v60  ;;  %vm1780_vm2 = vcmp.eq.f32.partialorder %v7642_v58, inf  ;;  %vm1782_vm3 = vcmp.eq.f32.partialorder %v7642_v58, 0.0 }
 0x1a2   :  { %v1763_v33 = vsel %vm1761_vm1, %v1762_v46, %v1760_v48  ;;  %6190 = vrsqrt.f32 %v7773_v55  ;;  %v7784_v13 = vadd.f32 %v1436_v42, %v7437_v3  ;;  %v1783_v37 = vand.u32 2147483648, %v7642_v58  ;;  %v1056_v40 = vpop.f32.mrf.mxu1  ;;  %v1167_v48 = vpop.f32.mrf.mxu0  ;;  %v6650_v46 = vld [vmem:[#allocation8 + $0xac] ss:$12 sps:$4 sm:$0xff]  }
 0x1a3   :  { %v1781_v21 = vsel %vm1780_vm2, %v7642_v58, %v1779_v2  ;;  %v7788_v56 = vpop.eup %6178  ;;  %v1438_v9 = vmul.f32 %v1054_v50, %v1054_v50  ;;  %v1398_v7 = vmul.f32 %v5777_v41, %v5777_v41  ;;  %v1751_v52 = vmul.f32 %v7696_v35, %v7597_v47  ;;  %3346 = vmatprep.subr.bf16.mxu0 %v6650_v46  ;;  %v10844_v50 = vld [vmem:[#allocation17_spill] sm:$0xff] }
 0x1a4   :  { %vm1752_vm4 = vcmp.eq.f32.partialorder %v7597_v47, inf  ;;  %6192 = vrsqrt.f32 %v7784_v13  ;;  %v1784_v3 = vsel %vm1782_vm3, %v1783_v37, %v1781_v21  ;;  %vm1754_vm5 = vcmp.eq.f32.partialorder %v7597_v47, 0.0  ;;  %v1058_v44 = vpop.f32.mrf.mxu1  ;;  %v5778_v57 = vpop.f32.mrf.mxu0 }
 0x1a5   :  { %v1755_v39 = vand.u32 2147483648, %v7597_v47  ;;  %v7798_v42 = vpop.eup %6180  ;;  %v2267_v2 = vpack.c.bf16 %v1784_v3, %v1763_v33  ;;  %v7801_v35 = vadd.f32 %v1438_v9, %v7441_v22  ;;  %v7804_v41 = vadd.f32 %v1398_v7, %v10844_v50 }
 0x1a6   :  { %v1753_v46 = vsel %vm1752_vm4, %v7597_v47, %v1751_v52  ;;  %v1772_v58 = vmul.f32 %v7718_v54, %v7629_v34  ;;  %vm1773_vm6 = vcmp.eq.f32.partialorder %v7629_v34, inf  ;;  %vm1775_vm7 = vcmp.eq.f32.partialorder %v7629_v34, 0.0  ;;  %v1060_v47 = vpop.f32.mrf.mxu1  ;;  %v1170_v9 = vpop.f32.mrf.mxu0 }
 0x1a7   :  { %v1756_v43 = vsel %vm1754_vm5, %v1755_v39, %v1753_v46  ;;  %v7811_v21 = vpop.eup %6182  ;;  %2510 = vmatprep.mubr.bf16.mxu0 %v2267_v2  ;;  %6194 = vrsqrt.f32 %v7801_v35  ;;  %v1776_v22 = vand.u32 2147483648, %v7629_v34  ;;  %v1439_v33 = vmul.f32 %v1056_v40, %v1056_v40 }
 0x1a8   :  { %v1392_v37 = vmul.f32 %v1167_v48, %v1167_v48  ;;  %6196 = vrsqrt.f32 %v7804_v41  ;;  %v1774_v7 = vsel %vm1773_vm6, %v7629_v34, %v1772_v58  ;;  %v1441_v54 = vmul.f32 %v1058_v44, %v1058_v44  ;;  %v1064_v40 = vpop.f32.mrf.mxu1  ;;  %v5781_v48 = vpop.f32.mrf.mxu0 }
 0x1a9   :  { %v1401_v52 = vmul.f32 %v5778_v57, %v5778_v57  ;;  %v7817_v3 = vpop.eup %6184  ;;  %v1777_v39 = vsel %vm1775_vm7, %v1776_v22, %v1774_v7  ;;  %v7820_v50 = vadd.f32 %v1439_v33, %v7443_v30  ;;  %v1442_v46 = vmul.f32 %v1060_v47, %v1060_v47 }
 0x1aa   :  { %v7823_v2 = vadd.f32 %v1392_v37, %v7173_v0  ;;  %v2266_v59 = vpack.c.bf16 %v1777_v39, %v1756_v43  ;;  %v7826_v31 = vadd.f32 %v1441_v54, %v7445_v14  ;;  %v1395_v57 = vmul.f32 %v1170_v9, %v1170_v9  ;;  %v1066_v43 = vpop.f32.mrf.mxu1  ;;  %v1183_v58 = vpop.f32.mrf.mxu0 }
 0x1ab   :  { %v7829_v34 = vadd.f32 %v1401_v52, %v7179_v25  ;;  %6198 = vrsqrt.f32 %v7820_v50  ;;  %v7835_v30 = vadd.f32 %v1442_v46, %v7451_v1  ;;  %v1800_v0 = vmul.f32 %v7754_v49, %v7670_v51 }
 0x1ac   :  { %v7831_v44 = vpop.eup %6186  ;;  %vm1801_vm8 = vcmp.eq.f32.partialorder %v7670_v51, inf  ;;  %2511 = vmatmul.mubr.bf16.gmra.mxu0 %v2266_v59  ;;  %6200 = vrsqrt.f32 %v7823_v2  ;;  %v7842_v25 = vadd.f32 %v1395_v57, %v7187_v27  ;;  %vm1803_vm9 = vcmp.eq.f32.partialorder %v7670_v51, 0.0  ;;  %v1068_v22 = vpop.f32.mrf.mxu1 }
 0x1ad   :  { %v1804_v14 = vand.u32 2147483648, %v7670_v51  ;;  %6202 = vrsqrt.f32 %v7826_v31  ;;  %v1802_v1 = vsel %vm1801_vm8, %v7670_v51, %v1800_v0  ;;  %v1821_v49 = vmul.f32 %v7777_v17, %v7693_v6  ;;  %v5782_v59 = vpop.f32.mrf.mxu0 }
 0x1ae   :  { %vm1822_vm10 = vcmp.eq.f32.partialorder %v7693_v6, inf  ;;  %v7851_v33 = vpop.eup %6188  ;;  %6204 = vrsqrt.f32 %v7829_v34  ;;  %vm1824_vm11 = vcmp.eq.f32.partialorder %v7693_v6, 0.0  ;;  %v1825_v37 = vand.u32 2147483648, %v7693_v6  ;;  %v1070_v7 = vpop.f32.mrf.mxu1 }
 0x1af   :  { %v1805_v27 = vsel %vm1803_vm9, %v1804_v14, %v1802_v1  ;;  %v7856_v47 = vpop.eup %6190  ;;  %6206 = vrsqrt.f32 %v7835_v30  ;;  %v1823_v51 = vsel %vm1822_vm10, %v7693_v6, %v1821_v49  ;;  %v1444_v17 = vmul.f32 %v1064_v40, %v1064_v40  ;;  %v1186_v54 = vpop.f32.mrf.mxu0  ;;  %v10845_v14 = vld [vmem:[#allocation18_spill] sm:$0xff] }
 0x1b0   :  { %v1410_v9 = vmul.f32 %v5781_v48, %v5781_v48  ;;  %6208 = vrsqrt.f32 %v7842_v25  ;;  %v1826_v52 = vsel %vm1824_vm11, %v1825_v37, %v1823_v51  ;;  %v1793_v39 = vmul.f32 %v7740_v61, %v7657_v11  ;;  %v1074_v40 = vpop.f32.mrf.mxu1 }
 0x1b1   :  { %vm1794_vm12 = vcmp.eq.f32.partialorder %v7657_v11, inf  ;;  %v7864_v46 = vpop.eup %6192  ;;  %v2270_v57 = vpack.c.bf16 %v1826_v52, %v1805_v27  ;;  %v7867_v0 = vadd.f32 %v1444_v17, %v7462_v19  ;;  %vm1796_vm13 = vcmp.eq.f32.partialorder %v7657_v11, 0.0  ;;  %v5785_v48 = vpop.f32.mrf.mxu0 }
 0x1b2   :  { %v7870_v6 = vadd.f32 %v1410_v9, %v10845_v14  ;;  %v1795_v1 = vsel %vm1794_vm12, %v7657_v11, %v1793_v39  ;;  %v1797_v49 = vand.u32 2147483648, %v7657_v11  ;;  %v1814_v61 = vmul.f32 %v7761_v18, %v7683_v4  ;;  %v7885_v9 = vpop.f32.mrf.mxu1 }
 0x1b3   :  { %vm1815_vm14 = vcmp.eq.f32.partialorder %v7683_v4, inf  ;;  %2518 = vmatprep.mubr.bf16.mxu0 %v2270_v57  ;;  %6210 = vrsqrt.f32 %v7867_v0  ;;  %vm1817_vm15 = vcmp.eq.f32.partialorder %v7683_v4, 0.0  ;;  %v1818_v19 = vand.u32 2147483648, %v7683_v4  ;;  %v7887_v18 = vpop.f32.mrf.mxu0 }
 0x1b4   :  { %v1445_v27 = vmul.f32 %v1066_v43, %v1066_v43  ;;  %v7881_v37 = vpop.eup %6194  ;;  %6212 = vrsqrt.f32 %v7870_v6  ;;  %v1798_v51 = vsel %vm1796_vm13, %v1797_v49, %v1795_v1  ;;  %v1816_v11 = vsel %vm1815_vm14, %v7683_v4, %v1814_v61 }
 0x1b5   :  { %v1404_v17 = vmul.f32 %v1183_v58, %v1183_v58  ;;  %v7889_v52 = vpop.eup %6196  ;;  %v1819_v39 = vsel %vm1817_vm15, %v1818_v19, %v1816_v11  ;;  %v1447_v14 = vmul.f32 %v1068_v22, %v1068_v22  ;;  %v1413_v43 = vmul.f32 %v5782_v59, %v5782_v59  ;;  %v10846_v58 = vld [vmem:[#allocation19_spill] sm:$0xff]  ;;  %v5786_v59 = vpop.f32.mrf.mxu0 }
 0x1b6   :  { %v7892_v57 = vadd.f32 %v1445_v27, %v7464_v26  ;;  %v2269_v38 = vpack.c.bf16 %v1819_v39, %v1798_v51  ;;  %v1448_v1 = vmul.f32 %v1070_v7, %v1070_v7  ;;  %v1407_v49 = vmul.f32 %v1186_v54, %v1186_v54 }
 0x1b7   :  { %v7895_v12 = vadd.f32 %v1404_v17, %v7207_v32  ;;  %v7899_v4 = vadd.f32 %v1447_v14, %v7474_v24  ;;  %v7902_v61 = vadd.f32 %v1413_v43, %v10846_v58  ;;  %v1842_v26 = vmul.f32 %v7798_v42, %v7715_v10  ;;  %v1078_v24 = vpop.f32.mrf.mxu1  ;;  %v1202_v43 = vpop.f32.mrf.mxu0 }
 0x1b8   :  { %6214 = vrsqrt.f32 %v7892_v57  ;;  %v7906_v19 = vpop.eup %6198  ;;  %2519 = vmatmul.mubr.bf16.gmra.mxu0 %v2269_v38  ;;  %v7910_v32 = vadd.f32 %v1448_v1, %v7480_v36  ;;  %v7913_v22 = vadd.f32 %v1407_v49, %v7223_v28  ;;  %vm1843_vm0 = vcmp.eq.f32.partialorder %v7715_v10, inf }
 0x1b9   :  { %10847 = vst [vmem:[#allocation17_spill] sm:$0xff] %v7902_v61  ;;  %6216 = vrsqrt.f32 %v7895_v12  ;;  %v7916_v7 = vpop.eup %6200  ;;  %v1844_v42 = vsel %vm1843_vm0, %v7715_v10, %v1842_v26  ;;  %vm1845_vm1 = vcmp.eq.f32.partialorder %v7715_v10, 0.0  ;;  %v1846_v38 = vand.u32 2147483648, %v7715_v10  ;;  %v1080_v14 = vpop.f32.mrf.mxu1  ;;  %v10849_v26 = vld [vmem:[#allocation20_spill] sm:$0xff] }
 0x1ba   :  { %6218 = vrsqrt.f32 %v7899_v4  ;;  %v7922_v54 = vpop.eup %6202  ;;  %v1863_v28 = vmul.f32 %v7817_v3, %v7738_v15  ;;  %vm1864_vm2 = vcmp.eq.f32.partialorder %v7738_v15, inf  ;;  %vm1866_vm3 = vcmp.eq.f32.partialorder %v7738_v15, 0.0 }
 0x1bb   :  { %6220 = vrsqrt.f32 %v7902_v61  ;;  %v7929_v36 = vpop.eup %6204  ;;  %v1847_v27 = vsel %vm1845_vm1, %v1846_v38, %v1844_v42  ;;  %v1867_v51 = vand.u32 2147483648, %v7738_v15  ;;  %v1450_v11 = vmul.f32 %v1074_v40, %v1074_v40  ;;  %v10854_v61 = vld [vmem:[#allocation23_spill] sm:$0xff] }
 0x1bc   :  { %6222 = vrsqrt.f32 %v7910_v32  ;;  %v7933_v10 = vpop.eup %6206  ;;  %v1865_v17 = vsel %vm1864_vm2, %v7738_v15, %v1863_v28  ;;  %v1422_v39 = vmul.f32 %v5785_v48, %v5785_v48  ;;  %v1835_v3 = vmul.f32 %v7788_v56, %v7704_v23 }
 0x1bd   :  { %6224 = vrsqrt.f32 %v7913_v22  ;;  %v7939_v1 = vpop.eup %6208  ;;  %v1868_v49 = vsel %vm1866_vm3, %v1867_v51, %v1865_v17  ;;  %v7942_v58 = vadd.f32 %v1450_v11, %v7488_v5  ;;  %vm1836_vm4 = vcmp.eq.f32.partialorder %v7704_v23, inf  ;;  %v5789_v51 = vpop.f32.mrf.mxu0 }
 0x1be   :  { %vm1838_vm5 = vcmp.eq.f32.partialorder %v7704_v23, 0.0  ;;  %v2273_v40 = vpack.c.bf16 %v1868_v49, %v1847_v27  ;;  %v7947_v42 = vadd.f32 %v1422_v39, %v10849_v26  ;;  %v1837_v15 = vsel %vm1836_vm4, %v7704_v23, %v1835_v3  ;;  %v1084_v27 = vpop.f32.mrf.mxu1 }
 0x1bf   :  { %10848 = vst [vmem:[#allocation18_spill] sm:$0xff] %v7942_v58  ;;  %v1839_v56 = vand.u32 2147483648, %v7704_v23  ;;  %6226 = vrsqrt.f32 %v7942_v58  ;;  %v1856_v48 = vmul.f32 %v7811_v21, %v7727_v63  ;;  %vm1857_vm6 = vcmp.eq.f32.partialorder %v7727_v63, inf  ;;  %v10852_v58 = vld [vmem:[#allocation43_spill] sm:$0xff] }
 0x1c0   :  { %10850 = vst [vmem:[#allocation19_spill] sm:$0xff] %v7947_v42  ;;  %vm1859_vm7 = vcmp.eq.f32.partialorder %v7727_v63, 0.0  ;;  %v7956_v5 = vpop.eup %6210  ;;  %2526 = vmatprep.mubr.bf16.mxu0 %v2273_v40  ;;  %6228 = vrsqrt.f32 %v7947_v42  ;;  %v1860_v28 = vand.u32 2147483648, %v7727_v63  ;;  %v1451_v23 = vmul.f32 %v7885_v9, %v7885_v9  ;;  %v10851_v42 = vld [vmem:[#allocation22_spill] sm:$0xff] }
 0x1c1   :  { %v1840_v38 = vsel %vm1838_vm5, %v1839_v56, %v1837_v15  ;;  %v7962_v11 = vpop.eup %6212  ;;  %v1858_v21 = vsel %vm1857_vm6, %v7727_v63, %v1856_v48  ;;  %v1416_v17 = vmul.f32 %v7887_v18, %v7887_v18  ;;  %v1453_v39 = vmul.f32 %v1078_v24, %v1078_v24  ;;  %v10856_v18 = vld [vmem:[#allocation44_spill] sm:$0xff] }
 0x1c2   :  { %v1425_v3 = vmul.f32 %v5786_v59, %v5786_v59  ;;  %v1861_v49 = vsel %vm1859_vm7, %v1860_v28, %v1858_v21  ;;  %v7968_v40 = vadd.f32 %v1451_v23, %v7501_v8  ;;  %v1454_v26 = vmul.f32 %v1080_v14, %v1080_v14  ;;  %v10857_v8 = vld [vmem:[#allocation24_spill] sm:$0xff] }
 0x1c3   :  { %v1419_v15 = vmul.f32 %v1202_v43, %v1202_v43  ;;  %v2272_v56 = vpack.c.bf16 %v1861_v49, %v1840_v38  ;;  %v7971_v9 = vadd.f32 %v1416_v17, %v10851_v42  ;;  %v7974_v53 = vadd.f32 %v1453_v39, %v10852_v58  ;;  %v1086_v43 = vpop.f32.mrf.mxu1  ;;  %v1215_v42 = vpop.f32.mrf.mxu0 }
 0x1c4   :  { %v7977_v63 = vadd.f32 %v1425_v3, %v10854_v61  ;;  %6230 = vrsqrt.f32 %v7968_v40  ;;  %v7983_v24 = vadd.f32 %v1454_v26, %v10856_v18  ;;  %v1884_v14 = vmul.f32 %v7851_v33, %v7764_v60 }
 0x1c5   :  { %10853 = vst [vmem:[#allocation20_spill] sm:$0xff] %v7974_v53  ;;  %v7979_v48 = vpop.eup %6214  ;;  %v7986_v59 = vadd.f32 %v1419_v15, %v10857_v8  ;;  %2527 = vmatmul.mubr.bf16.gmra.mxu0 %v2272_v56  ;;  %6232 = vrsqrt.f32 %v7971_v9  ;;  %vm1885_vm8 = vcmp.eq.f32.partialorder %v7764_v60, inf  ;;  %vm1887_vm9 = vcmp.eq.f32.partialorder %v7764_v60, 0.0  ;;  %v5790_v26 = vpop.f32.mrf.mxu0 }
 0x1c6   :  { %10855 = vst [vmem:[#allocation22_spill] sm:$0xff] %v7977_v63  ;;  %v7990_v58 = vpop.eup %6216  ;;  %v1888_v61 = vand.u32 2147483648, %v7764_v60  ;;  %6234 = vrsqrt.f32 %v7974_v53  ;;  %v1886_v28 = vsel %vm1885_vm8, %v7764_v60, %v1884_v14  ;;  %v1905_v33 = vmul.f32 %v7864_v46, %v7784_v13  ;;  %v1088_v46 = vpop.f32.mrf.mxu1 }
 0x1c7   :  { %v7996_v38 = vpop.eup %6218  ;;  %vm1906_vm10 = vcmp.eq.f32.partialorder %v7784_v13, inf  ;;  %6236 = vrsqrt.f32 %v7977_v63  ;;  %vm1908_vm11 = vcmp.eq.f32.partialorder %v7784_v13, 0.0  ;;  %v1909_v17 = vand.u32 2147483648, %v7784_v13  ;;  %v10864_v63 = vld [vmem:[#allocation26_spill] sm:$0xff] }
 0x1c8   :  { %v8003_v23 = vpop.eup %6220  ;;  %v1889_v21 = vsel %vm1887_vm9, %v1888_v61, %v1886_v28  ;;  %6238 = vrsqrt.f32 %v7983_v24  ;;  %v1907_v60 = vsel %vm1906_vm10, %v7784_v13, %v1905_v33  ;;  %v1456_v3 = vmul.f32 %v1084_v27, %v1084_v27  ;;  %v10859_v61 = vld [vmem:[#allocation25_spill] sm:$0xff] }
 0x1c9   :  { %v8008_v39 = vpop.eup %6222  ;;  %v1434_v49 = vmul.f32 %v5789_v51, %v5789_v51  ;;  %6240 = vrsqrt.f32 %v7986_v59  ;;  %v1910_v56 = vsel %vm1908_vm11, %v1909_v17, %v1907_v60  ;;  %v1877_v18 = vmul.f32 %v7831_v44, %v7750_v16  ;;  %v1218_v17 = vpop.f32.mrf.mxu0 }
 0x1ca   :  { %v8012_v15 = vpop.eup %6224  ;;  %vm1878_vm12 = vcmp.eq.f32.partialorder %v7750_v16, inf  ;;  %v2276_v8 = vpack.c.bf16 %v1910_v56, %v1889_v21  ;;  %v8019_v14 = vadd.f32 %v1456_v3, %v7528_v20  ;;  %vm1880_vm13 = vcmp.eq.f32.partialorder %v7750_v16, 0.0  ;;  %v1090_v21 = vpop.f32.mrf.mxu1  ;;  %v10863_v56 = vld [vmem:[#allocation45_spill] sm:$0xff] }
 0x1cb   :  { %v8022_v13 = vadd.f32 %v1434_v49, %v10859_v61  ;;  %v1879_v27 = vsel %vm1878_vm12, %v7750_v16, %v1877_v18  ;;  %v1881_v51 = vand.u32 2147483648, %v7750_v16  ;;  %v1898_v28 = vmul.f32 %v7856_v47, %v7773_v55 }
 0x1cc   :  { %10858 = vst [vmem:[#allocation43_spill] sm:$0xff] %v8019_v14  ;;  %vm1899_vm14 = vcmp.eq.f32.partialorder %v7773_v55, inf  ;;  %v8030_v44 = vpop.eup %6226  ;;  %2534 = vmatprep.mubr.bf16.mxu0 %v2276_v8  ;;  %6242 = vrsqrt.f32 %v8019_v14  ;;  %vm1901_vm15 = vcmp.eq.f32.partialorder %v7773_v55, 0.0  ;;  %v1902_v20 = vand.u32 2147483648, %v7773_v55 }
 0x1cd   :  { %10860 = vst [vmem:[#allocation23_spill] sm:$0xff] %v8022_v13  ;;  %10861 = vst [vmem:[#allocation44_spill] sm:$0xff] %v8030_v44  ;;  %v1457_v33 = vmul.f32 %v1086_v43, %v1086_v43  ;;  %v8035_v60 = vpop.eup %6228  ;;  %6244 = vrsqrt.f32 %v8022_v13  ;;  %v1882_v16 = vsel %vm1880_vm13, %v1881_v51, %v1879_v27  ;;  %v1900_v47 = vsel %vm1899_vm14, %v7773_v55, %v1898_v28  ;;  %v10866_v27 = vld [vmem:[#allocation27_spill] sm:$0xff] }
 0x1ce   :  { %10862 = vst [vmem:[#allocation24_spill] sm:$0xff] %v8035_v60  ;;  %v1428_v3 = vmul.f32 %v1215_v42, %v1215_v42  ;;  %v1903_v49 = vsel %vm1901_vm15, %v1902_v20, %v1900_v47  ;;  %v1459_v8 = vmul.f32 %v1088_v46, %v1088_v46  ;;  %v1437_v61 = vmul.f32 %v5790_v26, %v5790_v26  ;;  %v10865_v60 = vld [vmem:[#allocation46_spill] sm:$0xff]  ;;  %v10869_v26 = vld [vmem:[#allocation28_spill] sm:$0xff] }
 0x1cf   :  { %v8040_v18 = vadd.f32 %v1457_v33, %v10863_v56  ;;  %v2275_v14 = vpack.c.bf16 %v1903_v49, %v1882_v16  ;;  %v1460_v43 = vmul.f32 %v1090_v21, %v1090_v21  ;;  %v1431_v44 = vmul.f32 %v1218_v17, %v1218_v17 }
 0x1d0   :  { %v8043_v53 = vadd.f32 %v1428_v3, %v10864_v63  ;;  %v8047_v13 = vadd.f32 %v1459_v8, %v10865_v60  ;;  %v8050_v55 = vadd.f32 %v1437_v61, %v10866_v27  ;;  %v1926_v42 = vmul.f32 %v7906_v19, %v7820_v50  ;;  %v10868_v63 = vld [vmem:[#allocation47_spill] sm:$0xff] }
 0x1d1   :  { %6246 = vrsqrt.f32 %v8040_v18  ;;  %v8054_v51 = vpop.eup %6230  ;;  %2535 = vmatmul.mubr.bf16.gmra.mxu0 %v2275_v14  ;;  %v8058_v46 = vadd.f32 %v1460_v43, %v10868_v63  ;;  %v8061_v28 = vadd.f32 %v1431_v44, %v10869_v26  ;;  %vm1927_vm0 = vcmp.eq.f32.partialorder %v7820_v50, inf  ;;  %v1094_v14 = vpop.f32.mrf.mxu1 }
 0x1d2   :  { %10867 = vst [vmem:[#allocation25_spill] sm:$0xff] %v8050_v55  ;;  %6248 = vrsqrt.f32 %v8043_v53  ;;  %v8064_v20 = vpop.eup %6232  ;;  %v8068_v33 = vmul.f32 %v7768_v29, %v7768_v29  ;;  %v1928_v19 = vsel %vm1927_vm0, %v7820_v50, %v1926_v42  ;;  %vm1929_vm1 = vcmp.eq.f32.partialorder %v7820_v50, 0.0  ;;  %v5793_v29 = vpop.f32.mrf.mxu0 }
 0x1d3   :  { %6250 = vrsqrt.f32 %v8047_v13  ;;  %v8073_v21 = vpop.eup %6234  ;;  %v1930_v44 = vand.u32 2147483648, %v7820_v50  ;;  %v1947_v17 = vmul.f32 %v7933_v10, %v7835_v30  ;;  %vm1948_vm2 = vcmp.eq.f32.partialorder %v7835_v30, inf }
 0x1d4   :  { %10870 = vst [vmem:[#allocation45_spill] sm:$0xff] %v8068_v33  ;;  %6252 = vrsqrt.f32 %v8050_v55  ;;  %v8080_v60 = vpop.eup %6236  ;;  %vm1950_vm3 = vcmp.eq.f32.partialorder %v7835_v30, 0.0  ;;  %v1951_v16 = vand.u32 2147483648, %v7835_v30  ;;  %v1597_v47 = vmul.f32 %v7916_v7, %v7823_v2  ;;  %v1096_v7 = vpop.f32.mrf.mxu1  ;;  %v10876_v33 = vld [vmem:[#allocation49_spill] sm:$0xff] }
 0x1d5   :  { %6254 = vrsqrt.f32 %v8058_v46  ;;  %v8087_v3 = vpop.eup %6238  ;;  %v1931_v50 = vsel %vm1929_vm1, %v1930_v44, %v1928_v19  ;;  %v1949_v10 = vsel %vm1948_vm2, %v7835_v30, %v1947_v17  ;;  %vm1598_vm4 = vcmp.eq.f32.partialorder %v7823_v2, inf  ;;  %v1231_v42 = vpop.f32.mrf.mxu0 }
 0x1d6   :  { %6256 = vrsqrt.f32 %v8061_v28  ;;  %v8092_v49 = vpop.eup %6240  ;;  %v1952_v56 = vsel %vm1950_vm3, %v1951_v16, %v1949_v10  ;;  %v1599_v8 = vsel %vm1598_vm4, %v7823_v2, %v1597_v47  ;;  %vm1600_vm5 = vcmp.eq.f32.partialorder %v7823_v2, 0.0 }
 0x1d7   :  { %v1618_v61 = vmul.f32 %v7939_v1, %v7842_v25  ;;  %v2279_v43 = vpack.c.bf16 %v1952_v56, %v1931_v50  ;;  %v1601_v27 = vand.u32 2147483648, %v7823_v2  ;;  %vm1619_vm6 = vcmp.eq.f32.partialorder %v7842_v25, inf  ;;  %v10872_v50 = vld [vmem:[#allocation48_spill] sm:$0xff]  ;;  %v10874_v56 = vld [vmem:[#allocation29_spill] sm:$0xff] }
 0x1d8   :  { %v1622_v30 = vand.u32 2147483648, %v7842_v25  ;;  %vm1621_vm7 = vcmp.eq.f32.partialorder %v7842_v25, 0.0  ;;  %v1462_v26 = vmul.f32 %v1094_v14, %v1094_v14  ;;  %v1446_v19 = vmul.f32 %v5793_v29, %v5793_v29  ;;  %v1098_v14 = vpop.f32.mrf.mxu1 }
 0x1d9   :  { %v1620_v63 = vsel %vm1619_vm6, %v7842_v25, %v1618_v61  ;;  %v8103_v44 = vpop.eup %6242  ;;  %2542 = vmatprep.mubr.bf16.mxu0 %v2279_v43  ;;  %v1602_v17 = vsel %vm1600_vm5, %v1601_v27, %v1599_v8  ;;  %v1919_v16 = vmul.f32 %v7881_v37, %v7801_v35  ;;  %vm1920_vm8 = vcmp.eq.f32.partialorder %v7801_v35, inf  ;;  %v5794_v61 = vpop.f32.mrf.mxu0 }
 0x1da   :  { %v1623_v1 = vsel %vm1621_vm7, %v1622_v30, %v1620_v63  ;;  %v8108_v2 = vpop.eup %6244  ;;  %v8111_v10 = vadd.f32 %v1462_v26, %v10872_v50  ;;  %v8114_v25 = vadd.f32 %v1446_v19, %v10874_v56  ;;  %vm1922_vm9 = vcmp.eq.f32.partialorder %v7801_v35, 0.0 }
 0x1db   :  { %10871 = vst [vmem:[#allocation26_spill] sm:$0xff] %v8108_v2  ;;  %v2256_v47 = vpack.c.bf16 %v1623_v1, %v1602_v17  ;;  %v1921_v29 = vsel %vm1920_vm8, %v7801_v35, %v1919_v16  ;;  %v1923_v8 = vand.u32 2147483648, %v7801_v35  ;;  %v1940_v37 = vmul.f32 %v7922_v54, %v7826_v31  ;;  %v1234_v50 = vpop.f32.mrf.mxu0  ;;  %v10877_v2 = vld [vmem:[#allocation30_spill] sm:$0xff] }
 0x1dc   :  { %10873 = vst [vmem:[#allocation46_spill] sm:$0xff] %v8111_v10  ;;  %vm1941_vm10 = vcmp.eq.f32.partialorder %v7826_v31, inf  ;;  %6258 = vrsqrt.f32 %v8111_v10  ;;  %vm1943_vm11 = vcmp.eq.f32.partialorder %v7826_v31, 0.0  ;;  %v1944_v43 = vand.u32 2147483648, %v7826_v31 }
 0x1dd   :  { %5823 = vmatprep.mubr.bf16.mxu1 %v2256_v47  ;;  %v1639_v27 = vmul.f32 %v7889_v52, %v7804_v41  ;;  %v1924_v63 = vsel %vm1922_vm9, %v1923_v8, %v1921_v29  ;;  %v1942_v35 = vsel %vm1941_vm10, %v7826_v31, %v1940_v37  ;;  %vm1640_vm12 = vcmp.eq.f32.partialorder %v7804_v41, inf  ;;  %v1100_v52 = vpop.f32.mrf.mxu1 }
 0x1de   :  { %v8127_v30 = vpop.eup %6246  ;;  %vm1642_vm13 = vcmp.eq.f32.partialorder %v7804_v41, 0.0  ;;  %v1945_v26 = vsel %vm1943_vm11, %v1944_v43, %v1942_v35  ;;  %v1643_v17 = vand.u32 2147483648, %v7804_v41  ;;  %v1660_v1 = vmul.f32 %v7929_v36, %v7829_v34 }
 0x1df   :  { %v8132_v54 = vpop.eup %6248  ;;  %v1641_v19 = vsel %vm1640_vm12, %v7804_v41, %v1639_v27  ;;  %v2278_v47 = vpack.c.bf16 %v1945_v26, %v1924_v63  ;;  %vm1661_vm14 = vcmp.eq.f32.partialorder %v7829_v34, inf  ;;  %vm1663_vm15 = vcmp.eq.f32.partialorder %v7829_v34, 0.0 }
 0x1e0   :  { %v8138_v16 = vpop.eup %6250  ;;  %v1664_v31 = vand.u32 2147483648, %v7829_v34  ;;  %v1644_v29 = vsel %vm1642_vm13, %v1643_v17, %v1641_v19  ;;  %v1662_v8 = vsel %vm1661_vm14, %v7829_v34, %v1660_v1  ;;  %v1463_v41 = vmul.f32 %v1096_v7, %v1096_v7  ;;  %v10878_v34 = vld [vmem:[#allocation50_spill] sm:$0xff]  ;;  %v6651_v1 = vld [vmem:[#allocation7 + $0xa8] ss:$12 sps:$4 sm:$0xff]  }
 0x1e1   :  { %v8143_v56 = vpop.eup %6252  ;;  %v1440_v37 = vmul.f32 %v1231_v42, %v1231_v42  ;;  %2543 = vmatmul.mubr.bf16.gmra.mxu0 %v2278_v47  ;;  %v1465_v27 = vmul.f32 %v1098_v14, %v1098_v14  ;;  %v1449_v63 = vmul.f32 %v5794_v61, %v5794_v61  ;;  %v1466_v35 = vmul.f32 %v1100_v52, %v1100_v52  ;;  %v10879_v42 = vld [vmem:[#allocation31_spill] sm:$0xff] }
 0x1e2   :  { %10875 = vst [vmem:[#allocation27_spill] sm:$0xff] %v8143_v56  ;;  %v8146_v43 = vpop.eup %6254  ;;  %v1665_v36 = vsel %vm1663_vm15, %v1664_v31, %v1662_v8  ;;  %v8151_v55 = vadd.f32 %v1463_v41, %v10876_v33  ;;  %v1443_v19 = vmul.f32 %v1234_v50, %v1234_v50  ;;  %6260 = vrsqrt.f32 %v8114_v25  ;;  %v5797_v31 = vpop.f32.mrf.mxu0  ;;  %v6652_v50 = vld [vmem:[#allocation7 + $0x94] ss:$12 sps:$4 sm:$0xff]  }
 0x1e3   :  { %v8148_v26 = vpop.eup %6256  ;;  %v2259_v10 = vpack.c.bf16 %v1665_v36, %v1644_v29  ;;  %v8154_v56 = vadd.f32 %v1440_v37, %v10877_v2  ;;  %v8158_v7 = vadd.f32 %v1465_v27, %v10878_v34  ;;  %v8161_v17 = vadd.f32 %v1449_v63, %v10879_v42  ;;  %v10880_v2 = vld [vmem:[#allocation32_spill] sm:$0xff]  ;;  %v6653_v27 = vld [vmem:[#allocation7 + $0x90] ss:$12 sps:$4 sm:$0xff]  }
 0x1e4   :  { %v1968_v14 = vmul.f32 %v7979_v48, %v7892_v57  ;;  %6262 = vrsqrt.f32 %v8151_v55  ;;  %v8167_v33 = vadd.f32 %v1466_v35, %v7632_v45  ;;  %v8170_v61 = vadd.f32 %v1443_v19, %v10880_v2  ;;  %v1247_v35 = vpop.f32.mrf.mxu0  ;;  %v6654_v19 = vld [vmem:[#allocation7 + $0x7c] ss:$12 sps:$4 sm:$0xff]  }
 0x1e5   :  { %5824 = vmatmul.mubr.bf16.vlgmr.msra.gmra.mxu1 %v2259_v10  ;;  %vm1969_vm0 = vcmp.eq.f32.partialorder %v7892_v57, inf  ;;  %6264 = vrsqrt.f32 %v8154_v56  ;;  %vm1971_vm1 = vcmp.eq.f32.partialorder %v7892_v57, 0.0  ;;  %v1989_v48 = vmul.f32 %v8008_v39, %v7910_v32  ;;  %v1104_v10 = vpop.f32.mrf.mxu1 }
 0x1e6   :  { %2993 = vmatpush1.bf16.msra.mxu1 %v6651_v1  ;;  %v1970_v52 = vsel %vm1969_vm0, %v7892_v57, %v1968_v14  ;;  %6266 = vrsqrt.f32 %v8158_v7  ;;  %v1972_v45 = vand.u32 2147483648, %v7892_v57  ;;  %vm1990_vm2 = vcmp.eq.f32.partialorder %v7910_v32, inf }
 0x1e7   :  { %v1993_v47 = vand.u32 2147483648, %v7910_v32  ;;  %2994 = vmatprep.subr.bf16.mxu1 %v6652_v50  ;;  %6268 = vrsqrt.f32 %v8161_v17  ;;  %v1991_v29 = vsel %vm1990_vm2, %v7910_v32, %v1989_v48  ;;  %vm1992_vm3 = vcmp.eq.f32.partialorder %v7910_v32, 0.0  ;;  %v1106_v32 = vpop.f32.mrf.mxu1 }
 0x1e8   :  { %v1681_v39 = vmul.f32 %v7990_v58, %v7895_v12  ;;  %6270 = vrsqrt.f32 %v8167_v33  ;;  %v1973_v8 = vsel %vm1971_vm1, %v1972_v45, %v1970_v52  ;;  %vm1682_vm4 = vcmp.eq.f32.partialorder %v7895_v12, inf }
 0x1e9   :  { %v1994_v57 = vsel %vm1992_vm3, %v1993_v47, %v1991_v29  ;;  %v8189_v41 = vpop.eup %6258  ;;  %6272 = vrsqrt.f32 %v8170_v61  ;;  %vm1684_vm5 = vcmp.eq.f32.partialorder %v7895_v12, 0.0  ;;  %v1685_v58 = vand.u32 2147483648, %v7895_v12 }
 0x1ea   :  { %v2282_v37 = vpack.c.bf16 %v1994_v57, %v1973_v8  ;;  %v1683_v36 = vsel %vm1682_vm4, %v7895_v12, %v1681_v39  ;;  %2995 = vmatpush1.bf16.msra.mxu1 %v6653_v27  ;;  %v1702_v63 = vmul.f32 %v8012_v15, %v7913_v22  ;;  %vm1703_vm6 = vcmp.eq.f32.partialorder %v7913_v22, inf  ;;  %v10881_v12 = vld [vmem:[#allocation33_spill] sm:$0xff]  ;;  %v5798_v39 = vpop.f32.mrf.mxu0 }
 0x1eb   :  { %vm1705_vm7 = vcmp.eq.f32.partialorder %v7913_v22, 0.0  ;;  %2996 = vmatprep.subr.bf16.mxu1 %v6654_v19  ;;  %v1706_v34 = vand.u32 2147483648, %v7913_v22  ;;  %v1468_v42 = vmul.f32 %v1104_v10, %v1104_v10  ;;  %v1458_v14 = vmul.f32 %v5797_v31, %v5797_v31  ;;  %v1108_v10 = vpop.f32.mrf.mxu1  ;;  %v6655_v31 = vld [vmem:[#allocation7 + $0x78] ss:$12 sps:$4 sm:$0xff]  }
 0x1ec   :  { %2550 = vmatprep.mubr.bf16.mxu0 %v2282_v37  ;;  %v1961_v2 = vmul.f32 %v7956_v5, %v7867_v0  ;;  %v1686_v1 = vsel %vm1684_vm5, %v1685_v58, %v1683_v36  ;;  %v1704_v15 = vsel %vm1703_vm6, %v7913_v22, %v1702_v63  ;;  %vm1962_vm8 = vcmp.eq.f32.partialorder %v7867_v0, inf  ;;  %v6656_v8 = vld [vmem:[#allocation7 + $0x64] ss:$12 sps:$4 sm:$0xff]  }
 0x1ed   :  { %v1965_v52 = vand.u32 2147483648, %v7867_v0  ;;  %v1707_v48 = vsel %vm1705_vm7, %v1706_v34, %v1704_v15  ;;  %v8208_v45 = vadd.f32 %v1468_v42, %v7645_v62  ;;  %vm1964_vm9 = vcmp.eq.f32.partialorder %v7867_v0, 0.0  ;;  %v10883_v63 = vld [vmem:[#allocation17_spill] sm:$0xff]  ;;  %v1110_v19 = vpop.f32.mrf.mxu1  ;;  %v6657_v34 = vld [vmem:[#allocation7 + $0x60] ss:$12 sps:$4 sm:$0xff]  }
 0x1ee   :  { %v1963_v47 = vsel %vm1962_vm8, %v7867_v0, %v1961_v2  ;;  %2997 = vmatpush1.bf16.msra.mxu1 %v6655_v31  ;;  %v2262_v5 = vpack.c.bf16 %v1707_v48, %v1686_v1  ;;  %v8213_v50 = vadd.f32 %v1458_v14, %v10881_v12  ;;  %v1982_v29 = vmul.f32 %v7996_v38, %v7899_v4  ;;  %v1250_v2 = vpop.f32.mrf.mxu0  ;;  %v6658_v1 = vld [vmem:[#allocation7 + $0x4c] ss:$12 sps:$4 sm:$0xff]  }
 0x1ef   :  { %v1966_v22 = vsel %vm1964_vm9, %v1965_v52, %v1963_v47  ;;  %2998 = vmatprep.subr.bf16.mxu1 %v6656_v8  ;;  %6274 = vrsqrt.f32 %v8208_v45  ;;  %vm1983_vm10 = vcmp.eq.f32.partialorder %v7899_v4, inf  ;;  %v1986_v62 = vand.u32 2147483648, %v7899_v4  ;;  %v8222_v57 = vpop.eup %6260 }
 0x1f0   :  { %10882 = vst [vmem:[#allocation47_spill] sm:$0xff] %v8213_v50  ;;  %v1723_v0 = vmul.f32 %v7962_v11, %v7870_v6  ;;  %5827 = vmatprep.mubr.bf16.mxu1 %v2262_v5  ;;  %v1984_v37 = vsel %vm1983_vm10, %v7899_v4, %v1982_v29  ;;  %vm1985_vm11 = vcmp.eq.f32.partialorder %v7899_v4, 0.0  ;;  %vm1724_vm12 = vcmp.eq.f32.partialorder %v7870_v6, inf }
 0x1f1   :  { %vm1726_vm13 = vcmp.eq.f32.partialorder %v7870_v6, 0.0  ;;  %v8228_v38 = vpop.eup %6262  ;;  %v1987_v36 = vsel %vm1985_vm11, %v1986_v62, %v1984_v37  ;;  %v1727_v58 = vand.u32 2147483648, %v7870_v6  ;;  %v1744_v11 = vmul.f32 %v8003_v23, %v10883_v63 }
 0x1f2   :  { %v1725_v27 = vsel %vm1724_vm12, %v7870_v6, %v1723_v0  ;;  %2999 = vmatpush1.bf16.msra.mxu1 %v6657_v34  ;;  %v8234_v42 = vpop.eup %6264  ;;  %v2281_v4 = vpack.c.bf16 %v1987_v36, %v1966_v22  ;;  %vm1745_vm14 = vcmp.eq.f32.partialorder %v10883_v63, inf  ;;  %vm1747_vm15 = vcmp.eq.f32.partialorder %v10883_v63, 0.0  ;;  %v10884_v0 = vld [vmem:[#allocation51_spill] sm:$0xff]  ;;  %v10885_v36 = vld [vmem:[#allocation34_spill] sm:$0xff]  ;;  %v10889_v34 = vld [vmem:[#allocation53_spill] sm:$0xff] }
 0x1f3   :  { %v1748_v14 = vand.u32 2147483648, %v10883_v63  ;;  %3000 = vmatprep.subr.bf16.mxu1 %v6658_v1  ;;  %v8239_v15 = vpop.eup %6266  ;;  %v1728_v23 = vsel %vm1726_vm13, %v1727_v58, %v1725_v27  ;;  %v1746_v52 = vsel %vm1745_vm14, %v10883_v63, %v1744_v11  ;;  %v1469_v48 = vmul.f32 %v1106_v32, %v1106_v32  ;;  %v6659_v58 = vld [vmem:[#allocation7 + $0x48] ss:$12 sps:$4 sm:$0xff]  }
 0x1f4   :  { %v1452_v47 = vmul.f32 %v1247_v35, %v1247_v35  ;;  %v8244_v31 = vpop.eup %6268  ;;  %2551 = vmatmul.mubr.bf16.gmra.mxu0 %v2281_v4  ;;  %v1471_v12 = vmul.f32 %v1108_v10, %v1108_v10  ;;  %v1461_v22 = vmul.f32 %v5798_v39, %v5798_v39  ;;  %v1472_v29 = vmul.f32 %v1110_v19, %v1110_v19  ;;  %v10886_v35 = vld [vmem:[#allocation52_spill] sm:$0xff]  ;;  %v10887_v39 = vld [vmem:[#allocation35_spill] sm:$0xff] }
 0x1f5   :  { %v1749_v5 = vsel %vm1747_vm15, %v1748_v14, %v1746_v52  ;;  %v8246_v8 = vpop.eup %6270  ;;  %v8249_v37 = vadd.f32 %v1469_v48, %v10884_v0  ;;  %v1455_v27 = vmul.f32 %v1250_v2, %v1250_v2  ;;  %6276 = vrsqrt.f32 %v8213_v50  ;;  %v6660_v19 = vld [vmem:[#allocation7 + $0x34] ss:$12 sps:$4 sm:$0xff]   ;;  %v10890_v14 = vld [vmem:[#allocation36_spill] sm:$0xff] }
 0x1f6   :  { %v2265_v62 = vpack.c.bf16 %v1749_v5, %v1728_v23  ;;  %v8252_v6 = vadd.f32 %v1452_v47, %v10885_v36  ;;  %3001 = vmatpush1.bf16.msra.mxu1 %v6659_v58  ;;  %v8254_v32 = vpop.eup %6272  ;;  %v8258_v10 = vadd.f32 %v1471_v12, %v10886_v35  ;;  %v8261_v63 = vadd.f32 %v1461_v22, %v10887_v39  ;;  %v1114_v23 = vpop.f32.mrf.mxu1  ;;  %v6661_v5 = vld [vmem:[#allocation7 + $0x30] ss:$12 sps:$4 sm:$0xff]   ;;  %v6663_v35 = vld [vmem:[#allocation7 + $0x18] ss:$12 sps:$4 sm:$0xff]  }
 0x1f7   :  { %v2010_v11 = vmul.f32 %v8054_v51, %v7968_v40  ;;  %3002 = vmatprep.subr.bf16.mxu1 %v6660_v19  ;;  %6278 = vrsqrt.f32 %v8249_v37  ;;  %v8267_v4 = vadd.f32 %v1472_v29, %v10889_v34  ;;  %v8270_v2 = vadd.f32 %v1455_v27, %v10890_v14  ;;  %v5801_v47 = vpop.f32.mrf.mxu0  ;;  %v6662_v22 = vld [vmem:[#allocation7 + $0x1c] ss:$12 sps:$4 sm:$0xff]  }
 0x1f8   :  { %10888 = vst [vmem:[#allocation28_spill] sm:$0xff] %v8261_v63  ;;  %5828 = vmatmul.mubr.bf16.gmra.mxu1 %v2265_v62  ;;  %vm2011_vm0 = vcmp.eq.f32.partialorder %v7968_v40, inf  ;;  %6280 = vrsqrt.f32 %v8252_v6  ;;  %vm2013_vm1 = vcmp.eq.f32.partialorder %v7968_v40, 0.0  ;;  %v2031_v51 = vmul.f32 %v8087_v3, %v7983_v24  ;;  %v10891_v34 = vld [vmem:[#allocation18_spill] sm:$0xff]  ;;  %v10892_v14 = vld [vmem:[#allocation44_spill] sm:$0xff] }
 0x1f9   :  { %v2012_v1 = vsel %vm2011_vm0, %v7968_v40, %v2010_v11  ;;  %6282 = vrsqrt.f32 %v8258_v10  ;;  %v2014_v52 = vand.u32 2147483648, %v7968_v40  ;;  %vm2032_vm2 = vcmp.eq.f32.partialorder %v7983_v24, inf  ;;  %v1263_v40 = vpop.f32.mrf.mxu0 }
 0x1fa   :  { %v2035_v48 = vand.u32 2147483648, %v7983_v24  ;;  %3003 = vmatpush1.bf16.msra.mxu1 %v6661_v5  ;;  %6284 = vrsqrt.f32 %v8261_v63  ;;  %v2033_v12 = vsel %vm2032_vm2, %v7983_v24, %v2031_v51  ;;  %vm2034_vm3 = vcmp.eq.f32.partialorder %v7983_v24, 0.0  ;;  %v10893_v5 = vld [vmem:[#allocation54_spill] sm:$0xff] }
 0x1fb   :  { %v1765_v3 = vmul.f32 %v8064_v20, %v7971_v9  ;;  %3004 = vmatprep.subr.bf16.mxu1 %v6662_v22  ;;  %6286 = vrsqrt.f32 %v8267_v4  ;;  %v2015_v29 = vsel %vm2013_vm1, %v2014_v52, %v2012_v1  ;;  %vm1766_vm4 = vcmp.eq.f32.partialorder %v7971_v9, inf  ;;  %v1116_v20 = vpop.f32.mrf.mxu1  ;;  %v6664_v52 = vld [vmem:[#allocation7 + $0x4] ss:$12 sps:$4 sm:$0xff]  }
 0x1fc   :  { %v2036_v62 = vsel %vm2034_vm3, %v2035_v48, %v2033_v12  ;;  %v8291_v0 = vpop.eup %6274  ;;  %6288 = vrsqrt.f32 %v8270_v2  ;;  %vm1768_vm5 = vcmp.eq.f32.partialorder %v7971_v9, 0.0  ;;  %v1769_v27 = vand.u32 2147483648, %v7971_v9  ;;  %v10895_v22 = vld [vmem:[#allocation37_spill] sm:$0xff] }
 0x1fd   :  { %v2285_v36 = vpack.c.bf16 %v2036_v62, %v2015_v29  ;;  %v1767_v24 = vsel %vm1766_vm4, %v7971_v9, %v1765_v3  ;;  %v1786_v58 = vmul.f32 %v8092_v49, %v7986_v59  ;;  %vm1787_vm6 = vcmp.eq.f32.partialorder %v7986_v59, inf  ;;  %v10897_v62 = vld [vmem:[#allocation20_spill] sm:$0xff] }
 0x1fe   :  { %vm1789_vm7 = vcmp.eq.f32.partialorder %v7986_v59, 0.0  ;;  %3005 = vmatpush1.bf16.msra.mxu1 %v6663_v35  ;;  %v1790_v39 = vand.u32 2147483648, %v7986_v59  ;;  %v1474_v11 = vmul.f32 %v1114_v23, %v1114_v23  ;;  %v1470_v19 = vmul.f32 %v5801_v47, %v5801_v47  ;;  %v1118_v23 = vpop.f32.mrf.mxu1  ;;  %v10898_v35 = vld [vmem:[#allocation19_spill] sm:$0xff] }
 0x1ff   :  { %2558 = vmatprep.mubr.bf16.mxu0 %v2285_v36  ;;  %v2003_v1 = vmul.f32 %v10892_v14, %v10891_v34  ;;  %v1770_v51 = vsel %vm1768_vm5, %v1769_v27, %v1767_v24  ;;  %v1788_v9 = vsel %vm1787_vm6, %v7986_v59, %v1786_v58  ;;  %vm2004_vm8 = vcmp.eq.f32.partialorder %v10891_v34, inf  ;;  %3006 = vmatprep.subr.bf16.mxu1 %v6664_v52  ;;  %v5802_v24 = vpop.f32.mrf.mxu0  ;;  %v6665_v27 = vld [vmem:[#allocation7] ss:$12 sps:$4 sm:$0xff]  }
 0x200   :  { %v2007_v49 = vand.u32 2147483648, %v10891_v34  ;;  %v1791_v48 = vsel %vm1789_vm7, %v1790_v39, %v1788_v9  ;;  %v8308_v12 = vadd.f32 %v1474_v11, %v10893_v5  ;;  %vm2006_vm9 = vcmp.eq.f32.partialorder %v10891_v34, 0.0  ;;  %v10899_v39 = vld [vmem:[#allocation24_spill] sm:$0xff] }
 0x201   :  { %v2005_v3 = vsel %vm2004_vm8, %v10891_v34, %v2003_v1  ;;  %v2268_v47 = vpack.c.bf16 %v1791_v48, %v1770_v51  ;;  %v8313_v29 = vadd.f32 %v1470_v19, %v10895_v22  ;;  %v2024_v36 = vmul.f32 %v8073_v21, %v10897_v62  ;;  %v8322_v34 = vld [vmem:[#allocation8 + $0xb0] ss:$12 sps:$4 sm:$0xff]   ;;  %v1120_v48 = vpop.f32.mrf.mxu1  ;;  %v1266_v22 = vpop.f32.mrf.mxu0 }
 0x202   :  { %10894 = vst [vmem:[#allocation48_spill] sm:$0xff] %v8308_v12  ;;  %v2008_v59 = vsel %vm2006_vm9, %v2007_v49, %v2005_v3  ;;  %3007 = vmatpush1.bf16.msra.mxu1 %v6665_v27  ;;  %6290 = vrsqrt.f32 %v8308_v12  ;;  %vm2025_vm10 = vcmp.eq.f32.partialorder %v10897_v62, inf  ;;  %v2028_v58 = vand.u32 2147483648, %v10897_v62  ;;  %10900 = vst [vmem:[#allocation49_spill] sm:$0xff] %v8322_v34  ;;  %v8325_v19 = vpop.eup %6276  ;;  %v10902_v49 = vld [vmem:[#allocation22_spill] sm:$0xff]  ;;  %v10903_v12 = vld [vmem:[#allocation55_spill] sm:$0xff] }
 0x203   :  { %10896 = vst [vmem:[#allocation29_spill] sm:$0xff] %v8313_v29  ;;  %v1807_v11 = vmul.f32 %v10899_v39, %v10898_v35  ;;  %5903 = vmatprep.subr.bf16.mxu1 %v8322_v34  ;;  %10901 = vst [vmem:[#allocation30_spill] sm:$0xff] %v8325_v19  ;;  %5831 = vmatprep.mubr.bf16.mxu1 %v2268_v47  ;;  %v2026_v21 = vsel %vm2025_vm10, %v10897_v62, %v2024_v36  ;;  %vm2027_vm11 = vcmp.eq.f32.partialorder %v10897_v62, 0.0  ;;  %v10904_v19 = vld [vmem:[#allocation38_spill] sm:$0xff] }
 0x204   :  { %vm1808_vm12 = vcmp.eq.f32.partialorder %v10898_v35, inf  ;;  %vm1810_vm13 = vcmp.eq.f32.partialorder %v10898_v35, 0.0  ;;  %v8331_v14 = vpop.eup %6278  ;;  %v2029_v1 = vsel %vm2027_vm11, %v2028_v58, %v2026_v21  ;;  %v1811_v9 = vand.u32 2147483648, %v10898_v35 }
 0x205   :  { %v1809_v51 = vsel %vm1808_vm12, %v10898_v35, %v1807_v11  ;;  %v1828_v52 = vmul.f32 %v8080_v60, %v10902_v49  ;;  %v8337_v5 = vpop.eup %6280  ;;  %v2284_v3 = vpack.c.bf16 %v2029_v1, %v2008_v59  ;;  %vm1829_vm14 = vcmp.eq.f32.partialorder %v10902_v49, inf }
 0x206   :  { %vm1831_vm15 = vcmp.eq.f32.partialorder %v10902_v49, 0.0  ;;  %v1832_v47 = vand.u32 2147483648, %v10902_v49  ;;  %v8342_v62 = vpop.eup %6282  ;;  %v1812_v36 = vsel %vm1810_vm13, %v1811_v9, %v1809_v51  ;;  %v1475_v58 = vmul.f32 %v1116_v20, %v1116_v20  ;;  %v10905_v20 = vld [vmem:[#allocation56_spill] sm:$0xff] }
 0x207   :  { %v1830_v27 = vsel %vm1829_vm14, %v10902_v49, %v1828_v52  ;;  %v1464_v35 = vmul.f32 %v1263_v40, %v1263_v40  ;;  %v8345_v39 = vpop.eup %6284  ;;  %2559 = vmatmul.mubr.bf16.gmra.mxu0 %v2284_v3  ;;  %v1477_v11 = vmul.f32 %v1118_v23, %v1118_v23  ;;  %v1473_v59 = vmul.f32 %v5802_v24, %v5802_v24  ;;  %v10906_v23 = vld [vmem:[#allocation39_spill] sm:$0xff]  ;;  %v10909_v52 = vld [vmem:[#allocation40_spill] sm:$0xff] }
 0x208   :  { %v1833_v60 = vsel %vm1831_vm15, %v1832_v47, %v1830_v27  ;;  %v1478_v21 = vmul.f32 %v1120_v48, %v1120_v48  ;;  %v8347_v1 = vpop.eup %6286  ;;  %v8350_v63 = vadd.f32 %v1475_v58, %v10903_v12  ;;  %v1467_v51 = vmul.f32 %v1266_v22, %v1266_v22  ;;  %v10908_v12 = vld [vmem:[#allocation57_spill] sm:$0xff] }
 0x209   :  { %v2271_v34 = vpack.c.bf16 %v1833_v60, %v1812_v36  ;;  %v8353_v50 = vadd.f32 %v1464_v35, %v10904_v19  ;;  %v8355_v9 = vpop.eup %6288  ;;  %6292 = vrsqrt.f32 %v8313_v29  ;;  %v8359_v40 = vadd.f32 %v1477_v11, %v10905_v20  ;;  %v5805_v36 = vpop.f32.mrf.mxu0  ;;  %v10921_v29 = vld [vmem:[#allocation41_spill] sm:$0xff] }
 0x20a   :  { %v8362_v24 = vadd.f32 %v1473_v59, %v10906_v23  ;;  %v2052_v49 = vmul.f32 %v8127_v30, %v8040_v18  ;;  %6294 = vrsqrt.f32 %v8350_v63  ;;  %v8368_v19 = vadd.f32 %v1478_v21, %v10908_v12 }
 0x20b   :  { %5832 = vmatmul.mubr.bf16.gmra.mxu1 %v2271_v34  ;;  %v8371_v48 = vadd.f32 %v1467_v51, %v10909_v52  ;;  %vm2053_vm0 = vcmp.eq.f32.partialorder %v8040_v18, inf  ;;  %6296 = vrsqrt.f32 %v8353_v50  ;;  %vm2055_vm1 = vcmp.eq.f32.partialorder %v8040_v18, 0.0  ;;  %v1124_v34 = vpop.f32.mrf.mxu1  ;;  %v1279_v21 = vpop.f32.mrf.mxu0 }
 0x20c   :  { %10907 = vst [vmem:[#allocation50_spill] sm:$0xff] %v8362_v24  ;;  %v2054_v3 = vsel %vm2053_vm0, %v8040_v18, %v2052_v49  ;;  %v2073_v30 = vmul.f32 %v8146_v43, %v8058_v46  ;;  %6298 = vrsqrt.f32 %v8359_v40  ;;  %v2056_v47 = vand.u32 2147483648, %v8040_v18  ;;  %v10910_v49 = vld [vmem:[#allocation43_spill] sm:$0xff] }
 0x20d   :  { %vm2074_vm2 = vcmp.eq.f32.partialorder %v8058_v46, inf  ;;  %v2077_v22 = vand.u32 2147483648, %v8058_v46  ;;  %6300 = vrsqrt.f32 %v8362_v24  ;;  %vm2076_vm3 = vcmp.eq.f32.partialorder %v8058_v46, 0.0  ;;  %v1126_v59 = vpop.f32.mrf.mxu1  ;;  %v10920_v24 = vld [vmem:[#allocation59_spill] sm:$0xff] }
 0x20e   :  { %v2075_v27 = vsel %vm2074_vm2, %v8058_v46, %v2073_v30  ;;  %v1849_v58 = vmul.f32 %v8132_v54, %v8043_v53  ;;  %6302 = vrsqrt.f32 %v8368_v19  ;;  %v2057_v43 = vsel %vm2055_vm1, %v2056_v47, %v2054_v3  ;;  %v10911_v30 = vld [vmem:[#allocation58_spill] sm:$0xff] }
 0x20f   :  { %v2078_v35 = vsel %vm2076_vm3, %v2077_v22, %v2075_v27  ;;  %vm1850_vm4 = vcmp.eq.f32.partialorder %v8043_v53, inf  ;;  %v8390_v18 = vpop.eup %6290  ;;  %6304 = vrsqrt.f32 %v8371_v48  ;;  %vm1852_vm5 = vcmp.eq.f32.partialorder %v8043_v53, 0.0  ;;  %v10913_v27 = vld [vmem:[#allocation16_spill] sm:$0xff] }
 0x210   :  { %v2288_v60 = vpack.c.bf16 %v2078_v35, %v2057_v43  ;;  %v1851_v11 = vsel %vm1850_vm4, %v8043_v53, %v1849_v58  ;;  %v1853_v46 = vand.u32 2147483648, %v8043_v53  ;;  %v1870_v54 = vmul.f32 %v8148_v26, %v8061_v28  ;;  %v5806_v43 = vpop.f32.mrf.mxu0 }
 0x211   :  { %vm1871_vm6 = vcmp.eq.f32.partialorder %v8061_v28, inf  ;;  %vm1873_vm7 = vcmp.eq.f32.partialorder %v8061_v28, 0.0  ;;  %v1874_v51 = vand.u32 2147483648, %v8061_v28  ;;  %v1480_v20 = vmul.f32 %v1124_v34, %v1124_v34  ;;  %v1128_v34 = vpop.f32.mrf.mxu1 }
 0x212   :  { %2566 = vmatprep.mubr.bf16.mxu0 %v2288_v60  ;;  %v1482_v23 = vmul.f32 %v5805_v36, %v5805_v36  ;;  %v2045_v12 = vmul.f32 %v8103_v44, %v10910_v49  ;;  %v1854_v52 = vsel %vm1852_vm5, %v1853_v46, %v1851_v11  ;;  %v1872_v3 = vsel %vm1871_vm6, %v8061_v28, %v1870_v54  ;;  %v10914_v60 = vld [vmem:[#allocation23_spill] sm:$0xff]  ;;  %v10915_v11 = vld [vmem:[#allocation26_spill] sm:$0xff] }
 0x213   :  { %vm2046_vm8 = vcmp.eq.f32.partialorder %v10910_v49, inf  ;;  %v2049_v53 = vand.u32 2147483648, %v10910_v49  ;;  %v1875_v26 = vsel %vm1873_vm7, %v1874_v51, %v1872_v3  ;;  %v8407_v47 = vadd.f32 %v1480_v20, %v10911_v30 }
 0x214   :  { %v2047_v22 = vsel %vm2046_vm8, %v10910_v49, %v2045_v12  ;;  %vm2048_vm9 = vcmp.eq.f32.partialorder %v10910_v49, 0.0  ;;  %v2274_v36 = vpack.c.bf16 %v1875_v26, %v1854_v52  ;;  %v8412_v58 = vadd.f32 %v1482_v23, %v10913_v27  ;;  %v10917_v12 = vld [vmem:[#allocation25_spill] sm:$0xff]  ;;  %v10918_v52 = vld [vmem:[#allocation27_spill] sm:$0xff] }
 0x215   :  { %10912 = vst [vmem:[#allocation31_spill] sm:$0xff] %v8407_v47  ;;  %v2050_v44 = vsel %vm2048_vm9, %v2049_v53, %v2047_v22  ;;  %v2066_v28 = vmul.f32 %v8138_v16, %v8047_v13  ;;  %6306 = vrsqrt.f32 %v8407_v47  ;;  %vm2067_vm10 = vcmp.eq.f32.partialorder %v8047_v13, inf  ;;  %v1130_v53 = vpop.f32.mrf.mxu1  ;;  %v1282_v22 = vpop.f32.mrf.mxu0 }
 0x216   :  { %v2070_v35 = vand.u32 2147483648, %v8047_v13  ;;  %v1891_v46 = vmul.f32 %v10915_v11, %v10914_v60  ;;  %v8421_v54 = vpop.eup %6292  ;;  %5835 = vmatprep.mubr.bf16.mxu1 %v2274_v36  ;;  %vm2069_vm11 = vcmp.eq.f32.partialorder %v8047_v13, 0.0  ;;  %vm1892_vm12 = vcmp.eq.f32.partialorder %v10914_v60, inf }
 0x217   :  { %10916 = vst [vmem:[#allocation32_spill] sm:$0xff] %v8421_v54  ;;  %v2068_v51 = vsel %vm2067_vm10, %v8047_v13, %v2066_v28  ;;  %vm1894_vm13 = vcmp.eq.f32.partialorder %v10914_v60, 0.0  ;;  %v8427_v16 = vpop.eup %6294  ;;  %v1895_v49 = vand.u32 2147483648, %v10914_v60  ;;  %v1912_v3 = vmul.f32 %v10918_v52, %v10917_v12 }
 0x218   :  { %v2071_v20 = vsel %vm2069_vm11, %v2070_v35, %v2068_v51  ;;  %v1893_v23 = vsel %vm1892_vm12, %v10914_v60, %v1891_v46  ;;  %v8433_v26 = vpop.eup %6296  ;;  %vm1913_vm14 = vcmp.eq.f32.partialorder %v10917_v12, inf  ;;  %vm1915_vm15 = vcmp.eq.f32.partialorder %v10917_v12, 0.0 }
 0x219   :  { %v2287_v30 = vpack.c.bf16 %v2071_v20, %v2050_v44  ;;  %v1916_v13 = vand.u32 2147483648, %v10917_v12  ;;  %v8438_v36 = vpop.eup %6298  ;;  %v1896_v27 = vsel %vm1894_vm13, %v1895_v49, %v1893_v23  ;;  %v1914_v28 = vsel %vm1913_vm14, %v10917_v12, %v1912_v3  ;;  %v10925_v3 = vld [vmem:[#allocation45_spill] sm:$0xff] }
 0x21a   :  { %10919 = vst [vmem:[#allocation33_spill] sm:$0xff] %v8438_v36  ;;  %v1481_v35 = vmul.f32 %v1126_v59, %v1126_v59  ;;  %v1476_v60 = vmul.f32 %v1279_v21, %v1279_v21  ;;  %v8441_v11 = vpop.eup %6300  ;;  %v1483_v51 = vmul.f32 %v1128_v34, %v1128_v34  ;;  %v1485_v44 = vmul.f32 %v5806_v43, %v5806_v43  ;;  %v10922_v59 = vld [vmem:[#allocation21_spill] sm:$0xff]  ;;  %v10923_v34 = vld [vmem:[#allocation60_spill] sm:$0xff] }
 0x21b   :  { %2567 = vmatmul.mubr.bf16.gmra.mxu0 %v2287_v30  ;;  %v1917_v46 = vsel %vm1915_vm15, %v1916_v13, %v1914_v28  ;;  %v1484_v20 = vmul.f32 %v1130_v53, %v1130_v53  ;;  %v8443_v52 = vpop.eup %6302  ;;  %v1479_v23 = vmul.f32 %v1282_v22, %v1282_v22  ;;  %v1383_v21 = vmul.f32 %v10922_v59, %v10922_v59 }
 0x21c   :  { %v2277_v47 = vpack.c.bf16 %v1917_v46, %v1896_v27  ;;  %v8446_v54 = vadd.f32 %v1481_v35, %v10920_v24  ;;  %v8449_v36 = vadd.f32 %v1476_v60, %v10921_v29  ;;  %v8451_v49 = vpop.eup %6304  ;;  %6308 = vrsqrt.f32 %v8412_v58  ;;  %v10924_v24 = vld [vmem:[#allocation42_spill] sm:$0xff] }
 0x21d   :  { %v8457_v43 = vadd.f32 %v1483_v51, %v10923_v34  ;;  %v2094_v12 = vmul.f32 %v8228_v38, %v8151_v55  ;;  %v8463_v29 = vadd.f32 %v1485_v44, %v10924_v24  ;;  %v8466_v53 = vadd.f32 %v1484_v20, %v10925_v3  ;;  %v10926_v20 = vld [vmem:[#allocation46_spill] sm:$0xff] }
 0x21e   :  { %5836 = vmatmul.mubr.bf16.gmra.mxu1 %v2277_v47  ;;  %6310 = vrsqrt.f32 %v8446_v54  ;;  %vm2095_vm0 = vcmp.eq.f32.partialorder %v8151_v55, inf  ;;  %v8469_v30 = vadd.f32 %v1479_v23, %v1383_v21  ;;  %vm2097_vm1 = vcmp.eq.f32.partialorder %v8151_v55, 0.0 }
 0x21f   :  { %v2096_v13 = vsel %vm2095_vm0, %v8151_v55, %v2094_v12  ;;  %v2115_v38 = vmul.f32 %v8246_v8, %v8167_v33  ;;  %6312 = vrsqrt.f32 %v8449_v36  ;;  %v2098_v47 = vand.u32 2147483648, %v8151_v55 }
 0x220   :  { %vm2116_vm2 = vcmp.eq.f32.partialorder %v8167_v33, inf  ;;  %v2119_v22 = vand.u32 2147483648, %v8167_v33  ;;  %6314 = vrsqrt.f32 %v8457_v43  ;;  %vm2118_vm3 = vcmp.eq.f32.partialorder %v8167_v33, 0.0 }
 0x221   :  { %v2117_v27 = vsel %vm2116_vm2, %v8167_v33, %v2115_v38  ;;  %v1933_v28 = vmul.f32 %v8234_v42, %v8154_v56  ;;  %6316 = vrsqrt.f32 %v8463_v29  ;;  %v2099_v8 = vsel %vm2097_vm1, %v2098_v47, %v2096_v13 }
 0x222   :  { %v2120_v35 = vsel %vm2118_vm3, %v2119_v22, %v2117_v27  ;;  %vm1934_vm4 = vcmp.eq.f32.partialorder %v8154_v56, inf  ;;  %v8486_v55 = vpop.eup %6306  ;;  %6318 = vrsqrt.f32 %v8466_v53  ;;  %v1937_v51 = vand.u32 2147483648, %v8154_v56 }
 0x223   :  { %v2291_v60 = vpack.c.bf16 %v2120_v35, %v2099_v8  ;;  %v1935_v46 = vsel %vm1934_vm4, %v8154_v56, %v1933_v28  ;;  %vm1936_vm5 = vcmp.eq.f32.partialorder %v8154_v56, 0.0  ;;  %v1954_v33 = vmul.f32 %v8254_v32, %v8170_v61 }
 0x224   :  { %vm1955_vm6 = vcmp.eq.f32.partialorder %v8170_v61, inf  ;;  %vm1957_vm7 = vcmp.eq.f32.partialorder %v8170_v61, 0.0  ;;  %v1938_v42 = vsel %vm1936_vm5, %v1937_v51, %v1935_v46  ;;  %v1958_v44 = vand.u32 2147483648, %v8170_v61 }
 0x225   :  { %2574 = vmatprep.mubr.bf16.mxu0 %v2291_v60  ;;  %v2087_v23 = vmul.f32 %v8189_v41, %v10926_v20  ;;  %vm2088_vm8 = vcmp.eq.f32.partialorder %v10926_v20, inf  ;;  %v1956_v59 = vsel %vm1955_vm6, %v8170_v61, %v1954_v33  ;;  %vm2090_vm9 = vcmp.eq.f32.partialorder %v10926_v20, 0.0 }
 0x226   :  { %v2091_v56 = vand.u32 2147483648, %v10926_v20  ;;  %v2108_v32 = vmul.f32 %v8239_v15, %v8158_v7  ;;  %v1959_v21 = vsel %vm1957_vm7, %v1958_v44, %v1956_v59  ;;  %vm2109_vm10 = vcmp.eq.f32.partialorder %v8158_v7, inf }
 0x227   :  { %v2089_v34 = vsel %vm2088_vm8, %v10926_v20, %v2087_v23  ;;  %v2112_v12 = vand.u32 2147483648, %v8158_v7  ;;  %v2280_v24 = vpack.c.bf16 %v1959_v21, %v1938_v42  ;;  %vm2111_vm11 = vcmp.eq.f32.partialorder %v8158_v7, 0.0 }
 0x228   :  { %v2110_v41 = vsel %vm2109_vm10, %v8158_v7, %v2108_v32  ;;  %v1975_v61 = vmul.f32 %v8222_v57, %v8114_v25  ;;  %6320 = vrsqrt.f32 %v8469_v30  ;;  %v2092_v3 = vsel %vm2090_vm9, %v2091_v56, %v2089_v34 }
 0x229   :  { %v2113_v13 = vsel %vm2111_vm11, %v2112_v12, %v2110_v41  ;;  %vm1976_vm12 = vcmp.eq.f32.partialorder %v8114_v25, inf  ;;  %v8514_v15 = vpop.eup %6308  ;;  %5839 = vmatprep.mubr.bf16.mxu1 %v2280_v24  ;;  %v1979_v22 = vand.u32 2147483648, %v8114_v25  ;;  %v1996_v7 = vmul.f32 %v8244_v31, %v8161_v17 }
 0x22a   :  { %v2290_v38 = vpack.c.bf16 %v2113_v13, %v2092_v3  ;;  %v1977_v47 = vsel %vm1976_vm12, %v8114_v25, %v1975_v61  ;;  %vm1978_vm13 = vcmp.eq.f32.partialorder %v8114_v25, 0.0  ;;  %vm1997_vm14 = vcmp.eq.f32.partialorder %v8161_v17, inf  ;;  %v10927_v3 = vld [vmem:[#allocation47_spill] sm:$0xff]  ;;  %v10928_v13 = vld [vmem:[#allocation30_spill] sm:$0xff] }
 0x22b   :  { %v8520_v27 = vpop.eup %6310  ;;  %v2000_v57 = vand.u32 2147483648, %v8161_v17  ;;  %v2136_v28 = vmul.f32 %v8331_v14, %v8249_v37  ;;  %v1980_v8 = vsel %vm1978_vm13, %v1979_v22, %v1977_v47  ;;  %v1998_v35 = vsel %vm1997_vm14, %v8161_v17, %v1996_v7  ;;  %v10929_v22 = vld [vmem:[#allocation28_spill] sm:$0xff] }
 0x22c   :  { %2575 = vmatmul.mubr.bf16.gmra.mxu0 %v2290_v38  ;;  %vm1999_vm15 = vcmp.eq.f32.partialorder %v8161_v17, 0.0  ;;  %vm2137_vm0 = vcmp.eq.f32.partialorder %v8249_v37, inf  ;;  %v8530_v31 = vpop.eup %6312  ;;  %v2140_v46 = vand.u32 2147483648, %v8249_v37  ;;  %v2157_v51 = vmul.f32 %v8347_v1, %v8267_v4 }
 0x22d   :  { %v2001_v60 = vsel %vm1999_vm15, %v2000_v57, %v1998_v35  ;;  %v2138_v25 = vsel %vm2137_vm0, %v8249_v37, %v2136_v28  ;;  %v8536_v33 = vpop.eup %6314  ;;  %vm2139_vm1 = vcmp.eq.f32.partialorder %v8249_v37, 0.0  ;;  %vm2158_vm2 = vcmp.eq.f32.partialorder %v8267_v4, inf }
 0x22e   :  { %v2283_v14 = vpack.c.bf16 %v2001_v60, %v1980_v8  ;;  %v2161_v17 = vand.u32 2147483648, %v8267_v4  ;;  %v8541_v42 = vpop.eup %6316  ;;  %v2141_v44 = vsel %vm2139_vm1, %v2140_v46, %v2138_v25  ;;  %v2159_v20 = vsel %vm2158_vm2, %v8267_v4, %v2157_v51 }
 0x22f   :  { %vm2160_vm3 = vcmp.eq.f32.partialorder %v8267_v4, 0.0  ;;  %v2017_v23 = vmul.f32 %v8337_v5, %v8252_v6  ;;  %v8547_v1 = vpop.eup %6318  ;;  %vm2018_vm4 = vcmp.eq.f32.partialorder %v8252_v6, inf  ;;  %v2021_v37 = vand.u32 2147483648, %v8252_v6 }
 0x230   :  { %5840 = vmatmul.mubr.bf16.gmra.mxu1 %v2283_v14  ;;  %v2162_v59 = vsel %vm2160_vm3, %v2161_v17, %v2159_v20  ;;  %v2038_v56 = vmul.f32 %v8355_v9, %v8270_v2  ;;  %vm2039_vm5 = vcmp.eq.f32.partialorder %v8270_v2, inf  ;;  %v2042_v4 = vand.u32 2147483648, %v8270_v2 }
 0x231   :  { %v2294_v32 = vpack.c.bf16 %v2162_v59, %v2141_v44  ;;  %v2019_v21 = vsel %vm2018_vm4, %v8252_v6, %v2017_v23  ;;  %vm2020_vm6 = vcmp.eq.f32.partialorder %v8252_v6, 0.0  ;;  %vm2041_vm7 = vcmp.eq.f32.partialorder %v8270_v2, 0.0 }
 0x232   :  { %v2040_v5 = vsel %vm2039_vm5, %v8270_v2, %v2038_v56  ;;  %v2129_v34 = vmul.f32 %v8291_v0, %v8208_v45  ;;  %v2022_v12 = vsel %vm2020_vm6, %v2021_v37, %v2019_v21  ;;  %vm2130_vm8 = vcmp.eq.f32.partialorder %v8208_v45, inf }
 0x233   :  { %2582 = vmatprep.mubr.bf16.mxu0 %v2294_v32  ;;  %v2043_v24 = vsel %vm2041_vm7, %v2042_v4, %v2040_v5  ;;  %v2150_v9 = vmul.f32 %v8342_v62, %v8258_v10  ;;  %v2133_v6 = vand.u32 2147483648, %v8208_v45  ;;  %vm2151_vm9 = vcmp.eq.f32.partialorder %v8258_v10, inf }
 0x234   :  { %v2286_v41 = vpack.c.bf16 %v2043_v24, %v2022_v12  ;;  %v2131_v61 = vsel %vm2130_vm8, %v8208_v45, %v2129_v34  ;;  %vm2132_vm10 = vcmp.eq.f32.partialorder %v8208_v45, 0.0  ;;  %v2154_v0 = vand.u32 2147483648, %v8258_v10 }
 0x235   :  { %v2152_v2 = vsel %vm2151_vm9, %v8258_v10, %v2150_v9  ;;  %v2059_v38 = vmul.f32 %v10928_v13, %v10927_v3  ;;  %v8572_v47 = vpop.eup %6320  ;;  %v2134_v62 = vsel %vm2132_vm10, %v2133_v6, %v2131_v61  ;;  %vm2153_vm11 = vcmp.eq.f32.partialorder %v8258_v10, 0.0  ;;  %v10932_v9 = vld [vmem:[#allocation29_spill] sm:$0xff] }
 0x236   :  { %5843 = vmatprep.mubr.bf16.mxu1 %v2286_v41  ;;  %vm2060_vm12 = vcmp.eq.f32.partialorder %v10927_v3, inf  ;;  %v2080_v7 = vmul.f32 %v8345_v39, %v10929_v22  ;;  %v2155_v57 = vsel %vm2153_vm11, %v2154_v0, %v2152_v2  ;;  %v2063_v28 = vand.u32 2147483648, %v10927_v3  ;;  %v10933_v41 = vld [vmem:[#allocation32_spill] sm:$0xff]  ;;  %v10934_v2 = vld [vmem:[#allocation50_spill] sm:$0xff] }
 0x237   :  { %v2061_v45 = vsel %vm2060_vm12, %v10927_v3, %v2059_v38  ;;  %vm2081_vm13 = vcmp.eq.f32.partialorder %v10929_v22, inf  ;;  %v2293_v8 = vpack.c.bf16 %v2155_v57, %v2134_v62  ;;  %vm2062_vm14 = vcmp.eq.f32.partialorder %v10927_v3, 0.0 }
 0x238   :  { %v2082_v35 = vsel %vm2081_vm13, %v10929_v22, %v2080_v7  ;;  %v2084_v60 = vand.u32 2147483648, %v10929_v22  ;;  %v2064_v10 = vsel %vm2062_vm14, %v2063_v28, %v2061_v45  ;;  %vm2083_vm15 = vcmp.eq.f32.partialorder %v10929_v22, 0.0 }
 0x239   :  { %v2178_v39 = vmul.f32 %v8427_v16, %v8350_v63  ;;  %vm2179_vm0 = vcmp.eq.f32.partialorder %v8350_v63, inf  ;;  %2583 = vmatmul.mubr.bf16.gmra.mxu0 %v2293_v8  ;;  %v2182_v46 = vand.u32 2147483648, %v8350_v63  ;;  %v2199_v51 = vmul.f32 %v8443_v52, %v8368_v19 }
 0x23a   :  { %v2085_v25 = vsel %vm2083_vm15, %v2084_v60, %v2082_v35  ;;  %vm2200_vm1 = vcmp.eq.f32.partialorder %v8368_v19, inf  ;;  %v2203_v44 = vand.u32 2147483648, %v8368_v19  ;;  %v2101_v20 = vmul.f32 %v8433_v26, %v8353_v50  ;;  %v10930_v26 = vld [vmem:[#allocation48_spill] sm:$0xff] }
 0x23b   :  { %v2289_v14 = vpack.c.bf16 %v2085_v25, %v2064_v10  ;;  %v2180_v17 = vsel %vm2179_vm0, %v8350_v63, %v2178_v39  ;;  %vm2181_vm2 = vcmp.eq.f32.partialorder %v8350_v63, 0.0  ;;  %v2201_v16 = vsel %vm2200_vm1, %v8368_v19, %v2199_v51 }
 0x23c   :  { %vm2202_vm3 = vcmp.eq.f32.partialorder %v8368_v19, 0.0  ;;  %vm2102_vm4 = vcmp.eq.f32.partialorder %v8353_v50, inf  ;;  %v2183_v52 = vsel %vm2181_vm2, %v2182_v46, %v2180_v17  ;;  %v2122_v37 = vmul.f32 %v8451_v49, %v8371_v48  ;;  %v10931_v49 = vld [vmem:[#allocation33_spill] sm:$0xff] }
 0x23d   :  { %5844 = vmatmul.mubr.bf16.gmra.mxu1 %v2289_v14  ;;  %v2204_v23 = vsel %vm2202_vm3, %v2203_v44, %v2201_v16  ;;  %v2103_v59 = vsel %vm2102_vm4, %v8353_v50, %v2101_v20  ;;  %v2105_v32 = vand.u32 2147483648, %v8353_v50  ;;  %vm2123_vm5 = vcmp.eq.f32.partialorder %v8371_v48, inf  ;;  %v10937_v16 = vld [vmem:[#allocation31_spill] sm:$0xff] }
 0x23e   :  { %v2297_v56 = vpack.c.bf16 %v2204_v23, %v2183_v52  ;;  %v2126_v63 = vand.u32 2147483648, %v8371_v48  ;;  %vm2104_vm6 = vcmp.eq.f32.partialorder %v8353_v50, 0.0  ;;  %v2124_v19 = vsel %vm2123_vm5, %v8371_v48, %v2122_v37 }
 0x23f   :  { %vm2125_vm7 = vcmp.eq.f32.partialorder %v8371_v48, 0.0  ;;  %v2171_v21 = vmul.f32 %v8390_v18, %v10930_v26  ;;  %v2106_v4 = vsel %vm2104_vm6, %v2105_v32, %v2103_v59  ;;  %vm2172_vm8 = vcmp.eq.f32.partialorder %v10930_v26, inf }
 0x240   :  { %2590 = vmatprep.mubr.bf16.mxu0 %v2297_v56  ;;  %v2127_v5 = vsel %vm2125_vm7, %v2126_v63, %v2124_v19  ;;  %v2192_v34 = vmul.f32 %v10931_v49, %v8359_v40  ;;  %v2175_v50 = vand.u32 2147483648, %v10930_v26  ;;  %vm2193_vm9 = vcmp.eq.f32.partialorder %v8359_v40, inf }
 0x241   :  { %v2292_v12 = vpack.c.bf16 %v2127_v5, %v2106_v4  ;;  %v2173_v24 = vsel %vm2172_vm8, %v10930_v26, %v2171_v21  ;;  %vm2174_vm10 = vcmp.eq.f32.partialorder %v10930_v26, 0.0  ;;  %v2196_v18 = vand.u32 2147483648, %v8359_v40  ;;  %v8682_v5 = vld [vmem:[#allocation2] sm:$0xff]  }
 0x242   :  { %v2194_v48 = vsel %vm2193_vm9, %v8359_v40, %v2192_v34  ;;  %v2143_v61 = vmul.f32 %v10933_v41, %v10932_v9  ;;  %v2176_v6 = vsel %vm2174_vm10, %v2175_v50, %v2173_v24  ;;  %vm2195_vm11 = vcmp.eq.f32.partialorder %v8359_v40, 0.0  ;;  %v8632_v40 = vpop.f32.mrf.mxu0 }
 0x243   :  { %5847 = vmatprep.mubr.bf16.mxu1 %v2292_v12  ;;  %vm2144_vm12 = vcmp.eq.f32.partialorder %v10932_v9, inf  ;;  %v2164_v0 = vmul.f32 %v8441_v11, %v10934_v2  ;;  %v2197_v3 = vsel %vm2195_vm11, %v2196_v18, %v2194_v48  ;;  %v2147_v38 = vand.u32 2147483648, %v10932_v9 }
 0x244   :  { %v2145_v13 = vsel %vm2144_vm12, %v10932_v9, %v2143_v61  ;;  %vm2165_vm13 = vcmp.eq.f32.partialorder %v10934_v2, inf  ;;  %v2296_v62 = vpack.c.bf16 %v2197_v3, %v2176_v6  ;;  %vm2146_vm14 = vcmp.eq.f32.partialorder %v10932_v9, 0.0  ;;  %v5408_v35 = vpop.f32.mrf.mxu0  ;;  %v8702_v6 = vld [vmem:[#allocation2 + $0x10] sm:$0xff]  }
 0x245   :  { %v2166_v22 = vsel %vm2165_vm13, %v10934_v2, %v2164_v0  ;;  %v2168_v7 = vand.u32 2147483648, %v10934_v2  ;;  %v2148_v57 = vsel %vm2146_vm14, %v2147_v38, %v2145_v13  ;;  %vm2167_vm15 = vcmp.eq.f32.partialorder %v10934_v2, 0.0  ;;  %v6667_v3 = vld [vmem:[#allocation8 + $0xa8] ss:$12 sps:$4 sm:$0xff]  }
 0x246   :  { %v2220_v11 = vmul.f32 %v8520_v27, %v8446_v54  ;;  %vm2221_vm0 = vcmp.eq.f32.partialorder %v8446_v54, inf  ;;  %2591 = vmatmul.mubr.bf16.gmra.mxu0 %v2296_v62  ;;  %v2224_v28 = vand.u32 2147483648, %v8446_v54  ;;  %v2241_v8 = vmul.f32 %v8547_v1, %v8466_v53  ;;  %v8650_v1 = vpop.f32.mrf.mxu0  ;;  %v6668_v38 = vld [vmem:[#allocation8 + $0x94] ss:$12 sps:$4 sm:$0xff]  }
 0x247   :  { %v2169_v45 = vsel %vm2167_vm15, %v2168_v7, %v2166_v22  ;;  %vm2242_vm1 = vcmp.eq.f32.partialorder %v8466_v53, inf  ;;  %v2245_v39 = vand.u32 2147483648, %v8466_v53  ;;  %v2185_v27 = vmul.f32 %v8530_v31, %v8449_v36  ;;  %10935 = vst [vmem:[#allocation17_spill] sm:$0xff] %v8650_v1  ;;  %v10941_v62 = vld [vmem:[#allocation49_spill] sm:$0xff]  ;;  %v8715_v22 = vld [vmem:[#allocation2 + $0x18] sm:$0xff]  }
 0x248   :  { %v2295_v60 = vpack.c.bf16 %v2169_v45, %v2148_v57  ;;  %v2222_v10 = vsel %vm2221_vm0, %v8446_v54, %v2220_v11  ;;  %vm2223_vm2 = vcmp.eq.f32.partialorder %v8446_v54, 0.0  ;;  %v2243_v25 = vsel %vm2242_vm1, %v8466_v53, %v2241_v8  ;;  %v6669_v7 = vld [vmem:[#allocation8 + $0x90] ss:$12 sps:$4 sm:$0xff]   ;;  %v6670_v57 = vld [vmem:[#allocation8 + $0x98] ss:$12 sps:$4 sm:$0xff]  }
 0x249   :  { %vm2244_vm3 = vcmp.eq.f32.partialorder %v8466_v53, 0.0  ;;  %vm2186_vm4 = vcmp.eq.f32.partialorder %v8449_v36, inf  ;;  %v2225_v46 = vsel %vm2223_vm2, %v2224_v28, %v2222_v10  ;;  %v2206_v17 = vmul.f32 %v8572_v47, %v8469_v30  ;;  %v8658_v53 = vpop.f32.mrf.mxu0  ;;  %v6671_v45 = vld [vmem:[#allocation8 + $0x7c] ss:$12 sps:$4 sm:$0xff]   ;;  %v6673_v10 = vld [vmem:[#allocation8 + $0x64] ss:$12 sps:$4 sm:$0xff]  }
 0x24a   :  { %5848 = vmatmul.mubr.bf16.gmra.mxu1 %v2295_v60  ;;  %v2246_v51 = vsel %vm2244_vm3, %v2245_v39, %v2243_v25  ;;  %v2187_v14 = vsel %vm2186_vm4, %v8449_v36, %v2185_v27  ;;  %v2189_v31 = vand.u32 2147483648, %v8449_v36  ;;  %vm2207_vm5 = vcmp.eq.f32.partialorder %v8469_v30, inf  ;;  %10936 = vst [vmem:[#allocation51_spill] sm:$0xff] %v8658_v53  ;;  %v6674_v39 = vld [vmem:[#allocation8 + $0x80] ss:$12 sps:$4 sm:$0xff]   ;;  %v8729_v25 = vld [vmem:[#allocation2 + $0x30] sm:$0xff]  }
 0x24b   :  { %v2300_v44 = vpack.c.bf16 %v2246_v51, %v2225_v46  ;;  %v2210_v54 = vand.u32 2147483648, %v8469_v30  ;;  %vm2188_vm6 = vcmp.eq.f32.partialorder %v8449_v36, 0.0  ;;  %v2208_v20 = vsel %vm2207_vm5, %v8469_v30, %v2206_v17  ;;  %v8727_v27 = vld [vmem:[#allocation2 + $0x28] sm:$0xff]  }
 0x24c   :  { %vm2209_vm7 = vcmp.eq.f32.partialorder %v8469_v30, 0.0  ;;  %v2213_v52 = vmul.f32 %v8486_v55, %v10937_v16  ;;  %v2190_v47 = vsel %vm2188_vm6, %v2189_v31, %v2187_v14  ;;  %vm2214_vm8 = vcmp.eq.f32.partialorder %v10937_v16, inf  ;;  %v6675_v46 = vld [vmem:[#allocation8 + $0x60] ss:$12 sps:$4 sm:$0xff]   ;;  %v6676_v51 = vld [vmem:[#allocation8 + $0x68] ss:$12 sps:$4 sm:$0xff]  }
 0x24d   :  { %2598 = vmatprep.mubr.bf16.mxu0 %v2300_v44  ;;  %v2211_v23 = vsel %vm2209_vm7, %v2210_v54, %v2208_v20  ;;  %v2234_v59 = vmul.f32 %v8536_v33, %v8457_v43  ;;  %v5413_v37 = vpop.f32.mrf.mxu0  ;;  %vm2235_vm9 = vcmp.eq.f32.partialorder %v8457_v43, inf  ;;  %v2217_v36 = vand.u32 2147483648, %v10937_v16  ;;  %v6677_v17 = vld [vmem:[#allocation8 + $0x4c] ss:$12 sps:$4 sm:$0xff]   ;;  %v6678_v44 = vld [vmem:[#allocation8 + $0x48] ss:$12 sps:$4 sm:$0xff]  }
 0x24e   :  { %v2298_v56 = vpack.c.bf16 %v2211_v23, %v2190_v47  ;;  %v2215_v32 = vsel %vm2214_vm8, %v10937_v16, %v2213_v52  ;;  %v2238_v55 = vand.u32 2147483648, %v8457_v43  ;;  %v2227_v63 = vmul.f32 %v8514_v15, %v8412_v58  ;;  %v6679_v54 = vld [vmem:[#allocation8 + $0x34] ss:$12 sps:$4 sm:$0xff]   ;;  %v6680_v20 = vld [vmem:[#allocation8 + $0x50] ss:$12 sps:$4 sm:$0xff]  }
 0x24f   :  { %v2236_v30 = vsel %vm2235_vm9, %v8457_v43, %v2234_v59  ;;  %v5414_v19 = vpop.f32.mrf.mxu0  ;;  %vm2216_vm10 = vcmp.eq.f32.partialorder %v10937_v16, 0.0  ;;  %vm2237_vm11 = vcmp.eq.f32.partialorder %v8457_v43, 0.0  ;;  %vm2228_vm12 = vcmp.eq.f32.partialorder %v8412_v58, inf  ;;  %v8737_v52 = vld [vmem:[#allocation2 + $0x38] sm:$0xff]   ;;  %v8741_v23 = vld [vmem:[#allocation2 + $0x40] sm:$0xff]  }
 0x250   :  { %5851 = vmatprep.mubr.bf16.mxu1 %v2298_v56  ;;  %v2248_v33 = vmul.f32 %v8541_v42, %v8463_v29  ;;  %v2218_v26 = vsel %vm2216_vm10, %v2217_v36, %v2215_v32  ;;  %v2239_v21 = vsel %vm2237_vm11, %v2238_v55, %v2236_v30  ;;  %v2229_v4 = vsel %vm2228_vm12, %v8412_v58, %v2227_v63  ;;  %v6681_v59 = vld [vmem:[#allocation8 + $0x30] ss:$12 sps:$4 sm:$0xff]   ;;  %v6684_v36 = vld [vmem:[#allocation8 + $0x18] ss:$12 sps:$4 sm:$0xff]   ;;  %v6686_v63 = vld [vmem:[#allocation8 + $0x20] ss:$12 sps:$4 sm:$0xff]  }
 0x251   :  { %vm2249_vm13 = vcmp.eq.f32.partialorder %v8463_v29, inf  ;;  %v8684_v15 = vpop.f32.mrf.mxu0  ;;  %v2299_v49 = vpack.c.bf16 %v2239_v21, %v2218_v26  ;;  %v2231_v34 = vand.u32 2147483648, %v8412_v58  ;;  %v2252_v12 = vand.u32 2147483648, %v8463_v29  ;;  %v6683_v32 = vld [vmem:[#allocation8 + $0x1c] ss:$12 sps:$4 sm:$0xff]  }
 0x252   :  { %v2250_v43 = vsel %vm2249_vm13, %v8463_v29, %v2248_v33  ;;  %vm2230_vm14 = vcmp.eq.f32.partialorder %v8412_v58, 0.0  ;;  %vm2251_vm15 = vcmp.eq.f32.partialorder %v8463_v29, 0.0  ;;  %v8692_v42 = vadd.f32 %v5408_v35, %v8632_v40  ;;  %v8700_v58 = vld [vmem:[#allocation2 + $0x8] sm:$0xff]   ;;  %v8717_v40 = vld [vmem:[#allocation2 + $0x20] sm:$0xff]   ;;  %v8753_v33 = vld [vmem:[#allocation2 + $0x50] sm:$0xff]  }
 0x253   :  { %v8694_v24 = vadd.f32 %v5414_v19, %v5413_v37  ;;  %v8696_v50 = vpop.f32.mrf.mxu0  ;;  %2599 = vmatmul.mubr.bf16.gmra.mxu0 %v2299_v49  ;;  %v2232_v48 = vsel %vm2230_vm14, %v2231_v34, %v2229_v4  ;;  %v2253_v18 = vsel %vm2251_vm15, %v2252_v12, %v2250_v43  ;;  %v10938_v61 = vmov 0   ;;  %v6672_v35 = vld [vmem:[#allocation8 + $0x78] ss:$12 sps:$4 sm:$0xff]   ;;  %v8751_v19 = vld [vmem:[#allocation2 + $0x48] sm:$0xff]  }
 0x254   :  { %v2301_v9 = vpack.c.bf16 %v2253_v18, %v2232_v48  ;;  %5871 = vmatprep.mubr.bf16.mxu0 %v8682_v5  ;;  %v6682_v37 = vld [vmem:[#allocation8 + $0x38] ss:$12 sps:$4 sm:$0xff]   ;;  %v6687_v26 = vld [vmem:[#allocation8] ss:$12 sps:$4 sm:$0xff]   ;;  %v6688_v4 = vld [vmem:[#allocation8 + $0x8] ss:$12 sps:$4 sm:$0xff]  }
 0x255   :  { %v5419_v41 = vpop.f32.mrf.mxu0  ;;  %v6685_v55 = vld [vmem:[#allocation8 + $0x4] ss:$12 sps:$4 sm:$0xff]   ;;  %v6689_v49 = vld [vmem:[#allocation10 + $0xb8] sm:$0xff]  }
 0x256   :  { %5852 = vmatmul.mubr.bf16.gmra.mxu1 %v2301_v9  ;;  %v6690_v12 = vld [vmem:[#allocation10 + $0x78] sm:$0xff]   ;;  %v8765_v9 = vld [vmem:[#allocation2 + $0x60] sm:$0xff]  }
 0x257   :  { %3024 = vmatprep.mubr.bf16.mxu1 %v10938_v61  ;;  %v5420_v29 = vpop.f32.mrf.mxu0  ;;  %v8763_v18 = vld [vmem:[#allocation2 + $0x58] sm:$0xff]  }
 0x258   :  { %v8704_v2 = vadd.f32 %v5420_v29, %v5419_v41 }
 0x259   :  { %v8706_v0 = vpop.f32.mrf.mxu0 }
 0x25a   :  { %10939 = vst [vmem:[#allocation34_spill] sm:$0xff] %v8706_v0 }
 0x25b   :  { %5872 = vmatmul.mubr.bf16.vlgmr.msra.gmra.mxu0 %v8700_v58  ;;  %v8710_v13 = vpop.f32.mrf.mxu0 }
 0x25c   :  { %3347 = vmatpush1.bf16.msra.mxu0 %v6667_v3  ;;  %5875 = vmatprep.mubr.bf16.mxu0 %v8702_v6  ;;  %10940 = vst [vmem:[#allocation52_spill] sm:$0xff] %v8710_v13  ;;  %v8773_v3 = vld [vmem:[#allocation2 + $0x68] sm:$0xff]  }
 0x25d   :  { %3348 = vmatprep.subr.bf16.mxu0 %v6668_v38 }
 0x25e   :  { %3025 = vmatmul.mubr.bf16.vlgmr.msra.gmra.mxu1 %v8682_v5 }
 0x25f   :  { %5904 = vmatpush3.bf16.msra.mxu1 %v10941_v62  ;;  %3034 = vmatprep.mubr.bf16.mxu1 %v10938_v61  ;;  %v8775_v62 = vld [vmem:[#allocation2 + $0x70] sm:$0xff]  }
 0x260   :  { %3349 = vmatpush1.bf16.msra.mxu0 %v6669_v7  ;;  %5905 = vmatprep.subr.bf16.mxu1 %v6670_v57 }
 0x261   :  { %v5425_v11 = vpop.f32.mrf.mxu0  ;;  %3350 = vmatprep.subr.bf16.mxu0 %v6671_v45  ;;  %v8787_v45 = vld [vmem:[#allocation2 + $0x78] sm:$0xff]  }
 0x263   :  { %v5426_v28 = vpop.f32.mrf.mxu0  ;;  %5876 = vmatmul.mubr.bf16.gmra.mxu0 %v8715_v22  ;;  %5906 = vmatpush3.bf16.msra.mxu1 %v6670_v57 }
 0x264   :  { %v8720_v8 = vadd.f32 %v5426_v28, %v5425_v11  ;;  %5879 = vmatprep.mubr.bf16.mxu0 %v8717_v40  ;;  %3351 = vmatpush1.bf16.msra.mxu0 %v6672_v35 }
 0x265   :  { %v8723_v60 = vpop.f32.mrf.mxu0  ;;  %3352 = vmatprep.subr.bf16.mxu0 %v6673_v10  ;;  %5907 = vmatprep.subr.bf16.mxu1 %v6674_v39 }
 0x266   :  { %3035 = vmatmul.mubr.bf16.gmra.mxu1 %v8700_v58 }
 0x267   :  { %3044 = vmatprep.mubr.bf16.mxu1 %v10938_v61  ;;  %5908 = vmatpush3.bf16.msra.mxu1 %v6674_v39  ;;  %v8731_v14 = vpop.f32.mrf.mxu0 }
 0x268   :  { %3353 = vmatpush1.bf16.msra.mxu0 %v6675_v46  ;;  %5909 = vmatprep.subr.bf16.mxu1 %v6676_v51 }
 0x269   :  { %3354 = vmatprep.subr.bf16.mxu0 %v6677_v17 }
 0x26b   :  { %5880 = vmatmul.mubr.bf16.gmra.mxu0 %v8727_v27  ;;  %5910 = vmatpush3.bf16.msra.mxu1 %v6676_v51  ;;  %v6691_v51 = vld [vmem:[#allocation10 + $0xb0] sm:$0xff]  }
 0x26c   :  { %5883 = vmatprep.mubr.bf16.mxu0 %v8729_v25  ;;  %3355 = vmatpush1.bf16.msra.mxu0 %v6678_v44  ;;  %v5431_v31 = vpop.f32.mrf.mxu0  ;;  %v6692_v44 = vld [vmem:[#allocation10 + $0xa8] sm:$0xff]  }
 0x26d   :  { %3356 = vmatprep.subr.bf16.mxu0 %v6679_v54  ;;  %5911 = vmatprep.subr.bf16.mxu1 %v6680_v20 }
 0x26e   :  { %3045 = vmatmul.mubr.bf16.gmra.mxu1 %v8702_v6  ;;  %v5432_v16 = vpop.f32.mrf.mxu0 }
 0x26f   :  { %3054 = vmatprep.mubr.bf16.mxu1 %v10938_v61  ;;  %5912 = vmatpush3.bf16.msra.mxu1 %v6680_v20  ;;  %v8739_v47 = vadd.f32 %v5432_v16, %v5431_v31 }
 0x270   :  { %3357 = vmatpush1.bf16.msra.mxu0 %v6681_v59  ;;  %5913 = vmatprep.subr.bf16.mxu1 %v6682_v37  ;;  %v8743_v56 = vpop.f32.mrf.mxu0  ;;  %v6693_v59 = vld [vmem:[#allocation10 + $0xa0] sm:$0xff]  }
 0x271   :  { %3358 = vmatprep.subr.bf16.mxu0 %v6683_v32  ;;  %v5418_v32 = vadd.f32 %v8696_v50, %v8684_v15 }
 0x272   :  { %v8747_v30 = vpop.f32.mrf.mxu0 }
 0x273   :  { %5884 = vmatmul.mubr.bf16.gmra.mxu0 %v8737_v52  ;;  %5914 = vmatpush3.bf16.msra.mxu1 %v6682_v37 }
 0x274   :  { %5887 = vmatprep.mubr.bf16.mxu0 %v8741_v23  ;;  %3359 = vmatpush1.bf16.msra.mxu0 %v6684_v36 }
 0x275   :  { %3360 = vmatprep.subr.bf16.mxu0 %v6685_v55  ;;  %5915 = vmatprep.subr.bf16.mxu1 %v6686_v63 }
 0x276   :  { %3055 = vmatmul.mubr.bf16.gmra.mxu1 %v8715_v22 }
 0x277   :  { %3064 = vmatprep.mubr.bf16.mxu1 %v10938_v61  ;;  %5916 = vmatpush3.bf16.msra.mxu1 %v6686_v63 }
 0x278   :  { %3361 = vmatpush1.bf16.msra.mxu0 %v6687_v26  ;;  %v5437_v21 = vpop.f32.mrf.mxu0  ;;  %5917 = vmatprep.subr.bf16.mxu1 %v6688_v4  ;;  %v6694_v26 = vld [vmem:[#allocation10 + $0x98] sm:$0xff]  }
 0x279   :  { %5951 = vmatprep.subr.bf16.mxu0 %v6689_v49 }
 0x27a   :  { %v5438_v34 = vpop.f32.mrf.mxu0 }
 0x27b   :  { %5888 = vmatmul.mubr.bf16.gmra.mxu0 %v8751_v19  ;;  %v8756_v43 = vadd.f32 %v5438_v34, %v5437_v21  ;;  %5918 = vmatpush3.bf16.msra.mxu1 %v6688_v4  ;;  %v6695_v21 = vld [vmem:[#allocation10 + $0x90] sm:$0xff]  }
 0x27c   :  { %5891 = vmatprep.mubr.bf16.mxu0 %v8753_v33  ;;  %5575 = vmatprep.subr.bf16.mxu1 %v6690_v12  ;;  %v8759_v48 = vpop.f32.mrf.mxu0 }
 0x27e   :  { %3065 = vmatmul.mubr.bf16.gmra.mxu1 %v8717_v40  ;;  %v8767_v41 = vpop.f32.mrf.mxu0 }
 0x27f   :  { %3074 = vmatprep.mubr.bf16.mxu1 %v10938_v61 }
 0x283   :  { %5892 = vmatmul.mubr.bf16.gmra.mxu0 %v8763_v18 }
 0x284   :  { %5895 = vmatprep.mubr.bf16.mxu0 %v8765_v9 }
 0x285   :  { %v5443_v29 = vpop.f32.mrf.mxu0 }
 0x286   :  { %3075 = vmatmul.mubr.bf16.gmra.mxu1 %v8727_v27 }
 0x287   :  { %3084 = vmatprep.mubr.bf16.mxu1 %v10938_v61  ;;  %v5444_v38 = vpop.f32.mrf.mxu0 }
 0x288   :  { %v8777_v7 = vadd.f32 %v5444_v38, %v5443_v29 }
 0x289   :  { %v8779_v57 = vpop.f32.mrf.mxu0 }
 0x28b   :  { %5896 = vmatmul.mubr.bf16.gmra.mxu0 %v8773_v3  ;;  %v8783_v11 = vpop.f32.mrf.mxu0 }
 0x28c   :  { %5899 = vmatprep.mubr.bf16.mxu0 %v8775_v62 }
 0x28e   :  { %3085 = vmatmul.mubr.bf16.gmra.mxu1 %v8729_v25 }
 0x28f   :  { %3094 = vmatprep.mubr.bf16.mxu1 %v10938_v61 }
 0x291   :  { %v5449_v28 = vpop.f32.mrf.mxu0 }
 0x293   :  { %5900 = vmatmul.mubr.bf16.gmra.mxu0 %v8787_v45  ;;  %v5450_v35 = vpop.f32.mrf.mxu0 }
 0x294   :  { %3378 = vmatprep.mubr.bf16.mxu0 %v10938_v61  ;;  %v8791_v10 = vadd.f32 %v5450_v35, %v5449_v28  ;;  %v5430_v35 = vadd.f32 %v8731_v14, %v8723_v60 }
 0x295   :  { %v8795_v39 = vpop.f32.mrf.mxu0 }
 0x296   :  { %3095 = vmatmul.mubr.bf16.gmra.mxu1 %v8737_v52 }
 0x297   :  { %3104 = vmatprep.mubr.bf16.mxu1 %v10938_v61  ;;  %v8799_v46 = vpop.f32.mrf.mxu0 }
 0x29b   :  { %3379 = vmatmul.mubr.bf16.vlgmr.msra.gmra.mxu0 %v8682_v5 }
 0x29c   :  { %3388 = vmatprep.mubr.bf16.mxu0 %v10938_v61  ;;  %5952 = vmatpush3.bf16.msra.mxu0 %v6689_v49  ;;  %v6697_v49 = vld [vmem:[#allocation10 + $0x80] sm:$0xff]  }
 0x29d   :  { %5953 = vmatprep.subr.bf16.mxu0 %v6691_v51 }
 0x29e   :  { %3105 = vmatmul.mubr.bf16.gmra.mxu1 %v8741_v23 }
 0x29f   :  { %3114 = vmatprep.mubr.bf16.mxu1 %v10938_v61 }
 0x2a0   :  { %5954 = vmatpush3.bf16.msra.mxu0 %v6691_v51 }
 0x2a1   :  { %v5455_v17 = vpop.f32.mrf.mxu0  ;;  %5955 = vmatprep.subr.bf16.mxu0 %v6692_v44 }
 0x2a3   :  { %3389 = vmatmul.mubr.bf16.gmra.mxu0 %v8700_v58  ;;  %v5456_v31 = vpop.f32.mrf.mxu0 }
 0x2a4   :  { %3398 = vmatprep.mubr.bf16.mxu0 %v10938_v61  ;;  %v8805_v20 = vadd.f32 %v5456_v31, %v5455_v17  ;;  %5956 = vmatpush3.bf16.msra.mxu0 %v6692_v44 }
 0x2a5   :  { %v5825_v54 = vpop.f32.mrf.mxu1  ;;  %5957 = vmatprep.subr.bf16.mxu0 %v6693_v59 }
 0x2a6   :  { %v8808_v16 = vadd.f32 %v5825_v54, %v8694_v24  ;;  %3115 = vmatmul.mubr.bf16.gmra.mxu1 %v8751_v19  ;;  %v8821_v24 = vpop.f32.mrf.mxu0 }
 0x2a7   :  { %v2641_v37 = vpop.f32.mrf.mxu1  ;;  %3124 = vmatprep.mubr.bf16.mxu1 %v10938_v61  ;;  %10945 = vst [vmem:[#allocation18_spill] sm:$0xff] %v8821_v24 }
 0x2a8   :  { %10942 = vst [vmem:[#allocation35_spill] sm:$0xff] %v8808_v16  ;;  %v8815_v36 = vadd.f32 %v8692_v42, %v2641_v37  ;;  %5958 = vmatpush3.bf16.msra.mxu0 %v6693_v59  ;;  %v8825_v15 = vpop.f32.mrf.mxu0  ;;  %v6696_v42 = vld [vmem:[#allocation10 + $0x88] sm:$0xff]  }
 0x2a9   :  { %v5826_v55 = vpop.f32.mrf.mxu1  ;;  %5959 = vmatprep.subr.bf16.mxu0 %v6694_v26  ;;  %10946 = vst [vmem:[#allocation44_spill] sm:$0xff] %v8825_v15 }
 0x2aa   :  { %10943 = vst [vmem:[#allocation53_spill] sm:$0xff] %v8815_v36  ;;  %v8817_v63 = vadd.f32 %v5826_v55, %v5418_v32 }
 0x2ab   :  { %3399 = vmatmul.mubr.bf16.gmra.mxu0 %v8702_v6  ;;  %v8828_v50 = vpop.f32.mrf.mxu1 }
 0x2ac   :  { %10944 = vst [vmem:[#allocation36_spill] sm:$0xff] %v8817_v63  ;;  %3408 = vmatprep.mubr.bf16.mxu0 %v10938_v61  ;;  %5960 = vmatpush3.bf16.msra.mxu0 %v6694_v26  ;;  %10947 = vst [vmem:[#allocation54_spill] sm:$0xff] %v8828_v50  ;;  %v5442_v26 = vadd.f32 %v8767_v41, %v8759_v48 }
 0x2ad   :  { %5961 = vmatprep.subr.bf16.mxu0 %v6695_v21 }
 0x2ae   :  { %3125 = vmatmul.mubr.bf16.gmra.mxu1 %v8753_v33 }
 0x2af   :  { %3134 = vmatprep.mubr.bf16.mxu1 %v10938_v61 }
 0x2b0   :  { %5962 = vmatpush3.bf16.msra.mxu0 %v6695_v21 }
 0x2b1   :  { %5963 = vmatprep.subr.bf16.mxu0 %v6696_v42 }
 0x2b3   :  { %3409 = vmatmul.mubr.bf16.gmra.mxu0 %v8715_v22 }
 0x2b4   :  { %3418 = vmatprep.mubr.bf16.mxu0 %v10938_v61  ;;  %v5461_v4 = vpop.f32.mrf.mxu0  ;;  %5964 = vmatpush3.bf16.msra.mxu0 %v6696_v42 }
 0x2b5   :  { %5965 = vmatprep.subr.bf16.mxu0 %v6697_v49 }
 0x2b6   :  { %3135 = vmatmul.mubr.bf16.gmra.mxu1 %v8763_v18  ;;  %v5462_v34 = vpop.f32.mrf.mxu0 }
 0x2b7   :  { %3144 = vmatprep.mubr.bf16.mxu1 %v10938_v61  ;;  %v8833_v29 = vadd.f32 %v5462_v34, %v5461_v4 }
 0x2b8   :  { %v5829_v12 = vpop.f32.mrf.mxu1  ;;  %5966 = vmatpush3.bf16.msra.mxu0 %v6697_v49 }
 0x2b9   :  { %v8836_v38 = vadd.f32 %v5829_v12, %v8720_v8  ;;  %v8849_v8 = vpop.f32.mrf.mxu0 }
 0x2ba   :  { %v2657_v28 = vpop.f32.mrf.mxu1 }
 0x2bb   :  { %10948 = vst [vmem:[#allocation37_spill] sm:$0xff] %v8836_v38  ;;  %v8841_v51 = vadd.f32 %v8704_v2, %v2657_v28  ;;  %3419 = vmatmul.mubr.bf16.gmra.mxu0 %v8717_v40  ;;  %v8852_v31 = vpop.f32.mrf.mxu0 }
 0x2bc   :  { %v5830_v17 = vpop.f32.mrf.mxu1  ;;  %3428 = vmatprep.mubr.bf16.mxu0 %v10938_v61 }
 0x2bd   :  { %10949 = vst [vmem:[#allocation20_spill] sm:$0xff] %v8841_v51  ;;  %v8845_v44 = vadd.f32 %v5830_v17, %v5430_v35 }
 0x2be   :  { %3145 = vmatmul.mubr.bf16.gmra.mxu1 %v8765_v9  ;;  %v8856_v2 = vpop.f32.mrf.mxu1 }
 0x2bf   :  { %10950 = vst [vmem:[#allocation19_spill] sm:$0xff] %v8845_v44  ;;  %3154 = vmatprep.mubr.bf16.mxu1 %v10938_v61  ;;  %10951 = vst [vmem:[#allocation24_spill] sm:$0xff] %v8856_v2 }
 0x2c3   :  { %3429 = vmatmul.mubr.bf16.gmra.mxu0 %v8727_v27 }
 0x2c4   :  { %3438 = vmatprep.mubr.bf16.mxu0 %v10938_v61 }
 0x2c6   :  { %3155 = vmatmul.mubr.bf16.gmra.mxu1 %v8773_v3 }
 0x2c7   :  { %3164 = vmatprep.mubr.bf16.mxu1 %v10938_v61  ;;  %v5467_v60 = vpop.f32.mrf.mxu0 }
 0x2c9   :  { %v5468_v14 = vpop.f32.mrf.mxu0 }
 0x2ca   :  { %v8859_v59 = vadd.f32 %v5468_v14, %v5467_v60  ;;  %v6698_v60 = vld [vmem:[#allocation10 + $0x38] sm:$0xff]  }
 0x2cb   :  { %v5833_v54 = vpop.f32.mrf.mxu1  ;;  %3439 = vmatmul.mubr.bf16.gmra.mxu0 %v8729_v25  ;;  %v5470_v32 = vpop.f32.mrf.mxu0 }
 0x2cc   :  { %v8863_v37 = vadd.f32 %v5833_v54, %v8756_v43  ;;  %3448 = vmatprep.mubr.bf16.mxu0 %v10938_v61  ;;  %v5436_v43 = vadd.f32 %v8747_v30, %v8743_v56 }
 0x2cd   :  { %v2673_v55 = vpop.f32.mrf.mxu1  ;;  %v5471_v42 = vpop.f32.mrf.mxu0 }
 0x2ce   :  { %10952 = vst [vmem:[#allocation22_spill] sm:$0xff] %v8863_v37  ;;  %v8869_v21 = vadd.f32 %v8739_v47, %v2673_v55  ;;  %3165 = vmatmul.mubr.bf16.gmra.mxu1 %v8775_v62  ;;  %v8872_v49 = vadd.f32 %v5471_v42, %v5470_v32  ;;  %v6699_v32 = vld [vmem:[#allocation10 + $0x70] sm:$0xff]  }
 0x2cf   :  { %v5834_v4 = vpop.f32.mrf.mxu1  ;;  %3174 = vmatprep.mubr.bf16.mxu1 %v10938_v61  ;;  %v6700_v42 = vld [vmem:[#allocation10 + $0x30] sm:$0xff]  }
 0x2d0   :  { %10953 = vst [vmem:[#allocation55_spill] sm:$0xff] %v8869_v21  ;;  %10954 = vst [vmem:[#allocation38_spill] sm:$0xff] %v8872_v49  ;;  %v8877_v34 = vadd.f32 %v5834_v4, %v5442_v26  ;;  %v6704_v4 = vld [vmem:[#allocation10 + $0x20] sm:$0xff]  }
 0x2d1   :  { %v2676_v12 = vpop.f32.mrf.mxu1 }
 0x2d2   :  { %10955 = vst [vmem:[#allocation56_spill] sm:$0xff] %v8877_v34  ;;  %v8879_v28 = vadd.f32 %v5436_v43, %v2676_v12  ;;  %v6705_v43 = vld [vmem:[#allocation10 + $0x58] sm:$0xff]  }
 0x2d3   :  { %3449 = vmatmul.mubr.bf16.gmra.mxu0 %v8737_v52 }
 0x2d4   :  { %10956 = vst [vmem:[#allocation39_spill] sm:$0xff] %v8879_v28  ;;  %3458 = vmatprep.mubr.bf16.mxu0 %v10938_v61 }
 0x2d6   :  { %3175 = vmatmul.mubr.bf16.gmra.mxu1 %v8787_v45 }
 0x2d7   :  { %5919 = vmatprep.mubr.bf16.mxu1 %v8682_v5  ;;  %v5454_v5 = vadd.f32 %v8799_v46, %v8795_v39  ;;  %v6701_v39 = vld [vmem:[#allocation10 + $0x68] sm:$0xff]  }
 0x2d8   :  { %v6702_v46 = vld [vmem:[#allocation10 + $0x28] sm:$0xff]  }
 0x2db   :  { %v5473_v47 = vpop.f32.mrf.mxu0  ;;  %3459 = vmatmul.mubr.bf16.gmra.mxu0 %v8741_v23 }
 0x2dc   :  { %3468 = vmatprep.mubr.bf16.mxu0 %v10938_v61 }
 0x2dd   :  { %v5474_v56 = vpop.f32.mrf.mxu0 }
 0x2de   :  { %v5837_v30 = vpop.f32.mrf.mxu1  ;;  %v8887_v48 = vadd.f32 %v5474_v56, %v5473_v47  ;;  %5920 = vmatmul.mubr.bf16.vlgmr.msra.gmra.mxu1 %v8700_v58 }
 0x2df   :  { %v8891_v41 = vadd.f32 %v5837_v30, %v8791_v10  ;;  %v5476_v35 = vpop.f32.mrf.mxu0  ;;  %5923 = vmatprep.mubr.bf16.mxu1 %v8702_v6  ;;  %5576 = vmatpush3.bf16.msra.mxu1 %v6698_v60  ;;  %v5448_v10 = vadd.f32 %v8783_v11, %v8779_v57  ;;  %v6703_v57 = vld [vmem:[#allocation10 + $0x60] sm:$0xff]   ;;  %v6707_v30 = vld [vmem:[#allocation10 + $0x50] sm:$0xff]   ;;  %v5466_v60 = vadd.f32 %v8852_v31, %v8849_v8  ;;  %v6710_v8 = vld [vmem:[#allocation10 + $0x8] sm:$0xff]  }
 0x2e0   :  { %v2689_v17 = vpop.f32.mrf.mxu1  ;;  %5577 = vmatprep.subr.bf16.mxu1 %v6699_v32  ;;  %v6711_v31 = vld [vmem:[#allocation10 + $0x40] sm:$0xff]  }
 0x2e1   :  { %10957 = vst [vmem:[#allocation57_spill] sm:$0xff] %v8891_v41  ;;  %v8897_v14 = vadd.f32 %v8777_v7, %v2689_v17  ;;  %v5477_v54 = vpop.f32.mrf.mxu0 }
 0x2e2   :  { %v5838_v55 = vpop.f32.mrf.mxu1  ;;  %v8899_v58 = vadd.f32 %v5477_v54, %v5476_v35  ;;  %v6709_v54 = vld [vmem:[#allocation10 + $0x48] sm:$0xff]  }
 0x2e3   :  { %10958 = vst [vmem:[#allocation40_spill] sm:$0xff] %v8897_v14  ;;  %v8903_v26 = vadd.f32 %v5838_v55, %v5454_v5  ;;  %3469 = vmatmul.mubr.bf16.gmra.mxu0 %v8751_v19  ;;  %5578 = vmatpush3.bf16.msra.mxu1 %v6700_v42 }
 0x2e4   :  { %v2692_v6 = vpop.f32.mrf.mxu1  ;;  %3478 = vmatprep.mubr.bf16.mxu0 %v10938_v61  ;;  %5579 = vmatprep.subr.bf16.mxu1 %v6701_v39 }
 0x2e5   :  { %10959 = vst [vmem:[#allocation43_spill] sm:$0xff] %v8903_v26  ;;  %v8907_v7 = vadd.f32 %v5448_v10, %v2692_v6  ;;  %v6712_v6 = vld [vmem:[#allocation10] sm:$0xff]  }
 0x2e6   :  { %5924 = vmatmul.mubr.bf16.gmra.mxu1 %v8715_v22 }
 0x2e7   :  { %10960 = vst [vmem:[#allocation58_spill] sm:$0xff] %v8907_v7  ;;  %5927 = vmatprep.mubr.bf16.mxu1 %v8717_v40  ;;  %5580 = vmatpush3.bf16.msra.mxu1 %v6702_v46  ;;  %v6706_v40 = vld [vmem:[#allocation10 + $0x18] sm:$0xff]  }
 0x2e8   :  { %5581 = vmatprep.subr.bf16.mxu1 %v6703_v57 }
 0x2eb   :  { %3479 = vmatmul.mubr.bf16.gmra.mxu0 %v8753_v33  ;;  %5582 = vmatpush3.bf16.msra.mxu1 %v6704_v4 }
 0x2ec   :  { %v5479_v11 = vpop.f32.mrf.mxu0  ;;  %3488 = vmatprep.mubr.bf16.mxu0 %v10938_v61  ;;  %5583 = vmatprep.subr.bf16.mxu1 %v6705_v43 }
 0x2ee   :  { %v5480_v12 = vpop.f32.mrf.mxu0  ;;  %5928 = vmatmul.mubr.bf16.gmra.mxu1 %v8727_v27 }
 0x2ef   :  { %v5481_v47 = vadd.f32 %v5480_v12, %v5479_v11  ;;  %5931 = vmatprep.mubr.bf16.mxu1 %v8729_v25  ;;  %5584 = vmatpush3.bf16.msra.mxu1 %v6706_v40  ;;  %v6708_v25 = vld [vmem:[#allocation10 + $0x10] sm:$0xff]  }
 0x2f0   :  { %v5841_v22 = vpop.f32.mrf.mxu1  ;;  %5585 = vmatprep.subr.bf16.mxu1 %v6707_v30  ;;  %v8918_v17 = vpop.f32.mrf.mxu0 }
 0x2f1   :  { %v8916_v56 = vadd.f32 %v5841_v22, %v8833_v29  ;;  %10962 = vst [vmem:[#allocation23_spill] sm:$0xff] %v8918_v17 }
 0x2f2   :  { %v2705_v35 = vpop.f32.mrf.mxu1  ;;  %v8929_v32 = vpop.f32.mrf.mxu0 }
 0x2f3   :  { %10961 = vst [vmem:[#allocation16_spill] sm:$0xff] %v8916_v56  ;;  %v8923_v5 = vadd.f32 %v8805_v20, %v2705_v35  ;;  %3489 = vmatmul.mubr.bf16.gmra.mxu0 %v8763_v18  ;;  %5586 = vmatpush3.bf16.msra.mxu1 %v6708_v25  ;;  %10965 = vst [vmem:[#allocation27_spill] sm:$0xff] %v8929_v32 }
 0x2f4   :  { %v5842_v27 = vpop.f32.mrf.mxu1  ;;  %3498 = vmatprep.mubr.bf16.mxu0 %v10938_v61  ;;  %5587 = vmatprep.subr.bf16.mxu1 %v6709_v54 }
 0x2f5   :  { %10963 = vst [vmem:[#allocation26_spill] sm:$0xff] %v8923_v5  ;;  %v8927_v29 = vadd.f32 %v5842_v27, %v5466_v60 }
 0x2f6   :  { %5932 = vmatmul.mubr.bf16.gmra.mxu1 %v8737_v52  ;;  %v8933_v20 = vpop.f32.mrf.mxu1 }
 0x2f7   :  { %10964 = vst [vmem:[#allocation25_spill] sm:$0xff] %v8927_v29  ;;  %5935 = vmatprep.mubr.bf16.mxu1 %v8741_v23  ;;  %5588 = vmatpush3.bf16.msra.mxu1 %v6710_v8  ;;  %10966 = vst [vmem:[#allocation59_spill] sm:$0xff] %v8933_v20 }
 0x2f8   :  { %5589 = vmatprep.subr.bf16.mxu1 %v6711_v31 }
 0x2f9   :  { %v5485_v55 = vpop.f32.mrf.mxu0 }
 0x2fb   :  { %3499 = vmatmul.mubr.bf16.gmra.mxu0 %v8765_v9  ;;  %v5486_v10 = vpop.f32.mrf.mxu0  ;;  %5590 = vmatpush3.bf16.msra.mxu1 %v6712_v6 }
 0x2fc   :  { %3508 = vmatprep.mubr.bf16.mxu0 %v10938_v61  ;;  %v5487_v39 = vadd.f32 %v5486_v10, %v5485_v55 }
 0x2fd   :  { %v5845_v42 = vpop.f32.mrf.mxu1  ;;  %v5488_v46 = vpop.f32.mrf.mxu0 }
 0x2fe   :  { %v8938_v52 = vadd.f32 %v5845_v42, %v8887_v48  ;;  %5936 = vmatmul.mubr.bf16.gmra.mxu1 %v8751_v19 }
 0x2ff   :  { %v2721_v23 = vpop.f32.mrf.mxu1  ;;  %5939 = vmatprep.mubr.bf16.mxu1 %v8753_v33  ;;  %v5489_v43 = vpop.f32.mrf.mxu0 }
 0x300   :  { %10967 = vst [vmem:[#allocation41_spill] sm:$0xff] %v8938_v52  ;;  %v8943_v57 = vadd.f32 %v8859_v59, %v2721_v23  ;;  %v5490_v30 = vadd.f32 %v5489_v43, %v5488_v46 }
 0x301   :  { %v5846_v11 = vpop.f32.mrf.mxu1 }
 0x302   :  { %10968 = vst [vmem:[#allocation21_spill] sm:$0xff] %v8943_v57  ;;  %v8946_v4 = vadd.f32 %v5846_v11, %v8899_v58 }
 0x303   :  { %3509 = vmatmul.mubr.bf16.gmra.mxu0 %v8773_v3  ;;  %v8950_v48 = vpop.f32.mrf.mxu1 }
 0x304   :  { %10969 = vst [vmem:[#allocation60_spill] sm:$0xff] %v8946_v4  ;;  %3518 = vmatprep.mubr.bf16.mxu0 %v10938_v61  ;;  %10970 = vst [vmem:[#allocation42_spill] sm:$0xff] %v8950_v48 }
 0x306   :  { %5940 = vmatmul.mubr.bf16.gmra.mxu1 %v8763_v18  ;;  %v5491_v19 = vpop.f32.mrf.mxu0 }
 0x307   :  { %5943 = vmatprep.mubr.bf16.mxu1 %v8765_v9 }
 0x308   :  { %v5492_v33 = vpop.f32.mrf.mxu0 }
 0x309   :  { %v5493_v59 = vadd.f32 %v5492_v33, %v5491_v19 }
 0x30a   :  { %v5849_v12 = vpop.f32.mrf.mxu1  ;;  %v8957_v40 = vpop.f32.mrf.mxu0 }
 0x30b   :  { %v8954_v22 = vadd.f32 %v5849_v12, %v5487_v39  ;;  %3519 = vmatmul.mubr.bf16.gmra.mxu0 %v8775_v62  ;;  %10972 = vst [vmem:[#allocation46_spill] sm:$0xff] %v8957_v40 }
 0x30c   :  { %v2737_v58 = vpop.f32.mrf.mxu1  ;;  %3528 = vmatprep.mubr.bf16.mxu0 %v10938_v61  ;;  %v8965_v9 = vpop.f32.mrf.mxu0 }
 0x30d   :  { %10971 = vst [vmem:[#allocation45_spill] sm:$0xff] %v8954_v22  ;;  %v8959_v35 = vadd.f32 %v5481_v47, %v2737_v58  ;;  %10975 = vst [vmem:[#allocation28_spill] sm:$0xff] %v8965_v9 }
 0x30e   :  { %v5850_v60 = vpop.f32.mrf.mxu1  ;;  %5944 = vmatmul.mubr.bf16.gmra.mxu1 %v8773_v3 }
 0x30f   :  { %10973 = vst [vmem:[#allocation47_spill] sm:$0xff] %v8959_v35  ;;  %v8963_v18 = vadd.f32 %v5850_v60, %v5490_v30  ;;  %5947 = vmatprep.mubr.bf16.mxu1 %v8775_v62 }
 0x310   :  { %v8968_v27 = vpop.f32.mrf.mxu1 }
 0x311   :  { %10974 = vst [vmem:[#allocation30_spill] sm:$0xff] %v8963_v18  ;;  %10976 = vst [vmem:[#allocation48_spill] sm:$0xff] %v8968_v27 }
 0x313   :  { %v5497_v25 = vpop.f32.mrf.mxu0  ;;  %3529 = vmatmul.mubr.bf16.gmra.mxu0 %v8787_v45 }
 0x315   :  { %v5498_v54 = vpop.f32.mrf.mxu0 }
 0x316   :  { %v5853_v8 = vpop.f32.mrf.mxu1  ;;  %5948 = vmatmul.mubr.bf16.gmra.mxu1 %v8787_v45  ;;  %v5499_v47 = vadd.f32 %v5498_v54, %v5497_v25 }
 0x317   :  { %v5500_v61 = vpop.f32.mrf.mxu0 }
 0x318   :  { %v8972_v31 = vadd.f32 %v5853_v8, %v5499_v47  ;;  %v2753_v3 = vpop.f32.mrf.mxu1 }
 0x319   :  { %v8974_v55 = vadd.f32 %v5493_v59, %v2753_v3  ;;  %v5501_v10 = vpop.f32.mrf.mxu0 }
 0x31a   :  { %10977 = vst [vmem:[#allocation33_spill] sm:$0xff] %v8972_v31  ;;  %v5854_v6 = vpop.f32.mrf.mxu1  ;;  %v5502_v42 = vadd.f32 %v5501_v10, %v5500_v61 }
 0x31b   :  { %10978 = vst [vmem:[#allocation29_spill] sm:$0xff] %v8974_v55  ;;  %v5873_v62 = vpop.f32.mrf.mxu0 }
 0x31c   :  { %v8976_v39 = vadd.f32 %v5854_v6, %v5502_v42  ;;  %v8978_v23 = vpop.f32.mrf.mxu1  ;;  %v9048_v0 = vmul.f32 %v5873_v62, %v5873_v62 }
 0x31d   :  { %10980 = vst [vmem:[#allocation50_spill] sm:$0xff] %v8978_v23  ;;  %v3219_v46 = vpop.f32.mrf.mxu0 }
 0x31e   :  { %10979 = vst [vmem:[#allocation32_spill] sm:$0xff] %v8976_v39  ;;  %v3026_v11 = vpop.f32.mrf.mxu1  ;;  %v9050_v63 = vmul.f32 %v3219_v46, %v3219_v46 }
 0x31f   :  { %v5874_v43 = vpop.f32.mrf.mxu0  ;;  %v3700_v36 = vmul.f32 %v3026_v11, %v3026_v11 }
 0x320   :  { %v3028_v19 = vpop.f32.mrf.mxu1  ;;  %10985 = vst [vmem:[#allocation63_spill] sm:$0xff] %v9050_v63  ;;  %v9054_v53 = vmul.f32 %v5874_v43, %v5874_v43 }
 0x321   :  { %v3222_v45 = vpop.f32.mrf.mxu0  ;;  %v3701_v16 = vmul.f32 %v3028_v19, %v3028_v19 }
 0x322   :  { %v3030_v33 = vpop.f32.mrf.mxu1  ;;  %v9056_v1 = vmul.f32 %v3222_v45, %v3222_v45 }
 0x323   :  { %v5877_v12 = vpop.f32.mrf.mxu0 }
 0x324   :  { %v3032_v58 = vpop.f32.mrf.mxu1 }
 0x325   :  { %v3235_v30 = vpop.f32.mrf.mxu0 }
 0x326   :  { %v3036_v60 = vpop.f32.mrf.mxu1  ;;  %v9066_v62 = vmul.f32 %v3235_v30, %v3235_v30 }
 0x327   :  { %v5878_v59 = vpop.f32.mrf.mxu0  ;;  %v9070_v63 = vmul.f32 %v3036_v60, %v3036_v60 }
 0x328   :  { %v3038_v25 = vpop.f32.mrf.mxu1  ;;  %10986 = vst [vmem:[#allocation64_spill] sm:$0xff] %v9066_v62  ;;  %v9074_v43 = vmul.f32 %v5878_v59, %v5878_v59 }
 0x329   :  { %v3238_v54 = vpop.f32.mrf.mxu0  ;;  %v9072_v11 = vmul.f32 %v3038_v25, %v3038_v25 }
 0x32a   :  { %v3040_v8 = vpop.f32.mrf.mxu1  ;;  %10987 = vst [vmem:[#allocation65_spill] sm:$0xff] %v9074_v43  ;;  %v9076_v19 = vmul.f32 %v3238_v54, %v3238_v54 }
 0x32b   :  { %v5881_v47 = vpop.f32.mrf.mxu0 }
 0x32c   :  { %v3042_v61 = vpop.f32.mrf.mxu1  ;;  %10988 = vst [vmem:[#allocation66_spill] sm:$0xff] %v9076_v19 }
 0x32d   :  { %v3251_v3 = vpop.f32.mrf.mxu0 }
 0x32e   :  { %v3046_v10 = vpop.f32.mrf.mxu1  ;;  %v9086_v30 = vmul.f32 %v3251_v3, %v3251_v3 }
 0x32f   :  { %v8980_v6 = vpop.f32.mrf.mxu0  ;;  %v9090_v60 = vmul.f32 %v3046_v10, %v3046_v10 }
 0x330   :  { %v3048_v42 = vpop.f32.mrf.mxu1  ;;  %10990 = vst [vmem:[#allocation68_spill] sm:$0xff] %v9086_v30  ;;  %v9096_v59 = vmul.f32 %v8980_v6, %v8980_v6 }
 0x331   :  { %v3254_v39 = vpop.f32.mrf.mxu0  ;;  %v9092_v25 = vmul.f32 %v3048_v42, %v3048_v42 }
 0x332   :  { %v3050_v23 = vpop.f32.mrf.mxu1  ;;  %10991 = vst [vmem:[#allocation69_spill] sm:$0xff] %v9096_v59  ;;  %v9098_v54 = vmul.f32 %v3254_v39, %v3254_v39 }
 0x333   :  { %v8982_v55 = vpop.f32.mrf.mxu0 }
 0x334   :  { %v3052_v31 = vpop.f32.mrf.mxu1  ;;  %10992 = vst [vmem:[#allocation70_spill] sm:$0xff] %v9098_v54  ;;  %v9108_v3 = vmul.f32 %v8982_v55, %v8982_v55 }
 0x335   :  { %v8984_v9 = vpop.f32.mrf.mxu0 }
 0x336   :  { %v8986_v40 = vpop.f32.mrf.mxu1  ;;  %10993 = vst [vmem:[#allocation71_spill] sm:$0xff] %v9108_v3  ;;  %v9112_v10 = vmul.f32 %v8984_v9, %v8984_v9 }
 0x337   :  { %v8988_v18 = vpop.f32.mrf.mxu0  ;;  %v9116_v6 = vmul.f32 %v8986_v40, %v8986_v40 }
 0x338   :  { %v8990_v27 = vpop.f32.mrf.mxu1  ;;  %10994 = vst [vmem:[#allocation72_spill] sm:$0xff] %v9112_v10 }
 0x339   :  { %v8992_v35 = vpop.f32.mrf.mxu0  ;;  %v9120_v39 = vmul.f32 %v8990_v27, %v8990_v27 }
 0x33a   :  { %v8994_v22 = vpop.f32.mrf.mxu1  ;;  %v9138_v40 = vmul.f32 %v8992_v35, %v8992_v35 }
 0x33b   :  { %v8996_v32 = vpop.f32.mrf.mxu0  ;;  %v9130_v9 = vmul.f32 %v8994_v22, %v8994_v22 }
 0x33c   :  { %v8998_v17 = vpop.f32.mrf.mxu1  ;;  %10996 = vst [vmem:[#allocation74_spill] sm:$0xff] %v9138_v40  ;;  %v9142_v27 = vmul.f32 %v8996_v32, %v8996_v32 }
 0x33d   :  { %v9000_v4 = vpop.f32.mrf.mxu0  ;;  %v9134_v10 = vmul.f32 %v8998_v17, %v8998_v17 }
 0x33e   :  { %v9002_v49 = vpop.f32.mrf.mxu1  ;;  %10997 = vst [vmem:[#allocation75_spill] sm:$0xff] %v9142_v27  ;;  %v9150_v22 = vmul.f32 %v9000_v4, %v9000_v4 }
 0x33f   :  { %v9004_v48 = vpop.f32.mrf.mxu0 }
 0x340   :  { %v9006_v57 = vpop.f32.mrf.mxu1  ;;  %10998 = vst [vmem:[#allocation76_spill] sm:$0xff] %v9150_v22 }
 0x341   :  { %v9008_v52 = vpop.f32.mrf.mxu0  ;;  %v9156_v35 = vmul.f32 %v9006_v57, %v9006_v57 }
 0x342   :  { %v9010_v29 = vpop.f32.mrf.mxu1  ;;  %v9168_v4 = vmul.f32 %v9008_v52, %v9008_v52 }
 0x343   :  { %v9012_v5 = vpop.f32.mrf.mxu0  ;;  %v9160_v32 = vmul.f32 %v9010_v29, %v9010_v29 }
 0x344   :  { %v9014_v20 = vpop.f32.mrf.mxu1  ;;  %11000 = vst [vmem:[#allocation78_spill] sm:$0xff] %v9168_v4  ;;  %v9176_v57 = vmul.f32 %v9012_v5, %v9012_v5 }
 0x345   :  { %v9016_v56 = vpop.f32.mrf.mxu0 }
 0x346   :  { %v9018_v15 = vpop.f32.mrf.mxu1  ;;  %11001 = vst [vmem:[#allocation79_spill] sm:$0xff] %v9176_v57  ;;  %v9180_v29 = vmul.f32 %v9016_v56, %v9016_v56 }
 0x347   :  { %v9020_v24 = vpop.f32.mrf.mxu0  ;;  %v9185_v52 = vmul.f32 %v9018_v15, %v9018_v15 }
 0x348   :  { %v9022_v26 = vpop.f32.mrf.mxu1  ;;  %11002 = vst [vmem:[#allocation80_spill] sm:$0xff] %v9180_v29 }
 0x349   :  { %v9024_v7 = vpop.f32.mrf.mxu0  ;;  %v9195_v57 = vmul.f32 %v9022_v26, %v9022_v26 }
 0x34a   :  { %v9026_v14 = vpop.f32.mrf.mxu1  ;;  %v9203_v15 = vmul.f32 %v9024_v7, %v9024_v7 }
 0x34b   :  { %v9028_v41 = vpop.f32.mrf.mxu0  ;;  %v9199_v56 = vmul.f32 %v9026_v14, %v9026_v14 }
 0x34c   :  { %v9030_v34 = vpop.f32.mrf.mxu1  ;;  %11004 = vst [vmem:[#allocation82_spill] sm:$0xff] %v9203_v15 }
 0x34d   :  { %v9032_v28 = vpop.f32.mrf.mxu0 }
 0x34e   :  { %v9034_v21 = vpop.f32.mrf.mxu1 }
 0x34f   :  { %v9036_v37 = vpop.f32.mrf.mxu0  ;;  %v9219_v7 = vmul.f32 %v9034_v21, %v9034_v21 }
 0x350   :  { %10981 = vst [vmem:[#allocation31_spill] sm:$0xff] %v9036_v37  ;;  %v9038_v44 = vpop.f32.mrf.mxu1 }
 0x351   :  { %v9040_v51 = vpop.f32.mrf.mxu0 }
 0x352   :  { %10982 = vst [vmem:[#allocation49_spill] sm:$0xff] %v9040_v51  ;;  %v9042_v38 = vpop.f32.mrf.mxu1  ;;  %v9060_v51 = vmul.f32 %v3030_v33, %v3030_v33  ;;  %v9080_v33 = vmul.f32 %v3040_v8, %v3040_v8 }
 0x353   :  { %10983 = vst [vmem:[#allocation61_spill] sm:$0xff] %v9042_v38  ;;  %v9044_v2 = vpop.f32.mrf.mxu0  ;;  %v9062_v38 = vmul.f32 %v3032_v58, %v3032_v58  ;;  %v9082_v58 = vmul.f32 %v3042_v61, %v3042_v61  ;;  %v9102_v61 = vmul.f32 %v3050_v23, %v3050_v23 }
 0x354   :  { %10984 = vst [vmem:[#allocation62_spill] sm:$0xff] %v9044_v2  ;;  %v9046_v13 = vpop.f32.mrf.mxu1  ;;  %v9064_v2 = vmul.f32 %v5877_v12, %v5877_v12  ;;  %v9084_v12 = vmul.f32 %v5881_v47, %v5881_v47  ;;  %v9104_v47 = vmul.f32 %v3052_v31, %v3052_v31  ;;  %v9124_v31 = vmul.f32 %v8988_v18, %v8988_v18 }
 0x355   :  { %v9052_v50 = vpop.f32.mrf.mxu0 }
 0x356   :  { %v9058_v37 = vpop.f32.mrf.mxu1  ;;  %10989 = vst [vmem:[#allocation67_spill] sm:$0xff] %v9084_v12  ;;  %10995 = vst [vmem:[#allocation73_spill] sm:$0xff] %v9124_v31 }
 0x357   :  { %v9068_v46 = vpop.f32.mrf.mxu0 }
 0x358   :  { %v9078_v45 = vpop.f32.mrf.mxu1 }
 0x359   :  { %v9088_v62 = vpop.f32.mrf.mxu0 }
 0x35a   :  { %v9100_v8 = vpop.f32.mrf.mxu1 }
 0x35b   :  { %v3380_v42 = vpop.f32.mrf.mxu0 }
 0x35c   :  { %v9126_v23 = vpop.f32.mrf.mxu1  ;;  %v3796_v55 = vmul.f32 %v3380_v42, %v3380_v42  ;;  %v9146_v42 = vmul.f32 %v9002_v49, %v9002_v49  ;;  %v9164_v49 = vmul.f32 %v9004_v48, %v9004_v48 }
 0x35d   :  { %v3382_v18 = vpop.f32.mrf.mxu0 }
 0x35e   :  { %v3106_v31 = vpop.f32.mrf.mxu1  ;;  %v9152_v17 = vadd.f32 %v3796_v55, %v3700_v36  ;;  %v3797_v3 = vmul.f32 %v3382_v18, %v3382_v18  ;;  %10999 = vst [vmem:[#allocation77_spill] sm:$0xff] %v9164_v49  ;;  %v9172_v36 = vmul.f32 %v9014_v20, %v9014_v20  ;;  %v9189_v55 = vmul.f32 %v9020_v24, %v9020_v24 }
 0x35f   :  { %v3384_v22 = vpop.f32.mrf.mxu0  ;;  %v9211_v24 = vmul.f32 %v9028_v41, %v9028_v41 }
 0x360   :  { %6322 = vrsqrt.f32 %v9152_v17  ;;  %v3108_v48 = vpop.f32.mrf.mxu1  ;;  %11003 = vst [vmem:[#allocation81_spill] sm:$0xff] %v9189_v55  ;;  %v9191_v20 = vadd.f32 %v3797_v3, %v3701_v16  ;;  %v3799_v18 = vmul.f32 %v3384_v22, %v3384_v22  ;;  %v9207_v16 = vmul.f32 %v9030_v34, %v9030_v34 }
 0x361   :  { %v3386_v5 = vpop.f32.mrf.mxu0  ;;  %11005 = vst [vmem:[#allocation83_spill] sm:$0xff] %v9211_v24  ;;  %v9223_v3 = vmul.f32 %v9032_v28, %v9032_v28  ;;  %v11009_v24 = vld [vmem:[#allocation49_spill] sm:$0xff]  ;;  %vm3990_vm0 = vcmp.eq.f32.partialorder %v9152_v17, inf  ;;  %vm3992_vm2 = vcmp.eq.f32.partialorder %v9152_v17, 0.0 }
 0x362   :  { %v3110_v29 = vpop.f32.mrf.mxu1  ;;  %v3800_v4 = vmul.f32 %v3386_v5, %v3386_v5  ;;  %6324 = vrsqrt.f32 %v9191_v20  ;;  %v9215_v26 = vadd.f32 %v3799_v18, %v9060_v51  ;;  %v9230_v5 = vmul.f32 %v9038_v44, %v9038_v44  ;;  %v11007_v51 = vld [vmem:[#allocation31_spill] sm:$0xff] }
 0x363   :  { %v3390_v14 = vpop.f32.mrf.mxu0  ;;  %11006 = vst [vmem:[#allocation84_spill] sm:$0xff] %v9223_v3  ;;  %v9234_v18 = vmul.f32 %v11007_v51, %v11007_v51  ;;  %v9238_v21 = vmul.f32 %v11009_v24, %v11009_v24  ;;  %v11011_v3 = vld [vmem:[#allocation61_spill] sm:$0xff]  ;;  %v9251_v51 = vmul.f32 %v9046_v13, %v9046_v13  ;;  %v9255_v24 = vmul.f32 %v9058_v37, %v9058_v37 }
 0x364   :  { %v3112_v34 = vpop.f32.mrf.mxu1  ;;  %v9226_v22 = vadd.f32 %v3800_v4, %v9062_v38  ;;  %v3802_v41 = vmul.f32 %v3390_v14, %v3390_v14  ;;  %6326 = vrsqrt.f32 %v9215_v26  ;;  %v9243_v38 = vmul.f32 %v11011_v3, %v11011_v3 }
 0x365   :  { %11008 = vst [vmem:[#allocation31_spill] sm:$0xff] %v9234_v18  ;;  %11010 = vst [vmem:[#allocation49_spill] sm:$0xff] %v9238_v21  ;;  %v3392_v28 = vpop.f32.mrf.mxu0  ;;  %v11012_v21 = vld [vmem:[#allocation62_spill] sm:$0xff]  ;;  %v9263_v3 = vmul.f32 %v9052_v50, %v9052_v50  ;;  %v9279_v50 = vmul.f32 %v9100_v8, %v9100_v8  ;;  %vm3997_vm1 = vcmp.eq.f32.partialorder %v9191_v20, inf  ;;  %vm4011_vm3 = vcmp.eq.f32.partialorder %v9215_v26, inf }
 0x366   :  { %6328 = vrsqrt.f32 %v9226_v22  ;;  %v3116_v4 = vpop.f32.mrf.mxu1  ;;  %v9247_v44 = vadd.f32 %v3802_v41, %v9070_v63  ;;  %v3803_v14 = vmul.f32 %v3392_v28, %v3392_v28  ;;  %v9259_v18 = vmul.f32 %v11012_v21, %v11012_v21 }
 0x367   :  { %11014 = vst [vmem:[#allocation62_spill] sm:$0xff] %v9263_v3  ;;  %v3394_v15 = vpop.f32.mrf.mxu0  ;;  %v9267_v63 = vmul.f32 %v9068_v46, %v9068_v46  ;;  %v9275_v21 = vmul.f32 %v9078_v45, %v9078_v45  ;;  %v9283_v28 = vmul.f32 %v9126_v23, %v9126_v23  ;;  %v9287_v46 = vmul.f32 %v9088_v62, %v9088_v62 }
 0x368   :  { %11013 = vst [vmem:[#allocation61_spill] sm:$0xff] %v9259_v18  ;;  %6330 = vrsqrt.f32 %v9247_v44  ;;  %v3118_v13 = vpop.f32.mrf.mxu1  ;;  %v9271_v41 = vadd.f32 %v3803_v14, %v9072_v11  ;;  %v3805_v37 = vmul.f32 %v3394_v15, %v3394_v15  ;;  %v9289_v11 = vmul.f32 %v3106_v31, %v3106_v31 }
 0x369   :  { %11015 = vst [vmem:[#allocation85_spill] sm:$0xff] %v9267_v63  ;;  %11016 = vst [vmem:[#allocation86_spill] sm:$0xff] %v9287_v46  ;;  %v3396_v63 = vpop.f32.mrf.mxu0  ;;  %v9297_v23 = vmul.f32 %v3108_v48, %v3108_v48  ;;  %v9299_v3 = vmul.f32 %v3110_v29, %v3110_v29  ;;  %vm4013_vm4 = vcmp.eq.f32.partialorder %v9215_v26, 0.0  ;;  %v4014_v29 = vand.u32 2147483648, %v9215_v26 }
 0x36a   :  { %6332 = vrsqrt.f32 %v9271_v41  ;;  %v3120_v15 = vpop.f32.mrf.mxu1  ;;  %v9293_v45 = vadd.f32 %v3805_v37, %v9080_v33  ;;  %v3806_v14 = vmul.f32 %v3396_v63, %v3396_v63  ;;  %v9311_v48 = vmul.f32 %v3112_v34, %v3112_v34 }
 0x36b   :  { %v3400_v62 = vpop.f32.mrf.mxu0  ;;  %v9313_v8 = vmul.f32 %v3116_v4, %v3116_v4  ;;  %vm3999_vm5 = vcmp.eq.f32.partialorder %v9191_v20, 0.0  ;;  %vm4018_vm6 = vcmp.eq.f32.partialorder %v9226_v22, inf  ;;  %vm4020_vm7 = vcmp.eq.f32.partialorder %v9226_v22, 0.0 }
 0x36c   :  { %6334 = vrsqrt.f32 %v9293_v45  ;;  %v3122_v31 = vpop.f32.mrf.mxu1  ;;  %v9303_v46 = vadd.f32 %v3806_v14, %v9082_v58  ;;  %v3808_v18 = vmul.f32 %v3400_v62, %v3400_v62  ;;  %v4021_v34 = vand.u32 2147483648, %v9226_v22 }
 0x36d   :  { %v6323_v63 = vpop.eup %6322  ;;  %v3402_v37 = vpop.f32.mrf.mxu0  ;;  %v9324_v49 = vmul.f32 %v3118_v13, %v3118_v13  ;;  %vm4032_vm8 = vcmp.eq.f32.partialorder %v9247_v44, inf  ;;  %v9336_v30 = vmul.f32 %v3122_v31, %v3122_v31  ;;  %vm4039_vm9 = vcmp.eq.f32.partialorder %v9271_v41, inf }
 0x36e   :  { %6336 = vrsqrt.f32 %v9303_v46  ;;  %v3126_v58 = vpop.f32.mrf.mxu1  ;;  %v9317_v14 = vadd.f32 %v3808_v18, %v9090_v60  ;;  %v3809_v62 = vmul.f32 %v3402_v37, %v3402_v37  ;;  %v3989_v33 = vmul.f32 %v6323_v63, %v9152_v17 }
 0x36f   :  { %v3404_v55 = vpop.f32.mrf.mxu0  ;;  %v6325_v4 = vpop.eup %6324  ;;  %v9330_v63 = vmul.f32 %v3120_v15, %v3120_v15  ;;  %11017 = vst [vmem:[#allocation87_spill] sm:$0xff] %v9336_v30  ;;  %v9346_v59 = vmul.f32 %v3126_v58, %v3126_v58  ;;  %vm4034_vm10 = vcmp.eq.f32.partialorder %v9247_v44, 0.0  ;;  %vm4053_vm11 = vcmp.eq.f32.partialorder %v9293_v45, inf }
 0x370   :  { %v3128_v27 = vpop.f32.mrf.mxu1  ;;  %v9327_v40 = vadd.f32 %v3809_v62, %v9092_v25  ;;  %v3811_v60 = vmul.f32 %v3404_v55, %v3404_v55  ;;  %6338 = vrsqrt.f32 %v9317_v14  ;;  %v3996_v54 = vmul.f32 %v6325_v4, %v9191_v20 }
 0x371   :  { %v3406_v37 = vpop.f32.mrf.mxu0  ;;  %v6327_v13 = vpop.eup %6326  ;;  %v3991_v18 = vsel %vm3990_vm0, %v9152_v17, %v3989_v33  ;;  %11018 = vst [vmem:[#allocation88_spill] sm:$0xff] %v9346_v59  ;;  %v9350_v19 = vmul.f32 %v3128_v27, %v3128_v27  ;;  %vm4041_vm12 = vcmp.eq.f32.partialorder %v9271_v41, 0.0  ;;  %vm4060_vm13 = vcmp.eq.f32.partialorder %v9303_v46, inf }
 0x372   :  { %6340 = vrsqrt.f32 %v9327_v40  ;;  %v3130_v25 = vpop.f32.mrf.mxu1  ;;  %v9340_v55 = vadd.f32 %v3811_v60, %v9102_v61  ;;  %v3812_v15 = vmul.f32 %v3406_v37, %v3406_v37  ;;  %v4010_v4 = vmul.f32 %v6327_v13, %v9215_v26 }
 0x373   :  { %v6329_v62 = vpop.eup %6328  ;;  %v3410_v12 = vpop.f32.mrf.mxu0  ;;  %11019 = vst [vmem:[#allocation89_spill] sm:$0xff] %v9350_v19  ;;  %v11020_v37 = vand.u32 2147483648, %v9152_v17  ;;  %vm4055_vm14 = vcmp.eq.f32.partialorder %v9293_v45, 0.0  ;;  %vm4062_vm15 = vcmp.eq.f32.partialorder %v9303_v46, 0.0  ;;  %vm4081_vm0 = vcmp.eq.f32.partialorder %v9327_v40, inf }
 0x374   :  { %v3132_v30 = vpop.f32.mrf.mxu1  ;;  %v9353_v61 = vadd.f32 %v3812_v15, %v9104_v47  ;;  %v3814_v60 = vmul.f32 %v3410_v12, %v3410_v12  ;;  %v4012_v58 = vsel %vm4011_vm3, %v9215_v26, %v4010_v4  ;;  %6342 = vrsqrt.f32 %v9340_v55 }
 0x375   :  { %v6331_v33 = vpop.eup %6330  ;;  %v3412_v27 = vpop.f32.mrf.mxu0  ;;  %v3998_v47 = vsel %vm3997_vm1, %v9191_v20, %v3996_v54  ;;  %v4017_v12 = vmul.f32 %v6329_v62, %v9226_v22  ;;  %v3994_v31 = vsel %vm3992_vm2, %v11020_v37, %v3991_v18  ;;  %v4015_v4 = vsel %vm4013_vm4, %v4014_v29, %v4012_v58 }
 0x376   :  { %6344 = vrsqrt.f32 %v9353_v61  ;;  %v3136_v13 = vpop.f32.mrf.mxu1  ;;  %v3815_v15 = vmul.f32 %v3412_v27, %v3412_v27  ;;  %v9376_v62 = vmul.f32 %v3130_v25, %v3130_v25  ;;  %v9379_v19 = vadd.f32 %v3814_v60, %v9116_v6 }
 0x377   :  { %v6333_v54 = vpop.eup %6332  ;;  %v3414_v27 = vpop.f32.mrf.mxu0  ;;  %v4019_v17 = vsel %vm4018_vm6, %v9226_v22, %v4017_v12  ;;  %v4031_v26 = vmul.f32 %v6331_v33, %v9247_v44  ;;  %v11022_v25 = vand.u32 2147483648, %v9191_v20  ;;  %v4660_v43 = vpack.c.bf16 %v4015_v4, %v3994_v31 }
 0x378   :  { %11021 = vst [vmem:[#allocation90_spill] sm:$0xff] %v9376_v62  ;;  %v3138_v29 = vpop.f32.mrf.mxu1  ;;  %v9387_v18 = vadd.f32 %v3815_v15, %v9120_v39  ;;  %v3817_v37 = vmul.f32 %v3414_v27, %v3414_v27  ;;  %v4022_v60 = vsel %vm4020_vm7, %v4021_v34, %v4019_v17  ;;  %v9395_v62 = vmul.f32 %v3132_v30, %v3132_v30 }
 0x379   :  { %v4001_v6 = vsel %vm3999_vm5, %v11022_v25, %v3998_v47  ;;  %v6335_v58 = vpop.eup %6334  ;;  %v3416_v12 = vpop.f32.mrf.mxu0  ;;  %v4038_v33 = vmul.f32 %v6333_v54, %v9271_v41  ;;  %v4033_v20 = vsel %vm4032_vm8, %v9247_v44, %v4031_v26  ;;  %v9406_v22 = vmul.f32 %v3136_v13, %v3136_v13 }
 0x37a   :  { %v4661_v59 = vpack.c.bf16 %v4022_v60, %v4001_v6  ;;  %6346 = vrsqrt.f32 %v9387_v18  ;;  %v3140_v39 = vpop.f32.mrf.mxu1  ;;  %v9400_v15 = vadd.f32 %v3817_v37, %v9130_v9  ;;  %v3818_v27 = vmul.f32 %v3416_v12, %v3416_v12 }
 0x37b   :  { %v6337_v30 = vpop.eup %6336  ;;  %6348 = vrsqrt.f32 %v9379_v19  ;;  %v3420_v34 = vpop.f32.mrf.mxu0  ;;  %v4052_v31 = vmul.f32 %v6335_v58, %v9293_v45  ;;  %v4084_v47 = vand.u32 2147483648, %v9327_v40  ;;  %v9411_v9 = vmul.f32 %v3138_v29, %v3138_v29 }
 0x37c   :  { %4740 = vmatprep.mubr.bf16.mxu1 %v4661_v59  ;;  %v3142_v4 = vpop.f32.mrf.mxu1  ;;  %v9414_v54 = vadd.f32 %v3818_v27, %v9134_v10  ;;  %v3820_v17 = vmul.f32 %v3420_v34, %v3420_v34  ;;  %v4040_v13 = vsel %vm4039_vm9, %v9271_v41, %v4038_v33  ;;  %vm4074_vm1 = vcmp.eq.f32.partialorder %v9317_v14, inf }
 0x37d   :  { %4741 = vmatmul.mubr.bf16.vlgmr.msra.gmra.mxu1 %v4660_v43  ;;  %6350 = vrsqrt.f32 %v9400_v15  ;;  %v3422_v59 = vpop.f32.mrf.mxu0  ;;  %v4059_v26 = vmul.f32 %v6337_v30, %v9303_v46  ;;  %v11023_v29 = vand.u32 2147483648, %v9247_v44  ;;  %v4054_v43 = vsel %vm4053_vm11, %v9293_v45, %v4052_v31  ;;  %v6339_v10 = vpop.eup %6338 }
 0x37e   :  { %vm4083_vm2 = vcmp.eq.f32.partialorder %v9327_v40, 0.0  ;;  %v9430_v25 = vmul.f32 %v3140_v39, %v3140_v39  ;;  %6352 = vrsqrt.f32 %v9414_v54  ;;  %v3146_v6 = vpop.f32.mrf.mxu1  ;;  %v3821_v60 = vmul.f32 %v3422_v59, %v3422_v59 }
 0x37f   :  { %v4036_v37 = vsel %vm4034_vm10, %v11023_v29, %v4033_v20  ;;  %vm4102_vm3 = vcmp.eq.f32.partialorder %v9353_v61, inf  ;;  %v6341_v58 = vpop.eup %6340  ;;  %v9435_v12 = vadd.f32 %v3820_v17, %v9146_v42  ;;  %v3424_v44 = vpop.f32.mrf.mxu0  ;;  %v11024_v33 = vand.u32 2147483648, %v9271_v41 }
 0x380   :  { %v4061_v39 = vsel %vm4060_vm13, %v9303_v46, %v4059_v26  ;;  %v11025_v20 = vand.u32 2147483648, %v9293_v45  ;;  %v9448_v34 = vmul.f32 %v3142_v4, %v3142_v4  ;;  %v3148_v31 = vpop.f32.mrf.mxu1  ;;  %v9451_v42 = vadd.f32 %v3821_v60, %v9156_v35 }
 0x381   :  { %v4043_v27 = vsel %vm4041_vm12, %v11024_v33, %v4040_v13  ;;  %v3823_v17 = vmul.f32 %v3424_v44, %v3424_v44  ;;  %v11026_v59 = vand.u32 2147483648, %v9303_v46  ;;  %v3426_v13 = vpop.f32.mrf.mxu0  ;;  %v4080_v26 = vmul.f32 %v6341_v58, %v9327_v40  ;;  %v6343_v4 = vpop.eup %6342 }
 0x382   :  { %v4057_v30 = vsel %vm4055_vm14, %v11025_v20, %v4054_v43  ;;  %vm4104_vm4 = vcmp.eq.f32.partialorder %v9353_v61, 0.0  ;;  %v4073_v45 = vmul.f32 %v6339_v10, %v9317_v14  ;;  %v9460_v43 = vmul.f32 %v3146_v6, %v3146_v6  ;;  %v3150_v33 = vpop.f32.mrf.mxu1 }
 0x383   :  { %v4064_v41 = vsel %vm4062_vm15, %v11026_v59, %v4061_v39  ;;  %v9463_v35 = vadd.f32 %v3823_v17, %v9160_v32  ;;  %v3824_v60 = vmul.f32 %v3426_v13, %v3426_v13  ;;  %v4663_v44 = vpack.c.bf16 %v4057_v30, %v4036_v37  ;;  %v6345_v20 = vpop.eup %6344  ;;  %v3430_v58 = vpop.f32.mrf.mxu0 }
 0x384   :  { %v4664_v29 = vpack.c.bf16 %v4064_v41, %v4043_v27  ;;  %6354 = vrsqrt.f32 %v9435_v12  ;;  %v9466_v46 = vmul.f32 %v3148_v31, %v3148_v31  ;;  %v4082_v10 = vsel %vm4081_vm0, %v9327_v40, %v4080_v26  ;;  %v3152_v32 = vpop.f32.mrf.mxu1 }
 0x385   :  { %v4105_v6 = vand.u32 2147483648, %v9353_v61  ;;  %6356 = vrsqrt.f32 %v9451_v42  ;;  %v9473_v27 = vmul.f32 %v3150_v33, %v3150_v33  ;;  %v3826_v39 = vmul.f32 %v3430_v58, %v3430_v58  ;;  %v3432_v37 = vpop.f32.mrf.mxu0 }
 0x386   :  { %4748 = vmatprep.mubr.bf16.mxu1 %v4664_v29  ;;  %vm4076_vm5 = vcmp.eq.f32.partialorder %v9317_v14, 0.0  ;;  %v4101_v30 = vmul.f32 %v6345_v20, %v9353_v61  ;;  %v4075_v31 = vsel %vm4074_vm1, %v9317_v14, %v4073_v45  ;;  %v4077_v17 = vand.u32 2147483648, %v9317_v14  ;;  %v3156_v13 = vpop.f32.mrf.mxu1 }
 0x387   :  { %4749 = vmatmul.mubr.bf16.gmra.mxu1 %v4663_v44  ;;  %v4094_v59 = vmul.f32 %v6343_v4, %v9340_v55  ;;  %6358 = vrsqrt.f32 %v9463_v35  ;;  %v9484_v41 = vadd.f32 %v3824_v60, %v9172_v36  ;;  %v3827_v29 = vmul.f32 %v3432_v37, %v3432_v37  ;;  %v6347_v33 = vpop.eup %6346  ;;  %v3434_v20 = vpop.f32.mrf.mxu0 }
 0x388   :  { %v4085_v26 = vsel %vm4083_vm2, %v4084_v47, %v4082_v10  ;;  %v9490_v44 = vmul.f32 %v3152_v32, %v3152_v32  ;;  %v9493_v45 = vadd.f32 %v3826_v39, %v9185_v52  ;;  %v4103_v4 = vsel %vm4102_vm3, %v9353_v61, %v4101_v30  ;;  %v6349_v36 = vpop.eup %6348  ;;  %v3158_v60 = vpop.f32.mrf.mxu1 }
 0x389   :  { %vm4095_vm6 = vcmp.eq.f32.partialorder %v9340_v55, inf  ;;  %v3829_v58 = vmul.f32 %v3434_v20, %v3434_v20  ;;  %v4106_v40 = vsel %vm4104_vm4, %v4105_v6, %v4103_v4  ;;  %v4078_v47 = vsel %vm4076_vm5, %v4077_v17, %v4075_v31  ;;  %v3436_v32 = vpop.f32.mrf.mxu0 }
 0x38a   :  { %11027 = vst [vmem:[#allocation91_spill] sm:$0xff] %v9490_v44  ;;  %v4096_v10 = vsel %vm4095_vm6, %v9340_v55, %v4094_v59  ;;  %v9505_v52 = vadd.f32 %v3827_v29, %v9195_v57  ;;  %v4667_v39 = vpack.c.bf16 %v4106_v40, %v4085_v26  ;;  %v4098_v37 = vand.u32 2147483648, %v9340_v55  ;;  %v6351_v44 = vpop.eup %6350  ;;  %v3160_v20 = vpop.f32.mrf.mxu1 }
 0x38b   :  { %v4122_v30 = vmul.f32 %v6347_v33, %v9387_v18  ;;  %6360 = vrsqrt.f32 %v9484_v41  ;;  %v9511_v61 = vadd.f32 %v3829_v58, %v9199_v56  ;;  %v3830_v14 = vmul.f32 %v3436_v32, %v3436_v32  ;;  %v6353_v6 = vpop.eup %6352  ;;  %v3440_v17 = vpop.f32.mrf.mxu0 }
 0x38c   :  { %vm4097_vm7 = vcmp.eq.f32.partialorder %v9340_v55, 0.0  ;;  %v9514_v31 = vmul.f32 %v3156_v13, %v3156_v13  ;;  %6362 = vrsqrt.f32 %v9493_v45  ;;  %v9517_v57 = vmul.f32 %v3158_v60, %v3158_v60  ;;  %4756 = vmatprep.mubr.bf16.mxu1 %v4667_v39  ;;  %v3162_v29 = vpop.f32.mrf.mxu1 }
 0x38d   :  { %v4099_v59 = vsel %vm4097_vm7, %v4098_v37, %v4096_v10  ;;  %v9520_v26 = vadd.f32 %v3830_v14, %v9207_v16  ;;  %v3832_v33 = vmul.f32 %v3440_v17, %v3440_v17  ;;  %vm4123_vm8 = vcmp.eq.f32.partialorder %v9387_v18, inf  ;;  %v3442_v13 = vpop.f32.mrf.mxu0 }
 0x38e   :  { %11028 = vst [vmem:[#allocation92_spill] sm:$0xff] %v9514_v31  ;;  %11029 = vst [vmem:[#allocation93_spill] sm:$0xff] %v9517_v57  ;;  %v4666_v56 = vpack.c.bf16 %v4099_v59, %v4078_v47  ;;  %6364 = vrsqrt.f32 %v9505_v52  ;;  %v9524_v55 = vmul.f32 %v3160_v20, %v3160_v20  ;;  %v4124_v4 = vsel %vm4123_vm8, %v9387_v18, %v4122_v30  ;;  %v3166_v58 = vpop.f32.mrf.mxu1 }
 0x38f   :  { %v4143_v60 = vmul.f32 %v6353_v6, %v9414_v54  ;;  %6366 = vrsqrt.f32 %v9511_v61  ;;  %v3833_v40 = vmul.f32 %v3442_v13, %v3442_v13  ;;  %vm4125_vm9 = vcmp.eq.f32.partialorder %v9387_v18, 0.0  ;;  %v3444_v47 = vpop.f32.mrf.mxu0 }
 0x390   :  { %11030 = vst [vmem:[#allocation94_spill] sm:$0xff] %v9524_v55  ;;  %4757 = vmatmul.mubr.bf16.gmra.mxu1 %v4666_v56  ;;  %vm4144_vm10 = vcmp.eq.f32.partialorder %v9414_v54, inf  ;;  %v9532_v16 = vadd.f32 %v3832_v33, %v9219_v7  ;;  %v4126_v10 = vand.u32 2147483648, %v9387_v18  ;;  %v4147_v39 = vand.u32 2147483648, %v9414_v54  ;;  %v3168_v20 = vpop.f32.mrf.mxu1 }
 0x391   :  { %v4145_v32 = vsel %vm4144_vm10, %v9414_v54, %v4143_v60  ;;  %v9537_v37 = vpop.eup %6354  ;;  %v9539_v30 = vmul.f32 %v3162_v29, %v3162_v29  ;;  %6368 = vrsqrt.f32 %v9520_v26  ;;  %v3835_v14 = vmul.f32 %v3444_v47, %v3444_v47  ;;  %v3446_v17 = vpop.f32.mrf.mxu0 }
 0x392   :  { %vm4146_vm11 = vcmp.eq.f32.partialorder %v9414_v54, 0.0  ;;  %v6357_v6 = vpop.eup %6356  ;;  %v9544_v7 = vadd.f32 %v3833_v40, %v9230_v5  ;;  %v4127_v59 = vsel %vm4125_vm9, %v4126_v10, %v4124_v4  ;;  %v4115_v56 = vmul.f32 %v6349_v36, %v9379_v19  ;;  %v3170_v29 = vpop.f32.mrf.mxu1 }
 0x393   :  { %11031 = vst [vmem:[#allocation95_spill] sm:$0xff] %v9539_v30  ;;  %v4148_v33 = vsel %vm4146_vm11, %v4147_v39, %v4145_v32  ;;  %v9549_v13 = vmul.f32 %v3166_v58, %v3166_v58  ;;  %v9552_v60 = vadd.f32 %v3835_v14, %v9243_v38  ;;  %v3836_v47 = vmul.f32 %v3446_v17, %v3446_v17  ;;  %v3450_v40 = vpop.f32.mrf.mxu0 }
 0x394   :  { %v4670_v30 = vpack.c.bf16 %v4148_v33, %v4127_v59  ;;  %v9554_v54 = vpop.eup %6358  ;;  %6370 = vrsqrt.f32 %v9532_v16  ;;  %v9557_v5 = vmul.f32 %v3168_v20, %v3168_v20  ;;  %vm4116_vm12 = vcmp.eq.f32.partialorder %v9379_v19, inf  ;;  %v3172_v36 = vpop.f32.mrf.mxu1 }
 0x395   :  { %11032 = vst [vmem:[#allocation96_spill] sm:$0xff] %v9549_v13  ;;  %v4136_v18 = vmul.f32 %v6351_v44, %v9400_v15  ;;  %v9562_v4 = vadd.f32 %v3836_v47, %v9251_v51  ;;  %v3838_v38 = vmul.f32 %v3450_v40, %v3450_v40  ;;  %vm4118_vm13 = vcmp.eq.f32.partialorder %v9379_v19, 0.0  ;;  %v3452_v39 = vpop.f32.mrf.mxu0 }
 0x396   :  { %11033 = vst [vmem:[#allocation97_spill] sm:$0xff] %v9557_v5  ;;  %4764 = vmatprep.mubr.bf16.mxu1 %v4670_v30  ;;  %vm4137_vm14 = vcmp.eq.f32.partialorder %v9400_v15, inf  ;;  %6372 = vrsqrt.f32 %v9544_v7  ;;  %v9567_v58 = vmul.f32 %v3170_v29, %v3170_v29  ;;  %v4117_v10 = vsel %vm4116_vm12, %v9379_v19, %v4115_v56  ;;  %v3176_v44 = vpop.f32.mrf.mxu1 }
 0x397   :  { %v4138_v32 = vsel %vm4137_vm14, %v9400_v15, %v4136_v18  ;;  %6374 = vrsqrt.f32 %v9552_v60  ;;  %v4119_v51 = vand.u32 2147483648, %v9379_v19  ;;  %v4140_v30 = vand.u32 2147483648, %v9400_v15  ;;  %v3454_v33 = vpop.f32.mrf.mxu0 }
 0x398   :  { %11034 = vst [vmem:[#allocation98_spill] sm:$0xff] %v9567_v58  ;;  %v3839_v20 = vmul.f32 %v3452_v39, %v3452_v39  ;;  %v6361_v14 = vpop.eup %6360  ;;  %v9574_v17 = vmul.f32 %v3172_v36, %v3172_v36  ;;  %v9577_v59 = vadd.f32 %v3838_v38, %v9255_v24  ;;  %vm4139_vm15 = vcmp.eq.f32.partialorder %v9400_v15, 0.0  ;;  %v3178_v18 = vpop.f32.mrf.mxu1 }
 0x399   :  { %v4164_v56 = vmul.f32 %v6357_v6, %v9451_v42  ;;  %v9581_v29 = vpop.eup %6362  ;;  %6376 = vrsqrt.f32 %v9562_v4  ;;  %v4120_v47 = vsel %vm4118_vm13, %v4119_v51, %v4117_v10  ;;  %v4141_v40 = vsel %vm4139_vm15, %v4140_v30, %v4138_v32  ;;  %v3456_v15 = vpop.f32.mrf.mxu0 }
 0x39a   :  { %11035 = vst [vmem:[#allocation99_spill] sm:$0xff] %v9574_v17  ;;  %v3841_v39 = vmul.f32 %v3454_v33, %v3454_v33  ;;  %v9586_v36 = vmul.f32 %v3176_v44, %v3176_v44  ;;  %v4669_v17 = vpack.c.bf16 %v4141_v40, %v4120_v47  ;;  %v9589_v24 = vadd.f32 %v3839_v20, %v9275_v21  ;;  %v3180_v38 = vpop.f32.mrf.mxu1 }
 0x39b   :  { %vm4165_vm0 = vcmp.eq.f32.partialorder %v9451_v42, inf  ;;  %v9592_v6 = vpop.eup %6364  ;;  %v3842_v19 = vmul.f32 %v3456_v15, %v3456_v15  ;;  %vm4167_vm1 = vcmp.eq.f32.partialorder %v9451_v42, 0.0  ;;  %v4185_v10 = vmul.f32 %v6361_v14, %v9484_v41  ;;  %v3460_v51 = vpop.f32.mrf.mxu0 }
 0x39c   :  { %11036 = vst [vmem:[#allocation100_spill] sm:$0xff] %v9586_v36  ;;  %v9595_v58 = vadd.f32 %v3841_v39, %v9279_v50  ;;  %v9599_v32 = vpop.eup %6366  ;;  %6378 = vrsqrt.f32 %v9577_v59  ;;  %4765 = vmatmul.mubr.bf16.gmra.mxu1 %v4669_v17  ;;  %v9602_v21 = vmul.f32 %v3178_v18, %v3178_v18  ;;  %v4166_v44 = vsel %vm4165_vm0, %v9451_v42, %v4164_v56  ;;  %v9606_v30 = vpop.f32.mrf.mxu1 }
 0x39d   :  { %vm4186_vm2 = vcmp.eq.f32.partialorder %v9484_v41, inf  ;;  %11038 = vst [vmem:[#allocation102_spill] sm:$0xff] %v9606_v30  ;;  %v9609_v50 = vadd.f32 %v3842_v19, %v9283_v28  ;;  %v4168_v20 = vand.u32 2147483648, %v9451_v42  ;;  %v4189_v33 = vand.u32 2147483648, %v9484_v41  ;;  %v3462_v40 = vpop.f32.mrf.mxu0 }
 0x39e   :  { %11037 = vst [vmem:[#allocation101_spill] sm:$0xff] %v9602_v21  ;;  %v4187_v14 = vsel %vm4186_vm2, %v9484_v41, %v4185_v10  ;;  %v9614_v47 = vpop.eup %6368  ;;  %6380 = vrsqrt.f32 %v9589_v24  ;;  %vm4188_vm3 = vcmp.eq.f32.partialorder %v9484_v41, 0.0  ;;  %v3844_v17 = vmul.f32 %v3460_v51, %v3460_v51  ;;  %v5921_v39 = vpop.f32.mrf.mxu1 }
 0x39f   :  { %v4157_v56 = vmul.f32 %v9537_v37, %v9435_v12  ;;  %6382 = vrsqrt.f32 %v9595_v58  ;;  %v4169_v28 = vsel %vm4167_vm1, %v4168_v20, %v4166_v44  ;;  %v4190_v18 = vsel %vm4188_vm3, %v4189_v33, %v4187_v14  ;;  %v3464_v41 = vpop.f32.mrf.mxu0 }
 0x3a0   :  { %vm4158_vm4 = vcmp.eq.f32.partialorder %v9435_v12, inf  ;;  %6384 = vrsqrt.f32 %v9609_v50  ;;  %v4673_v15 = vpack.c.bf16 %v4190_v18, %v4169_v28  ;;  %v3804_v19 = vmul.f32 %v5921_v39, %v5921_v39  ;;  %v3573_v20 = vpop.f32.mrf.mxu1 }
 0x3a1   :  { %vm4160_vm5 = vcmp.eq.f32.partialorder %v9435_v12, 0.0  ;;  %v9626_v10 = vpop.eup %6370  ;;  %v9629_v37 = vadd.f32 %v3844_v17, %v9289_v11  ;;  %v4159_v51 = vsel %vm4158_vm4, %v9435_v12, %v4157_v56  ;;  %v4161_v42 = vand.u32 2147483648, %v9435_v12  ;;  %v3466_v18 = vpop.f32.mrf.mxu0 }
 0x3a2   :  { %v4178_v44 = vmul.f32 %v9554_v54, %v9463_v35  ;;  %4772 = vmatprep.mubr.bf16.mxu1 %v4673_v15  ;;  %v9636_v14 = vadd.f32 %v3804_v19, %v9048_v0  ;;  %vm4179_vm6 = vcmp.eq.f32.partialorder %v9463_v35, inf  ;;  %v4182_v33 = vand.u32 2147483648, %v9463_v35  ;;  %v5922_v21 = vpop.f32.mrf.mxu1 }
 0x3a3   :  { %v3845_v28 = vmul.f32 %v3462_v40, %v3462_v40  ;;  %v9640_v11 = vpop.eup %6372  ;;  %v3798_v56 = vmul.f32 %v3573_v20, %v3573_v20  ;;  %v3847_v39 = vmul.f32 %v3464_v41, %v3464_v41  ;;  %v3848_v36 = vmul.f32 %v3466_v18, %v3466_v18  ;;  %v3470_v40 = vpop.f32.mrf.mxu0 }
 0x3a4   :  { %v4180_v17 = vsel %vm4179_vm6, %v9463_v35, %v4178_v44  ;;  %v9643_v54 = vpop.eup %6374  ;;  %v9645_v15 = vmul.f32 %v3180_v38, %v3180_v38  ;;  %6386 = vrsqrt.f32 %v9636_v14  ;;  %v4162_v0 = vsel %vm4160_vm5, %v4161_v42, %v4159_v51  ;;  %v11040_v44 = vld [vmem:[#allocation63_spill] sm:$0xff]  ;;  %v3576_v38 = vpop.f32.mrf.mxu1 }
 0x3a5   :  { %vm4181_vm7 = vcmp.eq.f32.partialorder %v9463_v35, 0.0  ;;  %v9652_v30 = vadd.f32 %v3845_v28, %v9297_v23  ;;  %v9655_v41 = vadd.f32 %v3798_v56, %v11040_v44  ;;  %v9658_v20 = vadd.f32 %v3847_v39, %v9299_v3  ;;  %v3472_v35 = vpop.f32.mrf.mxu0 }
 0x3a6   :  { %11039 = vst [vmem:[#allocation103_spill] sm:$0xff] %v9645_v15  ;;  %v4183_v19 = vsel %vm4181_vm7, %v4182_v33, %v4180_v17  ;;  %v9660_v18 = vpop.eup %6376  ;;  %6388 = vrsqrt.f32 %v9629_v37  ;;  %v3807_v51 = vmul.f32 %v5922_v21, %v5922_v21  ;;  %v3801_v42 = vmul.f32 %v3576_v38, %v3576_v38  ;;  %v5925_v28 = vpop.f32.mrf.mxu1 }
 0x3a7   :  { %v4672_v12 = vpack.c.bf16 %v4183_v19, %v4162_v0  ;;  %6390 = vrsqrt.f32 %v9652_v30  ;;  %v9666_v23 = vadd.f32 %v3848_v36, %v9311_v48  ;;  %v4206_v3 = vmul.f32 %v9592_v6, %v9505_v52  ;;  %v3474_v56 = vpop.f32.mrf.mxu0 }
 0x3a8   :  { %6392 = vrsqrt.f32 %v9655_v41  ;;  %v9672_v17 = vadd.f32 %v3807_v51, %v9054_v53  ;;  %v9675_v21 = vadd.f32 %v3801_v42, %v9056_v1  ;;  %vm4207_vm8 = vcmp.eq.f32.partialorder %v9505_v52, inf  ;;  %v3589_v0 = vpop.f32.mrf.mxu1 }
 0x3a9   :  { %4773 = vmatmul.mubr.bf16.gmra.mxu1 %v4672_v12  ;;  %v9678_v39 = vpop.eup %6378  ;;  %6394 = vrsqrt.f32 %v9658_v20  ;;  %v4208_v48 = vsel %vm4207_vm8, %v9505_v52, %v4206_v3  ;;  %v4210_v36 = vand.u32 2147483648, %v9505_v52  ;;  %v4227_v6 = vmul.f32 %v9614_v47, %v9520_v26  ;;  %v3476_v53 = vpop.f32.mrf.mxu0 }
 0x3aa   :  { %6396 = vrsqrt.f32 %v9672_v17  ;;  %vm4209_vm9 = vcmp.eq.f32.partialorder %v9505_v52, 0.0  ;;  %vm4228_vm10 = vcmp.eq.f32.partialorder %v9520_v26, inf  ;;  %vm4046_vm11 = vcmp.eq.f32.partialorder %v9636_v14, inf  ;;  %v5926_v47 = vpop.f32.mrf.mxu1 }
 0x3ab   :  { %v9689_v19 = vpop.eup %6380  ;;  %6398 = vrsqrt.f32 %v9666_v23  ;;  %v4211_v44 = vsel %vm4209_vm9, %v4210_v36, %v4208_v48  ;;  %v4229_v38 = vsel %vm4228_vm10, %v9520_v26, %v4227_v6  ;;  %vm4230_vm12 = vcmp.eq.f32.partialorder %v9520_v26, 0.0  ;;  %v3480_v6 = vpop.f32.mrf.mxu0 }
 0x3ac   :  { %v9695_v12 = vpop.eup %6382  ;;  %6400 = vrsqrt.f32 %v9675_v21  ;;  %v4231_v52 = vand.u32 2147483648, %v9520_v26  ;;  %v3850_v51 = vmul.f32 %v3470_v40, %v3470_v40  ;;  %v3816_v42 = vmul.f32 %v5925_v28, %v5925_v28  ;;  %v3592_v36 = vpop.f32.mrf.mxu1 }
 0x3ad   :  { %v9699_v3 = vpop.eup %6384  ;;  %v4199_v1 = vmul.f32 %v9581_v29, %v9493_v45  ;;  %vm4200_vm13 = vcmp.eq.f32.partialorder %v9493_v45, inf  ;;  %vm4202_vm14 = vcmp.eq.f32.partialorder %v9493_v45, 0.0  ;;  %v4203_v48 = vand.u32 2147483648, %v9493_v45 }
 0x3ae   :  { %v4232_v33 = vsel %vm4230_vm12, %v4231_v52, %v4229_v38  ;;  %v9707_v15 = vadd.f32 %v3850_v51, %v9313_v8  ;;  %v9710_v26 = vadd.f32 %v3816_v42, %v9064_v2  ;;  %v4220_v40 = vmul.f32 %v9599_v32, %v9511_v61  ;;  %v5929_v5 = vpop.f32.mrf.mxu1 }
 0x3af   :  { %v4676_v28 = vpack.c.bf16 %v4232_v33, %v4211_v44  ;;  %v4201_v29 = vsel %vm4200_vm13, %v9493_v45, %v4199_v1  ;;  %vm4221_vm15 = vcmp.eq.f32.partialorder %v9511_v61, inf  ;;  %vm4223_vm0 = vcmp.eq.f32.partialorder %v9511_v61, 0.0  ;;  %v9722_v1 = vpop.f32.mrf.mxu0 }
 0x3b0   :  { %11041 = vst [vmem:[#allocation63_spill] sm:$0xff] %v9710_v26  ;;  %6402 = vrsqrt.f32 %v9707_v15  ;;  %v4204_v38 = vsel %vm4202_vm14, %v4203_v48, %v4201_v29  ;;  %v4222_v8 = vsel %vm4221_vm15, %v9511_v61, %v4220_v40  ;;  %v4224_v52 = vand.u32 2147483648, %v9511_v61  ;;  %v9725_v29 = vpop.f32.mrf.mxu1 }
 0x3b1   :  { %v6387_v2 = vpop.eup %6386  ;;  %vm4067_vm1 = vcmp.eq.f32.partialorder %v9672_v17, inf  ;;  %4780 = vmatprep.mubr.bf16.mxu1 %v4676_v28  ;;  %6404 = vrsqrt.f32 %v9710_v26  ;;  %v3851_v32 = vmul.f32 %v3472_v35, %v3472_v35  ;;  %v3810_v45 = vmul.f32 %v3589_v0, %v3589_v0  ;;  %v11042_v28 = vld [vmem:[#allocation64_spill] sm:$0xff] }
 0x3b2   :  { %v3853_v33 = vmul.f32 %v3474_v56, %v3474_v56  ;;  %v4045_v44 = vmul.f32 %v6387_v2, %v9636_v14  ;;  %v4225_v51 = vsel %vm4223_vm0, %v4224_v52, %v4222_v8  ;;  %v3819_v42 = vmul.f32 %v5926_v47, %v5926_v47  ;;  %v3484_v2 = vpop.f32.mrf.mxu0 }
 0x3b3   :  { %v3854_v48 = vmul.f32 %v3476_v53, %v3476_v53  ;;  %v9727_v40 = vpop.eup %6388  ;;  %v4675_v61 = vpack.c.bf16 %v4225_v51, %v4204_v38  ;;  %v9730_v13 = vadd.f32 %v3851_v32, %v9324_v49  ;;  %v9733_v55 = vadd.f32 %v3810_v45, %v11042_v28  ;;  %v11044_v53 = vld [vmem:[#allocation65_spill] sm:$0xff]  ;;  %v11046_v38 = vld [vmem:[#allocation87_spill] sm:$0xff]  ;;  %v11047_v45 = vld [vmem:[#allocation66_spill] sm:$0xff]  ;;  %v5930_v51 = vpop.f32.mrf.mxu1 }
 0x3b4   :  { %v9736_v35 = vadd.f32 %v3853_v33, %v9330_v63  ;;  %v9738_v56 = vpop.eup %6390  ;;  %v9743_v0 = vsel %vm4046_vm11, %v9636_v14, %v4045_v44  ;;  %v9746_v47 = vadd.f32 %v3819_v42, %v11044_v53  ;;  %v3813_v49 = vmul.f32 %v3592_v36, %v3592_v36 }
 0x3b5   :  { %v9749_v8 = vadd.f32 %v3854_v48, %v11046_v38  ;;  %v9751_v52 = vpop.eup %6392  ;;  %4781 = vmatmul.mubr.bf16.gmra.mxu1 %v4675_v61  ;;  %6406 = vrsqrt.f32 %v9730_v13  ;;  %v4248_v63 = vmul.f32 %v9640_v11, %v9544_v7  ;;  %vm4249_vm2 = vcmp.eq.f32.partialorder %v9544_v7, inf }
 0x3b6   :  { %11043 = vst [vmem:[#allocation64_spill] sm:$0xff] %v9736_v35  ;;  %11045 = vst [vmem:[#allocation65_spill] sm:$0xff] %v9746_v47  ;;  %vm4251_vm3 = vcmp.eq.f32.partialorder %v9544_v7, 0.0  ;;  %v9758_v32 = vpop.eup %6394  ;;  %6408 = vrsqrt.f32 %v9733_v55  ;;  %v9762_v33 = vadd.f32 %v3813_v49, %v11047_v45  ;;  %v4252_v36 = vand.u32 2147483648, %v9544_v7  ;;  %v3486_v45 = vpop.f32.mrf.mxu0 }
 0x3b7   :  { %v4269_v44 = vmul.f32 %v9660_v18, %v9562_v4  ;;  %v6397_v42 = vpop.eup %6396  ;;  %6410 = vrsqrt.f32 %v9736_v35  ;;  %v4250_v11 = vsel %vm4249_vm2, %v9544_v7, %v4248_v63  ;;  %vm4270_vm4 = vcmp.eq.f32.partialorder %v9562_v4, inf }
 0x3b8   :  { %vm4272_vm5 = vcmp.eq.f32.partialorder %v9562_v4, 0.0  ;;  %v9771_v48 = vpop.eup %6398  ;;  %v4066_v61 = vmul.f32 %v6397_v42, %v9672_v17  ;;  %6412 = vrsqrt.f32 %v9746_v47  ;;  %v4253_v28 = vsel %vm4251_vm3, %v4252_v36, %v4250_v11  ;;  %v3608_v36 = vpop.f32.mrf.mxu1  ;;  %v11048_v11 = vld [vmem:[#allocation88_spill] sm:$0xff] }
 0x3b9   :  { %v4271_v18 = vsel %vm4270_vm4, %v9562_v4, %v4269_v44  ;;  %v9778_v53 = vpop.eup %6400  ;;  %6414 = vrsqrt.f32 %v9749_v8  ;;  %v4273_v38 = vand.u32 2147483648, %v9562_v4  ;;  %v3856_v49 = vmul.f32 %v3480_v6, %v3480_v6 }
 0x3ba   :  { %v3828_v63 = vmul.f32 %v5929_v5, %v5929_v5  ;;  %v9785_v42 = vsel %vm4067_vm1, %v9672_v17, %v4066_v61  ;;  %6416 = vrsqrt.f32 %v9762_v33  ;;  %v4241_v7 = vmul.f32 %v9626_v10, %v9532_v16  ;;  %v11050_v5 = vld [vmem:[#allocation67_spill] sm:$0xff] }
 0x3bb   :  { %vm4242_vm6 = vcmp.eq.f32.partialorder %v9532_v16, inf  ;;  %v4274_v44 = vsel %vm4272_vm5, %v4273_v38, %v4271_v18  ;;  %v9794_v6 = vadd.f32 %v3856_v49, %v11048_v11  ;;  %vm4244_vm7 = vcmp.eq.f32.partialorder %v9532_v16, 0.0  ;;  %v3490_v18 = vpop.f32.mrf.mxu0  ;;  %v5933_v49 = vpop.f32.mrf.mxu1 }
 0x3bc   :  { %v9797_v57 = vadd.f32 %v3828_v63, %v11050_v5  ;;  %v4679_v61 = vpack.c.bf16 %v4274_v44, %v4253_v28  ;;  %v4243_v47 = vsel %vm4242_vm6, %v9532_v16, %v4241_v7  ;;  %v4245_v26 = vand.u32 2147483648, %v9532_v16 }
 0x3bd   :  { %11049 = vst [vmem:[#allocation87_spill] sm:$0xff] %v9794_v6  ;;  %v4262_v10 = vmul.f32 %v9643_v54, %v9552_v60  ;;  %v9804_v35 = vpop.eup %6402  ;;  %6418 = vrsqrt.f32 %v9794_v6  ;;  %vm4263_vm8 = vcmp.eq.f32.partialorder %v9552_v60, inf  ;;  %vm4265_vm9 = vcmp.eq.f32.partialorder %v9552_v60, 0.0  ;;  %v11053_v6 = vld [vmem:[#allocation89_spill] sm:$0xff] }
 0x3be   :  { %11051 = vst [vmem:[#allocation66_spill] sm:$0xff] %v9797_v57  ;;  %v4266_v4 = vand.u32 2147483648, %v9552_v60  ;;  %v9810_v38 = vpop.eup %6404  ;;  %4788 = vmatprep.mubr.bf16.mxu1 %v4679_v61  ;;  %6420 = vrsqrt.f32 %v9797_v57  ;;  %v4246_v16 = vsel %vm4244_vm7, %v4245_v26, %v4243_v47  ;;  %v3857_v54 = vmul.f32 %v9722_v1, %v9722_v1  ;;  %v11054_v57 = vld [vmem:[#allocation68_spill] sm:$0xff]  ;;  %v11057_v1 = vld [vmem:[#allocation69_spill] sm:$0xff] }
 0x3bf   :  { %11052 = vst [vmem:[#allocation88_spill] sm:$0xff] %v9810_v38  ;;  %v4264_v28 = vsel %vm4263_vm8, %v9552_v60, %v4262_v10  ;;  %v3822_v7 = vmul.f32 %v9725_v29, %v9725_v29  ;;  %v3859_v44 = vmul.f32 %v3484_v2, %v3484_v2  ;;  %v3831_v11 = vmul.f32 %v5930_v51, %v5930_v51  ;;  %v11055_v60 = vld [vmem:[#allocation90_spill] sm:$0xff]  ;;  %v3492_v2 = vpop.f32.mrf.mxu0 }
 0x3c0   :  { %v4267_v63 = vsel %vm4265_vm9, %v4266_v4, %v4264_v28  ;;  %v9819_v31 = vadd.f32 %v3857_v54, %v11053_v6  ;;  %v3860_v61 = vmul.f32 %v3486_v45, %v3486_v45  ;;  %v3825_v38 = vmul.f32 %v3608_v36, %v3608_v36  ;;  %v3621_v6 = vpop.f32.mrf.mxu1 }
 0x3c1   :  { %v4678_v5 = vpack.c.bf16 %v4267_v63, %v4246_v16  ;;  %v9822_v26 = vadd.f32 %v3822_v7, %v11054_v57  ;;  %v9825_v47 = vadd.f32 %v3859_v44, %v11055_v60  ;;  %v9828_v10 = vadd.f32 %v3831_v11, %v11057_v1  ;;  %v11059_v57 = vld [vmem:[#allocation70_spill] sm:$0xff] }
 0x3c2   :  { %v4290_v29 = vmul.f32 %v9689_v19, %v9589_v24  ;;  %v9832_v51 = vpop.eup %6406  ;;  %6422 = vrsqrt.f32 %v9819_v31  ;;  %v9836_v45 = vadd.f32 %v3860_v61, %v9395_v62  ;;  %v9839_v36 = vadd.f32 %v3825_v38, %v11059_v57  ;;  %v5934_v61 = vpop.f32.mrf.mxu1  ;;  %v11061_v57 = vld [vmem:[#allocation71_spill] sm:$0xff] }
 0x3c3   :  { %11056 = vst [vmem:[#allocation67_spill] sm:$0xff] %v9825_v47  ;;  %11058 = vst [vmem:[#allocation89_spill] sm:$0xff] %v9828_v10  ;;  %4789 = vmatmul.mubr.bf16.gmra.mxu1 %v4678_v5  ;;  %vm4291_vm10 = vcmp.eq.f32.partialorder %v9589_v24, inf  ;;  %v9842_v4 = vpop.eup %6408  ;;  %6424 = vrsqrt.f32 %v9822_v26  ;;  %vm4293_vm11 = vcmp.eq.f32.partialorder %v9589_v24, 0.0  ;;  %v4294_v16 = vand.u32 2147483648, %v9589_v24 }
 0x3c4   :  { %v4292_v19 = vsel %vm4291_vm10, %v9589_v24, %v4290_v29  ;;  %v9848_v28 = vpop.eup %6410  ;;  %6426 = vrsqrt.f32 %v9825_v47  ;;  %v4311_v62 = vmul.f32 %v9699_v3, %v9609_v50  ;;  %vm4312_vm12 = vcmp.eq.f32.partialorder %v9609_v50, inf  ;;  %v3494_v24 = vpop.f32.mrf.mxu0 }
 0x3c5   :  { %vm4314_vm13 = vcmp.eq.f32.partialorder %v9609_v50, 0.0  ;;  %v9855_v38 = vpop.eup %6412  ;;  %6428 = vrsqrt.f32 %v9828_v10  ;;  %v4295_v54 = vsel %vm4293_vm11, %v4294_v16, %v4292_v19  ;;  %v4315_v63 = vand.u32 2147483648, %v9609_v50 }
 0x3c6   :  { %v3862_v7 = vmul.f32 %v3490_v18, %v3490_v18  ;;  %v9859_v44 = vpop.eup %6414  ;;  %6430 = vrsqrt.f32 %v9836_v45  ;;  %v4313_v11 = vsel %vm4312_vm12, %v9609_v50, %v4311_v62  ;;  %v3840_v3 = vmul.f32 %v5933_v49, %v5933_v49 }
 0x3c7   :  { %v4283_v5 = vmul.f32 %v9678_v39, %v9577_v59  ;;  %v9865_v60 = vpop.eup %6416  ;;  %6432 = vrsqrt.f32 %v9839_v36  ;;  %v4316_v1 = vsel %vm4314_vm13, %v4315_v63, %v4313_v11  ;;  %vm4284_vm14 = vcmp.eq.f32.partialorder %v9577_v59, inf  ;;  %v3624_v63 = vpop.f32.mrf.mxu1 }
 0x3c8   :  { %v9869_v29 = vadd.f32 %v3862_v7, %v9406_v22  ;;  %v4682_v18 = vpack.c.bf16 %v4316_v1, %v4295_v54  ;;  %v9873_v19 = vadd.f32 %v3840_v3, %v11061_v57  ;;  %vm4286_vm15 = vcmp.eq.f32.partialorder %v9577_v59, 0.0  ;;  %v3496_v22 = vpop.f32.mrf.mxu0 }
 0x3c9   :  { %v4285_v50 = vsel %vm4284_vm14, %v9577_v59, %v4283_v5  ;;  %v4287_v39 = vand.u32 2147483648, %v9577_v59  ;;  %v4304_v49 = vmul.f32 %v9695_v12, %v9595_v58  ;;  %vm4305_vm0 = vcmp.eq.f32.partialorder %v9595_v58, inf }
 0x3ca   :  { %11060 = vst [vmem:[#allocation68_spill] sm:$0xff] %v9869_v29  ;;  %11062 = vst [vmem:[#allocation90_spill] sm:$0xff] %v9873_v19  ;;  %6434 = vrsqrt.f32 %v9869_v29  ;;  %v9882_v16 = vpop.eup %6418  ;;  %4796 = vmatprep.mubr.bf16.mxu1 %v4682_v18  ;;  %vm4307_vm1 = vcmp.eq.f32.partialorder %v9595_v58, 0.0  ;;  %v4308_v62 = vand.u32 2147483648, %v9595_v58  ;;  %v3863_v54 = vmul.f32 %v3492_v2, %v3492_v2  ;;  %v11063_v29 = vld [vmem:[#allocation72_spill] sm:$0xff] }
 0x3cb   :  { %6436 = vrsqrt.f32 %v9873_v19  ;;  %v9887_v7 = vpop.eup %6420  ;;  %v4288_v59 = vsel %vm4286_vm15, %v4287_v39, %v4285_v50  ;;  %v4306_v11 = vsel %vm4305_vm0, %v9595_v58, %v4304_v49  ;;  %v3834_v12 = vmul.f32 %v3621_v6, %v3621_v6  ;;  %v11064_v50 = vld [vmem:[#allocation73_spill] sm:$0xff]  ;;  %v5937_v39 = vpop.f32.mrf.mxu1 }
 0x3cc   :  { %v3865_v3 = vmul.f32 %v3494_v24, %v3494_v24  ;;  %v4309_v5 = vsel %vm4307_vm1, %v4308_v62, %v4306_v11  ;;  %v9891_v1 = vadd.f32 %v3863_v54, %v9411_v9  ;;  %v3843_v18 = vmul.f32 %v5934_v61, %v5934_v61  ;;  %v3500_v24 = vpop.f32.mrf.mxu0 }
 0x3cd   :  { %v3866_v57 = vmul.f32 %v3496_v22, %v3496_v22  ;;  %v4681_v19 = vpack.c.bf16 %v4309_v5, %v4288_v59  ;;  %v9894_v10 = vadd.f32 %v3834_v12, %v11063_v29  ;;  %v3837_v47 = vmul.f32 %v3624_v63, %v3624_v63 }
 0x3ce   :  { %v9897_v2 = vadd.f32 %v3865_v3, %v9430_v25  ;;  %6438 = vrsqrt.f32 %v9891_v1  ;;  %v9901_v58 = vadd.f32 %v3843_v18, %v11064_v50  ;;  %v4332_v9 = vmul.f32 %v9738_v56, %v9652_v30  ;;  %v11065_v25 = vld [vmem:[#allocation74_spill] sm:$0xff]  ;;  %v3502_v59 = vpop.f32.mrf.mxu0  ;;  %v3637_v3 = vpop.f32.mrf.mxu1 }
 0x3cf   :  { %v9904_v6 = vadd.f32 %v3866_v57, %v9448_v34  ;;  %v9908_v61 = vpop.eup %6422  ;;  %4797 = vmatmul.mubr.bf16.gmra.mxu1 %v4681_v19  ;;  %6440 = vrsqrt.f32 %v9894_v10  ;;  %v9912_v29 = vadd.f32 %v3837_v47, %v11065_v25  ;;  %vm4333_vm2 = vcmp.eq.f32.partialorder %v9652_v30, inf }
 0x3d0   :  { %vm4335_vm3 = vcmp.eq.f32.partialorder %v9652_v30, 0.0  ;;  %v9916_v49 = vpop.eup %6424  ;;  %6442 = vrsqrt.f32 %v9897_v2  ;;  %v4334_v34 = vsel %vm4333_vm2, %v9652_v30, %v4332_v9  ;;  %v4336_v56 = vand.u32 2147483648, %v9652_v30 }
 0x3d1   :  { %v4353_v19 = vmul.f32 %v9771_v48, %v9666_v23  ;;  %v9923_v22 = vpop.eup %6426  ;;  %vm4048_vm4 = vcmp.eq.f32.partialorder %v9636_v14, 0.0  ;;  %6444 = vrsqrt.f32 %v9901_v58  ;;  %vm4354_vm5 = vcmp.eq.f32.partialorder %v9666_v23, inf }
 0x3d2   :  { %vm4356_vm6 = vcmp.eq.f32.partialorder %v9666_v23, 0.0  ;;  %v4357_v47 = vand.u32 2147483648, %v9666_v23  ;;  %v9930_v62 = vpop.eup %6428  ;;  %vm4069_vm7 = vcmp.eq.f32.partialorder %v9672_v17, 0.0  ;;  %6446 = vrsqrt.f32 %v9904_v6 }
 0x3d3   :  { %v4337_v48 = vsel %vm4335_vm3, %v4336_v56, %v4334_v34  ;;  %v4355_v54 = vsel %vm4354_vm5, %v9666_v23, %v4353_v19  ;;  %v4003_v63 = vmul.f32 %v9751_v52, %v9655_v41  ;;  %v9939_v11 = vpop.eup %6430  ;;  %6448 = vrsqrt.f32 %v9912_v29  ;;  %v3504_v19 = vpop.f32.mrf.mxu0 }
 0x3d4   :  { %v4358_v12 = vsel %vm4356_vm6, %v4357_v47, %v4355_v54  ;;  %vm4004_vm8 = vcmp.eq.f32.partialorder %v9655_v41, inf  ;;  %vm4006_vm9 = vcmp.eq.f32.partialorder %v9655_v41, 0.0  ;;  %v9944_v5 = vpop.eup %6432  ;;  %v4007_v23 = vand.u32 2147483648, %v9655_v41 }
 0x3d5   :  { %v4685_v30 = vpack.c.bf16 %v4358_v12, %v4337_v48  ;;  %v4005_v18 = vsel %vm4004_vm8, %v9655_v41, %v4003_v63  ;;  %v4024_v52 = vmul.f32 %v9778_v53, %v9675_v21  ;;  %vm4025_vm10 = vcmp.eq.f32.partialorder %v9675_v21, inf  ;;  %v11066_v63 = vld [vmem:[#allocation75_spill] sm:$0xff] }
 0x3d6   :  { %vm4027_vm11 = vcmp.eq.f32.partialorder %v9675_v21, 0.0  ;;  %v4028_v57 = vand.u32 2147483648, %v9675_v21  ;;  %v3868_v50 = vmul.f32 %v3500_v24, %v3500_v24  ;;  %v4008_v25 = vsel %vm4006_vm9, %v4007_v23, %v4005_v18  ;;  %v5938_v24 = vpop.f32.mrf.mxu1  ;;  %v3506_v23 = vpop.f32.mrf.mxu0 }
 0x3d7   :  { %v9953_v9 = vpop.eup %6434  ;;  %4804 = vmatprep.mubr.bf16.mxu1 %v4685_v30  ;;  %v4026_v34 = vsel %vm4025_vm10, %v9675_v21, %v4024_v52  ;;  %v3852_v56 = vmul.f32 %v5937_v39, %v5937_v39  ;;  %v4325_v41 = vmul.f32 %v9727_v40, %v9629_v37  ;;  %vm4326_vm12 = vcmp.eq.f32.partialorder %v9629_v37, inf }
 0x3d8   :  { %v9958_v47 = vpop.eup %6436  ;;  %v4029_v53 = vsel %vm4027_vm11, %v4028_v57, %v4026_v34  ;;  %v9961_v48 = vadd.f32 %v3868_v50, %v9460_v43  ;;  %vm4328_vm13 = vcmp.eq.f32.partialorder %v9629_v37, 0.0  ;;  %v4329_v40 = vand.u32 2147483648, %v9629_v37 }
 0x3d9   :  { %v4662_v54 = vpack.c.bf16 %v4029_v53, %v4008_v25  ;;  %v9966_v12 = vadd.f32 %v3852_v56, %v11066_v63  ;;  %v4327_v21 = vsel %vm4326_vm12, %v9629_v37, %v4325_v41  ;;  %v4346_v39 = vmul.f32 %v9758_v32, %v9658_v20  ;;  %v3640_v56 = vpop.f32.mrf.mxu1 }
 0x3da   :  { %6450 = vrsqrt.f32 %v9961_v48  ;;  %vm4347_vm14 = vcmp.eq.f32.partialorder %v9658_v20, inf  ;;  %vm4349_vm15 = vcmp.eq.f32.partialorder %v9658_v20, 0.0  ;;  %v4330_v43 = vsel %vm4328_vm13, %v4329_v40, %v4327_v21  ;;  %v11069_v40 = vld [vmem:[#allocation76_spill] sm:$0xff] }
 0x3db   :  { %5967 = vmatprep.mubr.bf16.mxu0 %v4662_v54  ;;  %6452 = vrsqrt.f32 %v9966_v12  ;;  %v4350_v30 = vand.u32 2147483648, %v9658_v20  ;;  %v11067_v18 = vand.u32 2147483648, %v9636_v14  ;;  %v9982_v52 = vpop.eup %6438  ;;  %v4348_v32 = vsel %vm4347_vm14, %v9658_v20, %v4346_v39 }
 0x3dc   :  { %v11068_v57 = vand.u32 2147483648, %v9672_v17  ;;  %v3869_v25 = vmul.f32 %v3502_v59, %v3502_v59  ;;  %v3846_v34 = vmul.f32 %v3637_v3, %v3637_v3  ;;  %v9990_v41 = vpop.eup %6440  ;;  %v3871_v14 = vmul.f32 %v3504_v19, %v3504_v19  ;;  %v11070_v3 = vld [vmem:[#allocation77_spill] sm:$0xff] }
 0x3dd   :  { %v4050_v37 = vsel %vm4048_vm4, %v11067_v18, %v9743_v0  ;;  %v4351_v53 = vsel %vm4349_vm15, %v4350_v30, %v4348_v32  ;;  %v3855_v0 = vmul.f32 %v5938_v24, %v5938_v24  ;;  %v9992_v63 = vpop.eup %6442  ;;  %v3872_v17 = vmul.f32 %v3506_v23, %v3506_v23 }
 0x3de   :  { %v4071_v50 = vsel %vm4069_vm7, %v11068_v57, %v9785_v42  ;;  %v4684_v21 = vpack.c.bf16 %v4351_v53, %v4330_v43  ;;  %v9995_v20 = vadd.f32 %v3869_v25, %v9466_v46  ;;  %v9998_v39 = vadd.f32 %v3846_v34, %v11069_v40  ;;  %v10000_v42 = vpop.eup %6444  ;;  %v11071_v46 = vld [vmem:[#allocation91_spill] sm:$0xff]  ;;  %v3510_v57 = vpop.f32.mrf.mxu0 }
 0x3df   :  { %v4665_v54 = vpack.c.bf16 %v4071_v50, %v4050_v37  ;;  %v10003_v59 = vadd.f32 %v3871_v14, %v9473_v27  ;;  %v10006_v30 = vadd.f32 %v3855_v0, %v11070_v3  ;;  %v3849_v19 = vmul.f32 %v3640_v56, %v3640_v56  ;;  %v10010_v43 = vpop.eup %6446  ;;  %v11072_v37 = vld [vmem:[#allocation78_spill] sm:$0xff]  ;;  %v5941_v25 = vpop.f32.mrf.mxu1 }
 0x3e0   :  { %v4374_v24 = vmul.f32 %v9832_v51, %v9730_v13  ;;  %4805 = vmatmul.mubr.bf16.gmra.mxu1 %v4684_v21  ;;  %6454 = vrsqrt.f32 %v9995_v20  ;;  %v10014_v18 = vadd.f32 %v3872_v17, %v11071_v46  ;;  %vm4375_vm0 = vcmp.eq.f32.partialorder %v9730_v13, inf  ;;  %v10018_v27 = vpop.eup %6448  ;;  %v3512_v0 = vpop.f32.mrf.mxu0 }
 0x3e1   :  { %5968 = vmatmul.mubr.bf16.vlgmr.msra.gmra.mxu0 %v4665_v54  ;;  %vm4377_vm1 = vcmp.eq.f32.partialorder %v9730_v13, 0.0  ;;  %6456 = vrsqrt.f32 %v9998_v39  ;;  %v10022_v23 = vadd.f32 %v3849_v19, %v11072_v37  ;;  %v4378_v32 = vand.u32 2147483648, %v9730_v13 }
 0x3e2   :  { %v4376_v51 = vsel %vm4375_vm0, %v9730_v13, %v4374_v24  ;;  %6458 = vrsqrt.f32 %v10003_v59  ;;  %v4395_v50 = vmul.f32 %v9859_v44, %v9749_v8  ;;  %vm4396_vm2 = vcmp.eq.f32.partialorder %v9749_v8, inf }
 0x3e3   :  { %vm4398_vm3 = vcmp.eq.f32.partialorder %v9749_v8, 0.0  ;;  %6460 = vrsqrt.f32 %v10006_v30  ;;  %v4379_v34 = vsel %vm4377_vm1, %v4378_v32, %v4376_v51  ;;  %v4399_v56 = vand.u32 2147483648, %v9749_v8  ;;  %v11073_v51 = vld [vmem:[#allocation92_spill] sm:$0xff] }
 0x3e4   :  { %v4087_v53 = vmul.f32 %v9842_v4, %v9733_v55  ;;  %6462 = vrsqrt.f32 %v10014_v18  ;;  %v4397_v13 = vsel %vm4396_vm2, %v9749_v8, %v4395_v50  ;;  %vm4088_vm4 = vcmp.eq.f32.partialorder %v9733_v55, inf  ;;  %v3653_v8 = vpop.f32.mrf.mxu1  ;;  %v11075_v50 = vld [vmem:[#allocation79_spill] sm:$0xff] }
 0x3e5   :  { %vm4090_vm5 = vcmp.eq.f32.partialorder %v9733_v55, 0.0  ;;  %6464 = vrsqrt.f32 %v10022_v23  ;;  %v4400_v44 = vsel %vm4398_vm3, %v4399_v56, %v4397_v13  ;;  %v4091_v14 = vand.u32 2147483648, %v9733_v55 }
 0x3e6   :  { %v4089_v54 = vsel %vm4088_vm4, %v9733_v55, %v4087_v53  ;;  %v4688_v21 = vpack.c.bf16 %v4400_v44, %v4379_v34  ;;  %v4108_v4 = vmul.f32 %v9865_v60, %v9762_v33  ;;  %vm4109_vm6 = vcmp.eq.f32.partialorder %v9762_v33, inf  ;;  %v11077_v53 = vld [vmem:[#allocation64_spill] sm:$0xff]  ;;  %v5942_v13 = vpop.f32.mrf.mxu1 }
 0x3e7   :  { %vm4111_vm7 = vcmp.eq.f32.partialorder %v9762_v33, 0.0  ;;  %v10046_v40 = vpop.eup %6450  ;;  %v4092_v17 = vsel %vm4090_vm5, %v4091_v14, %v4089_v54  ;;  %v4112_v3 = vand.u32 2147483648, %v9762_v33  ;;  %v3874_v19 = vmul.f32 %v3510_v57, %v3510_v57 }
 0x3e8   :  { %v3864_v24 = vmul.f32 %v5941_v25, %v5941_v25  ;;  %v10049_v46 = vpop.eup %6452  ;;  %4812 = vmatprep.mubr.bf16.mxu1 %v4688_v21  ;;  %v4110_v55 = vsel %vm4109_vm6, %v9762_v33, %v4108_v4  ;;  %v4367_v60 = vmul.f32 %v9804_v35, %v9707_v15  ;;  %vm4368_vm8 = vcmp.eq.f32.partialorder %v9707_v15, inf  ;;  %v3514_v25 = vpop.f32.mrf.mxu0  ;;  %v11078_v21 = vld [vmem:[#allocation63_spill] sm:$0xff] }
 0x3e9   :  { %vm4370_vm9 = vcmp.eq.f32.partialorder %v9707_v15, 0.0  ;;  %v4113_v37 = vsel %vm4111_vm7, %v4112_v3, %v4110_v55  ;;  %v10057_v32 = vadd.f32 %v3874_v19, %v11073_v51  ;;  %v4371_v57 = vand.u32 2147483648, %v9707_v15  ;;  %v11080_v19 = vld [vmem:[#allocation65_spill] sm:$0xff] }
 0x3ea   :  { %v10060_v34 = vadd.f32 %v3864_v24, %v11075_v50  ;;  %v4668_v56 = vpack.c.bf16 %v4113_v37, %v4092_v17  ;;  %v4369_v33 = vsel %vm4368_vm8, %v9707_v15, %v4367_v60  ;;  %v4388_v35 = vmul.f32 %v9848_v28, %v11077_v53  ;;  %v11079_v15 = vld [vmem:[#allocation88_spill] sm:$0xff]  ;;  %v3516_v55 = vpop.f32.mrf.mxu0  ;;  %v3656_v50 = vpop.f32.mrf.mxu1 }
 0x3eb   :  { %11074 = vst [vmem:[#allocation69_spill] sm:$0xff] %v10057_v32  ;;  %vm4389_vm10 = vcmp.eq.f32.partialorder %v11077_v53, inf  ;;  %6466 = vrsqrt.f32 %v10057_v32  ;;  %v4372_v44 = vsel %vm4370_vm9, %v4371_v57, %v4369_v33  ;;  %vm4391_vm11 = vcmp.eq.f32.partialorder %v11077_v53, 0.0 }
 0x3ec   :  { %11076 = vst [vmem:[#allocation70_spill] sm:$0xff] %v10060_v34  ;;  %v4392_v54 = vand.u32 2147483648, %v11077_v53  ;;  %5971 = vmatprep.mubr.bf16.mxu0 %v4668_v56  ;;  %6468 = vrsqrt.f32 %v10060_v34  ;;  %v4390_v14 = vsel %vm4389_vm10, %v11077_v53, %v4388_v35  ;;  %v4129_v4 = vmul.f32 %v11079_v15, %v11078_v21 }
 0x3ed   :  { %vm4130_vm12 = vcmp.eq.f32.partialorder %v11078_v21, inf  ;;  %v10075_v28 = vpop.eup %6454  ;;  %vm4132_vm13 = vcmp.eq.f32.partialorder %v11078_v21, 0.0  ;;  %v4133_v3 = vand.u32 2147483648, %v11078_v21  ;;  %v4150_v24 = vmul.f32 %v9855_v38, %v11080_v19 }
 0x3ee   :  { %v4393_v17 = vsel %vm4391_vm11, %v4392_v54, %v4390_v14  ;;  %v10081_v60 = vpop.eup %6456  ;;  %v4131_v51 = vsel %vm4130_vm12, %v11078_v21, %v4129_v4  ;;  %vm4151_vm14 = vcmp.eq.f32.partialorder %v11080_v19, inf  ;;  %vm4153_vm15 = vcmp.eq.f32.partialorder %v11080_v19, 0.0 }
 0x3ef   :  { %v4687_v37 = vpack.c.bf16 %v4393_v17, %v4372_v44  ;;  %v10086_v57 = vpop.eup %6458  ;;  %v4134_v56 = vsel %vm4132_vm13, %v4133_v3, %v4131_v51  ;;  %v4152_v33 = vsel %vm4151_vm14, %v11080_v19, %v4150_v24  ;;  %v4154_v53 = vand.u32 2147483648, %v11080_v19  ;;  %v11081_v17 = vld [vmem:[#allocation93_spill] sm:$0xff]  ;;  %v11082_v19 = vld [vmem:[#allocation80_spill] sm:$0xff] }
 0x3f0   :  { %v3875_v35 = vmul.f32 %v3512_v0, %v3512_v0  ;;  %v10090_v38 = vpop.eup %6460  ;;  %v3858_v54 = vmul.f32 %v3653_v8, %v3653_v8  ;;  %v3877_v44 = vmul.f32 %v3514_v25, %v3514_v25  ;;  %v3867_v14 = vmul.f32 %v5942_v13, %v5942_v13  ;;  %v11083_v8 = vld [vmem:[#allocation94_spill] sm:$0xff]  ;;  %v11084_v13 = vld [vmem:[#allocation81_spill] sm:$0xff] }
 0x3f1   :  { %4813 = vmatmul.mubr.bf16.gmra.mxu1 %v4687_v37  ;;  %v3878_v21 = vmul.f32 %v3516_v55, %v3516_v55  ;;  %v10092_v15 = vpop.eup %6462  ;;  %v4155_v4 = vsel %vm4153_vm15, %v4154_v53, %v4152_v33  ;;  %v3861_v32 = vmul.f32 %v3656_v50, %v3656_v50  ;;  %v4416_v3 = vmul.f32 %v9908_v61, %v9819_v31  ;;  %v11086_v37 = vld [vmem:[#allocation95_spill] sm:$0xff]  ;;  %v11087_v50 = vld [vmem:[#allocation82_spill] sm:$0xff] }
 0x3f2   :  { %v10095_v34 = vadd.f32 %v3875_v35, %v11081_v17  ;;  %v10099_v24 = vpop.eup %6464  ;;  %v4671_v0 = vpack.c.bf16 %v4155_v4, %v4134_v56  ;;  %v10102_v51 = vadd.f32 %v3858_v54, %v11082_v19  ;;  %v10105_v25 = vadd.f32 %v3877_v44, %v11083_v8  ;;  %v3520_v35 = vpop.f32.mrf.mxu0 }
 0x3f3   :  { %v10108_v55 = vadd.f32 %v3867_v14, %v11084_v13  ;;  %v10112_v33 = vadd.f32 %v3878_v21, %v11086_v37  ;;  %v10115_v53 = vadd.f32 %v3861_v32, %v11087_v50  ;;  %vm4417_vm0 = vcmp.eq.f32.partialorder %v9819_v31, inf  ;;  %v5945_v32 = vpop.f32.mrf.mxu1 }
 0x3f4   :  { %6470 = vrsqrt.f32 %v10095_v34  ;;  %5972 = vmatmul.mubr.bf16.gmra.mxu0 %v4671_v0  ;;  %v4418_v61 = vsel %vm4417_vm0, %v9819_v31, %v4416_v3  ;;  %vm4419_vm1 = vcmp.eq.f32.partialorder %v9819_v31, 0.0  ;;  %v4420_v56 = vand.u32 2147483648, %v9819_v31  ;;  %v3522_v0 = vpop.f32.mrf.mxu0 }
 0x3f5   :  { %11085 = vst [vmem:[#allocation71_spill] sm:$0xff] %v10108_v55  ;;  %6472 = vrsqrt.f32 %v10102_v51  ;;  %v4437_v54 = vmul.f32 %v9939_v11, %v9836_v45  ;;  %vm4438_vm2 = vcmp.eq.f32.partialorder %v9836_v45, inf  ;;  %vm4440_vm3 = vcmp.eq.f32.partialorder %v9836_v45, 0.0  ;;  %v3669_v8 = vpop.f32.mrf.mxu1 }
 0x3f6   :  { %6474 = vrsqrt.f32 %v10105_v25  ;;  %v4421_v44 = vsel %vm4419_vm1, %v4420_v56, %v4418_v61  ;;  %v4441_v14 = vand.u32 2147483648, %v9836_v45  ;;  %v4171_v21 = vmul.f32 %v9916_v49, %v9822_v26  ;;  %v11089_v56 = vld [vmem:[#allocation87_spill] sm:$0xff] }
 0x3f7   :  { %6476 = vrsqrt.f32 %v10108_v55  ;;  %v4439_v31 = vsel %vm4438_vm2, %v9836_v45, %v4437_v54  ;;  %vm4172_vm4 = vcmp.eq.f32.partialorder %v9822_v26, inf  ;;  %vm4174_vm5 = vcmp.eq.f32.partialorder %v9822_v26, 0.0 }
 0x3f8   :  { %6478 = vrsqrt.f32 %v10112_v33  ;;  %v10135_v11 = vpop.eup %6466  ;;  %v4442_v4 = vsel %vm4440_vm3, %v4441_v14, %v4439_v31  ;;  %v4173_v17 = vsel %vm4172_vm4, %v9822_v26, %v4171_v21  ;;  %v4175_v3 = vand.u32 2147483648, %v9822_v26  ;;  %v11092_v21 = vld [vmem:[#allocation83_spill] sm:$0xff] }
 0x3f9   :  { %6480 = vrsqrt.f32 %v10115_v53  ;;  %v10140_v19 = vpop.eup %6468  ;;  %v4691_v49 = vpack.c.bf16 %v4442_v4, %v4421_v44  ;;  %v4192_v45 = vmul.f32 %v9944_v5, %v9839_v36  ;;  %vm4193_vm6 = vcmp.eq.f32.partialorder %v9839_v36, inf  ;;  %v11090_v44 = vld [vmem:[#allocation96_spill] sm:$0xff] }
 0x3fa   :  { %11088 = vst [vmem:[#allocation72_spill] sm:$0xff] %v10140_v19  ;;  %vm4195_vm7 = vcmp.eq.f32.partialorder %v9839_v36, 0.0  ;;  %v4176_v13 = vsel %vm4174_vm5, %v4175_v3, %v4173_v17  ;;  %v4196_v37 = vand.u32 2147483648, %v9839_v36  ;;  %v3880_v50 = vmul.f32 %v3520_v35, %v3520_v35  ;;  %v11094_v17 = vld [vmem:[#allocation67_spill] sm:$0xff]  ;;  %v5946_v3 = vpop.f32.mrf.mxu1 }
 0x3fb   :  { %v3876_v61 = vmul.f32 %v5945_v32, %v5945_v32  ;;  %4820 = vmatprep.mubr.bf16.mxu1 %v4691_v49  ;;  %v4194_v26 = vsel %vm4193_vm6, %v9839_v36, %v4192_v45  ;;  %v4409_v54 = vmul.f32 %v9882_v16, %v11089_v56  ;;  %vm4410_vm8 = vcmp.eq.f32.partialorder %v11089_v56, inf  ;;  %v3524_v32 = vpop.f32.mrf.mxu0 }
 0x3fc   :  { %vm4412_vm9 = vcmp.eq.f32.partialorder %v11089_v56, 0.0  ;;  %v4197_v5 = vsel %vm4195_vm7, %v4196_v37, %v4194_v26  ;;  %v10153_v14 = vadd.f32 %v3880_v50, %v11090_v44  ;;  %v4413_v35 = vand.u32 2147483648, %v11089_v56  ;;  %v11095_v37 = vld [vmem:[#allocation66_spill] sm:$0xff] }
 0x3fd   :  { %v10156_v31 = vadd.f32 %v3876_v61, %v11092_v21  ;;  %v4674_v4 = vpack.c.bf16 %v4197_v5, %v4176_v13  ;;  %v4411_v36 = vsel %vm4410_vm8, %v11089_v56, %v4409_v54  ;;  %v4430_v16 = vmul.f32 %v9923_v22, %v11094_v17  ;;  %v11096_v56 = vld [vmem:[#allocation89_spill] sm:$0xff]  ;;  %v3526_v5 = vpop.f32.mrf.mxu0 }
 0x3fe   :  { %11091 = vst [vmem:[#allocation73_spill] sm:$0xff] %v10153_v14  ;;  %vm4431_vm10 = vcmp.eq.f32.partialorder %v11094_v17, inf  ;;  %6482 = vrsqrt.f32 %v10153_v14  ;;  %v4414_v49 = vsel %vm4412_vm9, %v4413_v35, %v4411_v36  ;;  %vm4433_vm11 = vcmp.eq.f32.partialorder %v11094_v17, 0.0  ;;  %v11097_v14 = vld [vmem:[#allocation97_spill] sm:$0xff] }
 0x3ff   :  { %11093 = vst [vmem:[#allocation74_spill] sm:$0xff] %v10156_v31  ;;  %v4434_v45 = vand.u32 2147483648, %v11094_v17  ;;  %5975 = vmatprep.mubr.bf16.mxu0 %v4674_v4  ;;  %6484 = vrsqrt.f32 %v10156_v31  ;;  %v4432_v13 = vsel %vm4431_vm10, %v11094_v17, %v4430_v16  ;;  %v4213_v50 = vmul.f32 %v9887_v7, %v11095_v37  ;;  %v3672_v7 = vpop.f32.mrf.mxu1 }
 0x400   :  { %vm4214_vm12 = vcmp.eq.f32.partialorder %v11095_v37, inf  ;;  %vm4216_vm13 = vcmp.eq.f32.partialorder %v11095_v37, 0.0  ;;  %v4217_v26 = vand.u32 2147483648, %v11095_v37  ;;  %v4234_v54 = vmul.f32 %v9930_v62, %v11096_v56 }
 0x401   :  { %v10171_v22 = vpop.eup %6470  ;;  %v4435_v61 = vsel %vm4433_vm11, %v4434_v45, %v4432_v13  ;;  %v4215_v35 = vsel %vm4214_vm12, %v11095_v37, %v4213_v50  ;;  %vm4235_vm14 = vcmp.eq.f32.partialorder %v11096_v56, inf  ;;  %vm4237_vm15 = vcmp.eq.f32.partialorder %v11096_v56, 0.0 }
 0x402   :  { %v10177_v44 = vpop.eup %6472  ;;  %v4690_v21 = vpack.c.bf16 %v4435_v61, %v4414_v49  ;;  %v4218_v36 = vsel %vm4216_vm13, %v4217_v26, %v4215_v35  ;;  %v4236_v17 = vsel %vm4235_vm14, %v11096_v56, %v4234_v54  ;;  %v4238_v16 = vand.u32 2147483648, %v11096_v56  ;;  %v11098_v56 = vld [vmem:[#allocation84_spill] sm:$0xff] }
 0x403   :  { %v10182_v4 = vpop.eup %6474  ;;  %v3881_v45 = vmul.f32 %v3522_v0, %v3522_v0  ;;  %v3870_v13 = vmul.f32 %v3669_v8, %v3669_v8  ;;  %v3883_v49 = vmul.f32 %v3524_v32, %v3524_v32  ;;  %v3879_v61 = vmul.f32 %v5946_v3, %v5946_v3  ;;  %v11099_v8 = vld [vmem:[#allocation98_spill] sm:$0xff]  ;;  %v11100_v3 = vld [vmem:[#allocation31_spill] sm:$0xff] }
 0x404   :  { %v10186_v62 = vpop.eup %6476  ;;  %4821 = vmatmul.mubr.bf16.gmra.mxu1 %v4690_v21  ;;  %v3884_v37 = vmul.f32 %v3526_v5, %v3526_v5  ;;  %v4239_v31 = vsel %vm4237_vm15, %v4238_v16, %v4236_v17  ;;  %v3873_v19 = vmul.f32 %v3672_v7, %v3672_v7  ;;  %v4458_v26 = vmul.f32 %v9982_v52, %v9891_v1  ;;  %v11102_v21 = vld [vmem:[#allocation102_spill] sm:$0xff]  ;;  %v11103_v7 = vld [vmem:[#allocation99_spill] sm:$0xff]  ;;  %v3530_v16 = vpop.f32.mrf.mxu0 }
 0x405   :  { %v10188_v50 = vpop.eup %6478  ;;  %v10191_v55 = vadd.f32 %v3881_v45, %v11097_v14  ;;  %v4677_v0 = vpack.c.bf16 %v4239_v31, %v4218_v36  ;;  %v10198_v35 = vadd.f32 %v3870_v13, %v11098_v56  ;;  %v10201_v32 = vadd.f32 %v3883_v49, %v11099_v8  ;;  %v11104_v31 = vld [vmem:[#allocation49_spill] sm:$0xff]  ;;  %v5949_v49 = vpop.f32.mrf.mxu1 }
 0x406   :  { %v10195_v54 = vpop.eup %6480  ;;  %v10204_v5 = vadd.f32 %v3879_v61, %v11100_v3  ;;  %v10208_v14 = vmul.f32 %v11102_v21, %v11102_v21  ;;  %v10212_v52 = vadd.f32 %v3884_v37, %v11103_v7  ;;  %vm4459_vm0 = vcmp.eq.f32.partialorder %v9891_v1, inf  ;;  %v3532_v56 = vpop.f32.mrf.mxu0 }
 0x407   :  { %6486 = vrsqrt.f32 %v10191_v55  ;;  %5976 = vmatmul.mubr.bf16.gmra.mxu0 %v4677_v0  ;;  %v10217_v36 = vadd.f32 %v3873_v19, %v11104_v31  ;;  %v4460_v17 = vsel %vm4459_vm0, %v9891_v1, %v4458_v26  ;;  %vm4461_vm1 = vcmp.eq.f32.partialorder %v9891_v1, 0.0  ;;  %v3685_v21 = vpop.f32.mrf.mxu1 }
 0x408   :  { %11101 = vst [vmem:[#allocation75_spill] sm:$0xff] %v10204_v5  ;;  %6488 = vrsqrt.f32 %v10198_v35  ;;  %v4462_v45 = vand.u32 2147483648, %v9891_v1  ;;  %v4479_v13 = vmul.f32 %v10010_v43, %v9904_v6  ;;  %vm4480_vm2 = vcmp.eq.f32.partialorder %v9904_v6, inf }
 0x409   :  { %6490 = vrsqrt.f32 %v10201_v32  ;;  %vm4482_vm3 = vcmp.eq.f32.partialorder %v9904_v6, 0.0  ;;  %v4483_v19 = vand.u32 2147483648, %v9904_v6  ;;  %v4255_v61 = vmul.f32 %v9990_v41, %v9894_v10 }
 0x40a   :  { %6492 = vrsqrt.f32 %v10204_v5  ;;  %v4463_v37 = vsel %vm4461_vm1, %v4462_v45, %v4460_v17  ;;  %v4481_v1 = vsel %vm4480_vm2, %v9904_v6, %v4479_v13  ;;  %vm4256_vm4 = vcmp.eq.f32.partialorder %v9894_v10, inf }
 0x40b   :  { %6494 = vrsqrt.f32 %v10212_v52  ;;  %v10234_v43 = vpop.eup %6482  ;;  %v4484_v26 = vsel %vm4482_vm3, %v4483_v19, %v4481_v1  ;;  %v4257_v0 = vsel %vm4256_vm4, %v9894_v10, %v4255_v61  ;;  %vm4258_vm5 = vcmp.eq.f32.partialorder %v9894_v10, 0.0  ;;  %v11106_v19 = vld [vmem:[#allocation68_spill] sm:$0xff] }
 0x40c   :  { %6496 = vrsqrt.f32 %v10217_v36  ;;  %v10239_v8 = vpop.eup %6484  ;;  %v4694_v41 = vpack.c.bf16 %v4484_v26, %v4463_v37  ;;  %v4259_v3 = vand.u32 2147483648, %v9894_v10  ;;  %v4276_v6 = vmul.f32 %v10018_v27, %v9912_v29  ;;  %v11107_v27 = vld [vmem:[#allocation100_spill] sm:$0xff]  ;;  %v3534_v26 = vpop.f32.mrf.mxu0 }
 0x40d   :  { %11105 = vst [vmem:[#allocation76_spill] sm:$0xff] %v10239_v8  ;;  %vm4277_vm6 = vcmp.eq.f32.partialorder %v9912_v29, inf  ;;  %vm4279_vm7 = vcmp.eq.f32.partialorder %v9912_v29, 0.0  ;;  %v4280_v7 = vand.u32 2147483648, %v9912_v29  ;;  %v3886_v31 = vmul.f32 %v3530_v16, %v3530_v16 }
 0x40e   :  { %v3888_v17 = vmul.f32 %v5949_v49, %v5949_v49  ;;  %4828 = vmatprep.mubr.bf16.mxu1 %v4694_v41  ;;  %v4260_v45 = vsel %vm4258_vm5, %v4259_v3, %v4257_v0  ;;  %v4278_v13 = vsel %vm4277_vm6, %v9912_v29, %v4276_v6  ;;  %v4451_v61 = vmul.f32 %v9953_v9, %v11106_v19  ;;  %v11109_v49 = vld [vmem:[#allocation61_spill] sm:$0xff]  ;;  %v5950_v0 = vpop.f32.mrf.mxu1 }
 0x40f   :  { %vm4452_vm8 = vcmp.eq.f32.partialorder %v11106_v19, inf  ;;  %v4281_v10 = vsel %vm4279_vm7, %v4280_v7, %v4278_v13  ;;  %v10252_v37 = vadd.f32 %v3886_v31, %v11107_v27  ;;  %vm4454_vm9 = vcmp.eq.f32.partialorder %v11106_v19, 0.0  ;;  %v11110_v31 = vld [vmem:[#allocation90_spill] sm:$0xff] }
 0x410   :  { %v4455_v1 = vand.u32 2147483648, %v11106_v19  ;;  %v4680_v16 = vpack.c.bf16 %v4281_v10, %v4260_v45  ;;  %v10257_v41 = vadd.f32 %v3888_v17, %v11109_v49  ;;  %v4453_v29 = vsel %vm4452_vm8, %v11106_v19, %v4451_v61  ;;  %v3536_v61 = vpop.f32.mrf.mxu0 }
 0x411   :  { %11108 = vst [vmem:[#allocation77_spill] sm:$0xff] %v10252_v37  ;;  %v4472_v9 = vmul.f32 %v9992_v63, %v9897_v2  ;;  %6498 = vrsqrt.f32 %v10252_v37  ;;  %vm4473_vm10 = vcmp.eq.f32.partialorder %v9897_v2, inf  ;;  %v4476_v6 = vand.u32 2147483648, %v9897_v2  ;;  %v11111_v37 = vld [vmem:[#allocation101_spill] sm:$0xff] }
 0x412   :  { %v4456_v3 = vsel %vm4454_vm9, %v4455_v1, %v4453_v29  ;;  %5979 = vmatprep.mubr.bf16.mxu0 %v4680_v16  ;;  %vm4475_vm11 = vcmp.eq.f32.partialorder %v9897_v2, 0.0  ;;  %v4297_v17 = vmul.f32 %v9958_v47, %v11110_v31  ;;  %vm4298_vm12 = vcmp.eq.f32.partialorder %v11110_v31, inf  ;;  %v3688_v47 = vpop.f32.mrf.mxu1 }
 0x413   :  { %v4474_v7 = vsel %vm4473_vm10, %v9897_v2, %v4472_v9  ;;  %vm4300_vm13 = vcmp.eq.f32.partialorder %v11110_v31, 0.0  ;;  %v4301_v13 = vand.u32 2147483648, %v11110_v31  ;;  %v4318_v19 = vmul.f32 %v10000_v42, %v9901_v58 }
 0x414   :  { %v10270_v45 = vpop.eup %6486  ;;  %v4477_v63 = vsel %vm4475_vm11, %v4476_v6, %v4474_v7  ;;  %v4299_v2 = vsel %vm4298_vm12, %v11110_v31, %v4297_v17  ;;  %vm4319_vm14 = vcmp.eq.f32.partialorder %v9901_v58, inf  ;;  %vm4321_vm15 = vcmp.eq.f32.partialorder %v9901_v58, 0.0 }
 0x415   :  { %v10276_v10 = vpop.eup %6488  ;;  %v4693_v27 = vpack.c.bf16 %v4477_v63, %v4456_v3  ;;  %v4302_v16 = vsel %vm4300_vm13, %v4301_v13, %v4299_v2  ;;  %v4320_v49 = vsel %vm4319_vm14, %v9901_v58, %v4318_v19  ;;  %v4322_v29 = vand.u32 2147483648, %v9901_v58 }
 0x416   :  { %v10281_v1 = vpop.eup %6490  ;;  %v3887_v9 = vmul.f32 %v3532_v56, %v3532_v56  ;;  %v3882_v6 = vmul.f32 %v3685_v21, %v3685_v21  ;;  %v3889_v3 = vmul.f32 %v3534_v26, %v3534_v26  ;;  %v3891_v7 = vmul.f32 %v5950_v0, %v5950_v0  ;;  %v11112_v56 = vld [vmem:[#allocation62_spill] sm:$0xff]  ;;  %v11113_v26 = vld [vmem:[#allocation103_spill] sm:$0xff] }
 0x417   :  { %v10285_v42 = vpop.eup %6492  ;;  %4829 = vmatmul.mubr.bf16.gmra.mxu1 %v4693_v27  ;;  %v3890_v31 = vmul.f32 %v3536_v61, %v3536_v61  ;;  %v4323_v63 = vsel %vm4321_vm15, %v4322_v29, %v4320_v49  ;;  %v3885_v8 = vmul.f32 %v3688_v47, %v3688_v47  ;;  %v4500_v13 = vmul.f32 %v10075_v28, %v9995_v20  ;;  %v11114_v61 = vld [vmem:[#allocation85_spill] sm:$0xff]  ;;  %v11115_v27 = vld [vmem:[#allocation86_spill] sm:$0xff] }
 0x418   :  { %v10287_v17 = vpop.eup %6494  ;;  %v10290_v5 = vadd.f32 %v3887_v9, %v11111_v37  ;;  %6500 = vrsqrt.f32 %v10257_v41  ;;  %v4683_v58 = vpack.c.bf16 %v4323_v63, %v4302_v16  ;;  %v10298_v21 = vadd.f32 %v3882_v6, %v11112_v56 }
 0x419   :  { %v10294_v19 = vpop.eup %6496  ;;  %v10301_v0 = vadd.f32 %v3889_v3, %v11113_v26  ;;  %v10305_v37 = vadd.f32 %v3891_v7, %v11114_v61  ;;  %vm4501_vm0 = vcmp.eq.f32.partialorder %v9995_v20, inf  ;;  %v10310_v28 = vadd.f32 %v3890_v31, %v10208_v14 }
 0x41a   :  { %6502 = vrsqrt.f32 %v10290_v5  ;;  %5980 = vmatmul.mubr.bf16.gmra.mxu0 %v4683_v58  ;;  %v10313_v2 = vadd.f32 %v3885_v8, %v11115_v27  ;;  %v4502_v47 = vsel %vm4501_vm0, %v9995_v20, %v4500_v13  ;;  %vm4503_vm1 = vcmp.eq.f32.partialorder %v9995_v20, 0.0 }
 0x41b   :  { %6504 = vrsqrt.f32 %v10298_v21  ;;  %v4504_v16 = vand.u32 2147483648, %v9995_v20  ;;  %v4521_v49 = vmul.f32 %v10092_v15, %v10014_v18  ;;  %vm4522_vm2 = vcmp.eq.f32.partialorder %v10014_v18, inf }
 0x41c   :  { %6506 = vrsqrt.f32 %v10301_v0  ;;  %vm4524_vm3 = vcmp.eq.f32.partialorder %v10014_v18, 0.0  ;;  %v4525_v14 = vand.u32 2147483648, %v10014_v18  ;;  %v4339_v8 = vmul.f32 %v10081_v60, %v9998_v39 }
 0x41d   :  { %6508 = vrsqrt.f32 %v10305_v37  ;;  %v4505_v29 = vsel %vm4503_vm1, %v4504_v16, %v4502_v47  ;;  %v4523_v9 = vsel %vm4522_vm2, %v10014_v18, %v4521_v49  ;;  %vm4340_vm4 = vcmp.eq.f32.partialorder %v9998_v39, inf }
 0x41e   :  { %v10329_v20 = vpop.eup %6498  ;;  %6510 = vrsqrt.f32 %v10310_v28  ;;  %v4526_v15 = vsel %vm4524_vm3, %v4525_v14, %v4523_v9  ;;  %v4341_v6 = vsel %vm4340_vm4, %v9998_v39, %v4339_v8  ;;  %vm4342_vm5 = vcmp.eq.f32.partialorder %v9998_v39, 0.0 }
 0x41f   :  { %6512 = vrsqrt.f32 %v10313_v2  ;;  %v4697_v3 = vpack.c.bf16 %v4526_v15, %v4505_v29  ;;  %v4343_v60 = vand.u32 2147483648, %v9998_v39  ;;  %v4360_v7 = vmul.f32 %v10099_v24, %v10022_v23 }
 0x420   :  { %vm4361_vm6 = vcmp.eq.f32.partialorder %v10022_v23, inf  ;;  %vm4363_vm7 = vcmp.eq.f32.partialorder %v10022_v23, 0.0  ;;  %v4364_v18 = vand.u32 2147483648, %v10022_v23  ;;  %v4493_v31 = vmul.f32 %v10046_v40, %v9961_v48 }
 0x421   :  { %4836 = vmatprep.mubr.bf16.mxu1 %v4697_v3  ;;  %v4344_v63 = vsel %vm4342_vm5, %v4343_v60, %v4341_v6  ;;  %v4362_v13 = vsel %vm4361_vm6, %v10022_v23, %v4360_v7  ;;  %vm4494_vm8 = vcmp.eq.f32.partialorder %v9961_v48, inf  ;;  %v4514_v39 = vmul.f32 %v10086_v57, %v10003_v59 }
 0x422   :  { %v4365_v58 = vsel %vm4363_vm7, %v4364_v18, %v4362_v13  ;;  %v4495_v24 = vsel %vm4494_vm8, %v9961_v48, %v4493_v31  ;;  %v4497_v56 = vand.u32 2147483648, %v9961_v48  ;;  %vm4515_vm9 = vcmp.eq.f32.partialorder %v10003_v59, inf }
 0x423   :  { %v4686_v26 = vpack.c.bf16 %v4365_v58, %v4344_v63  ;;  %vm4496_vm10 = vcmp.eq.f32.partialorder %v9961_v48, 0.0  ;;  %v4516_v40 = vsel %vm4515_vm9, %v10003_v59, %v4514_v39  ;;  %v4518_v61 = vand.u32 2147483648, %v10003_v59 }
 0x424   :  { %v4498_v23 = vsel %vm4496_vm10, %v4497_v56, %v4495_v24  ;;  %vm4517_vm11 = vcmp.eq.f32.partialorder %v10003_v59, 0.0  ;;  %v4381_v57 = vmul.f32 %v10049_v46, %v9966_v12  ;;  %vm4382_vm12 = vcmp.eq.f32.partialorder %v9966_v12, inf }
 0x425   :  { %v10357_v27 = vpop.eup %6500  ;;  %5983 = vmatprep.mubr.bf16.mxu0 %v4686_v26  ;;  %v4519_v47 = vsel %vm4517_vm11, %v4518_v61, %v4516_v40  ;;  %v4385_v16 = vand.u32 2147483648, %v9966_v12  ;;  %v4402_v48 = vmul.f32 %v10090_v38, %v10006_v30  ;;  %vm4403_vm13 = vcmp.eq.f32.partialorder %v10006_v30, inf  ;;  %v11116_v26 = vld [vmem:[#allocation69_spill] sm:$0xff] }
 0x426   :  { %v4696_v14 = vpack.c.bf16 %v4519_v47, %v4498_v23  ;;  %v4383_v59 = vsel %vm4382_vm12, %v9966_v12, %v4381_v57  ;;  %v4406_v46 = vand.u32 2147483648, %v10006_v30  ;;  %v4542_v8 = vmul.f32 %v10171_v22, %v10095_v34 }
 0x427   :  { %v10363_v49 = vpop.eup %6502  ;;  %vm4384_vm14 = vcmp.eq.f32.partialorder %v9966_v12, 0.0  ;;  %v4404_v9 = vsel %vm4403_vm13, %v10006_v30, %v4402_v48  ;;  %vm4405_vm15 = vcmp.eq.f32.partialorder %v10006_v30, 0.0  ;;  %vm4543_vm0 = vcmp.eq.f32.partialorder %v10095_v34, inf  ;;  %v11117_v48 = vld [vmem:[#allocation70_spill] sm:$0xff] }
 0x428   :  { %v10369_v29 = vpop.eup %6504  ;;  %4837 = vmatmul.mubr.bf16.gmra.mxu1 %v4696_v14  ;;  %v4386_v15 = vsel %vm4384_vm14, %v4385_v16, %v4383_v59  ;;  %v4407_v6 = vsel %vm4405_vm15, %v4406_v46, %v4404_v9  ;;  %v4544_v3 = vsel %vm4543_vm0, %v10095_v34, %v4542_v8  ;;  %v4563_v22 = vmul.f32 %v10188_v50, %v10112_v33  ;;  %v11118_v14 = vld [vmem:[#allocation72_spill] sm:$0xff]  ;;  %v11119_v8 = vld [vmem:[#allocation71_spill] sm:$0xff] }
 0x429   :  { %v10375_v38 = vpop.eup %6506  ;;  %v4689_v60 = vpack.c.bf16 %v4407_v6, %v4386_v15  ;;  %v4546_v7 = vand.u32 2147483648, %v10095_v34  ;;  %vm4564_vm1 = vcmp.eq.f32.partialorder %v10112_v33, inf  ;;  %v4567_v12 = vand.u32 2147483648, %v10112_v33 }
 0x42a   :  { %v10383_v30 = vpop.eup %6508  ;;  %vm4545_vm2 = vcmp.eq.f32.partialorder %v10095_v34, 0.0  ;;  %v4565_v18 = vsel %vm4564_vm1, %v10112_v33, %v4563_v22  ;;  %vm4566_vm3 = vcmp.eq.f32.partialorder %v10112_v33, 0.0  ;;  %v4423_v31 = vmul.f32 %v10177_v44, %v10102_v51 }
 0x42b   :  { %v10390_v63 = vpop.eup %6510  ;;  %5984 = vmatmul.mubr.bf16.gmra.mxu0 %v4689_v60  ;;  %v4547_v50 = vsel %vm4545_vm2, %v4546_v7, %v4544_v3  ;;  %v4568_v13 = vsel %vm4566_vm3, %v4567_v12, %v4565_v18  ;;  %vm4424_vm4 = vcmp.eq.f32.partialorder %v10102_v51, inf  ;;  %v4444_v39 = vmul.f32 %v10195_v54, %v10115_v53 }
 0x42c   :  { %v10395_v58 = vpop.eup %6512  ;;  %v4700_v34 = vpack.c.bf16 %v4568_v13, %v4547_v50  ;;  %v4425_v24 = vsel %vm4424_vm4, %v10102_v51, %v4423_v31  ;;  %v4427_v33 = vand.u32 2147483648, %v10102_v51  ;;  %vm4445_vm5 = vcmp.eq.f32.partialorder %v10115_v53, inf }
 0x42d   :  { %vm4426_vm6 = vcmp.eq.f32.partialorder %v10102_v51, 0.0  ;;  %v4446_v44 = vsel %vm4445_vm5, %v10115_v53, %v4444_v39  ;;  %v4448_v56 = vand.u32 2147483648, %v10115_v53  ;;  %v4535_v40 = vmul.f32 %v10135_v11, %v11116_v26 }
 0x42e   :  { %4844 = vmatprep.mubr.bf16.mxu1 %v4700_v34  ;;  %v4428_v54 = vsel %vm4426_vm6, %v4427_v33, %v4425_v24  ;;  %vm4447_vm7 = vcmp.eq.f32.partialorder %v10115_v53, 0.0  ;;  %vm4536_vm8 = vcmp.eq.f32.partialorder %v11116_v26, inf  ;;  %v4556_v61 = vmul.f32 %v10182_v4, %v10105_v25 }
 0x42f   :  { %v4449_v23 = vsel %vm4447_vm7, %v4448_v56, %v4446_v44  ;;  %v4537_v57 = vsel %vm4536_vm8, %v11116_v26, %v4535_v40  ;;  %v4539_v51 = vand.u32 2147483648, %v11116_v26  ;;  %vm4557_vm9 = vcmp.eq.f32.partialorder %v10105_v25, inf  ;;  %v11120_v44 = vld [vmem:[#allocation73_spill] sm:$0xff] }
 0x430   :  { %v4692_v47 = vpack.c.bf16 %v4449_v23, %v4428_v54  ;;  %vm4538_vm10 = vcmp.eq.f32.partialorder %v11116_v26, 0.0  ;;  %v4558_v11 = vsel %vm4557_vm9, %v10105_v25, %v4556_v61  ;;  %v4560_v16 = vand.u32 2147483648, %v10105_v25 }
 0x431   :  { %v4540_v53 = vsel %vm4538_vm10, %v4539_v51, %v4537_v57  ;;  %vm4559_vm11 = vcmp.eq.f32.partialorder %v10105_v25, 0.0  ;;  %v4465_v4 = vmul.f32 %v11118_v14, %v11117_v48  ;;  %vm4466_vm12 = vcmp.eq.f32.partialorder %v11117_v48, inf  ;;  %v11121_v57 = vld [vmem:[#allocation74_spill] sm:$0xff]  ;;  %v11122_v51 = vld [vmem:[#allocation76_spill] sm:$0xff] }
 0x432   :  { %5987 = vmatprep.mubr.bf16.mxu0 %v4692_v47  ;;  %v4561_v59 = vsel %vm4559_vm11, %v4560_v16, %v4558_v11  ;;  %v4469_v46 = vand.u32 2147483648, %v11117_v48  ;;  %v4486_v9 = vmul.f32 %v10186_v62, %v11119_v8  ;;  %vm4487_vm13 = vcmp.eq.f32.partialorder %v11119_v8, inf }
 0x433   :  { %v4699_v15 = vpack.c.bf16 %v4561_v59, %v4540_v53  ;;  %v4467_v6 = vsel %vm4466_vm12, %v11117_v48, %v4465_v4  ;;  %v4490_v3 = vand.u32 2147483648, %v11119_v8  ;;  %v4584_v25 = vmul.f32 %v10270_v45, %v10191_v55  ;;  %v11123_v53 = vld [vmem:[#allocation75_spill] sm:$0xff] }
 0x434   :  { %vm4468_vm14 = vcmp.eq.f32.partialorder %v11117_v48, 0.0  ;;  %v4488_v22 = vsel %vm4487_vm13, %v11119_v8, %v4486_v9  ;;  %vm4489_vm15 = vcmp.eq.f32.partialorder %v11119_v8, 0.0  ;;  %vm4585_vm0 = vcmp.eq.f32.partialorder %v10191_v55, inf }
 0x435   :  { %4845 = vmatmul.mubr.bf16.gmra.mxu1 %v4699_v15  ;;  %v4470_v62 = vsel %vm4468_vm14, %v4469_v46, %v4467_v6  ;;  %v4491_v60 = vsel %vm4489_vm15, %v4490_v3, %v4488_v22  ;;  %v4586_v7 = vsel %vm4585_vm0, %v10191_v55, %v4584_v25  ;;  %v4605_v12 = vmul.f32 %v10287_v17, %v10212_v52 }
 0x436   :  { %v4695_v18 = vpack.c.bf16 %v4491_v60, %v4470_v62  ;;  %v4588_v31 = vand.u32 2147483648, %v10191_v55  ;;  %vm4606_vm1 = vcmp.eq.f32.partialorder %v10212_v52, inf  ;;  %v4609_v45 = vand.u32 2147483648, %v10212_v52 }
 0x437   :  { %vm4587_vm2 = vcmp.eq.f32.partialorder %v10191_v55, 0.0  ;;  %v4607_v50 = vsel %vm4606_vm1, %v10212_v52, %v4605_v12  ;;  %vm4608_vm3 = vcmp.eq.f32.partialorder %v10212_v52, 0.0  ;;  %v4507_v13 = vmul.f32 %v10276_v10, %v10198_v35 }
 0x438   :  { %5988 = vmatmul.mubr.bf16.gmra.mxu0 %v4695_v18  ;;  %v4589_v39 = vsel %vm4587_vm2, %v4588_v31, %v4586_v7  ;;  %v4610_v34 = vsel %vm4608_vm3, %v4609_v45, %v4607_v50  ;;  %vm4508_vm4 = vcmp.eq.f32.partialorder %v10198_v35, inf  ;;  %v4528_v17 = vmul.f32 %v10294_v19, %v10217_v36 }
 0x439   :  { %v4703_v24 = vpack.c.bf16 %v4610_v34, %v4589_v39  ;;  %v4509_v33 = vsel %vm4508_vm4, %v10198_v35, %v4507_v13  ;;  %v4511_v55 = vand.u32 2147483648, %v10198_v35  ;;  %vm4529_vm5 = vcmp.eq.f32.partialorder %v10217_v36, inf  ;;  %v11124_v13 = vld [vmem:[#allocation77_spill] sm:$0xff] }
 0x43a   :  { %vm4510_vm6 = vcmp.eq.f32.partialorder %v10198_v35, 0.0  ;;  %v4530_v52 = vsel %vm4529_vm5, %v10217_v36, %v4528_v17  ;;  %v4532_v10 = vand.u32 2147483648, %v10217_v36  ;;  %v4577_v56 = vmul.f32 %v10234_v43, %v11120_v44 }
 0x43b   :  { %4852 = vmatprep.mubr.bf16.mxu1 %v4703_v24  ;;  %v4512_v26 = vsel %vm4510_vm6, %v4511_v55, %v4509_v33  ;;  %vm4531_vm7 = vcmp.eq.f32.partialorder %v10217_v36, 0.0  ;;  %vm4578_vm8 = vcmp.eq.f32.partialorder %v11120_v44, inf  ;;  %v4598_v19 = vmul.f32 %v10281_v1, %v10201_v32 }
 0x43c   :  { %v4533_v40 = vsel %vm4531_vm7, %v4532_v10, %v4530_v52  ;;  %v4579_v54 = vsel %vm4578_vm8, %v11120_v44, %v4577_v56  ;;  %v4581_v35 = vand.u32 2147483648, %v11120_v44  ;;  %vm4599_vm9 = vcmp.eq.f32.partialorder %v10201_v32, inf }
 0x43d   :  { %v4698_v61 = vpack.c.bf16 %v4533_v40, %v4512_v26  ;;  %vm4580_vm10 = vcmp.eq.f32.partialorder %v11120_v44, 0.0  ;;  %v4600_v43 = vsel %vm4599_vm9, %v10201_v32, %v4598_v19  ;;  %v4602_v23 = vand.u32 2147483648, %v10201_v32  ;;  %v10467_v47 = vpop.f32.mrf.mxu1 }
 0x43e   :  { %v4582_v36 = vsel %vm4580_vm10, %v4581_v35, %v4579_v54  ;;  %vm4601_vm11 = vcmp.eq.f32.partialorder %v10201_v32, 0.0  ;;  %v4549_v1 = vmul.f32 %v11122_v51, %v11121_v57  ;;  %vm4550_vm12 = vcmp.eq.f32.partialorder %v11121_v57, inf }
 0x43f   :  { %5991 = vmatprep.mubr.bf16.mxu0 %v4698_v61  ;;  %v4603_v11 = vsel %vm4601_vm11, %v4602_v23, %v4600_v43  ;;  %v4553_v16 = vand.u32 2147483648, %v11121_v57  ;;  %v4570_v48 = vmul.f32 %v10285_v42, %v11123_v53  ;;  %vm4571_vm13 = vcmp.eq.f32.partialorder %v11123_v53, inf  ;;  %v5592_v46 = vpop.f32.mrf.mxu1 }
 0x440   :  { %v4702_v14 = vpack.c.bf16 %v4603_v11, %v4582_v36  ;;  %v4551_v4 = vsel %vm4550_vm12, %v11121_v57, %v4549_v1  ;;  %v4574_v32 = vand.u32 2147483648, %v11123_v53  ;;  %v4626_v59 = vmul.f32 %v10363_v49, %v10290_v5 }
 0x441   :  { %vm4552_vm14 = vcmp.eq.f32.partialorder %v11121_v57, 0.0  ;;  %v4572_v8 = vsel %vm4571_vm13, %v11123_v53, %v4570_v48  ;;  %vm4573_vm15 = vcmp.eq.f32.partialorder %v11123_v53, 0.0  ;;  %vm4627_vm0 = vcmp.eq.f32.partialorder %v10290_v5, inf  ;;  %v10484_v3 = vpop.f32.mrf.mxu1 }
 0x442   :  { %4853 = vmatmul.mubr.bf16.gmra.mxu1 %v4702_v14  ;;  %v4554_v42 = vsel %vm4552_vm14, %v4553_v16, %v4551_v4  ;;  %v4575_v9 = vsel %vm4573_vm15, %v4574_v32, %v4572_v8  ;;  %v4628_v15 = vsel %vm4627_vm0, %v10290_v5, %v4626_v59  ;;  %v4647_v6 = vmul.f32 %v10390_v63, %v10310_v28 }
 0x443   :  { %v4701_v49 = vpack.c.bf16 %v4575_v9, %v4554_v42  ;;  %v4630_v25 = vand.u32 2147483648, %v10290_v5  ;;  %vm4648_vm1 = vcmp.eq.f32.partialorder %v10310_v28, inf  ;;  %v4651_v22 = vand.u32 2147483648, %v10310_v28  ;;  %v10494_v7 = vpop.f32.mrf.mxu1 }
 0x444   :  { %vm4629_vm2 = vcmp.eq.f32.partialorder %v10290_v5, 0.0  ;;  %v4649_v62 = vsel %vm4648_vm1, %v10310_v28, %v4647_v6  ;;  %vm4650_vm3 = vcmp.eq.f32.partialorder %v10310_v28, 0.0  ;;  %v4591_v60 = vmul.f32 %v10369_v29, %v10298_v21 }
 0x445   :  { %5992 = vmatmul.mubr.bf16.gmra.mxu0 %v4701_v49  ;;  %v4631_v63 = vsel %vm4629_vm2, %v4630_v25, %v4628_v15  ;;  %v4652_v12 = vsel %vm4650_vm3, %v4651_v22, %v4649_v62  ;;  %vm4592_vm4 = vcmp.eq.f32.partialorder %v10298_v21, inf  ;;  %v4612_v18 = vmul.f32 %v10395_v58, %v10313_v2  ;;  %v11125_v49 = vld [vmem:[#allocation17_spill] sm:$0xff]  ;;  %v11126_v25 = vld [vmem:[#allocation51_spill] sm:$0xff] }
 0x446   :  { %v4706_v31 = vpack.c.bf16 %v4652_v12, %v4631_v63  ;;  %v4593_v5 = vsel %vm4592_vm4, %v10298_v21, %v4591_v60  ;;  %v4595_v45 = vand.u32 2147483648, %v10298_v21  ;;  %vm4613_vm5 = vcmp.eq.f32.partialorder %v10313_v2, inf  ;;  %v11127_v62 = vld [vmem:[#allocation35_spill] sm:$0xff]  ;;  %v11128_v12 = vld [vmem:[#allocation53_spill] sm:$0xff] }
 0x447   :  { %v10502_v28 = vpop.f32.mrf.mxu1  ;;  %vm4594_vm6 = vcmp.eq.f32.partialorder %v10298_v21, 0.0  ;;  %v4614_v29 = vsel %vm4613_vm5, %v10313_v2, %v4612_v18  ;;  %v4616_v50 = vand.u32 2147483648, %v10313_v2  ;;  %v4619_v39 = vmul.f32 %v10329_v20, %v11124_v13 }
 0x448   :  { %4860 = vmatprep.mubr.bf16.mxu1 %v4706_v31  ;;  %v4596_v58 = vsel %vm4594_vm6, %v4595_v45, %v4593_v5  ;;  %vm4615_vm7 = vcmp.eq.f32.partialorder %v10313_v2, 0.0  ;;  %vm4620_vm8 = vcmp.eq.f32.partialorder %v11124_v13, inf  ;;  %v4640_v34 = vmul.f32 %v10375_v38, %v10301_v0  ;;  %v11129_v31 = vld [vmem:[#allocation54_spill] sm:$0xff] }
 0x449   :  { %v5598_v17 = vpop.f32.mrf.mxu1  ;;  %v4617_v24 = vsel %vm4615_vm7, %v4616_v50, %v4614_v29  ;;  %v4621_v21 = vsel %vm4620_vm8, %v11124_v13, %v4619_v39  ;;  %v4623_v33 = vand.u32 2147483648, %v11124_v13  ;;  %vm4641_vm9 = vcmp.eq.f32.partialorder %v10301_v0, inf  ;;  %v11130_v29 = vld [vmem:[#allocation36_spill] sm:$0xff] }
 0x44a   :  { %v4704_v55 = vpack.c.bf16 %v4617_v24, %v4596_v58  ;;  %vm4622_vm10 = vcmp.eq.f32.partialorder %v11124_v13, 0.0  ;;  %v4642_v20 = vsel %vm4641_vm9, %v10301_v0, %v4640_v34  ;;  %v4644_v2 = vand.u32 2147483648, %v10301_v0 }
 0x44b   :  { %v5600_v52 = vpop.f32.mrf.mxu1  ;;  %v4624_v10 = vsel %vm4622_vm10, %v4623_v33, %v4621_v21  ;;  %vm4643_vm11 = vcmp.eq.f32.partialorder %v10301_v0, 0.0  ;;  %v4633_v38 = vmul.f32 %v10357_v27, %v10257_v41  ;;  %vm4634_vm12 = vcmp.eq.f32.partialorder %v10257_v41, inf }
 0x44c   :  { %5995 = vmatprep.mubr.bf16.mxu0 %v4704_v55  ;;  %v4645_v44 = vsel %vm4643_vm11, %v4644_v2, %v4642_v20  ;;  %v4637_v56 = vand.u32 2147483648, %v10257_v41  ;;  %v4654_v26 = vmul.f32 %v10383_v30, %v10305_v37  ;;  %vm4655_vm13 = vcmp.eq.f32.partialorder %v10305_v37, inf }
 0x44d   :  { %v5601_v19 = vpop.f32.mrf.mxu1  ;;  %v4705_v40 = vpack.c.bf16 %v4645_v44, %v4624_v10  ;;  %v4635_v54 = vsel %vm4634_vm12, %v10257_v41, %v4633_v38  ;;  %v4658_v0 = vand.u32 2147483648, %v10305_v37  ;;  %v5593_v35 = vadd.f32 %v5592_v46, %v10467_v47 }
 0x44e   :  { %vm4636_vm14 = vcmp.eq.f32.partialorder %v10257_v41, 0.0  ;;  %v4656_v27 = vsel %vm4655_vm13, %v10305_v37, %v4654_v26  ;;  %vm4657_vm15 = vcmp.eq.f32.partialorder %v10305_v37, 0.0  ;;  %v5412_v22 = vadd.f32 %v11126_v25, %v11125_v49  ;;  %v11134_v49 = vld [vmem:[#allocation37_spill] sm:$0xff] }
 0x44f   :  { %4861 = vmatmul.mubr.bf16.gmra.mxu1 %v4705_v40  ;;  %v4638_v61 = vsel %vm4636_vm14, %v4637_v56, %v4635_v54  ;;  %v4659_v43 = vsel %vm4657_vm15, %v4658_v0, %v4656_v27  ;;  %v2770_v60 = vmax.f32 %v11127_v62, 1.1920929e-07  ;;  %v5599_v63 = vadd.f32 %v5598_v17, %v10502_v28  ;;  %v11131_v40 = vld [vmem:[#allocation34_spill] sm:$0xff]  ;;  %v11133_v27 = vld [vmem:[#allocation24_spill] sm:$0xff] }
 0x450   :  { %v4707_v30 = vpack.c.bf16 %v4659_v43, %v4638_v61  ;;  %v10533_v23 = vpop.f32.mrf.mxu1  ;;  %v2768_v18 = vmax.f32 %v11128_v12, 1.1920929e-07  ;;  %v2645_v5 = vadd.f32 %v5412_v22, %v11129_v31  ;;  %v2771_v50 = vmax.f32 %v11130_v29, 1.1920929e-07 }
 0x451   :  { %6514 = vlog2.f32 %v2770_v60  ;;  %v5602_v34 = vadd.f32 %v5601_v19, %v5600_v52  ;;  %v5596_v28 = vadd.f32 %v10494_v7, %v10484_v3  ;;  %v11132_v3 = vld [vmem:[#allocation52_spill] sm:$0xff]  ;;  %v2774_v25 = vmax.f32 %v11134_v49, 1.1920929e-07 }
 0x452   :  { %5996 = vmatmul.mubr.bf16.gmra.mxu0 %v4707_v30  ;;  %v10535_v36 = vpop.f32.mrf.mxu1  ;;  %6516 = vlog2.f32 %v2768_v18  ;;  %v2769_v33 = vmax.f32 %v2645_v5, 1.1920929e-07  ;;  %v5424_v7 = vadd.f32 %v11132_v3, %v11131_v40 }
 0x453   :  { %6518 = vlog2.f32 %v2771_v50  ;;  %v5605_v50 = vadd.f32 %v10535_v36, %v10533_v23 }
 0x454   :  { %v10537_v57 = vpop.f32.mrf.mxu1  ;;  %v2661_v61 = vadd.f32 %v5424_v7, %v11133_v27 }
 0x456   :  { %v10539_v51 = vpop.f32.mrf.mxu1  ;;  %v2773_v29 = vmax.f32 %v2661_v61, 1.1920929e-07 }
 0x457   :  { %v5608_v36 = vadd.f32 %v10539_v51, %v10537_v57 }
 0x45c   :  { %v5609_v1 = vpop.f32.mrf.mxu1 }
 0x45e   :  { %v5610_v47 = vpop.f32.mrf.mxu1  ;;  %v6515_v19 = vpop.eup %6514 }
 0x45f   :  { %v6517_v54 = vpop.eup %6516  ;;  %v5611_v22 = vadd.f32 %v5610_v47, %v5609_v1 }
 0x460   :  { %v10541_v41 = vpop.f32.mrf.mxu1  ;;  %v2801_v60 = vmul.f32 0.6931472, %v6517_v54 }
 0x462   :  { %v10543_v11 = vpop.f32.mrf.mxu1 }
 0x463   :  { %v5614_v47 = vadd.f32 %v10543_v11, %v10541_v41 }
 0x469   :  { %v10545_v37 = vpop.f32.mrf.mxu1 }
 0x46b   :  { %v10547_v16 = vpop.f32.mrf.mxu1 }
 0x46d   :  { %v10549_v53 = vpop.f32.mrf.mxu1 }
 0x46f   :  { %v10551_v48 = vpop.f32.mrf.mxu1 }
 0x475   :  { %v10553_v14 = vpop.f32.mrf.mxu1 }
 0x477   :  { %v10555_v4 = vpop.f32.mrf.mxu1 }
 0x479   :  { %v10557_v32 = vpop.f32.mrf.mxu1 }
 0x47b   :  { %v10559_v59 = vpop.f32.mrf.mxu1 }
 0x483   :  { %v10561_v46 = vpop.f32.mrf.mxu1 }
 0x485   :  { %v10563_v8 = vpop.f32.mrf.mxu1 }
 0x487   :  { %v10565_v42 = vpop.f32.mrf.mxu1 }
 0x489   :  { %v10567_v9 = vpop.f32.mrf.mxu1 }
 0x48f   :  { %v10569_v15 = vpop.f32.mrf.mxu1 }
 0x491   :  { %v10571_v6 = vpop.f32.mrf.mxu1 }
 0x493   :  { %v10580_v13 = vpop.f32.mrf.mxu1 }
 0x495   :  { %v10584_v17 = vpop.f32.mrf.mxu1 }
 0x4a0   :  { %v10586_v52 = vpop.f32.mrf.mxu1 }
 0x4a1   :  { %v5969_v45 = vpop.f32.mrf.mxu0 }
 0x4a2   :  { %v4912_v39 = vadd.f32 %v5969_v45, %v5599_v63  ;;  %v10588_v26 = vpop.f32.mrf.mxu1  ;;  %v11135_v63 = vld [vmem:[#allocation20_spill] sm:$0xff] }
 0x4a3   :  { %v4903_v58 = vpop.f32.mrf.mxu0  ;;  %v2772_v12 = vmax.f32 %v11135_v63, 1.1920929e-07 }
 0x4a4   :  { %v5032_v24 = vmax.f32 %v4912_v39, 1.1920929e-07  ;;  %v4904_v21 = vadd.f32 %v5593_v35, %v4903_v58  ;;  %v10592_v0 = vpop.f32.mrf.mxu1  ;;  %v6519_v35 = vpop.eup %6518  ;;  %v2805_v58 = vmul.f32 0.6931472, %v6515_v19  ;;  %v11136_v19 = vld [vmem:[#allocation19_spill] sm:$0xff] }
 0x4a5   :  { %v5970_v55 = vpop.f32.mrf.mxu0  ;;  %v2775_v40 = vmax.f32 %v11136_v19, 1.1920929e-07  ;;  %v11140_v19 = vld [vmem:[#allocation56_spill] sm:$0xff] }
 0x4a6   :  { %v5030_v20 = vmax.f32 %v4904_v21, 1.1920929e-07  ;;  %v4915_v2 = vadd.f32 %v5970_v55, %v5602_v34  ;;  %6520 = vlog2.f32 %v5032_v24  ;;  %v10597_v31 = vpop.f32.mrf.mxu1  ;;  %v2807_v34 = vmul.f32 0.6931472, %v6519_v35 }
 0x4a7   :  { %v4906_v10 = vpop.f32.mrf.mxu0 }
 0x4a8   :  { %6522 = vlog2.f32 %v5030_v20  ;;  %v5033_v38 = vmax.f32 %v4915_v2, 1.1920929e-07  ;;  %v4907_v44 = vadd.f32 %v5596_v28, %v4906_v10 }
 0x4a9   :  { %6524 = vlog2.f32 %v2769_v33 }
 0x4aa   :  { %6526 = vlog2.f32 %v5033_v38  ;;  %v5031_v56 = vmax.f32 %v4907_v44, 1.1920929e-07 }
 0x4ac   :  { %6528 = vlog2.f32 %v5031_v56 }
 0x4ad   :  { %6530 = vlog2.f32 %v2774_v25 }
 0x4ae   :  { %6532 = vlog2.f32 %v2772_v12 }
 0x4af   :  { %6534 = vlog2.f32 %v2773_v29  ;;  %v5623_v29 = vadd.f32 %v10555_v4, %v10553_v14  ;;  %v5626_v4 = vadd.f32 %v10559_v59, %v10557_v32 }
 0x4b1   :  { %v10603_v38 = vpop.f32.mrf.mxu1 }
 0x4b3   :  { %v6521_v43 = vpop.eup %6520 }
 0x4b4   :  { %v5973_v5 = vpop.f32.mrf.mxu0  ;;  %v5067_v24 = vmul.f32 0.6931472, %v6521_v43  ;;  %v10608_v43 = vpop.f32.mrf.mxu1 }
 0x4b5   :  { %v6523_v30 = vpop.eup %6522  ;;  %v4928_v39 = vadd.f32 %v5973_v5, %v5611_v22 }
 0x4b6   :  { %v6525_v62 = vpop.eup %6524  ;;  %v5063_v18 = vmul.f32 0.6931472, %v6523_v30  ;;  %v4919_v33 = vpop.f32.mrf.mxu0  ;;  %v5128_v3 = vsub.f32 %v2805_v58, %v5067_v24 }
 0x4b7   :  { %v6527_v45 = vpop.eup %6526  ;;  %v5036_v55 = vmax.f32 %v4928_v39, 1.1920929e-07  ;;  %v4920_v28 = vadd.f32 %v5605_v50, %v4919_v33  ;;  %v2803_v20 = vmul.f32 0.6931472, %v6525_v62  ;;  %v10610_v22 = vpop.f32.mrf.mxu1  ;;  %v11138_v39 = vld [vmem:[#allocation55_spill] sm:$0xff] }
 0x4b8   :  { %v5126_v21 = vsub.f32 %v2801_v60, %v5063_v18  ;;  %v5069_v2 = vmul.f32 0.6931472, %v6527_v45  ;;  %v5974_v23 = vpop.f32.mrf.mxu0  ;;  %v5160_v57 = vand.u32 2147483647, %v5128_v3  ;;  %v11137_v18 = vld [vmem:[#allocation22_spill] sm:$0xff]  ;;  %v2776_v58 = vmax.f32 %v11138_v39, 1.1920929e-07 }
 0x4b9   :  { %v6529_v1 = vpop.eup %6528  ;;  %v5034_v44 = vmax.f32 %v4920_v28, 1.1920929e-07  ;;  %v4931_v56 = vadd.f32 %v5974_v23, %v5614_v47  ;;  %6536 = vlog2.f32 %v5036_v55  ;;  %v10612_v63 = vpop.f32.mrf.mxu1  ;;  %v2778_v5 = vmax.f32 %v11137_v18, 1.1920929e-07 }
 0x4ba   :  { %v5065_v10 = vmul.f32 0.6931472, %v6529_v1  ;;  %v4922_v41 = vpop.f32.mrf.mxu0  ;;  %v5158_v35 = vand.u32 2147483647, %v5126_v21  ;;  %v5129_v27 = vsub.f32 %v2807_v34, %v5069_v2  ;;  %v6531_v60 = vpop.eup %6530  ;;  %v11139_v21 = vld [vmem:[#allocation39_spill] sm:$0xff]  ;;  %v5617_v1 = vadd.f32 %v10547_v16, %v10545_v37 }
 0x4bb   :  { %6538 = vlog2.f32 %v5034_v44  ;;  %v5037_v11 = vmax.f32 %v4931_v56, 1.1920929e-07  ;;  %v4923_v54 = vadd.f32 %v5608_v36, %v4922_v41  ;;  %v6533_v12 = vpop.eup %6532  ;;  %v2777_v33 = vmax.f32 %v11139_v21, 1.1920929e-07  ;;  %v11141_v21 = vld [vmem:[#allocation57_spill] sm:$0xff] }
 0x4bc   :  { %v5127_v7 = vsub.f32 %v2803_v20, %v5065_v10  ;;  %v5161_v49 = vand.u32 2147483647, %v5129_v27  ;;  %v6535_v45 = vpop.eup %6534  ;;  %v2813_v28 = vmul.f32 0.6931472, %v6531_v60  ;;  %v2809_v20 = vmul.f32 0.6931472, %v6533_v12 }
 0x4bd   :  { %6540 = vlog2.f32 %v5037_v11  ;;  %v5035_v30 = vmax.f32 %v4923_v54, 1.1920929e-07  ;;  %v2811_v14 = vmul.f32 0.6931472, %v6535_v45  ;;  %v5620_v41 = vadd.f32 %v10551_v48, %v10549_v53 }
 0x4be   :  { %v5159_v61 = vand.u32 2147483647, %v5127_v7  ;;  %6542 = vlog2.f32 %v2775_v40  ;;  %v2779_v40 = vmax.f32 %v11140_v19, 1.1920929e-07 }
 0x4bf   :  { %6544 = vlog2.f32 %v5035_v30 }
 0x4c0   :  { %v5190_v51 = vadd.f32 %v5159_v61, %v5158_v35  ;;  %6546 = vlog2.f32 %v2778_v5 }
 0x4c1   :  { %6548 = vlog2.f32 %v2776_v58 }
 0x4c2   :  { %v5191_v25 = vadd.f32 %v5190_v51, %v5160_v57  ;;  %6550 = vlog2.f32 %v2777_v33 }
 0x4c4   :  { %v5192_v62 = vadd.f32 %v5191_v25, %v5161_v49  ;;  %v10621_v47 = vpop.f32.mrf.mxu1 }
 0x4c6   :  { %v6537_v50 = vpop.eup %6536  ;;  %v10628_v11 = vpop.f32.mrf.mxu1 }
 0x4c7   :  { %v5977_v34 = vpop.f32.mrf.mxu0  ;;  %v5075_v37 = vmul.f32 0.6931472, %v6537_v50 }
 0x4c8   :  { %v6539_v24 = vpop.eup %6538  ;;  %v4944_v55 = vadd.f32 %v5977_v34, %v5623_v29  ;;  %v10630_v12 = vpop.f32.mrf.mxu1 }
 0x4c9   :  { %v5071_v2 = vmul.f32 0.6931472, %v6539_v24  ;;  %v4935_v10 = vpop.f32.mrf.mxu0  ;;  %v5132_v49 = vsub.f32 %v2813_v28, %v5075_v37 }
 0x4ca   :  { %v6541_v23 = vpop.eup %6540  ;;  %v5040_v36 = vmax.f32 %v4944_v55, 1.1920929e-07  ;;  %v4936_v44 = vadd.f32 %v5617_v1, %v4935_v10  ;;  %v10632_v29 = vpop.f32.mrf.mxu1  ;;  %v5635_v55 = vadd.f32 %v10571_v6, %v10569_v15  ;;  %v5638_v15 = vadd.f32 %v10584_v17, %v10580_v13 }
 0x4cb   :  { %v6543_v56 = vpop.eup %6542  ;;  %v5130_v16 = vsub.f32 %v2809_v20, %v5071_v2  ;;  %v5978_v3 = vpop.f32.mrf.mxu0  ;;  %v5077_v32 = vmul.f32 0.6931472, %v6541_v23  ;;  %v5164_v5 = vand.u32 2147483647, %v5132_v49  ;;  %v11142_v20 = vld [vmem:[#allocation40_spill] sm:$0xff] }
 0x4cc   :  { %v6545_v7 = vpop.eup %6544  ;;  %v5038_v54 = vmax.f32 %v4936_v44, 1.1920929e-07  ;;  %v4947_v35 = vadd.f32 %v5978_v3, %v5626_v4  ;;  %6552 = vlog2.f32 %v5040_v36  ;;  %v2815_v51 = vmul.f32 0.6931472, %v6543_v56 }
 0x4cd   :  { %v5162_v27 = vand.u32 2147483647, %v5130_v16  ;;  %v5073_v59 = vmul.f32 0.6931472, %v6545_v7  ;;  %v4938_v61 = vpop.f32.mrf.mxu0  ;;  %v6547_v58 = vpop.eup %6546  ;;  %v2780_v2 = vmax.f32 %v11142_v20, 1.1920929e-07  ;;  %v11146_v20 = vld [vmem:[#allocation44_spill] sm:$0xff] }
 0x4ce   :  { %6554 = vlog2.f32 %v5038_v54  ;;  %v5041_v30 = vmax.f32 %v4947_v35, 1.1920929e-07  ;;  %v4939_v57 = vadd.f32 %v5620_v41, %v4938_v61  ;;  %v5133_v48 = vsub.f32 %v2815_v51, %v5077_v32  ;;  %v6549_v24 = vpop.eup %6548  ;;  %v11143_v41 = vld [vmem:[#allocation58_spill] sm:$0xff]  ;;  %v11144_v32 = vld [vmem:[#allocation43_spill] sm:$0xff] }
 0x4cf   :  { %v5193_v25 = vadd.f32 %v5192_v62, %v5162_v27  ;;  %v5131_v60 = vsub.f32 %v2811_v14, %v5073_v59  ;;  %v2782_v62 = vmax.f32 %v11141_v21, 1.1920929e-07  ;;  %v6551_v1 = vpop.eup %6550  ;;  %v5629_v14 = vadd.f32 %v10563_v8, %v10561_v46 }
 0x4d0   :  { %6556 = vlog2.f32 %v5041_v30  ;;  %v5039_v53 = vmax.f32 %v4939_v57, 1.1920929e-07  ;;  %v5165_v50 = vand.u32 2147483647, %v5133_v48  ;;  %v2821_v36 = vmul.f32 0.6931472, %v6547_v58 }
 0x4d1   :  { %6558 = vlog2.f32 %v2779_v40  ;;  %v5163_v18 = vand.u32 2147483647, %v5131_v60  ;;  %v2817_v44 = vmul.f32 0.6931472, %v6549_v24  ;;  %v2819_v16 = vmul.f32 0.6931472, %v6551_v1 }
 0x4d2   :  { %6560 = vlog2.f32 %v5039_v53  ;;  %v2781_v54 = vmax.f32 %v11143_v41, 1.1920929e-07  ;;  %v2783_v59 = vmax.f32 %v11144_v32, 1.1920929e-07  ;;  %v5632_v61 = vadd.f32 %v10567_v9, %v10565_v42 }
 0x4d3   :  { %v5194_v45 = vadd.f32 %v5193_v25, %v5163_v18  ;;  %6562 = vlog2.f32 %v2782_v62 }
 0x4d4   :  { %6564 = vlog2.f32 %v2780_v2 }
 0x4d5   :  { %v5195_v39 = vadd.f32 %v5194_v45, %v5164_v5 }
 0x4d7   :  { %v5196_v34 = vadd.f32 %v5195_v39, %v5165_v50  ;;  %v10635_v33 = vpop.f32.mrf.mxu1 }
 0x4d9   :  { %v6553_v28 = vpop.eup %6552  ;;  %v10642_v19 = vpop.f32.mrf.mxu1 }
 0x4da   :  { %v5981_v10 = vpop.f32.mrf.mxu0  ;;  %v5083_v46 = vmul.f32 0.6931472, %v6553_v28  ;;  %v11145_v28 = vld [vmem:[#allocation18_spill] sm:$0xff] }
 0x4db   :  { %v6555_v23 = vpop.eup %6554  ;;  %v4960_v4 = vadd.f32 %v5981_v10, %v5635_v55  ;;  %v10650_v17 = vpop.f32.mrf.mxu1  ;;  %v5460_v2 = vadd.f32 %v11146_v20, %v11145_v28  ;;  %v5659_v28 = vadd.f32 %v10642_v19, %v10635_v33 }
 0x4dc   :  { %v5079_v56 = vmul.f32 0.6931472, %v6555_v23  ;;  %v4951_v40 = vpop.f32.mrf.mxu0  ;;  %v5136_v18 = vsub.f32 %v2821_v36, %v5083_v46 }
 0x4dd   :  { %v6557_v37 = vpop.eup %6556  ;;  %v5044_v6 = vmax.f32 %v4960_v4, 1.1920929e-07  ;;  %v4952_v3 = vadd.f32 %v5629_v14, %v4951_v40  ;;  %v10652_v39 = vpop.f32.mrf.mxu1  ;;  %v11147_v4 = vld [vmem:[#allocation16_spill] sm:$0xff] }
 0x4de   :  { %v6559_v7 = vpop.eup %6558  ;;  %v5134_v8 = vsub.f32 %v2817_v44, %v5079_v56  ;;  %v5982_v35 = vpop.f32.mrf.mxu0  ;;  %v5085_v49 = vmul.f32 0.6931472, %v6557_v37  ;;  %v5168_v58 = vand.u32 2147483647, %v5136_v18  ;;  %v2786_v36 = vmax.f32 %v11147_v4, 1.1920929e-07  ;;  %v11148_v44 = vld [vmem:[#allocation59_spill] sm:$0xff] }
 0x4df   :  { %v6561_v27 = vpop.eup %6560  ;;  %v5042_v30 = vmax.f32 %v4952_v3, 1.1920929e-07  ;;  %v4963_v57 = vadd.f32 %v5982_v35, %v5638_v15  ;;  %6566 = vlog2.f32 %v5044_v6  ;;  %v2823_v60 = vmul.f32 0.6931472, %v6559_v7  ;;  %v11149_v37 = vld [vmem:[#allocation26_spill] sm:$0xff] }
 0x4e0   :  { %v5166_v51 = vand.u32 2147483647, %v5134_v8  ;;  %v5081_v13 = vmul.f32 0.6931472, %v6561_v27  ;;  %v4954_v25 = vpop.f32.mrf.mxu0  ;;  %v6563_v55 = vpop.eup %6562  ;;  %v2709_v56 = vadd.f32 %v5460_v2, %v11148_v44  ;;  %v5641_v15 = vadd.f32 %v10588_v26, %v10586_v52  ;;  %v11154_v44 = vld [vmem:[#allocation38_spill] sm:$0xff] }
 0x4e1   :  { %6568 = vlog2.f32 %v5042_v30  ;;  %v5045_v53 = vmax.f32 %v4963_v57, 1.1920929e-07  ;;  %v4955_v48 = vadd.f32 %v5632_v61, %v4954_v25  ;;  %v5137_v42 = vsub.f32 %v2823_v60, %v5085_v49  ;;  %v6565_v14 = vpop.eup %6564  ;;  %v11150_v49 = vld [vmem:[#allocation25_spill] sm:$0xff] }
 0x4e2   :  { %6570 = vlog2.f32 %v2781_v54  ;;  %v5197_v5 = vadd.f32 %v5196_v34, %v5166_v51  ;;  %v5135_v45 = vsub.f32 %v2819_v16, %v5081_v13  ;;  %v5647_v34 = vadd.f32 %v10608_v43, %v10603_v38 }
 0x4e3   :  { %6572 = vlog2.f32 %v5045_v53  ;;  %v5043_v50 = vmax.f32 %v4955_v48, 1.1920929e-07  ;;  %v5169_v21 = vand.u32 2147483647, %v5137_v42  ;;  %v2784_v16 = vmax.f32 %v11149_v37, 1.1920929e-07 }
 0x4e4   :  { %6574 = vlog2.f32 %v2783_v59  ;;  %v5167_v9 = vand.u32 2147483647, %v5135_v45  ;;  %v2829_v43 = vmul.f32 0.6931472, %v6563_v55  ;;  %v5650_v54 = vadd.f32 %v10612_v63, %v10610_v22 }
 0x4e5   :  { %6576 = vlog2.f32 %v5043_v50  ;;  %v2825_v27 = vmul.f32 0.6931472, %v6565_v14  ;;  %v2785_v32 = vmax.f32 %v2709_v56, 1.1920929e-07  ;;  %v5644_v52 = vadd.f32 %v10597_v31, %v10592_v0  ;;  %v11152_v14 = vld [vmem:[#allocation21_spill] sm:$0xff] }
 0x4e6   :  { %v5198_v24 = vadd.f32 %v5197_v5, %v5167_v9  ;;  %6578 = vlog2.f32 %v2786_v36  ;;  %v2787_v13 = vmax.f32 %v11150_v49, 1.1920929e-07  ;;  %v2788_v4 = vmax.f32 %v11152_v14, 1.1920929e-07  ;;  %v11153_v36 = vld [vmem:[#allocation42_spill] sm:$0xff]  ;;  %v11160_v14 = vld [vmem:[#allocation48_spill] sm:$0xff] }
 0x4e7   :  { %6580 = vlog2.f32 %v2784_v16  ;;  %v2725_v56 = vadd.f32 %v11154_v44, %v11153_v36 }
 0x4e8   :  { %v5199_v62 = vadd.f32 %v5198_v24, %v5168_v58  ;;  %v10654_v1 = vpop.f32.mrf.mxu1 }
 0x4ea   :  { %v5200_v10 = vadd.f32 %v5199_v62, %v5169_v21  ;;  %v10660_v23 = vpop.f32.mrf.mxu1  ;;  %v11151_v62 = vld [vmem:[#allocation41_spill] sm:$0xff] }
 0x4eb   :  { %v5985_v40 = vpop.f32.mrf.mxu0  ;;  %v2790_v55 = vmax.f32 %v11151_v62, 1.1920929e-07  ;;  %v5665_v36 = vadd.f32 %v10660_v23, %v10654_v1 }
 0x4ec   :  { %v4976_v6 = vadd.f32 %v5985_v40, %v5647_v34  ;;  %v6567_v3 = vpop.eup %6566  ;;  %v10667_v41 = vpop.f32.mrf.mxu1 }
 0x4ed   :  { %v4967_v7 = vpop.f32.mrf.mxu0  ;;  %v5091_v25 = vmul.f32 0.6931472, %v6567_v3 }
 0x4ee   :  { %v6569_v38 = vpop.eup %6568  ;;  %v5048_v46 = vmax.f32 %v4976_v6, 1.1920929e-07  ;;  %v4968_v8 = vadd.f32 %v5641_v15, %v4967_v7  ;;  %v10674_v63 = vpop.f32.mrf.mxu1  ;;  %v5662_v6 = vadd.f32 %v10652_v39, %v10650_v17 }
 0x4ef   :  { %v6571_v35 = vpop.eup %6570  ;;  %v5087_v59 = vmul.f32 0.6931472, %v6569_v38  ;;  %v5986_v61 = vpop.f32.mrf.mxu0  ;;  %v5140_v9 = vsub.f32 %v2829_v43, %v5091_v25  ;;  %v5668_v1 = vadd.f32 %v10674_v63, %v10667_v41 }
 0x4f0   :  { %v6573_v30 = vpop.eup %6572  ;;  %v5046_v26 = vmax.f32 %v4968_v8, 1.1920929e-07  ;;  %v4979_v57 = vadd.f32 %v5986_v61, %v5650_v54  ;;  %6582 = vlog2.f32 %v5048_v46  ;;  %v2827_v48 = vmul.f32 0.6931472, %v6571_v35  ;;  %v11155_v61 = vld [vmem:[#allocation60_spill] sm:$0xff] }
 0x4f1   :  { %v6575_v51 = vpop.eup %6574  ;;  %v5138_v22 = vsub.f32 %v2825_v27, %v5087_v59  ;;  %v4970_v60 = vpop.f32.mrf.mxu0  ;;  %v5093_v50 = vmul.f32 0.6931472, %v6573_v30  ;;  %v5172_v37 = vand.u32 2147483647, %v5140_v9  ;;  %v2789_v46 = vmax.f32 %v2725_v56, 1.1920929e-07 }
 0x4f2   :  { %v6577_v53 = vpop.eup %6576  ;;  %6584 = vlog2.f32 %v5046_v26  ;;  %v5049_v18 = vmax.f32 %v4979_v57, 1.1920929e-07  ;;  %v4971_v5 = vadd.f32 %v5644_v52, %v4970_v60  ;;  %v2831_v31 = vmul.f32 0.6931472, %v6575_v51  ;;  %v11157_v60 = vld [vmem:[#allocation27_spill] sm:$0xff] }
 0x4f3   :  { %6586 = vlog2.f32 %v2785_v32  ;;  %v5170_v45 = vand.u32 2147483647, %v5138_v22  ;;  %v5089_v0 = vmul.f32 0.6931472, %v6577_v53  ;;  %v6579_v54 = vpop.eup %6578  ;;  %v2791_v17 = vmax.f32 %v11155_v61, 1.1920929e-07  ;;  %v11156_v22 = vld [vmem:[#allocation23_spill] sm:$0xff] }
 0x4f4   :  { %6588 = vlog2.f32 %v5049_v18  ;;  %v5047_v42 = vmax.f32 %v4971_v5, 1.1920929e-07  ;;  %v5141_v20 = vsub.f32 %v2831_v31, %v5093_v50  ;;  %v6581_v35 = vpop.eup %6580  ;;  %v5484_v53 = vadd.f32 %v11157_v60, %v11156_v22 }
 0x4f5   :  { %6590 = vlog2.f32 %v2787_v13  ;;  %v5201_v58 = vadd.f32 %v5200_v10, %v5170_v45  ;;  %v5139_v24 = vsub.f32 %v2827_v48, %v5089_v0  ;;  %v5669_v21 = vpop.f32.mrf.mxu1  ;;  %v5653_v10 = vadd.f32 %v10628_v11, %v10621_v47  ;;  %v11158_v0 = vld [vmem:[#allocation45_spill] sm:$0xff] }
 0x4f6   :  { %6592 = vlog2.f32 %v5047_v42  ;;  %v5173_v3 = vand.u32 2147483647, %v5141_v20  ;;  %v5656_v47 = vadd.f32 %v10632_v29, %v10630_v12  ;;  %v2833_v49 = vmul.f32 0.6931472, %v6581_v35  ;;  %v11159_v20 = vld [vmem:[#allocation47_spill] sm:$0xff] }
 0x4f7   :  { %v5171_v2 = vand.u32 2147483647, %v5139_v24  ;;  %v5670_v34 = vpop.f32.mrf.mxu1  ;;  %6594 = vlog2.f32 %v2790_v55  ;;  %v2837_v50 = vmul.f32 0.6931472, %v6579_v54  ;;  %v2794_v31 = vmax.f32 %v11158_v0, 1.1920929e-07  ;;  %v11165_v0 = vld [vmem:[#allocation29_spill] sm:$0xff] }
 0x4f8   :  { %v5989_v40 = vpop.f32.mrf.mxu0  ;;  %6596 = vlog2.f32 %v2788_v4  ;;  %v5671_v62 = vadd.f32 %v5670_v34, %v5669_v21  ;;  %v2741_v4 = vadd.f32 %v5484_v53, %v11160_v14 }
 0x4f9   :  { %v5202_v16 = vadd.f32 %v5201_v58, %v5171_v2  ;;  %v4992_v15 = vadd.f32 %v5989_v40, %v5659_v28  ;;  %v5672_v19 = vpop.f32.mrf.mxu1  ;;  %v2792_v2 = vmax.f32 %v11159_v20, 1.1920929e-07 }
 0x4fa   :  { %v4983_v33 = vpop.f32.mrf.mxu0 }
 0x4fb   :  { %v5203_v7 = vadd.f32 %v5202_v16, %v5172_v37  ;;  %v5052_v38 = vmax.f32 %v4992_v15, 1.1920929e-07  ;;  %v4984_v43 = vadd.f32 %v5653_v10, %v4983_v33  ;;  %v5673_v39 = vpop.f32.mrf.mxu1 }
 0x4fc   :  { %v5990_v8 = vpop.f32.mrf.mxu0  ;;  %v5674_v33 = vadd.f32 %v5673_v39, %v5672_v19 }
 0x4fd   :  { %v5204_v11 = vadd.f32 %v5203_v7, %v5173_v3  ;;  %v5050_v27 = vmax.f32 %v4984_v43, 1.1920929e-07  ;;  %v4995_v32 = vadd.f32 %v5990_v8, %v5662_v6  ;;  %v6583_v59 = vpop.eup %6582  ;;  %6598 = vlog2.f32 %v5052_v38 }
 0x4fe   :  { %v4986_v30 = vpop.f32.mrf.mxu0  ;;  %v5099_v48 = vmul.f32 0.6931472, %v6583_v59  ;;  %v2793_v43 = vmax.f32 %v2741_v4, 1.1920929e-07 }
 0x4ff   :  { %v6585_v52 = vpop.eup %6584  ;;  %6600 = vlog2.f32 %v5050_v27  ;;  %v5053_v26 = vmax.f32 %v4995_v32, 1.1920929e-07  ;;  %v4987_v57 = vadd.f32 %v5656_v47, %v4986_v30 }
 0x500   :  { %v6587_v51 = vpop.eup %6586  ;;  %6602 = vlog2.f32 %v2789_v46  ;;  %v5095_v13 = vmul.f32 0.6931472, %v6585_v52  ;;  %v5144_v56 = vsub.f32 %v2837_v50, %v5099_v48 }
 0x501   :  { %v6589_v25 = vpop.eup %6588  ;;  %6604 = vlog2.f32 %v5053_v26  ;;  %v5051_v12 = vmax.f32 %v4987_v57, 1.1920929e-07  ;;  %v2835_v9 = vmul.f32 0.6931472, %v6587_v51  ;;  %v11162_v57 = vld [vmem:[#allocation46_spill] sm:$0xff]  ;;  %v11163_v51 = vld [vmem:[#allocation28_spill] sm:$0xff] }
 0x502   :  { %v6591_v29 = vpop.eup %6590  ;;  %6606 = vlog2.f32 %v2791_v17  ;;  %v5142_v18 = vsub.f32 %v2833_v49, %v5095_v13  ;;  %v10691_v5 = vpop.f32.mrf.mxu1  ;;  %v5101_v42 = vmul.f32 0.6931472, %v6589_v25  ;;  %v5176_v54 = vand.u32 2147483647, %v5144_v56 }
 0x503   :  { %v6593_v45 = vpop.eup %6592  ;;  %6608 = vlog2.f32 %v5051_v12  ;;  %v2839_v28 = vmul.f32 0.6931472, %v6591_v29  ;;  %v5496_v49 = vadd.f32 %v11163_v51, %v11162_v57 }
 0x504   :  { %v5174_v58 = vand.u32 2147483647, %v5142_v18  ;;  %v5097_v24 = vmul.f32 0.6931472, %v6593_v45  ;;  %v10694_v55 = vpop.f32.mrf.mxu1  ;;  %v6595_v16 = vpop.eup %6594  ;;  %6610 = vlog2.f32 %v2794_v31  ;;  %v11164_v45 = vld [vmem:[#allocation33_spill] sm:$0xff]  ;;  %v2796_v31 = vmax.f32 %v11165_v0, 1.1920929e-07 }
 0x505   :  { %v5993_v44 = vpop.f32.mrf.mxu0  ;;  %v5145_v15 = vsub.f32 %v2839_v28, %v5101_v42  ;;  %v6597_v38 = vpop.eup %6596  ;;  %6612 = vlog2.f32 %v2792_v2  ;;  %v2845_v29 = vmul.f32 0.6931472, %v6595_v16  ;;  %v2798_v50 = vmax.f32 %v11164_v45, 1.1920929e-07  ;;  %v11166_v28 = vld [vmem:[#allocation50_spill] sm:$0xff] }
 0x506   :  { %v5205_v40 = vadd.f32 %v5204_v11, %v5174_v58  ;;  %v5143_v10 = vsub.f32 %v2835_v9, %v5097_v24  ;;  %v5008_v37 = vadd.f32 %v5993_v44, %v5671_v62  ;;  %v10700_v21 = vpop.f32.mrf.mxu1  ;;  %v11161_v11 = vld [vmem:[#allocation30_spill] sm:$0xff]  ;;  %v2841_v26 = vmul.f32 0.6931472, %v6597_v38 }
 0x507   :  { %v4999_v6 = vpop.f32.mrf.mxu0  ;;  %v2795_v27 = vmax.f32 %v11161_v11, 1.1920929e-07  ;;  %v5177_v32 = vand.u32 2147483647, %v5145_v15  ;;  %v2757_v20 = vadd.f32 %v5496_v49, %v11166_v28  ;;  %v5677_v56 = vadd.f32 %v10694_v55, %v10691_v5 }
 0x508   :  { %v5175_v34 = vand.u32 2147483647, %v5143_v10  ;;  %v5056_v3 = vmax.f32 %v5008_v37, 1.1920929e-07  ;;  %v5000_v7 = vadd.f32 %v5665_v36, %v4999_v6  ;;  %v5679_v59 = vpop.f32.mrf.mxu1 }
 0x509   :  { %v5994_v23 = vpop.f32.mrf.mxu0  ;;  %v5680_v5 = vadd.f32 %v5679_v59, %v10700_v21 }
 0x50a   :  { %v5206_v46 = vadd.f32 %v5205_v40, %v5175_v34  ;;  %v5054_v8 = vmax.f32 %v5000_v7, 1.1920929e-07  ;;  %v5011_v35 = vadd.f32 %v5994_v23, %v5674_v33  ;;  %v6599_v47 = vpop.eup %6598  ;;  %6614 = vlog2.f32 %v5056_v3  ;;  %v11167_v7 = vld [vmem:[#allocation32_spill] sm:$0xff] }
 0x50b   :  { %v5002_v19 = vpop.f32.mrf.mxu0  ;;  %v5107_v22 = vmul.f32 0.6931472, %v6599_v47  ;;  %v2799_v38 = vmax.f32 %v11167_v7, 1.1920929e-07 }
 0x50c   :  { %v6601_v61 = vpop.eup %6600  ;;  %v5207_v17 = vadd.f32 %v5206_v46, %v5176_v54  ;;  %6616 = vlog2.f32 %v5054_v8  ;;  %v5057_v39 = vmax.f32 %v5011_v35, 1.1920929e-07  ;;  %v5003_v30 = vadd.f32 %v5668_v1, %v5002_v19 }
 0x50d   :  { %v6603_v52 = vpop.eup %6602  ;;  %6618 = vlog2.f32 %v2793_v43  ;;  %v5103_v41 = vmul.f32 0.6931472, %v6601_v61  ;;  %v5148_v4 = vsub.f32 %v2845_v29, %v5107_v22  ;;  %v2797_v43 = vmax.f32 %v2757_v20, 1.1920929e-07 }
 0x50e   :  { %v6605_v63 = vpop.eup %6604  ;;  %v5208_v13 = vadd.f32 %v5207_v17, %v5177_v32  ;;  %6620 = vlog2.f32 %v5057_v39  ;;  %v5055_v25 = vmax.f32 %v5003_v30, 1.1920929e-07  ;;  %v2843_v18 = vmul.f32 0.6931472, %v6603_v52 }
 0x50f   :  { %v6607_v12 = vpop.eup %6606  ;;  %6622 = vlog2.f32 %v2795_v27  ;;  %v5146_v60 = vsub.f32 %v2841_v26, %v5103_v41  ;;  %v5681_v53 = vpop.f32.mrf.mxu1  ;;  %v5109_v9 = vmul.f32 0.6931472, %v6605_v63  ;;  %v5180_v46 = vand.u32 2147483647, %v5148_v4 }
 0x510   :  { %v6609_v48 = vpop.eup %6608  ;;  %6624 = vlog2.f32 %v5055_v25  ;;  %v2847_v62 = vmul.f32 0.6931472, %v6607_v12 }
 0x511   :  { %v5178_v42 = vand.u32 2147483647, %v5146_v60  ;;  %v5105_v58 = vmul.f32 0.6931472, %v6609_v48  ;;  %v5682_v24 = vpop.f32.mrf.mxu1  ;;  %v6611_v10 = vpop.eup %6610  ;;  %6626 = vlog2.f32 %v2798_v50 }
 0x512   :  { %v5997_v2 = vpop.f32.mrf.mxu0  ;;  %v5683_v14 = vadd.f32 %v5682_v24, %v5681_v53  ;;  %6628 = vlog2.f32 %v2796_v31  ;;  %v5149_v15 = vsub.f32 %v2847_v62, %v5109_v9  ;;  %v6613_v3 = vpop.eup %6612  ;;  %v2853_v49 = vmul.f32 0.6931472, %v6611_v10 }
 0x513   :  { %v5209_v36 = vadd.f32 %v5208_v13, %v5178_v42  ;;  %v5147_v44 = vsub.f32 %v2843_v18, %v5105_v58  ;;  %v5684_v40 = vpop.f32.mrf.mxu1  ;;  %v2849_v39 = vmul.f32 0.6931472, %v6613_v3 }
 0x514   :  { %v5024_v37 = vadd.f32 %v5997_v2, %v5683_v14  ;;  %v5015_v16 = vpop.f32.mrf.mxu0  ;;  %v5181_v32 = vand.u32 2147483647, %v5149_v15 }
 0x515   :  { %v5179_v6 = vand.u32 2147483647, %v5147_v44  ;;  %v5016_v34 = vadd.f32 %v5677_v56, %v5015_v16  ;;  %v5685_v33 = vpop.f32.mrf.mxu1 }
 0x516   :  { %v5060_v1 = vmax.f32 %v5024_v37, 1.1920929e-07  ;;  %v5998_v23 = vpop.f32.mrf.mxu0  ;;  %v5686_v54 = vadd.f32 %v5685_v33, %v5684_v40 }
 0x517   :  { %v5210_v8 = vadd.f32 %v5209_v36, %v5179_v6  ;;  %v5058_v55 = vmax.f32 %v5016_v34, 1.1920929e-07  ;;  %v6615_v35 = vpop.eup %6614 }
 0x518   :  { %6630 = vlog2.f32 %v5060_v1  ;;  %v5027_v47 = vadd.f32 %v5998_v23, %v5686_v54  ;;  %v5018_v11 = vpop.f32.mrf.mxu0  ;;  %v5115_v59 = vmul.f32 0.6931472, %v6615_v35 }
 0x519   :  { %v6617_v27 = vpop.eup %6616  ;;  %v5211_v19 = vadd.f32 %v5210_v8, %v5180_v46  ;;  %6632 = vlog2.f32 %v5058_v55  ;;  %v5019_v61 = vadd.f32 %v5680_v5, %v5018_v11 }
 0x51a   :  { %v6619_v17 = vpop.eup %6618  ;;  %6634 = vlog2.f32 %v2797_v43  ;;  %v5111_v30 = vmul.f32 0.6931472, %v6617_v27  ;;  %v5061_v52 = vmax.f32 %v5027_v47, 1.1920929e-07  ;;  %v5152_v60 = vsub.f32 %v2853_v49, %v5115_v59 }
 0x51b   :  { %v6621_v26 = vpop.eup %6620  ;;  %6636 = vlog2.f32 %v2799_v38  ;;  %v5212_v41 = vadd.f32 %v5211_v19, %v5181_v32  ;;  %v5059_v63 = vmax.f32 %v5019_v61, 1.1920929e-07  ;;  %v2851_v13 = vmul.f32 0.6931472, %v6619_v17 }
 0x51c   :  { %v6623_v21 = vpop.eup %6622  ;;  %v5150_v57 = vsub.f32 %v2849_v39, %v5111_v30  ;;  %6638 = vlog2.f32 %v5061_v52  ;;  %v5117_v12 = vmul.f32 0.6931472, %v6621_v26  ;;  %v5184_v31 = vand.u32 2147483647, %v5152_v60 }
 0x51d   :  { %v6625_v51 = vpop.eup %6624  ;;  %6640 = vlog2.f32 %v5059_v63  ;;  %v2855_v22 = vmul.f32 0.6931472, %v6623_v21 }
 0x51e   :  { %v5182_v25 = vand.u32 2147483647, %v5150_v57  ;;  %v5113_v29 = vmul.f32 0.6931472, %v6625_v51  ;;  %v6627_v18 = vpop.eup %6626 }
 0x51f   :  { %v6629_v45 = vpop.eup %6628  ;;  %v5153_v50 = vsub.f32 %v2855_v22, %v5117_v12  ;;  %v2861_v10 = vmul.f32 0.6931472, %v6627_v18 }
 0x520   :  { %v5213_v53 = vadd.f32 %v5212_v41, %v5182_v25  ;;  %v5151_v48 = vsub.f32 %v2851_v13, %v5113_v29  ;;  %v2857_v20 = vmul.f32 0.6931472, %v6629_v45 }
 0x521   :  { %v5185_v24 = vand.u32 2147483647, %v5153_v50 }
 0x522   :  { %v5183_v0 = vand.u32 2147483647, %v5151_v48 }
 0x524   :  { %v5214_v42 = vadd.f32 %v5213_v53, %v5183_v0 }
 0x525   :  { %v6631_v9 = vpop.eup %6630 }
 0x526   :  { %v6633_v58 = vpop.eup %6632  ;;  %v5215_v62 = vadd.f32 %v5214_v42, %v5184_v31  ;;  %v5123_v44 = vmul.f32 0.6931472, %v6631_v9 }
 0x527   :  { %v6635_v28 = vpop.eup %6634  ;;  %v5119_v2 = vmul.f32 0.6931472, %v6633_v58 }
 0x528   :  { %v6637_v14 = vpop.eup %6636  ;;  %v5216_v4 = vadd.f32 %v5215_v62, %v5185_v24  ;;  %v2859_v37 = vmul.f32 0.6931472, %v6635_v28  ;;  %v5156_v7 = vsub.f32 %v2861_v10, %v5123_v44 }
 0x529   :  { %v6639_v36 = vpop.eup %6638  ;;  %v5154_v56 = vsub.f32 %v2857_v20, %v5119_v2  ;;  %v2863_v3 = vmul.f32 0.6931472, %v6637_v14 }
 0x52a   :  { %v6641_v40 = vpop.eup %6640  ;;  %v5125_v15 = vmul.f32 0.6931472, %v6639_v36  ;;  %v5188_v1 = vand.u32 2147483647, %v5156_v7 }
 0x52b   :  { %v5186_v16 = vand.u32 2147483647, %v5154_v56  ;;  %v5121_v6 = vmul.f32 0.6931472, %v6641_v40 }
 0x52c   :  { %v5157_v43 = vsub.f32 %v2863_v3, %v5125_v15 }
 0x52d   :  { %v5217_v34 = vadd.f32 %v5216_v4, %v5186_v16  ;;  %v5155_v33 = vsub.f32 %v2859_v37, %v5121_v6 }
 0x52e   :  { %v5189_v54 = vand.u32 2147483647, %v5157_v43 }
 0x52f   :  { %v5187_v38 = vand.u32 2147483647, %v5155_v33 }
 0x531   :  { %v5218_v23 = vadd.f32 %v5217_v34, %v5187_v38 }
 0x533   :  { %v5219_v46 = vadd.f32 %v5218_v23, %v5188_v1 }
 0x535   :  { %v5220_v8 = vadd.f32 %v5219_v46, %v5189_v54 }
 0x537   :  { %5221 = vst [vmem:[#allocation11] sm:$0xff] %v5220_v8 }
 0x538   :  { %6824 = shalt.err (!%p6821_p1)
}
 0x539   :  { %5231 = dma.vmem_to_hbm [thread:$0]  %s5229_s4, 128, %s10722_s5, [#allocation4]  }
 0x53a   :  { %6839 = dma.done.wait [#allocation4], 128  }
 0x53b   :  { %6840 = vsyncadd [#allocation4], 4294967168 }
 0x53c   :  { %5235 = vsyncpa [#allocation3], 1 }
 0x53d   :  { %5236 = vsyncpa [#allocation6], 1 }
 0x53e   :  { %5237 = vsyncpa [#allocation9], 1 }
 0x53f   :  { %5238 = vsyncpa [#allocation4], 1 }

</bundles_post_ra>
